<compile_context>
chip_gen: v6e
topology: v6e:2x2x1
jax: 0.10.0
libtpu: 0.0.40
codegen_flags: <defaults>
</compile_context>

<pallas_src>
import functools

import jax
import jax.numpy as jnp
from jax import lax
from jax.experimental import pallas as pl
from jax.experimental.pallas import tpu as pltpu

EPS = 1e-5
LANE = 128
ROW_TILE = 256
VMEM_LIMIT = 32 * 1024 * 1024


def _round_up(x, m):
    return (x + m - 1) // m * m


def _row_tile(m):
    """Pick a row tile (multiple of 8) and the padded row count."""
    mp = _round_up(m, 8)
    if mp <= ROW_TILE:
        return mp, mp
    return ROW_TILE, _round_up(mp, ROW_TILE)


# ----------------------------- Pallas kernels ------------------------------

def _mm_bn_kernel(x_ref, w_ref, sb_ref, o_ref, *, relu):
    # y = (patches @ w) * bn_scale + bn_bias  [+ relu];  bf16 in, f32 accum, bf16 out.
    y = jnp.dot(x_ref[...], w_ref[...], preferred_element_type=jnp.float32)
    y = y * sb_ref[0:1, :] + sb_ref[1:2, :]
    if relu:
        y = jnp.maximum(y, 0.0)
    o_ref[...] = y.astype(o_ref.dtype)


def _mm_bn_res_kernel(x_ref, w_ref, sb_ref, r_ref, o_ref, *, relu):
    y = jnp.dot(x_ref[...], w_ref[...], preferred_element_type=jnp.float32)
    y = y * sb_ref[0:1, :] + sb_ref[1:2, :] + r_ref[...].astype(jnp.float32)
    if relu:
        y = jnp.maximum(y, 0.0)
    o_ref[...] = y.astype(o_ref.dtype)


def _pool_fc_kernel(x_ref, w_ref, b_ref, o_ref, acc_ref, *, inv_l):
    # Global average pool over L (gridded, f32 accumulator) fused with the FC layer.
    li = pl.program_id(0)

    @pl.when(li == 0)
    def _():
        acc_ref[...] = jnp.zeros_like(acc_ref)

    acc_ref[...] += jnp.sum(x_ref[...].astype(jnp.float32), axis=1)

    @pl.when(li == pl.num_programs(0) - 1)
    def _():
        feat = (acc_ref[...] * inv_l).astype(jnp.bfloat16)
        y = jnp.dot(feat, w_ref[...], preferred_element_type=jnp.float32)
        o_ref[...] = y + b_ref[0:1, :]


# ----------------------------- conv-as-matmul ------------------------------

def _im2col(x, k, stride, padding):
    """x: (N, L, C) -> patches (N*L_out, k*C), tap-major / channel-minor ordering.

    Built with basic strided slices + concat (no advanced-indexing gather).
    """
    n, l, c = x.shape
    xp = jnp.pad(x, ((0, 0), (padding, padding), (0, 0)))
    l_out = (l + 2 * padding - k) // stride + 1
    taps = []
    for j in range(k):
        lim = j + stride * (l_out - 1) + 1
        taps.append(lax.slice(xp, (0, j, 0), (n, lim, c), (1, stride, 1)))
    patches = jnp.concatenate(taps, axis=-1)          # (N, L_out, k*C)
    return patches.reshape(n * l_out, k * c), l_out


def conv1d_bn(x, cp, *, relu, residual=None):
    """Fused conv1d + folded BN (+ residual) (+ ReLU) as a gridded Pallas matmul.

    x: (N, L, Cin_store) bf16, cp: prepared conv params (padded bf16 weight etc.).
    Returns (N, L_out, Cout_store) bf16.
    """
    n, l, cin_store = x.shape
    k, stride, padding = cp["k"], cp["stride"], cp["padding"]
    cout_store = cp["cout_store"]
    k_pad = cp["w"].shape[0]

    patches, l_out = _im2col(x, k, stride, padding)    # (M, k*Cin_store) bf16
    m = n * l_out
    k_raw = k * cin_store
    tm, mp = _row_tile(m)
    patches = jnp.pad(patches, ((0, mp - m), (0, k_pad - k_raw)))

    args = [patches, cp["w"], cp["sb"]]
    in_specs = [
        pl.BlockSpec((tm, k_pad), lambda i: (i, 0)),
        pl.BlockSpec((k_pad, cout_store), lambda i: (0, 0)),   # DMA'd once
        pl.BlockSpec((8, cout_store), lambda i: (0, 0)),       # packed scale/bias
    ]
    if residual is not None:
        r = residual.reshape(m, cout_store)
        r = jnp.pad(r, ((0, mp - m), (0, 0)))
        args.append(r)
        in_specs.append(pl.BlockSpec((tm, cout_store), lambda i: (i, 0)))
        kernel = functools.partial(_mm_bn_res_kernel, relu=relu)
    else:
        kernel = functools.partial(_mm_bn_kernel, relu=relu)

    y = pl.pallas_call(
        kernel,
        out_shape=jax.ShapeDtypeStruct((mp, cout_store), jnp.bfloat16),
        grid=(mp // tm,),
        in_specs=in_specs,
        out_specs=pl.BlockSpec((tm, cout_store), lambda i: (i, 0)),
        compiler_params=pltpu.CompilerParams(
            dimension_semantics=("parallel",),
            vmem_limit_bytes=VMEM_LIMIT,
        ),
    )(*args)
    return y[:m].reshape(n, l_out, cout_store)


def pool_fc(x, fp):
    """Global average pool over L fused with the final Linear layer.

    x: (N, L, C) bf16.  Returns (N, num_classes) f32.
    """
    n, l, c = x.shape
    ncp = fp["w"].shape[1]
    if l <= 128:
        tl, lp = l, l
    else:
        tl, lp = 128, _round_up(l, 128)
    xpad = jnp.pad(x, ((0, 0), (0, lp - l), (0, 0)))   # zero rows don't affect the sum

    out = pl.pallas_call(
        functools.partial(_pool_fc_kernel, inv_l=1.0 / l),
        out_shape=jax.ShapeDtypeStruct((n, ncp), jnp.float32),
        grid=(lp // tl,),
        in_specs=[
            pl.BlockSpec((n, tl, c), lambda i: (0, i, 0)),
            pl.BlockSpec((c, ncp), lambda i: (0, 0)),
            pl.BlockSpec((8, ncp), lambda i: (0, 0)),
        ],
        out_specs=pl.BlockSpec((n, ncp), lambda i: (0, 0)),
        scratch_shapes=[pltpu.VMEM((n, c), jnp.float32)],
        compiler_params=pltpu.CompilerParams(
            dimension_semantics=("arbitrary",),
            vmem_limit_bytes=VMEM_LIMIT,
        ),
    )(xpad, fp["w"], fp["b"])
    return out[:, :fp["num_classes"]]


# ----------------------------- parameter init ------------------------------

def _init_conv(key, cout, cin, k):
    return 0.05 * jax.random.normal(key, (cout, cin, k), jnp.float32)


def _init_bn(key, c):
    k1, k2, k3, k4 = jax.random.split(key, 4)
    return {
        "gamma": 1.0 + 0.1 * jax.random.normal(k1, (c,), jnp.float32),
        "beta": 0.1 * jax.random.normal(k2, (c,), jnp.float32),
        "mean": 0.1 * jax.random.normal(k3, (c,), jnp.float32),
        "var": 1.0 + 0.1 * jnp.abs(jax.random.normal(k4, (c,), jnp.float32)),
    }


def _init_block(key, cin, cout, stride):
    ks = jax.random.split(key, 6)
    p = {
        "conv1_w": _init_conv(ks[0], cout, cin, 3),
        "bn1": _init_bn(ks[1], cout),
        "conv2_w": _init_conv(ks[2], cout, cout, 3),
        "bn2": _init_bn(ks[3], cout),
        "stride": stride,
    }
    if stride != 1 or cin != cout:
        p["sc_w"] = _init_conv(ks[4], cout, cin, 1)
        p["sc_bn"] = _init_bn(ks[5], cout)
    return p


def init_resnet1d(key, num_blocks, num_classes):
    keys = jax.random.split(key, 8)
    params = {
        "conv1_w": _init_conv(keys[0], 64, 2, 7),
        "bn1": _init_bn(keys[1], 64),
        "layers": [],
    }
    in_c = 64
    plan = [(64, num_blocks[0], 1), (128, num_blocks[1], 2),
            (256, num_blocks[2], 2), (512, num_blocks[3], 2)]
    for li, (out_c, nb, stride) in enumerate(plan):
        strides = [stride] + [1] * (nb - 1)
        layer = []
        lkeys = jax.random.split(keys[2 + li], nb)
        for bi, s in enumerate(strides):
            layer.append(_init_block(lkeys[bi], in_c, out_c, s))
            in_c = out_c  # BasicBlock expansion = 1
        params["layers"].append(layer)
    k_fc = jax.random.split(keys[6], 2)
    params["fc_w"] = 0.05 * jax.random.normal(k_fc[0], (num_classes, 512), jnp.float32)
    params["fc_b"] = 0.05 * jax.random.normal(k_fc[1], (num_classes,), jnp.float32)
    return params


# -------------------- fold BN / pad / transpose at prep time ----------------

def _prep_conv(w, bn, cin_store, *, stride, padding):
    """torch-layout conv weight (Cout, Cin, K) + BN -> padded bf16 matmul operands."""
    cout, cin, k = w.shape
    cout_store = _round_up(cout, LANE)
    wpad = jnp.pad(w, ((0, 0), (0, cin_store - cin), (0, 0)))     # zero rows for padded Cin
    w2 = jnp.transpose(wpad, (2, 1, 0)).reshape(k * cin_store, cout)   # tap-major, chan-minor
    k_raw = k * cin_store
    k_pad = _round_up(k_raw, LANE)
    w2 = jnp.pad(w2, ((0, k_pad - k_raw), (0, cout_store - cout))).astype(jnp.bfloat16)

    scale = bn["gamma"] * lax.rsqrt(bn["var"] + EPS)
    bias = bn["beta"] - bn["mean"] * scale
    sb = jnp.zeros((8, cout_store), jnp.float32)
    sb = sb.at[0, :cout].set(scale).at[1, :cout].set(bias)       # padded lanes -> 0

    return {"w": w2, "sb": sb, "k": int(k), "stride": int(stride),
            "padding": int(padding), "cout_store": int(cout_store)}


def prepare_params(raw):
    prepared = {
        "stem": _prep_conv(raw["conv1_w"], raw["bn1"], cin_store=2, stride=2, padding=3),
        "layers": [],
    }
    cin_store = prepared["stem"]["cout_store"]
    for layer in raw["layers"]:
        blocks = []
        for b in layer:
            blk = {"conv1": _prep_conv(b["conv1_w"], b["bn1"], cin_store,
                                       stride=b["stride"], padding=1)}
            cout_store = blk["conv1"]["cout_store"]
            blk["conv2"] = _prep_conv(b["conv2_w"], b["bn2"], cout_store,
                                      stride=1, padding=1)
            if "sc_w" in b:
                blk["shortcut"] = _prep_conv(b["sc_w"], b["sc_bn"], cin_store,
                                             stride=b["stride"], padding=0)
            else:
                blk["shortcut"] = None
            blocks.append(blk)
            cin_store = cout_store
        prepared["layers"].append(blocks)

    nc = raw["fc_w"].shape[0]
    ncp = _round_up(nc, LANE)
    w_fc = jnp.pad(jnp.transpose(raw["fc_w"]), ((0, 0), (0, ncp - nc))).astype(jnp.bfloat16)
    b_fc = jnp.zeros((8, ncp), jnp.float32).at[0, :nc].set(raw["fc_b"])
    prepared["fc"] = {"w": w_fc, "b": b_fc, "num_classes": int(nc)}
    return prepared


# ----------------------------- forward pass --------------------------------

def basic_block_forward(x, p):
    out = conv1d_bn(x, p["conv1"], relu=True)
    if p["shortcut"] is not None:
        sc = conv1d_bn(x, p["shortcut"], relu=False)
    else:
        sc = x
    return conv1d_bn(out, p["conv2"], relu=True, residual=sc)


def resnet1d_forward(params, x_ncl):
    # x_ncl: (N, 2, L) -- PyTorch NCL layout.  Internally NLC, bf16 activations.
    x = jnp.transpose(x_ncl, (0, 2, 1)).astype(jnp.bfloat16)
    x = conv1d_bn(x, params["stem"], relu=True)
    for layer in params["layers"]:
        for block in layer:
            x = basic_block_forward(x, block)
    return pool_fc(x, params["fc"])          # (N, num_classes) f32


# ---------------------------------- main ------------------------------------

if __name__ == "__main__":
    key = jax.random.PRNGKey(0)
    k_param, k_input = jax.random.split(key)

    num_blocks = [1, 1, 1, 1]
    num_classes = 10
    raw_params = init_resnet1d(k_param, num_blocks, num_classes)
    params = prepare_params(raw_params)       # fold BN, pad, transpose ONCE

    # Small input: batch=2, channels=2 (I/Q), length=64
    x = jax.random.normal(k_input, (2, 2, 64), jnp.float32)

    fwd = jax.jit(functools.partial(resnet1d_forward, params))
    out = jax.block_until_ready(fwd(x))
    assert out.shape == (2, num_classes)
    print("KERNEL_OK")
</pallas_src>

<mosaic_0001>
module attributes {stable_mosaic.version = 11 : i64} {
  func.func @_mm_bn_res_kernel(%arg0: i32, %arg1: memref<64x384xbf16, #tpu.memory_space<vmem>>, %arg2: memref<384x128xbf16, #tpu.memory_space<vmem>>, %arg3: memref<8x128xf32, #tpu.memory_space<vmem>>, %arg4: memref<64x128xbf16, #tpu.memory_space<vmem>>, %arg5: memref<64x128xbf16, #tpu.memory_space<vmem>>) attributes {dimension_semantics = [#tpu.dimension_semantics<parallel>], iteration_bounds = array<i64: 1>, scalar_prefetch = 0 : i64, scratch_operands = 0 : i64, tpu.core_type = #tpu.core_type<tc>, window_params = [{transform_indices = @transform_0, window_bounds = array<i64: 64, 384>}, {pipeline_mode = #tpu.pipeline_mode<synchronous>, transform_indices = @transform_1, window_bounds = array<i64: 384, 128>}, {pipeline_mode = #tpu.pipeline_mode<synchronous>, transform_indices = @transform_2, window_bounds = array<i64: 8, 128>}, {transform_indices = @transform_3, window_bounds = array<i64: 64, 128>}, {transform_indices = @transform_4, window_bounds = array<i64: 64, 128>}]} {
    %c0 = arith.constant 0 : index
    %c0_0 = arith.constant 0 : index
    %0 = vector.load %arg1[%c0, %c0_0] : memref<64x384xbf16, #tpu.memory_space<vmem>>, vector<64x384xbf16>
    %c0_1 = arith.constant 0 : index
    %c0_2 = arith.constant 0 : index
    %1 = vector.load %arg2[%c0_1, %c0_2] : memref<384x128xbf16, #tpu.memory_space<vmem>>, vector<384x128xbf16>
    %cst = arith.constant dense<0.000000e+00> : vector<64x128xf32>
    %2 = tpu.matmul %0, %1, %cst {dimension_numbers = #tpu.dot_dimension_numbers<[1], [0], [0], [1], [0, 0, 1, 1], [], []>} : vector<64x384xbf16>, vector<384x128xbf16>, vector<64x128xf32> -> vector<64x128xf32>
    %c0_3 = arith.constant 0 : index
    %c0_4 = arith.constant 0 : index
    %3 = vector.load %arg3[%c0_3, %c0_4] : memref<8x128xf32, #tpu.memory_space<vmem>>, vector<1x128xf32>
    %4 = vector.broadcast %3 : vector<1x128xf32> to vector<64x128xf32>
    %5 = arith.mulf %2, %4 : vector<64x128xf32>
    %c1 = arith.constant 1 : index
    %c0_5 = arith.constant 0 : index
    %6 = vector.load %arg3[%c1, %c0_5] : memref<8x128xf32, #tpu.memory_space<vmem>>, vector<1x128xf32>
    %7 = vector.broadcast %6 : vector<1x128xf32> to vector<64x128xf32>
    %8 = arith.addf %5, %7 : vector<64x128xf32>
    %c0_6 = arith.constant 0 : index
    %c0_7 = arith.constant 0 : index
    %9 = vector.load %arg4[%c0_6, %c0_7] : memref<64x128xbf16, #tpu.memory_space<vmem>>, vector<64x128xbf16>
    %10 = arith.extf %9 : vector<64x128xbf16> to vector<64x128xf32>
    %11 = arith.addf %8, %10 : vector<64x128xf32>
    %cst_8 = arith.constant 0.000000e+00 : f32
    %12 = vector.broadcast %cst_8 : f32 to vector<64x128xf32>
    %13 = arith.maximumf %11, %12 : vector<64x128xf32>
    %14 = arith.truncf %13 : vector<64x128xf32> to vector<64x128xbf16>
    %c0_9 = arith.constant 0 : index
    %c0_10 = arith.constant 0 : index
    %15 = vector.load %arg5[%c0_9, %c0_10] : memref<64x128xbf16, #tpu.memory_space<vmem>>, vector<64x128xbf16>
    tpu.vector_store %arg5[%c0_9, %c0_10], %14 {strides = array<i32>} : memref<64x128xbf16, #tpu.memory_space<vmem>>, vector<64x128xbf16>,
    return
  }
  func.func @transform_0(%arg0: i32) -> (i32, i32) {
    %c0_i32 = arith.constant 0 : i32
    %c0_i32_0 = arith.constant 0 : i32
    return %arg0, %c0_i32 : i32, i32
  }
  func.func @transform_1(%arg0: i32) -> (i32, i32) {
    %c0_i32 = arith.constant 0 : i32
    %c0_i32_0 = arith.constant 0 : i32
    %c0_i32_1 = arith.constant 0 : i32
    return %c0_i32, %c0_i32_0 : i32, i32
  }
  func.func @transform_2(%arg0: i32) -> (i32, i32) {
    %c0_i32 = arith.constant 0 : i32
    %c0_i32_0 = arith.constant 0 : i32
    %c0_i32_1 = arith.constant 0 : i32
    return %c0_i32, %c0_i32_0 : i32, i32
  }
  func.func @transform_3(%arg0: i32) -> (i32, i32) {
    %c0_i32 = arith.constant 0 : i32
    %c0_i32_0 = arith.constant 0 : i32
    return %arg0, %c0_i32 : i32, i32
  }
  func.func @transform_4(%arg0: i32) -> (i32, i32) {
    %c0_i32 = arith.constant 0 : i32
    %c0_i32_0 = arith.constant 0 : i32
    return %arg0, %c0_i32 : i32, i32
  }
}

module attributes {stable_mosaic.version = 11 : i64} {
  func.func @_mm_bn_kernel(%arg0: i32, %arg1: memref<64x128xbf16, #tpu.memory_space<vmem>>, %arg2: memref<128x128xbf16, #tpu.memory_space<vmem>>, %arg3: memref<8x128xf32, #tpu.memory_space<vmem>>, %arg4: memref<64x128xbf16, #tpu.memory_space<vmem>>) attributes {dimension_semantics = [#tpu.dimension_semantics<parallel>], iteration_bounds = array<i64: 1>, scalar_prefetch = 0 : i64, scratch_operands = 0 : i64, tpu.core_type = #tpu.core_type<tc>, window_params = [{transform_indices = @transform_0, window_bounds = array<i64: 64, 128>}, {pipeline_mode = #tpu.pipeline_mode<synchronous>, transform_indices = @transform_1, window_bounds = array<i64: 128, 128>}, {pipeline_mode = #tpu.pipeline_mode<synchronous>, transform_indices = @transform_2, window_bounds = array<i64: 8, 128>}, {transform_indices = @transform_3, window_bounds = array<i64: 64, 128>}]} {
    %c0 = arith.constant 0 : index
    %c0_0 = arith.constant 0 : index
    %0 = vector.load %arg1[%c0, %c0_0] : memref<64x128xbf16, #tpu.memory_space<vmem>>, vector<64x128xbf16>
    %c0_1 = arith.constant 0 : index
    %c0_2 = arith.constant 0 : index
    %1 = vector.load %arg2[%c0_1, %c0_2] : memref<128x128xbf16, #tpu.memory_space<vmem>>, vector<128x128xbf16>
    %cst = arith.constant dense<0.000000e+00> : vector<64x128xf32>
    %2 = tpu.matmul %0, %1, %cst {dimension_numbers = #tpu.dot_dimension_numbers<[1], [0], [0], [1], [0, 0, 1, 1], [], []>} : vector<64x128xbf16>, vector<128x128xbf16>, vector<64x128xf32> -> vector<64x128xf32>
    %c0_3 = arith.constant 0 : index
    %c0_4 = arith.constant 0 : index
    %3 = vector.load %arg3[%c0_3, %c0_4] : memref<8x128xf32, #tpu.memory_space<vmem>>, vector<1x128xf32>
    %4 = vector.broadcast %3 : vector<1x128xf32> to vector<64x128xf32>
    %5 = arith.mulf %2, %4 : vector<64x128xf32>
    %c1 = arith.constant 1 : index
    %c0_5 = arith.constant 0 : index
    %6 = vector.load %arg3[%c1, %c0_5] : memref<8x128xf32, #tpu.memory_space<vmem>>, vector<1x128xf32>
    %7 = vector.broadcast %6 : vector<1x128xf32> to vector<64x128xf32>
    %8 = arith.addf %5, %7 : vector<64x128xf32>
    %cst_6 = arith.constant 0.000000e+00 : f32
    %9 = vector.broadcast %cst_6 : f32 to vector<64x128xf32>
    %10 = arith.maximumf %8, %9 : vector<64x128xf32>
    %11 = arith.truncf %10 : vector<64x128xf32> to vector<64x128xbf16>
    %c0_7 = arith.constant 0 : index
    %c0_8 = arith.constant 0 : index
    %12 = vector.load %arg4[%c0_7, %c0_8] : memref<64x128xbf16, #tpu.memory_space<vmem>>, vector<64x128xbf16>
    tpu.vector_store %arg4[%c0_7, %c0_8], %11 {strides = array<i32>} : memref<64x128xbf16, #tpu.memory_space<vmem>>, vector<64x128xbf16>,
    return
  }
  func.func @transform_0(%arg0: i32) -> (i32, i32) {
    %c0_i32 = arith.constant 0 : i32
    %c0_i32_0 = arith.constant 0 : i32
    return %arg0, %c0_i32 : i32, i32
  }
  func.func @transform_1(%arg0: i32) -> (i32, i32) {
    %c0_i32 = arith.constant 0 : i32
    %c0_i32_0 = arith.constant 0 : i32
    %c0_i32_1 = arith.constant 0 : i32
    return %c0_i32, %c0_i32_0 : i32, i32
  }
  func.func @transform_2(%arg0: i32) -> (i32, i32) {
    %c0_i32 = arith.constant 0 : i32
    %c0_i32_0 = arith.constant 0 : i32
    %c0_i32_1 = arith.constant 0 : i32
    return %c0_i32, %c0_i32_0 : i32, i32
  }
  func.func @transform_3(%arg0: i32) -> (i32, i32) {
    %c0_i32 = arith.constant 0 : i32
    %c0_i32_0 = arith.constant 0 : i32
    return %arg0, %c0_i32 : i32, i32
  }
}

module attributes {stable_mosaic.version = 11 : i64} {
  func.func @_mm_bn_kernel(%arg0: i32, %arg1: memref<64x384xbf16, #tpu.memory_space<vmem>>, %arg2: memref<384x128xbf16, #tpu.memory_space<vmem>>, %arg3: memref<8x128xf32, #tpu.memory_space<vmem>>, %arg4: memref<64x128xbf16, #tpu.memory_space<vmem>>) attributes {dimension_semantics = [#tpu.dimension_semantics<parallel>], iteration_bounds = array<i64: 1>, scalar_prefetch = 0 : i64, scratch_operands = 0 : i64, tpu.core_type = #tpu.core_type<tc>, window_params = [{transform_indices = @transform_0, window_bounds = array<i64: 64, 384>}, {pipeline_mode = #tpu.pipeline_mode<synchronous>, transform_indices = @transform_1, window_bounds = array<i64: 384, 128>}, {pipeline_mode = #tpu.pipeline_mode<synchronous>, transform_indices = @transform_2, window_bounds = array<i64: 8, 128>}, {transform_indices = @transform_3, window_bounds = array<i64: 64, 128>}]} {
    %c0 = arith.constant 0 : index
    %c0_0 = arith.constant 0 : index
    %0 = vector.load %arg1[%c0, %c0_0] : memref<64x384xbf16, #tpu.memory_space<vmem>>, vector<64x384xbf16>
    %c0_1 = arith.constant 0 : index
    %c0_2 = arith.constant 0 : index
    %1 = vector.load %arg2[%c0_1, %c0_2] : memref<384x128xbf16, #tpu.memory_space<vmem>>, vector<384x128xbf16>
    %cst = arith.constant dense<0.000000e+00> : vector<64x128xf32>
    %2 = tpu.matmul %0, %1, %cst {dimension_numbers = #tpu.dot_dimension_numbers<[1], [0], [0], [1], [0, 0, 1, 1], [], []>} : vector<64x384xbf16>, vector<384x128xbf16>, vector<64x128xf32> -> vector<64x128xf32>
    %c0_3 = arith.constant 0 : index
    %c0_4 = arith.constant 0 : index
    %3 = vector.load %arg3[%c0_3, %c0_4] : memref<8x128xf32, #tpu.memory_space<vmem>>, vector<1x128xf32>
    %4 = vector.broadcast %3 : vector<1x128xf32> to vector<64x128xf32>
    %5 = arith.mulf %2, %4 : vector<64x128xf32>
    %c1 = arith.constant 1 : index
    %c0_5 = arith.constant 0 : index
    %6 = vector.load %arg3[%c1, %c0_5] : memref<8x128xf32, #tpu.memory_space<vmem>>, vector<1x128xf32>
    %7 = vector.broadcast %6 : vector<1x128xf32> to vector<64x128xf32>
    %8 = arith.addf %5, %7 : vector<64x128xf32>
    %cst_6 = arith.constant 0.000000e+00 : f32
    %9 = vector.broadcast %cst_6 : f32 to vector<64x128xf32>
    %10 = arith.maximumf %8, %9 : vector<64x128xf32>
    %11 = arith.truncf %10 : vector<64x128xf32> to vector<64x128xbf16>
    %c0_7 = arith.constant 0 : index
    %c0_8 = arith.constant 0 : index
    %12 = vector.load %arg4[%c0_7, %c0_8] : memref<64x128xbf16, #tpu.memory_space<vmem>>, vector<64x128xbf16>
    tpu.vector_store %arg4[%c0_7, %c0_8], %11 {strides = array<i32>} : memref<64x128xbf16, #tpu.memory_space<vmem>>, vector<64x128xbf16>,
    return
  }
  func.func @transform_0(%arg0: i32) -> (i32, i32) {
    %c0_i32 = arith.constant 0 : i32
    %c0_i32_0 = arith.constant 0 : i32
    return %arg0, %c0_i32 : i32, i32
  }
  func.func @transform_1(%arg0: i32) -> (i32, i32) {
    %c0_i32 = arith.constant 0 : i32
    %c0_i32_0 = arith.constant 0 : i32
    %c0_i32_1 = arith.constant 0 : i32
    return %c0_i32, %c0_i32_0 : i32, i32
  }
  func.func @transform_2(%arg0: i32) -> (i32, i32) {
    %c0_i32 = arith.constant 0 : i32
    %c0_i32_0 = arith.constant 0 : i32
    %c0_i32_1 = arith.constant 0 : i32
    return %c0_i32, %c0_i32_0 : i32, i32
  }
  func.func @transform_3(%arg0: i32) -> (i32, i32) {
    %c0_i32 = arith.constant 0 : i32
    %c0_i32_0 = arith.constant 0 : i32
    return %arg0, %c0_i32 : i32, i32
  }
}

module attributes {stable_mosaic.version = 11 : i64} {
  func.func @_mm_bn_kernel(%arg0: i32, %arg1: memref<32x128xbf16, #tpu.memory_space<vmem>>, %arg2: memref<128x128xbf16, #tpu.memory_space<vmem>>, %arg3: memref<8x128xf32, #tpu.memory_space<vmem>>, %arg4: memref<32x128xbf16, #tpu.memory_space<vmem>>) attributes {dimension_semantics = [#tpu.dimension_semantics<parallel>], iteration_bounds = array<i64: 1>, scalar_prefetch = 0 : i64, scratch_operands = 0 : i64, tpu.core_type = #tpu.core_type<tc>, window_params = [{transform_indices = @transform_0, window_bounds = array<i64: 32, 128>}, {pipeline_mode = #tpu.pipeline_mode<synchronous>, transform_indices = @transform_1, window_bounds = array<i64: 128, 128>}, {pipeline_mode = #tpu.pipeline_mode<synchronous>, transform_indices = @transform_2, window_bounds = array<i64: 8, 128>}, {transform_indices = @transform_3, window_bounds = array<i64: 32, 128>}]} {
    %c0 = arith.constant 0 : index
    %c0_0 = arith.constant 0 : index
    %0 = vector.load %arg1[%c0, %c0_0] : memref<32x128xbf16, #tpu.memory_space<vmem>>, vector<32x128xbf16>
    %c0_1 = arith.constant 0 : index
    %c0_2 = arith.constant 0 : index
    %1 = vector.load %arg2[%c0_1, %c0_2] : memref<128x128xbf16, #tpu.memory_space<vmem>>, vector<128x128xbf16>
    %cst = arith.constant dense<0.000000e+00> : vector<32x128xf32>
    %2 = tpu.matmul %0, %1, %cst {dimension_numbers = #tpu.dot_dimension_numbers<[1], [0], [0], [1], [0, 0, 1, 1], [], []>} : vector<32x128xbf16>, vector<128x128xbf16>, vector<32x128xf32> -> vector<32x128xf32>
    %c0_3 = arith.constant 0 : index
    %c0_4 = arith.constant 0 : index
    %3 = vector.load %arg3[%c0_3, %c0_4] : memref<8x128xf32, #tpu.memory_space<vmem>>, vector<1x128xf32>
    %4 = vector.broadcast %3 : vector<1x128xf32> to vector<32x128xf32>
    %5 = arith.mulf %2, %4 : vector<32x128xf32>
    %c1 = arith.constant 1 : index
    %c0_5 = arith.constant 0 : index
    %6 = vector.load %arg3[%c1, %c0_5] : memref<8x128xf32, #tpu.memory_space<vmem>>, vector<1x128xf32>
    %7 = vector.broadcast %6 : vector<1x128xf32> to vector<32x128xf32>
    %8 = arith.addf %5, %7 : vector<32x128xf32>
    %9 = arith.truncf %8 : vector<32x128xf32> to vector<32x128xbf16>
    %c0_6 = arith.constant 0 : index
    %c0_7 = arith.constant 0 : index
    %10 = vector.load %arg4[%c0_6, %c0_7] : memref<32x128xbf16, #tpu.memory_space<vmem>>, vector<32x128xbf16>
    tpu.vector_store %arg4[%c0_6, %c0_7], %9 {strides = array<i32>} : memref<32x128xbf16, #tpu.memory_space<vmem>>, vector<32x128xbf16>,
    return
  }
  func.func @transform_0(%arg0: i32) -> (i32, i32) {
    %c0_i32 = arith.constant 0 : i32
    %c0_i32_0 = arith.constant 0 : i32
    return %arg0, %c0_i32 : i32, i32
  }
  func.func @transform_1(%arg0: i32) -> (i32, i32) {
    %c0_i32 = arith.constant 0 : i32
    %c0_i32_0 = arith.constant 0 : i32
    %c0_i32_1 = arith.constant 0 : i32
    return %c0_i32, %c0_i32_0 : i32, i32
  }
  func.func @transform_2(%arg0: i32) -> (i32, i32) {
    %c0_i32 = arith.constant 0 : i32
    %c0_i32_0 = arith.constant 0 : i32
    %c0_i32_1 = arith.constant 0 : i32
    return %c0_i32, %c0_i32_0 : i32, i32
  }
  func.func @transform_3(%arg0: i32) -> (i32, i32) {
    %c0_i32 = arith.constant 0 : i32
    %c0_i32_0 = arith.constant 0 : i32
    return %arg0, %c0_i32 : i32, i32
  }
}

module attributes {stable_mosaic.version = 11 : i64} {
  func.func @_mm_bn_kernel(%arg0: i32, %arg1: memref<32x384xbf16, #tpu.memory_space<vmem>>, %arg2: memref<384x128xbf16, #tpu.memory_space<vmem>>, %arg3: memref<8x128xf32, #tpu.memory_space<vmem>>, %arg4: memref<32x128xbf16, #tpu.memory_space<vmem>>) attributes {dimension_semantics = [#tpu.dimension_semantics<parallel>], iteration_bounds = array<i64: 1>, scalar_prefetch = 0 : i64, scratch_operands = 0 : i64, tpu.core_type = #tpu.core_type<tc>, window_params = [{transform_indices = @transform_0, window_bounds = array<i64: 32, 384>}, {pipeline_mode = #tpu.pipeline_mode<synchronous>, transform_indices = @transform_1, window_bounds = array<i64: 384, 128>}, {pipeline_mode = #tpu.pipeline_mode<synchronous>, transform_indices = @transform_2, window_bounds = array<i64: 8, 128>}, {transform_indices = @transform_3, window_bounds = array<i64: 32, 128>}]} {
    %c0 = arith.constant 0 : index
    %c0_0 = arith.constant 0 : index
    %0 = vector.load %arg1[%c0, %c0_0] : memref<32x384xbf16, #tpu.memory_space<vmem>>, vector<32x384xbf16>
    %c0_1 = arith.constant 0 : index
    %c0_2 = arith.constant 0 : index
    %1 = vector.load %arg2[%c0_1, %c0_2] : memref<384x128xbf16, #tpu.memory_space<vmem>>, vector<384x128xbf16>
    %cst = arith.constant dense<0.000000e+00> : vector<32x128xf32>
    %2 = tpu.matmul %0, %1, %cst {dimension_numbers = #tpu.dot_dimension_numbers<[1], [0], [0], [1], [0, 0, 1, 1], [], []>} : vector<32x384xbf16>, vector<384x128xbf16>, vector<32x128xf32> -> vector<32x128xf32>
    %c0_3 = arith.constant 0 : index
    %c0_4 = arith.constant 0 : index
    %3 = vector.load %arg3[%c0_3, %c0_4] : memref<8x128xf32, #tpu.memory_space<vmem>>, vector<1x128xf32>
    %4 = vector.broadcast %3 : vector<1x128xf32> to vector<32x128xf32>
    %5 = arith.mulf %2, %4 : vector<32x128xf32>
    %c1 = arith.constant 1 : index
    %c0_5 = arith.constant 0 : index
    %6 = vector.load %arg3[%c1, %c0_5] : memref<8x128xf32, #tpu.memory_space<vmem>>, vector<1x128xf32>
    %7 = vector.broadcast %6 : vector<1x128xf32> to vector<32x128xf32>
    %8 = arith.addf %5, %7 : vector<32x128xf32>
    %cst_6 = arith.constant 0.000000e+00 : f32
    %9 = vector.broadcast %cst_6 : f32 to vector<32x128xf32>
    %10 = arith.maximumf %8, %9 : vector<32x128xf32>
    %11 = arith.truncf %10 : vector<32x128xf32> to vector<32x128xbf16>
    %c0_7 = arith.constant 0 : index
    %c0_8 = arith.constant 0 : index
    %12 = vector.load %arg4[%c0_7, %c0_8] : memref<32x128xbf16, #tpu.memory_space<vmem>>, vector<32x128xbf16>
    tpu.vector_store %arg4[%c0_7, %c0_8], %11 {strides = array<i32>} : memref<32x128xbf16, #tpu.memory_space<vmem>>, vector<32x128xbf16>,
    return
  }
  func.func @transform_0(%arg0: i32) -> (i32, i32) {
    %c0_i32 = arith.constant 0 : i32
    %c0_i32_0 = arith.constant 0 : i32
    return %arg0, %c0_i32 : i32, i32
  }
  func.func @transform_1(%arg0: i32) -> (i32, i32) {
    %c0_i32 = arith.constant 0 : i32
    %c0_i32_0 = arith.constant 0 : i32
    %c0_i32_1 = arith.constant 0 : i32
    return %c0_i32, %c0_i32_0 : i32, i32
  }
  func.func @transform_2(%arg0: i32) -> (i32, i32) {
    %c0_i32 = arith.constant 0 : i32
    %c0_i32_0 = arith.constant 0 : i32
    %c0_i32_1 = arith.constant 0 : i32
    return %c0_i32, %c0_i32_0 : i32, i32
  }
  func.func @transform_3(%arg0: i32) -> (i32, i32) {
    %c0_i32 = arith.constant 0 : i32
    %c0_i32_0 = arith.constant 0 : i32
    return %arg0, %c0_i32 : i32, i32
  }
}

module attributes {stable_mosaic.version = 11 : i64} {
  func.func @_mm_bn_res_kernel(%arg0: i32, %arg1: memref<32x384xbf16, #tpu.memory_space<vmem>>, %arg2: memref<384x128xbf16, #tpu.memory_space<vmem>>, %arg3: memref<8x128xf32, #tpu.memory_space<vmem>>, %arg4: memref<32x128xbf16, #tpu.memory_space<vmem>>, %arg5: memref<32x128xbf16, #tpu.memory_space<vmem>>) attributes {dimension_semantics = [#tpu.dimension_semantics<parallel>], iteration_bounds = array<i64: 1>, scalar_prefetch = 0 : i64, scratch_operands = 0 : i64, tpu.core_type = #tpu.core_type<tc>, window_params = [{transform_indices = @transform_0, window_bounds = array<i64: 32, 384>}, {pipeline_mode = #tpu.pipeline_mode<synchronous>, transform_indices = @transform_1, window_bounds = array<i64: 384, 128>}, {pipeline_mode = #tpu.pipeline_mode<synchronous>, transform_indices = @transform_2, window_bounds = array<i64: 8, 128>}, {transform_indices = @transform_3, window_bounds = array<i64: 32, 128>}, {transform_indices = @transform_4, window_bounds = array<i64: 32, 128>}]} {
    %c0 = arith.constant 0 : index
    %c0_0 = arith.constant 0 : index
    %0 = vector.load %arg1[%c0, %c0_0] : memref<32x384xbf16, #tpu.memory_space<vmem>>, vector<32x384xbf16>
    %c0_1 = arith.constant 0 : index
    %c0_2 = arith.constant 0 : index
    %1 = vector.load %arg2[%c0_1, %c0_2] : memref<384x128xbf16, #tpu.memory_space<vmem>>, vector<384x128xbf16>
    %cst = arith.constant dense<0.000000e+00> : vector<32x128xf32>
    %2 = tpu.matmul %0, %1, %cst {dimension_numbers = #tpu.dot_dimension_numbers<[1], [0], [0], [1], [0, 0, 1, 1], [], []>} : vector<32x384xbf16>, vector<384x128xbf16>, vector<32x128xf32> -> vector<32x128xf32>
    %c0_3 = arith.constant 0 : index
    %c0_4 = arith.constant 0 : index
    %3 = vector.load %arg3[%c0_3, %c0_4] : memref<8x128xf32, #tpu.memory_space<vmem>>, vector<1x128xf32>
    %4 = vector.broadcast %3 : vector<1x128xf32> to vector<32x128xf32>
    %5 = arith.mulf %2, %4 : vector<32x128xf32>
    %c1 = arith.constant 1 : index
    %c0_5 = arith.constant 0 : index
    %6 = vector.load %arg3[%c1, %c0_5] : memref<8x128xf32, #tpu.memory_space<vmem>>, vector<1x128xf32>
    %7 = vector.broadcast %6 : vector<1x128xf32> to vector<32x128xf32>
    %8 = arith.addf %5, %7 : vector<32x128xf32>
    %c0_6 = arith.constant 0 : index
    %c0_7 = arith.constant 0 : index
    %9 = vector.load %arg4[%c0_6, %c0_7] : memref<32x128xbf16, #tpu.memory_space<vmem>>, vector<32x128xbf16>
    %10 = arith.extf %9 : vector<32x128xbf16> to vector<32x128xf32>
    %11 = arith.addf %8, %10 : vector<32x128xf32>
    %cst_8 = arith.constant 0.000000e+00 : f32
    %12 = vector.broadcast %cst_8 : f32 to vector<32x128xf32>
    %13 = arith.maximumf %11, %12 : vector<32x128xf32>
    %14 = arith.truncf %13 : vector<32x128xf32> to vector<32x128xbf16>
    %c0_9 = arith.constant 0 : index
    %c0_10 = arith.constant 0 : index
    %15 = vector.load %arg5[%c0_9, %c0_10] : memref<32x128xbf16, #tpu.memory_space<vmem>>, vector<32x128xbf16>
    tpu.vector_store %arg5[%c0_9, %c0_10], %14 {strides = array<i32>} : memref<32x128xbf16, #tpu.memory_space<vmem>>, vector<32x128xbf16>,
    return
  }
  func.func @transform_0(%arg0: i32) -> (i32, i32) {
    %c0_i32 = arith.constant 0 : i32
    %c0_i32_0 = arith.constant 0 : i32
    return %arg0, %c0_i32 : i32, i32
  }
  func.func @transform_1(%arg0: i32) -> (i32, i32) {
    %c0_i32 = arith.constant 0 : i32
    %c0_i32_0 = arith.constant 0 : i32
    %c0_i32_1 = arith.constant 0 : i32
    return %c0_i32, %c0_i32_0 : i32, i32
  }
  func.func @transform_2(%arg0: i32) -> (i32, i32) {
    %c0_i32 = arith.constant 0 : i32
    %c0_i32_0 = arith.constant 0 : i32
    %c0_i32_1 = arith.constant 0 : i32
    return %c0_i32, %c0_i32_0 : i32, i32
  }
  func.func @transform_3(%arg0: i32) -> (i32, i32) {
    %c0_i32 = arith.constant 0 : i32
    %c0_i32_0 = arith.constant 0 : i32
    return %arg0, %c0_i32 : i32, i32
  }
  func.func @transform_4(%arg0: i32) -> (i32, i32) {
    %c0_i32 = arith.constant 0 : i32
    %c0_i32_0 = arith.constant 0 : i32
    return %arg0, %c0_i32 : i32, i32
  }
}

module attributes {stable_mosaic.version = 11 : i64} {
  func.func @_mm_bn_kernel(%arg0: i32, %arg1: memref<16x128xbf16, #tpu.memory_space<vmem>>, %arg2: memref<128x256xbf16, #tpu.memory_space<vmem>>, %arg3: memref<8x256xf32, #tpu.memory_space<vmem>>, %arg4: memref<16x256xbf16, #tpu.memory_space<vmem>>) attributes {dimension_semantics = [#tpu.dimension_semantics<parallel>], iteration_bounds = array<i64: 1>, scalar_prefetch = 0 : i64, scratch_operands = 0 : i64, tpu.core_type = #tpu.core_type<tc>, window_params = [{transform_indices = @transform_0, window_bounds = array<i64: 16, 128>}, {pipeline_mode = #tpu.pipeline_mode<synchronous>, transform_indices = @transform_1, window_bounds = array<i64: 128, 256>}, {pipeline_mode = #tpu.pipeline_mode<synchronous>, transform_indices = @transform_2, window_bounds = array<i64: 8, 256>}, {transform_indices = @transform_3, window_bounds = array<i64: 16, 256>}]} {
    %c0 = arith.constant 0 : index
    %c0_0 = arith.constant 0 : index
    %0 = vector.load %arg1[%c0, %c0_0] : memref<16x128xbf16, #tpu.memory_space<vmem>>, vector<16x128xbf16>
    %c0_1 = arith.constant 0 : index
    %c0_2 = arith.constant 0 : index
    %1 = vector.load %arg2[%c0_1, %c0_2] : memref<128x256xbf16, #tpu.memory_space<vmem>>, vector<128x256xbf16>
    %cst = arith.constant dense<0.000000e+00> : vector<16x256xf32>
    %2 = tpu.matmul %0, %1, %cst {dimension_numbers = #tpu.dot_dimension_numbers<[1], [0], [0], [1], [0, 0, 1, 1], [], []>} : vector<16x128xbf16>, vector<128x256xbf16>, vector<16x256xf32> -> vector<16x256xf32>
    %c0_3 = arith.constant 0 : index
    %c0_4 = arith.constant 0 : index
    %3 = vector.load %arg3[%c0_3, %c0_4] : memref<8x256xf32, #tpu.memory_space<vmem>>, vector<1x256xf32>
    %4 = vector.broadcast %3 : vector<1x256xf32> to vector<16x256xf32>
    %5 = arith.mulf %2, %4 : vector<16x256xf32>
    %c1 = arith.constant 1 : index
    %c0_5 = arith.constant 0 : index
    %6 = vector.load %arg3[%c1, %c0_5] : memref<8x256xf32, #tpu.memory_space<vmem>>, vector<1x256xf32>
    %7 = vector.broadcast %6 : vector<1x256xf32> to vector<16x256xf32>
    %8 = arith.addf %5, %7 : vector<16x256xf32>
    %9 = arith.truncf %8 : vector<16x256xf32> to vector<16x256xbf16>
    %c0_6 = arith.constant 0 : index
    %c0_7 = arith.constant 0 : index
    %10 = vector.load %arg4[%c0_6, %c0_7] : memref<16x256xbf16, #tpu.memory_space<vmem>>, vector<16x256xbf16>
    tpu.vector_store %arg4[%c0_6, %c0_7], %9 {strides = array<i32>} : memref<16x256xbf16, #tpu.memory_space<vmem>>, vector<16x256xbf16>,
    return
  }
  func.func @transform_0(%arg0: i32) -> (i32, i32) {
    %c0_i32 = arith.constant 0 : i32
    %c0_i32_0 = arith.constant 0 : i32
    return %arg0, %c0_i32 : i32, i32
  }
  func.func @transform_1(%arg0: i32) -> (i32, i32) {
    %c0_i32 = arith.constant 0 : i32
    %c0_i32_0 = arith.constant 0 : i32
    %c0_i32_1 = arith.constant 0 : i32
    return %c0_i32, %c0_i32_0 : i32, i32
  }
  func.func @transform_2(%arg0: i32) -> (i32, i32) {
    %c0_i32 = arith.constant 0 : i32
    %c0_i32_0 = arith.constant 0 : i32
    %c0_i32_1 = arith.constant 0 : i32
    return %c0_i32, %c0_i32_0 : i32, i32
  }
  func.func @transform_3(%arg0: i32) -> (i32, i32) {
    %c0_i32 = arith.constant 0 : i32
    %c0_i32_0 = arith.constant 0 : i32
    return %arg0, %c0_i32 : i32, i32
  }
}

module attributes {stable_mosaic.version = 11 : i64} {
  func.func @_mm_bn_kernel(%arg0: i32, %arg1: memref<16x384xbf16, #tpu.memory_space<vmem>>, %arg2: memref<384x256xbf16, #tpu.memory_space<vmem>>, %arg3: memref<8x256xf32, #tpu.memory_space<vmem>>, %arg4: memref<16x256xbf16, #tpu.memory_space<vmem>>) attributes {dimension_semantics = [#tpu.dimension_semantics<parallel>], iteration_bounds = array<i64: 1>, scalar_prefetch = 0 : i64, scratch_operands = 0 : i64, tpu.core_type = #tpu.core_type<tc>, window_params = [{transform_indices = @transform_0, window_bounds = array<i64: 16, 384>}, {pipeline_mode = #tpu.pipeline_mode<synchronous>, transform_indices = @transform_1, window_bounds = array<i64: 384, 256>}, {pipeline_mode = #tpu.pipeline_mode<synchronous>, transform_indices = @transform_2, window_bounds = array<i64: 8, 256>}, {transform_indices = @transform_3, window_bounds = array<i64: 16, 256>}]} {
    %c0 = arith.constant 0 : index
    %c0_0 = arith.constant 0 : index
    %0 = vector.load %arg1[%c0, %c0_0] : memref<16x384xbf16, #tpu.memory_space<vmem>>, vector<16x384xbf16>
    %c0_1 = arith.constant 0 : index
    %c0_2 = arith.constant 0 : index
    %1 = vector.load %arg2[%c0_1, %c0_2] : memref<384x256xbf16, #tpu.memory_space<vmem>>, vector<384x256xbf16>
    %cst = arith.constant dense<0.000000e+00> : vector<16x256xf32>
    %2 = tpu.matmul %0, %1, %cst {dimension_numbers = #tpu.dot_dimension_numbers<[1], [0], [0], [1], [0, 0, 1, 1], [], []>} : vector<16x384xbf16>, vector<384x256xbf16>, vector<16x256xf32> -> vector<16x256xf32>
    %c0_3 = arith.constant 0 : index
    %c0_4 = arith.constant 0 : index
    %3 = vector.load %arg3[%c0_3, %c0_4] : memref<8x256xf32, #tpu.memory_space<vmem>>, vector<1x256xf32>
    %4 = vector.broadcast %3 : vector<1x256xf32> to vector<16x256xf32>
    %5 = arith.mulf %2, %4 : vector<16x256xf32>
    %c1 = arith.constant 1 : index
    %c0_5 = arith.constant 0 : index
    %6 = vector.load %arg3[%c1, %c0_5] : memref<8x256xf32, #tpu.memory_space<vmem>>, vector<1x256xf32>
    %7 = vector.broadcast %6 : vector<1x256xf32> to vector<16x256xf32>
    %8 = arith.addf %5, %7 : vector<16x256xf32>
    %cst_6 = arith.constant 0.000000e+00 : f32
    %9 = vector.broadcast %cst_6 : f32 to vector<16x256xf32>
    %10 = arith.maximumf %8, %9 : vector<16x256xf32>
    %11 = arith.truncf %10 : vector<16x256xf32> to vector<16x256xbf16>
    %c0_7 = arith.constant 0 : index
    %c0_8 = arith.constant 0 : index
    %12 = vector.load %arg4[%c0_7, %c0_8] : memref<16x256xbf16, #tpu.memory_space<vmem>>, vector<16x256xbf16>
    tpu.vector_store %arg4[%c0_7, %c0_8], %11 {strides = array<i32>} : memref<16x256xbf16, #tpu.memory_space<vmem>>, vector<16x256xbf16>,
    return
  }
  func.func @transform_0(%arg0: i32) -> (i32, i32) {
    %c0_i32 = arith.constant 0 : i32
    %c0_i32_0 = arith.constant 0 : i32
    return %arg0, %c0_i32 : i32, i32
  }
  func.func @transform_1(%arg0: i32) -> (i32, i32) {
    %c0_i32 = arith.constant 0 : i32
    %c0_i32_0 = arith.constant 0 : i32
    %c0_i32_1 = arith.constant 0 : i32
    return %c0_i32, %c0_i32_0 : i32, i32
  }
  func.func @transform_2(%arg0: i32) -> (i32, i32) {
    %c0_i32 = arith.constant 0 : i32
    %c0_i32_0 = arith.constant 0 : i32
    %c0_i32_1 = arith.constant 0 : i32
    return %c0_i32, %c0_i32_0 : i32, i32
  }
  func.func @transform_3(%arg0: i32) -> (i32, i32) {
    %c0_i32 = arith.constant 0 : i32
    %c0_i32_0 = arith.constant 0 : i32
    return %arg0, %c0_i32 : i32, i32
  }
}

module attributes {stable_mosaic.version = 11 : i64} {
  func.func @_mm_bn_res_kernel(%arg0: i32, %arg1: memref<16x768xbf16, #tpu.memory_space<vmem>>, %arg2: memref<768x256xbf16, #tpu.memory_space<vmem>>, %arg3: memref<8x256xf32, #tpu.memory_space<vmem>>, %arg4: memref<16x256xbf16, #tpu.memory_space<vmem>>, %arg5: memref<16x256xbf16, #tpu.memory_space<vmem>>) attributes {dimension_semantics = [#tpu.dimension_semantics<parallel>], iteration_bounds = array<i64: 1>, scalar_prefetch = 0 : i64, scratch_operands = 0 : i64, tpu.core_type = #tpu.core_type<tc>, window_params = [{transform_indices = @transform_0, window_bounds = array<i64: 16, 768>}, {pipeline_mode = #tpu.pipeline_mode<synchronous>, transform_indices = @transform_1, window_bounds = array<i64: 768, 256>}, {pipeline_mode = #tpu.pipeline_mode<synchronous>, transform_indices = @transform_2, window_bounds = array<i64: 8, 256>}, {transform_indices = @transform_3, window_bounds = array<i64: 16, 256>}, {transform_indices = @transform_4, window_bounds = array<i64: 16, 256>}]} {
    %c0 = arith.constant 0 : index
    %c0_0 = arith.constant 0 : index
    %0 = vector.load %arg1[%c0, %c0_0] : memref<16x768xbf16, #tpu.memory_space<vmem>>, vector<16x768xbf16>
    %c0_1 = arith.constant 0 : index
    %c0_2 = arith.constant 0 : index
    %1 = vector.load %arg2[%c0_1, %c0_2] : memref<768x256xbf16, #tpu.memory_space<vmem>>, vector<768x256xbf16>
    %cst = arith.constant dense<0.000000e+00> : vector<16x256xf32>
    %2 = tpu.matmul %0, %1, %cst {dimension_numbers = #tpu.dot_dimension_numbers<[1], [0], [0], [1], [0, 0, 1, 1], [], []>} : vector<16x768xbf16>, vector<768x256xbf16>, vector<16x256xf32> -> vector<16x256xf32>
    %c0_3 = arith.constant 0 : index
    %c0_4 = arith.constant 0 : index
    %3 = vector.load %arg3[%c0_3, %c0_4] : memref<8x256xf32, #tpu.memory_space<vmem>>, vector<1x256xf32>
    %4 = vector.broadcast %3 : vector<1x256xf32> to vector<16x256xf32>
    %5 = arith.mulf %2, %4 : vector<16x256xf32>
    %c1 = arith.constant 1 : index
    %c0_5 = arith.constant 0 : index
    %6 = vector.load %arg3[%c1, %c0_5] : memref<8x256xf32, #tpu.memory_space<vmem>>, vector<1x256xf32>
    %7 = vector.broadcast %6 : vector<1x256xf32> to vector<16x256xf32>
    %8 = arith.addf %5, %7 : vector<16x256xf32>
    %c0_6 = arith.constant 0 : index
    %c0_7 = arith.constant 0 : index
    %9 = vector.load %arg4[%c0_6, %c0_7] : memref<16x256xbf16, #tpu.memory_space<vmem>>, vector<16x256xbf16>
    %10 = arith.extf %9 : vector<16x256xbf16> to vector<16x256xf32>
    %11 = arith.addf %8, %10 : vector<16x256xf32>
    %cst_8 = arith.constant 0.000000e+00 : f32
    %12 = vector.broadcast %cst_8 : f32 to vector<16x256xf32>
    %13 = arith.maximumf %11, %12 : vector<16x256xf32>
    %14 = arith.truncf %13 : vector<16x256xf32> to vector<16x256xbf16>
    %c0_9 = arith.constant 0 : index
    %c0_10 = arith.constant 0 : index
    %15 = vector.load %arg5[%c0_9, %c0_10] : memref<16x256xbf16, #tpu.memory_space<vmem>>, vector<16x256xbf16>
    tpu.vector_store %arg5[%c0_9, %c0_10], %14 {strides = array<i32>} : memref<16x256xbf16, #tpu.memory_space<vmem>>, vector<16x256xbf16>,
    return
  }
  func.func @transform_0(%arg0: i32) -> (i32, i32) {
    %c0_i32 = arith.constant 0 : i32
    %c0_i32_0 = arith.constant 0 : i32
    return %arg0, %c0_i32 : i32, i32
  }
  func.func @transform_1(%arg0: i32) -> (i32, i32) {
    %c0_i32 = arith.constant 0 : i32
    %c0_i32_0 = arith.constant 0 : i32
    %c0_i32_1 = arith.constant 0 : i32
    return %c0_i32, %c0_i32_0 : i32, i32
  }
  func.func @transform_2(%arg0: i32) -> (i32, i32) {
    %c0_i32 = arith.constant 0 : i32
    %c0_i32_0 = arith.constant 0 : i32
    %c0_i32_1 = arith.constant 0 : i32
    return %c0_i32, %c0_i32_0 : i32, i32
  }
  func.func @transform_3(%arg0: i32) -> (i32, i32) {
    %c0_i32 = arith.constant 0 : i32
    %c0_i32_0 = arith.constant 0 : i32
    return %arg0, %c0_i32 : i32, i32
  }
  func.func @transform_4(%arg0: i32) -> (i32, i32) {
    %c0_i32 = arith.constant 0 : i32
    %c0_i32_0 = arith.constant 0 : i32
    return %arg0, %c0_i32 : i32, i32
  }
}

module attributes {stable_mosaic.version = 11 : i64} {
  func.func @_mm_bn_kernel(%arg0: i32, %arg1: memref<8x256xbf16, #tpu.memory_space<vmem>>, %arg2: memref<256x512xbf16, #tpu.memory_space<vmem>>, %arg3: memref<8x512xf32, #tpu.memory_space<vmem>>, %arg4: memref<8x512xbf16, #tpu.memory_space<vmem>>) attributes {dimension_semantics = [#tpu.dimension_semantics<parallel>], iteration_bounds = array<i64: 1>, scalar_prefetch = 0 : i64, scratch_operands = 0 : i64, tpu.core_type = #tpu.core_type<tc>, window_params = [{transform_indices = @transform_0, window_bounds = array<i64: 8, 256>}, {pipeline_mode = #tpu.pipeline_mode<synchronous>, transform_indices = @transform_1, window_bounds = array<i64: 256, 512>}, {pipeline_mode = #tpu.pipeline_mode<synchronous>, transform_indices = @transform_2, window_bounds = array<i64: 8, 512>}, {transform_indices = @transform_3, window_bounds = array<i64: 8, 512>}]} {
    %c0 = arith.constant 0 : index
    %c0_0 = arith.constant 0 : index
    %0 = vector.load %arg1[%c0, %c0_0] : memref<8x256xbf16, #tpu.memory_space<vmem>>, vector<8x256xbf16>
    %c0_1 = arith.constant 0 : index
    %c0_2 = arith.constant 0 : index
    %1 = vector.load %arg2[%c0_1, %c0_2] : memref<256x512xbf16, #tpu.memory_space<vmem>>, vector<256x512xbf16>
    %cst = arith.constant dense<0.000000e+00> : vector<8x512xf32>
    %2 = tpu.matmul %0, %1, %cst {dimension_numbers = #tpu.dot_dimension_numbers<[1], [0], [0], [1], [0, 0, 1, 1], [], []>} : vector<8x256xbf16>, vector<256x512xbf16>, vector<8x512xf32> -> vector<8x512xf32>
    %c0_3 = arith.constant 0 : index
    %c0_4 = arith.constant 0 : index
    %3 = vector.load %arg3[%c0_3, %c0_4] : memref<8x512xf32, #tpu.memory_space<vmem>>, vector<1x512xf32>
    %4 = vector.broadcast %3 : vector<1x512xf32> to vector<8x512xf32>
    %5 = arith.mulf %2, %4 : vector<8x512xf32>
    %c1 = arith.constant 1 : index
    %c0_5 = arith.constant 0 : index
    %6 = vector.load %arg3[%c1, %c0_5] : memref<8x512xf32, #tpu.memory_space<vmem>>, vector<1x512xf32>
    %7 = vector.broadcast %6 : vector<1x512xf32> to vector<8x512xf32>
    %8 = arith.addf %5, %7 : vector<8x512xf32>
    %9 = arith.truncf %8 : vector<8x512xf32> to vector<8x512xbf16>
    %c0_6 = arith.constant 0 : index
    %c0_7 = arith.constant 0 : index
    %10 = vector.load %arg4[%c0_6, %c0_7] : memref<8x512xbf16, #tpu.memory_space<vmem>>, vector<8x512xbf16>
    tpu.vector_store %arg4[%c0_6, %c0_7], %9 {strides = array<i32>} : memref<8x512xbf16, #tpu.memory_space<vmem>>, vector<8x512xbf16>,
    return
  }
  func.func @transform_0(%arg0: i32) -> (i32, i32) {
    %c0_i32 = arith.constant 0 : i32
    %c0_i32_0 = arith.constant 0 : i32
    return %arg0, %c0_i32 : i32, i32
  }
  func.func @transform_1(%arg0: i32) -> (i32, i32) {
    %c0_i32 = arith.constant 0 : i32
    %c0_i32_0 = arith.constant 0 : i32
    %c0_i32_1 = arith.constant 0 : i32
    return %c0_i32, %c0_i32_0 : i32, i32
  }
  func.func @transform_2(%arg0: i32) -> (i32, i32) {
    %c0_i32 = arith.constant 0 : i32
    %c0_i32_0 = arith.constant 0 : i32
    %c0_i32_1 = arith.constant 0 : i32
    return %c0_i32, %c0_i32_0 : i32, i32
  }
  func.func @transform_3(%arg0: i32) -> (i32, i32) {
    %c0_i32 = arith.constant 0 : i32
    %c0_i32_0 = arith.constant 0 : i32
    return %arg0, %c0_i32 : i32, i32
  }
}

module attributes {stable_mosaic.version = 11 : i64} {
  func.func @_mm_bn_kernel(%arg0: i32, %arg1: memref<8x768xbf16, #tpu.memory_space<vmem>>, %arg2: memref<768x512xbf16, #tpu.memory_space<vmem>>, %arg3: memref<8x512xf32, #tpu.memory_space<vmem>>, %arg4: memref<8x512xbf16, #tpu.memory_space<vmem>>) attributes {dimension_semantics = [#tpu.dimension_semantics<parallel>], iteration_bounds = array<i64: 1>, scalar_prefetch = 0 : i64, scratch_operands = 0 : i64, tpu.core_type = #tpu.core_type<tc>, window_params = [{transform_indices = @transform_0, window_bounds = array<i64: 8, 768>}, {pipeline_mode = #tpu.pipeline_mode<synchronous>, transform_indices = @transform_1, window_bounds = array<i64: 768, 512>}, {pipeline_mode = #tpu.pipeline_mode<synchronous>, transform_indices = @transform_2, window_bounds = array<i64: 8, 512>}, {transform_indices = @transform_3, window_bounds = array<i64: 8, 512>}]} {
    %c0 = arith.constant 0 : index
    %c0_0 = arith.constant 0 : index
    %0 = vector.load %arg1[%c0, %c0_0] : memref<8x768xbf16, #tpu.memory_space<vmem>>, vector<8x768xbf16>
    %c0_1 = arith.constant 0 : index
    %c0_2 = arith.constant 0 : index
    %1 = vector.load %arg2[%c0_1, %c0_2] : memref<768x512xbf16, #tpu.memory_space<vmem>>, vector<768x512xbf16>
    %cst = arith.constant dense<0.000000e+00> : vector<8x512xf32>
    %2 = tpu.matmul %0, %1, %cst {dimension_numbers = #tpu.dot_dimension_numbers<[1], [0], [0], [1], [0, 0, 1, 1], [], []>} : vector<8x768xbf16>, vector<768x512xbf16>, vector<8x512xf32> -> vector<8x512xf32>
    %c0_3 = arith.constant 0 : index
    %c0_4 = arith.constant 0 : index
    %3 = vector.load %arg3[%c0_3, %c0_4] : memref<8x512xf32, #tpu.memory_space<vmem>>, vector<1x512xf32>
    %4 = vector.broadcast %3 : vector<1x512xf32> to vector<8x512xf32>
    %5 = arith.mulf %2, %4 : vector<8x512xf32>
    %c1 = arith.constant 1 : index
    %c0_5 = arith.constant 0 : index
    %6 = vector.load %arg3[%c1, %c0_5] : memref<8x512xf32, #tpu.memory_space<vmem>>, vector<1x512xf32>
    %7 = vector.broadcast %6 : vector<1x512xf32> to vector<8x512xf32>
    %8 = arith.addf %5, %7 : vector<8x512xf32>
    %cst_6 = arith.constant 0.000000e+00 : f32
    %9 = vector.broadcast %cst_6 : f32 to vector<8x512xf32>
    %10 = arith.maximumf %8, %9 : vector<8x512xf32>
    %11 = arith.truncf %10 : vector<8x512xf32> to vector<8x512xbf16>
    %c0_7 = arith.constant 0 : index
    %c0_8 = arith.constant 0 : index
    %12 = vector.load %arg4[%c0_7, %c0_8] : memref<8x512xbf16, #tpu.memory_space<vmem>>, vector<8x512xbf16>
    tpu.vector_store %arg4[%c0_7, %c0_8], %11 {strides = array<i32>} : memref<8x512xbf16, #tpu.memory_space<vmem>>, vector<8x512xbf16>,
    return
  }
  func.func @transform_0(%arg0: i32) -> (i32, i32) {
    %c0_i32 = arith.constant 0 : i32
    %c0_i32_0 = arith.constant 0 : i32
    return %arg0, %c0_i32 : i32, i32
  }
  func.func @transform_1(%arg0: i32) -> (i32, i32) {
    %c0_i32 = arith.constant 0 : i32
    %c0_i32_0 = arith.constant 0 : i32
    %c0_i32_1 = arith.constant 0 : i32
    return %c0_i32, %c0_i32_0 : i32, i32
  }
  func.func @transform_2(%arg0: i32) -> (i32, i32) {
    %c0_i32 = arith.constant 0 : i32
    %c0_i32_0 = arith.constant 0 : i32
    %c0_i32_1 = arith.constant 0 : i32
    return %c0_i32, %c0_i32_0 : i32, i32
  }
  func.func @transform_3(%arg0: i32) -> (i32, i32) {
    %c0_i32 = arith.constant 0 : i32
    %c0_i32_0 = arith.constant 0 : i32
    return %arg0, %c0_i32 : i32, i32
  }
}

module attributes {stable_mosaic.version = 11 : i64} {
  func.func @_mm_bn_res_kernel(%arg0: i32, %arg1: memref<8x1536xbf16, #tpu.memory_space<vmem>>, %arg2: memref<1536x512xbf16, #tpu.memory_space<vmem>>, %arg3: memref<8x512xf32, #tpu.memory_space<vmem>>, %arg4: memref<8x512xbf16, #tpu.memory_space<vmem>>, %arg5: memref<8x512xbf16, #tpu.memory_space<vmem>>) attributes {dimension_semantics = [#tpu.dimension_semantics<parallel>], iteration_bounds = array<i64: 1>, scalar_prefetch = 0 : i64, scratch_operands = 0 : i64, tpu.core_type = #tpu.core_type<tc>, window_params = [{transform_indices = @transform_0, window_bounds = array<i64: 8, 1536>}, {pipeline_mode = #tpu.pipeline_mode<synchronous>, transform_indices = @transform_1, window_bounds = array<i64: 1536, 512>}, {pipeline_mode = #tpu.pipeline_mode<synchronous>, transform_indices = @transform_2, window_bounds = array<i64: 8, 512>}, {transform_indices = @transform_3, window_bounds = array<i64: 8, 512>}, {transform_indices = @transform_4, window_bounds = array<i64: 8, 512>}]} {
    %c0 = arith.constant 0 : index
    %c0_0 = arith.constant 0 : index
    %0 = vector.load %arg1[%c0, %c0_0] : memref<8x1536xbf16, #tpu.memory_space<vmem>>, vector<8x1536xbf16>
    %c0_1 = arith.constant 0 : index
    %c0_2 = arith.constant 0 : index
    %1 = vector.load %arg2[%c0_1, %c0_2] : memref<1536x512xbf16, #tpu.memory_space<vmem>>, vector<1536x512xbf16>
    %cst = arith.constant dense<0.000000e+00> : vector<8x512xf32>
    %2 = tpu.matmul %0, %1, %cst {dimension_numbers = #tpu.dot_dimension_numbers<[1], [0], [0], [1], [0, 0, 1, 1], [], []>} : vector<8x1536xbf16>, vector<1536x512xbf16>, vector<8x512xf32> -> vector<8x512xf32>
    %c0_3 = arith.constant 0 : index
    %c0_4 = arith.constant 0 : index
    %3 = vector.load %arg3[%c0_3, %c0_4] : memref<8x512xf32, #tpu.memory_space<vmem>>, vector<1x512xf32>
    %4 = vector.broadcast %3 : vector<1x512xf32> to vector<8x512xf32>
    %5 = arith.mulf %2, %4 : vector<8x512xf32>
    %c1 = arith.constant 1 : index
    %c0_5 = arith.constant 0 : index
    %6 = vector.load %arg3[%c1, %c0_5] : memref<8x512xf32, #tpu.memory_space<vmem>>, vector<1x512xf32>
    %7 = vector.broadcast %6 : vector<1x512xf32> to vector<8x512xf32>
    %8 = arith.addf %5, %7 : vector<8x512xf32>
    %c0_6 = arith.constant 0 : index
    %c0_7 = arith.constant 0 : index
    %9 = vector.load %arg4[%c0_6, %c0_7] : memref<8x512xbf16, #tpu.memory_space<vmem>>, vector<8x512xbf16>
    %10 = arith.extf %9 : vector<8x512xbf16> to vector<8x512xf32>
    %11 = arith.addf %8, %10 : vector<8x512xf32>
    %cst_8 = arith.constant 0.000000e+00 : f32
    %12 = vector.broadcast %cst_8 : f32 to vector<8x512xf32>
    %13 = arith.maximumf %11, %12 : vector<8x512xf32>
    %14 = arith.truncf %13 : vector<8x512xf32> to vector<8x512xbf16>
    %c0_9 = arith.constant 0 : index
    %c0_10 = arith.constant 0 : index
    %15 = vector.load %arg5[%c0_9, %c0_10] : memref<8x512xbf16, #tpu.memory_space<vmem>>, vector<8x512xbf16>
    tpu.vector_store %arg5[%c0_9, %c0_10], %14 {strides = array<i32>} : memref<8x512xbf16, #tpu.memory_space<vmem>>, vector<8x512xbf16>,
    return
  }
  func.func @transform_0(%arg0: i32) -> (i32, i32) {
    %c0_i32 = arith.constant 0 : i32
    %c0_i32_0 = arith.constant 0 : i32
    return %arg0, %c0_i32 : i32, i32
  }
  func.func @transform_1(%arg0: i32) -> (i32, i32) {
    %c0_i32 = arith.constant 0 : i32
    %c0_i32_0 = arith.constant 0 : i32
    %c0_i32_1 = arith.constant 0 : i32
    return %c0_i32, %c0_i32_0 : i32, i32
  }
  func.func @transform_2(%arg0: i32) -> (i32, i32) {
    %c0_i32 = arith.constant 0 : i32
    %c0_i32_0 = arith.constant 0 : i32
    %c0_i32_1 = arith.constant 0 : i32
    return %c0_i32, %c0_i32_0 : i32, i32
  }
  func.func @transform_3(%arg0: i32) -> (i32, i32) {
    %c0_i32 = arith.constant 0 : i32
    %c0_i32_0 = arith.constant 0 : i32
    return %arg0, %c0_i32 : i32, i32
  }
  func.func @transform_4(%arg0: i32) -> (i32, i32) {
    %c0_i32 = arith.constant 0 : i32
    %c0_i32_0 = arith.constant 0 : i32
    return %arg0, %c0_i32 : i32, i32
  }
}

module attributes {stable_mosaic.version = 11 : i64} {
  func.func @_pool_fc_kernel(%arg0: i32, %arg1: memref<2x4x512xbf16, #tpu.memory_space<vmem>>, %arg2: memref<512x128xbf16, #tpu.memory_space<vmem>>, %arg3: memref<8x128xf32, #tpu.memory_space<vmem>>, %arg4: memref<2x128xf32, #tpu.memory_space<vmem>>, %arg5: memref<2x512xf32, #tpu.memory_space<vmem>>) attributes {dimension_semantics = [#tpu.dimension_semantics<arbitrary>], iteration_bounds = array<i64: 1>, scalar_prefetch = 0 : i64, scratch_operands = 1 : i64, tpu.core_type = #tpu.core_type<tc>, window_params = [{transform_indices = @transform_0, window_bounds = array<i64: 2, 4, 512>}, {pipeline_mode = #tpu.pipeline_mode<synchronous>, transform_indices = @transform_1, window_bounds = array<i64: 512, 128>}, {pipeline_mode = #tpu.pipeline_mode<synchronous>, transform_indices = @transform_2, window_bounds = array<i64: 8, 128>}, {pipeline_mode = #tpu.pipeline_mode<synchronous>, transform_indices = @transform_3, window_bounds = array<i64: 2, 128>}]} {
    %c0_i32 = arith.constant 0 : i32
    %0 = arith.cmpi eq, %arg0, %c0_i32 : i32
    %1 = arith.extui %0 : i1 to i32
    %c0_i32_0 = arith.constant 0 : i32
    %2 = arith.cmpi ne, %1, %c0_i32_0 : i32
    scf.if %2 {
      %cst_9 = arith.constant 0.000000e+00 : f32
      %12 = vector.broadcast %cst_9 : f32 to vector<2x512xf32>
      %c0_10 = arith.constant 0 : index
      %c0_11 = arith.constant 0 : index
      %13 = vector.load %arg5[%c0_10, %c0_11] : memref<2x512xf32, #tpu.memory_space<vmem>>, vector<2x512xf32>
      tpu.vector_store %arg5[%c0_10, %c0_11], %12 {strides = array<i32>} : memref<2x512xf32, #tpu.memory_space<vmem>>, vector<2x512xf32>,
    } else {
    }
    %c0 = arith.constant 0 : index
    %c0_1 = arith.constant 0 : index
    %3 = vector.load %arg5[%c0, %c0_1] : memref<2x512xf32, #tpu.memory_space<vmem>>, vector<2x512xf32>
    %c0_2 = arith.constant 0 : index
    %c0_3 = arith.constant 0 : index
    %c0_4 = arith.constant 0 : index
    %4 = vector.load %arg1[%c0_2, %c0_3, %c0_4] : memref<2x4x512xbf16, #tpu.memory_space<vmem>>, vector<2x4x512xbf16>
    %5 = arith.extf %4 : vector<2x4x512xbf16> to vector<2x4x512xf32>
    %cst = arith.constant dense<0.000000e+00> : vector<2x512xf32>
    %6 = vector.multi_reduction <add>, %5, %cst [1] : vector<2x4x512xf32> to vector<2x512xf32>
    %7 = arith.addf %3, %6 : vector<2x512xf32>
    %c0_5 = arith.constant 0 : index
    %c0_6 = arith.constant 0 : index
    %8 = vector.load %arg5[%c0_5, %c0_6] : memref<2x512xf32, #tpu.memory_space<vmem>>, vector<2x512xf32>
    tpu.vector_store %arg5[%c0_5, %c0_6], %7 {strides = array<i32>} : memref<2x512xf32, #tpu.memory_space<vmem>>, vector<2x512xf32>,
    %c0_i32_7 = arith.constant 0 : i32
    %9 = arith.cmpi eq, %arg0, %c0_i32_7 : i32
    %10 = arith.extui %9 : i1 to i32
    %c0_i32_8 = arith.constant 0 : i32
    %11 = arith.cmpi ne, %10, %c0_i32_8 : i32
    scf.if %11 {
      %c0_9 = arith.constant 0 : index
      %c0_10 = arith.constant 0 : index
      %12 = vector.load %arg5[%c0_9, %c0_10] : memref<2x512xf32, #tpu.memory_space<vmem>>, vector<2x512xf32>
      %cst_11 = arith.constant 2.500000e-01 : f32
      %13 = vector.broadcast %cst_11 : f32 to vector<2x512xf32>
      %14 = arith.mulf %12, %13 : vector<2x512xf32>
      %15 = arith.truncf %14 : vector<2x512xf32> to vector<2x512xbf16>
      %c0_12 = arith.constant 0 : index
      %c0_13 = arith.constant 0 : index
      %16 = vector.load %arg2[%c0_12, %c0_13] : memref<512x128xbf16, #tpu.memory_space<vmem>>, vector<512x128xbf16>
      %cst_14 = arith.constant dense<0.000000e+00> : vector<2x128xf32>
      %17 = tpu.matmul %15, %16, %cst_14 {dimension_numbers = #tpu.dot_dimension_numbers<[1], [0], [0], [1], [0, 0, 1, 1], [], []>} : vector<2x512xbf16>, vector<512x128xbf16>, vector<2x128xf32> -> vector<2x128xf32>
      %c0_15 = arith.constant 0 : index
      %c0_16 = arith.constant 0 : index
      %18 = vector.load %arg3[%c0_15, %c0_16] : memref<8x128xf32, #tpu.memory_space<vmem>>, vector<1x128xf32>
      %19 = vector.broadcast %18 : vector<1x128xf32> to vector<2x128xf32>
      %20 = arith.addf %17, %19 : vector<2x128xf32>
      %c0_17 = arith.constant 0 : index
      %c0_18 = arith.constant 0 : index
      %21 = vector.load %arg4[%c0_17, %c0_18] : memref<2x128xf32, #tpu.memory_space<vmem>>, vector<2x128xf32>
      tpu.vector_store %arg4[%c0_17, %c0_18], %20 {strides = array<i32>} : memref<2x128xf32, #tpu.memory_space<vmem>>, vector<2x128xf32>,
    } else {
    }
    return
  }
  func.func @transform_0(%arg0: i32) -> (i32, i32, i32) {
    %c0_i32 = arith.constant 0 : i32
    %c0_i32_0 = arith.constant 0 : i32
    %c0_i32_1 = arith.constant 0 : i32
    return %c0_i32, %arg0, %c0_i32_0 : i32, i32, i32
  }
  func.func @transform_1(%arg0: i32) -> (i32, i32) {
    %c0_i32 = arith.constant 0 : i32
    %c0_i32_0 = arith.constant 0 : i32
    %c0_i32_1 = arith.constant 0 : i32
    return %c0_i32, %c0_i32_0 : i32, i32
  }
  func.func @transform_2(%arg0: i32) -> (i32, i32) {
    %c0_i32 = arith.constant 0 : i32
    %c0_i32_0 = arith.constant 0 : i32
    %c0_i32_1 = arith.constant 0 : i32
    return %c0_i32, %c0_i32_0 : i32, i32
  }
  func.func @transform_3(%arg0: i32) -> (i32, i32) {
    %c0_i32 = arith.constant 0 : i32
    %c0_i32_0 = arith.constant 0 : i32
    %c0_i32_1 = arith.constant 0 : i32
    return %c0_i32, %c0_i32_0 : i32, i32
  }
}

</mosaic_0001>

<bundles_post_ra>
// kernel: resnet1d_forward.13
= control target key start
LH: loop header
LB: loop body
LE: loop exit
PB: predicated region body
PF: predicated region fallthrough
CT: control target
= control target key end

     0   :  { %8 = vsyncpa [#allocation3], 0  ;;  %s501_s0 = inlined_call_operand.vmem [shape: bf16[64,128], index: 0, kind: input, shape index: {}]   ;;  %s502_s1 = inlined_call_operand.hbm [shape: bf16[128,128], index: 1, kind: input, shape index: {}]   ;;  %s503_s2 = inlined_call_operand.hbm [shape: f32[8,128], index: 2, kind: input, shape index: {}]   ;;  %s504_s3 = inlined_call_operand.vmem [shape: bf16[64,128], index: 3, kind: output, shape index: {}]  }
   0x1   :  { %9 = vsyncpa [#allocation5], 0  ;;  %s447_s12 = smov [#allocation2]  }
   0x2   :  { %s17_s13 = sshll.u32 %s447_s12, 4  ;;  %s18_s13 = int_to_ptr.vmem [resolvable:$true] %s17_s13 }
   0x3   :  { %s411_s14 = scalar_lea.vmem %s18_s13, 1024  ;;  %p416_p1 = scmp.lt.s32.totalorder %s18_s13, %s18_s13 }
   0x4   :  { %p412_p0 = scmp.ne.s32.totalorder %s18_s13, %s411_s14  ;;  %p417_p2 = scmp.lt.s32.totalorder %s411_s14, %s411_s14 }
   0x6   :  { %p418_p3 = por %p417_p2, %p416_p1 }
   0x8   :  { %p419_p4 = pnand %p418_p3, %p412_p0 }
   0xa   :  { %422 = shalt.err (!%p419_p4)
}
   0xb   :  { %s448_s15 = smov 64   ;;  %s449_s16 = smov 4  }
   0xc   :  { %23 = dma.hbm_to_vmem [thread:$0]  %s502_s1, 1024, %s18_s13, [#allocation3], %s448_s15, %s448_s15, %s449_s16  }
   0xd   :  { %s450_s19 = smov [#allocation4]  }
   0xe   :  { %s30_s20 = sshll.u32 %s450_s19, 4  ;;  %s31_s20 = int_to_ptr.vmem [resolvable:$true] %s30_s20 }
   0xf   :  { %s431_s21 = scalar_lea.vmem %s31_s20, 128  ;;  %p436_p6 = scmp.lt.s32.totalorder %s31_s20, %s31_s20 }
  0x10   :  { %p432_p5 = scmp.ne.s32.totalorder %s31_s20, %s431_s21  ;;  %p437_p7 = scmp.lt.s32.totalorder %s431_s21, %s431_s21 }
  0x12   :  { %p438_p8 = por %p437_p7, %p436_p6 }
  0x14   :  { %p439_p9 = pnand %p438_p8, %p432_p5 }
  0x16   :  { %442 = shalt.err (!%p439_p9)
}
  0x17   :  { %33 = dma.hbm_to_vmem [thread:$0]  %s503_s2, 128, %s31_s20, [#allocation5]  }
  0x18   :  { %443 = dma.done.wait [#allocation3], 1024  }
  0x19   :  { %444 = vsyncadd [#allocation3], 4294966272 }
  0x1a   :  { %445 = dma.done.wait [#allocation5], 128  }
  0x1b   :  { %446 = vsyncadd [#allocation5], 4294967168  ;;  %v391_v0 = vld [vmem:[#allocation2 + $0x38] sm:$0xff]   ;;  %v392_v1 = vld [vmem:[#allocation2 + $0x30] sm:$0xff]  }
  0x1c   :  { %347 = vmatprep.subr.bf16.mxu0 %v391_v0  ;;  %371 = vmatprep.subr.bf16.mxu1 %v391_v0  ;;  %v393_v2 = vld [vmem:[#allocation2 + $0x28] sm:$0xff]   ;;  %v394_v3 = vld [vmem:[#allocation2 + $0x20] sm:$0xff]   ;;  %v400_v5 = vld [vmem:[%s501_s0 + $0x10] sm:$0xff]  }
  0x1d   :  { %348 = vmatpush3.bf16.msra.mxu0 %v391_v0  ;;  %379 = vmatpush3.bf16.msra.mxu1 %v391_v0  ;;  %v399_v4 = vld [vmem:[%s501_s0] sm:$0xff]   ;;  %v395_v6 = vld [vmem:[#allocation2 + $0x18] sm:$0xff]   ;;  %v396_v7 = vld [vmem:[#allocation2 + $0x10] sm:$0xff]  }
  0x1e   :  { %349 = vmatprep.subr.bf16.mxu0 %v392_v1  ;;  %372 = vmatprep.subr.bf16.mxu1 %v392_v1  ;;  %v397_v8 = vld [vmem:[#allocation2 + $0x8] sm:$0xff]   ;;  %v398_v9 = vld [vmem:[#allocation2] sm:$0xff]   ;;  %v402_v11 = vld [vmem:[%s501_s0 + $0x18] sm:$0xff]  }
  0x1f   :  { %363 = vmatprep.mubr.bf16.mxu0 %v399_v4  ;;  %367 = vmatprep.mubr.bf16.mxu1 %v400_v5  ;;  %v401_v10 = vld [vmem:[%s501_s0 + $0x8] sm:$0xff]   ;;  %v294_v12 = vld [vmem:[#allocation4] ss:$0 sm:$0xff]  ;;  %v295_v19 = vld [vmem:[#allocation4 + $0x1] ss:$0 sm:$0xff] }
  0x21   :  { %350 = vmatpush3.bf16.msra.mxu0 %v392_v1  ;;  %380 = vmatpush3.bf16.msra.mxu1 %v392_v1 }
  0x22   :  { %351 = vmatprep.subr.bf16.mxu0 %v393_v2  ;;  %373 = vmatprep.subr.bf16.mxu1 %v393_v2 }
  0x25   :  { %352 = vmatpush3.bf16.msra.mxu0 %v393_v2  ;;  %381 = vmatpush3.bf16.msra.mxu1 %v393_v2 }
  0x26   :  { %353 = vmatprep.subr.bf16.mxu0 %v394_v3  ;;  %374 = vmatprep.subr.bf16.mxu1 %v394_v3 }
  0x29   :  { %354 = vmatpush3.bf16.msra.mxu0 %v394_v3  ;;  %382 = vmatpush3.bf16.msra.mxu1 %v394_v3 }
  0x2a   :  { %355 = vmatprep.subr.bf16.mxu0 %v395_v6  ;;  %375 = vmatprep.subr.bf16.mxu1 %v395_v6 }
  0x2d   :  { %356 = vmatpush3.bf16.msra.mxu0 %v395_v6  ;;  %383 = vmatpush3.bf16.msra.mxu1 %v395_v6 }
  0x2e   :  { %357 = vmatprep.subr.bf16.mxu0 %v396_v7  ;;  %376 = vmatprep.subr.bf16.mxu1 %v396_v7 }
  0x31   :  { %358 = vmatpush3.bf16.msra.mxu0 %v396_v7  ;;  %384 = vmatpush3.bf16.msra.mxu1 %v396_v7 }
  0x32   :  { %359 = vmatprep.subr.bf16.mxu0 %v397_v8  ;;  %377 = vmatprep.subr.bf16.mxu1 %v397_v8 }
  0x35   :  { %360 = vmatpush3.bf16.msra.mxu0 %v397_v8  ;;  %385 = vmatpush3.bf16.msra.mxu1 %v397_v8 }
  0x36   :  { %361 = vmatprep.subr.bf16.mxu0 %v398_v9  ;;  %378 = vmatprep.subr.bf16.mxu1 %v398_v9 }
  0x39   :  { %362 = vmatpush3.bf16.msra.mxu0 %v398_v9  ;;  %386 = vmatpush3.bf16.msra.mxu1 %v398_v9 }
  0x3c   :  { %364 = vmatmul.mubr.bf16.vlgmr.msra.gmra.mxu0 %v401_v10  ;;  %368 = vmatmul.mubr.bf16.vlgmr.msra.gmra.mxu1 %v402_v11 }
  0xfc   :  { %v365_v13 = vpop.f32.mrf.mxu0  ;;  %v369_v14 = vpop.f32.mrf.mxu1 }
  0xfd   :  { %v209_v15 = vmul.f32 %v365_v13, %v294_v12  ;;  %v213_v16 = vmul.f32 %v369_v14, %v294_v12 }
  0xfe   :  { %v171_v17 = vpop.f32.mrf.mxu0  ;;  %v187_v18 = vpop.f32.mrf.mxu1 }
  0xff   :  { %v207_v20 = vmul.f32 %v294_v12, %v171_v17  ;;  %v211_v21 = vmul.f32 %v294_v12, %v187_v18  ;;  %v222_v24 = vadd.f32 %v295_v19, %v209_v15  ;;  %v226_v25 = vadd.f32 %v295_v19, %v213_v16 }
 0x100   :  { %v366_v22 = vpop.f32.mrf.mxu0  ;;  %v370_v23 = vpop.f32.mrf.mxu1 }
 0x101   :  { %v210_v26 = vmul.f32 %v366_v22, %v294_v12  ;;  %v214_v27 = vmul.f32 %v370_v23, %v294_v12  ;;  %v220_v30 = vadd.f32 %v295_v19, %v207_v20  ;;  %v224_v31 = vadd.f32 %v295_v19, %v211_v21 }
 0x102   :  { %v174_v28 = vpop.f32.mrf.mxu0  ;;  %v190_v29 = vpop.f32.mrf.mxu1  ;;  %v230_v38 = vmax.f32 %v222_v24, 0.0  ;;  %v234_v39 = vmax.f32 %v226_v25, 0.0 }
 0x103   :  { %v208_v32 = vmul.f32 %v294_v12, %v174_v28  ;;  %v212_v33 = vmul.f32 %v294_v12, %v190_v29  ;;  %v223_v34 = vadd.f32 %v295_v19, %v210_v26  ;;  %v227_v35 = vadd.f32 %v295_v19, %v214_v27 }
 0x104   :  { %v228_v42 = vmax.f32 %v220_v30, 0.0  ;;  %v232_v43 = vmax.f32 %v224_v31, 0.0 }
 0x105   :  { %v221_v36 = vadd.f32 %v295_v19, %v208_v32  ;;  %v225_v37 = vadd.f32 %v295_v19, %v212_v33  ;;  %v231_v40 = vmax.f32 %v223_v34, 0.0  ;;  %v235_v41 = vmax.f32 %v227_v35, 0.0 }
 0x107   :  { %v229_v44 = vmax.f32 %v221_v36, 0.0  ;;  %v233_v45 = vmax.f32 %v225_v37, 0.0  ;;  %v320_v46 = vpack.c.bf16 %v231_v40, %v230_v38  ;;  %v330_v47 = vpack.c.bf16 %v235_v41, %v234_v39 }
 0x109   :  { %v315_v48 = vpack.c.bf16 %v229_v44, %v228_v42  ;;  %v325_v49 = vpack.c.bf16 %v233_v45, %v232_v43  ;;  %332 = vst [vmem:[%s504_s3 + $0x8] sm:$0xff] %v320_v46   ;;  %334 = vst [vmem:[%s504_s3 + $0x18] sm:$0xff] %v330_v47  }
 0x10b   :  { %316 = vst [vmem:[%s504_s3] sm:$0xff] %v315_v48   ;;  %333 = vst [vmem:[%s504_s3 + $0x10] sm:$0xff] %v325_v49  }
 0x10c   :  { %280 = vsyncpa [#allocation3], 1 }
 0x10d   :  { %281 = vsyncpa [#allocation5], 1 }

// kernel: resnet1d_forward.17
= control target key start
LH: loop header
LB: loop body
LE: loop exit
PB: predicated region body
PF: predicated region fallthrough
CT: control target
= control target key end

     0   :  { %8 = vsyncpa [#allocation3], 0  ;;  %s375_s0 = inlined_call_operand.vmem [shape: bf16[32,128], index: 0, kind: input, shape index: {}]   ;;  %s376_s1 = inlined_call_operand.hbm [shape: bf16[128,128], index: 1, kind: input, shape index: {}]   ;;  %s377_s2 = inlined_call_operand.hbm [shape: f32[8,128], index: 2, kind: input, shape index: {}]   ;;  %s378_s3 = inlined_call_operand.vmem [shape: bf16[32,128], index: 3, kind: output, shape index: {}]  }
   0x1   :  { %9 = vsyncpa [#allocation5], 0  ;;  %s333_s12 = smov [#allocation2]  }
   0x2   :  { %s17_s13 = sshll.u32 %s333_s12, 4  ;;  %s18_s13 = int_to_ptr.vmem [resolvable:$true] %s17_s13 }
   0x3   :  { %s297_s14 = scalar_lea.vmem %s18_s13, 1024  ;;  %p302_p1 = scmp.lt.s32.totalorder %s18_s13, %s18_s13 }
   0x4   :  { %p298_p0 = scmp.ne.s32.totalorder %s18_s13, %s297_s14  ;;  %p303_p2 = scmp.lt.s32.totalorder %s297_s14, %s297_s14 }
   0x6   :  { %p304_p3 = por %p303_p2, %p302_p1 }
   0x8   :  { %p305_p4 = pnand %p304_p3, %p298_p0 }
   0xa   :  { %308 = shalt.err (!%p305_p4)
}
   0xb   :  { %s334_s15 = smov 64   ;;  %s335_s16 = smov 4  }
   0xc   :  { %23 = dma.hbm_to_vmem [thread:$0]  %s376_s1, 1024, %s18_s13, [#allocation3], %s334_s15, %s334_s15, %s335_s16  }
   0xd   :  { %s336_s19 = smov [#allocation4]  }
   0xe   :  { %s30_s20 = sshll.u32 %s336_s19, 4  ;;  %s31_s20 = int_to_ptr.vmem [resolvable:$true] %s30_s20 }
   0xf   :  { %s317_s21 = scalar_lea.vmem %s31_s20, 128  ;;  %p322_p6 = scmp.lt.s32.totalorder %s31_s20, %s31_s20 }
  0x10   :  { %p318_p5 = scmp.ne.s32.totalorder %s31_s20, %s317_s21  ;;  %p323_p7 = scmp.lt.s32.totalorder %s317_s21, %s317_s21 }
  0x12   :  { %p324_p8 = por %p323_p7, %p322_p6 }
  0x14   :  { %p325_p9 = pnand %p324_p8, %p318_p5 }
  0x16   :  { %328 = shalt.err (!%p325_p9)
}
  0x17   :  { %33 = dma.hbm_to_vmem [thread:$0]  %s377_s2, 128, %s31_s20, [#allocation5]  }
  0x18   :  { %329 = dma.done.wait [#allocation3], 1024  }
  0x19   :  { %330 = vsyncadd [#allocation3], 4294966272 }
  0x1a   :  { %331 = dma.done.wait [#allocation5], 128  }
  0x1b   :  { %332 = vsyncadd [#allocation5], 4294967168  ;;  %v279_v0 = vld [vmem:[#allocation2 + $0x38] sm:$0xff]   ;;  %v280_v1 = vld [vmem:[#allocation2 + $0x30] sm:$0xff]  }
  0x1c   :  { %255 = vmatprep.subr.bf16.mxu0 %v279_v0  ;;  %v281_v2 = vld [vmem:[#allocation2 + $0x28] sm:$0xff]   ;;  %v282_v3 = vld [vmem:[#allocation2 + $0x20] sm:$0xff]   ;;  %v283_v5 = vld [vmem:[#allocation2 + $0x18] sm:$0xff]  }
  0x1d   :  { %256 = vmatpush3.bf16.msra.mxu0 %v279_v0  ;;  %v287_v4 = vld [vmem:[%s375_s0] sm:$0xff]   ;;  %v284_v6 = vld [vmem:[#allocation2 + $0x10] sm:$0xff]   ;;  %v285_v7 = vld [vmem:[#allocation2 + $0x8] sm:$0xff]  }
  0x1e   :  { %257 = vmatprep.subr.bf16.mxu0 %v280_v1  ;;  %271 = vmatprep.mubr.bf16.mxu0 %v287_v4  ;;  %v286_v8 = vld [vmem:[#allocation2] sm:$0xff]   ;;  %v288_v9 = vld [vmem:[%s375_s0 + $0x8] sm:$0xff]  }
  0x1f   :  { %v224_v11 = vld [vmem:[#allocation4] ss:$0 sm:$0xff]  ;;  %v225_v14 = vld [vmem:[#allocation4 + $0x1] ss:$0 sm:$0xff] }
  0x21   :  { %258 = vmatpush3.bf16.msra.mxu0 %v280_v1 }
  0x22   :  { %259 = vmatprep.subr.bf16.mxu0 %v281_v2 }
  0x25   :  { %260 = vmatpush3.bf16.msra.mxu0 %v281_v2 }
  0x26   :  { %261 = vmatprep.subr.bf16.mxu0 %v282_v3 }
  0x29   :  { %262 = vmatpush3.bf16.msra.mxu0 %v282_v3 }
  0x2a   :  { %263 = vmatprep.subr.bf16.mxu0 %v283_v5 }
  0x2d   :  { %264 = vmatpush3.bf16.msra.mxu0 %v283_v5 }
  0x2e   :  { %265 = vmatprep.subr.bf16.mxu0 %v284_v6 }
  0x31   :  { %266 = vmatpush3.bf16.msra.mxu0 %v284_v6 }
  0x32   :  { %267 = vmatprep.subr.bf16.mxu0 %v285_v7 }
  0x35   :  { %268 = vmatpush3.bf16.msra.mxu0 %v285_v7 }
  0x36   :  { %269 = vmatprep.subr.bf16.mxu0 %v286_v8 }
  0x39   :  { %270 = vmatpush3.bf16.msra.mxu0 %v286_v8 }
  0x3c   :  { %272 = vmatmul.mubr.bf16.vlgmr.msra.gmra.mxu0 %v288_v9 }
  0xfc   :  { %v273_v10 = vpop.f32.mrf.mxu0 }
  0xfd   :  { %v177_v13 = vmul.f32 %v273_v10, %v224_v11 }
  0xfe   :  { %v155_v12 = vpop.f32.mrf.mxu0 }
  0xff   :  { %v175_v16 = vmul.f32 %v224_v11, %v155_v12  ;;  %v186_v19 = vadd.f32 %v225_v14, %v177_v13 }
 0x100   :  { %v274_v15 = vpop.f32.mrf.mxu0 }
 0x101   :  { %v178_v17 = vmul.f32 %v274_v15, %v224_v11  ;;  %v184_v22 = vadd.f32 %v225_v14, %v175_v16 }
 0x102   :  { %v158_v18 = vpop.f32.mrf.mxu0 }
 0x103   :  { %v187_v20 = vadd.f32 %v225_v14, %v178_v17  ;;  %v176_v21 = vmul.f32 %v224_v11, %v158_v18 }
 0x105   :  { %v242_v23 = vpack.c.bf16 %v187_v20, %v186_v19  ;;  %v185_v24 = vadd.f32 %v225_v14, %v176_v21 }
 0x107   :  { %244 = vst [vmem:[%s378_s3 + $0x8] sm:$0xff] %v242_v23   ;;  %v237_v25 = vpack.c.bf16 %v185_v24, %v184_v22 }
 0x109   :  { %238 = vst [vmem:[%s378_s3] sm:$0xff] %v237_v25  }
 0x10a   :  { %212 = vsyncpa [#allocation3], 1 }
 0x10b   :  { %213 = vsyncpa [#allocation5], 1 }

// kernel: resnet1d_forward.14
= control target key start
LH: loop header
LB: loop body
LE: loop exit
PB: predicated region body
PF: predicated region fallthrough
CT: control target
= control target key end

     0   :  { %8 = vsyncpa [#allocation3], 0  ;;  %s842_s0 = inlined_call_operand.vmem [shape: bf16[64,384], index: 0, kind: input, shape index: {}]   ;;  %s843_s1 = inlined_call_operand.hbm [shape: bf16[384,128], index: 1, kind: input, shape index: {}]   ;;  %s844_s2 = inlined_call_operand.hbm [shape: f32[8,128], index: 2, kind: input, shape index: {}]   ;;  %s845_s3 = inlined_call_operand.vmem [shape: bf16[64,128], index: 3, kind: output, shape index: {}]  }
   0x1   :  { %9 = vsyncpa [#allocation5], 0  ;;  %s764_s12 = smov [#allocation2]  }
   0x2   :  { %s17_s13 = sshll.u32 %s764_s12, 4  ;;  %s18_s13 = int_to_ptr.vmem [resolvable:$true] %s17_s13 }
   0x3   :  { %s728_s14 = scalar_lea.vmem %s18_s13, 3072  ;;  %p733_p1 = scmp.lt.s32.totalorder %s18_s13, %s18_s13 }
   0x4   :  { %p729_p0 = scmp.ne.s32.totalorder %s18_s13, %s728_s14  ;;  %p734_p2 = scmp.lt.s32.totalorder %s728_s14, %s728_s14 }
   0x6   :  { %p735_p3 = por %p734_p2, %p733_p1 }
   0x8   :  { %p736_p4 = pnand %p735_p3, %p729_p0 }
   0xa   :  { %739 = shalt.err (!%p736_p4)
}
   0xb   :  { %s765_s15 = smov 64   ;;  %s766_s16 = smov 4  }
   0xc   :  { %23 = dma.hbm_to_vmem [thread:$0]  %s843_s1, 3072, %s18_s13, [#allocation3], %s765_s15, %s765_s15, %s766_s16  }
   0xd   :  { %s767_s19 = smov [#allocation4]  }
   0xe   :  { %s30_s20 = sshll.u32 %s767_s19, 4  ;;  %s31_s20 = int_to_ptr.vmem [resolvable:$true] %s30_s20 }
   0xf   :  { %s748_s21 = scalar_lea.vmem %s31_s20, 128  ;;  %p753_p6 = scmp.lt.s32.totalorder %s31_s20, %s31_s20 }
  0x10   :  { %p749_p5 = scmp.ne.s32.totalorder %s31_s20, %s748_s21  ;;  %p754_p7 = scmp.lt.s32.totalorder %s748_s21, %s748_s21 }
  0x12   :  { %p755_p8 = por %p754_p7, %p753_p6 }
  0x14   :  { %p756_p9 = pnand %p755_p8, %p749_p5 }
  0x16   :  { %759 = shalt.err (!%p756_p9)
}
  0x17   :  { %33 = dma.hbm_to_vmem [thread:$0]  %s844_s2, 128, %s31_s20, [#allocation5]  }
  0x18   :  { %760 = dma.done.wait [#allocation3], 3072  }
  0x19   :  { %761 = vsyncadd [#allocation3], 4294964224 }
  0x1a   :  { %762 = dma.done.wait [#allocation5], 128  }
  0x1b   :  { %763 = vsyncadd [#allocation5], 4294967168  ;;  %v680_v0 = vld [vmem:[#allocation2 + $0x78] sm:$0xff]   ;;  %v683_v3 = vld [vmem:[#allocation2 + $0x70] sm:$0xff]  }
  0x1c   :  { %v681_v1 = vld [vmem:[#allocation2 + $0x38] sm:$0xff]   ;;  %600 = vmatprep.subr.bf16.mxu0 %v680_v0  ;;  %v684_v4 = vld [vmem:[#allocation2 + $0x30] sm:$0xff]   ;;  %v686_v6 = vld [vmem:[#allocation2 + $0x68] sm:$0xff]  }
  0x1d   :  { %v682_v2 = vld [vmem:[#allocation2 + $0xb8] sm:$0xff]   ;;  %601 = vmatpush3.bf16.msra.mxu0 %v681_v1  ;;  %v685_v5 = vld [vmem:[#allocation2 + $0xb0] sm:$0xff]   ;;  %v687_v7 = vld [vmem:[#allocation2 + $0x28] sm:$0xff]  }
  0x1e   :  { %652 = vmatprep.subr.bf16.mxu1 %v682_v2  ;;  %602 = vmatprep.subr.bf16.mxu0 %v683_v3  ;;  %v688_v8 = vld [vmem:[#allocation2 + $0xa8] sm:$0xff]   ;;  %v689_v9 = vld [vmem:[#allocation2 + $0x60] sm:$0xff]   ;;  %v692_v12 = vld [vmem:[#allocation2 + $0x58] sm:$0xff]  }
  0x1f   :  { %653 = vmatpush3.bf16.msra.mxu1 %v682_v2  ;;  %v690_v10 = vld [vmem:[#allocation2 + $0x20] sm:$0xff]   ;;  %v694_v13 = vld [vmem:[#allocation2 + $0x98] sm:$0xff]   ;;  %v695_v15 = vld [vmem:[#allocation2 + $0x50] sm:$0xff]  }
  0x20   :  { %654 = vmatprep.subr.bf16.mxu1 %v685_v5  ;;  %v691_v11 = vld [vmem:[#allocation2 + $0xa0] sm:$0xff]   ;;  %v693_v14 = vld [vmem:[#allocation2 + $0x18] sm:$0xff]   ;;  %v697_v16 = vld [vmem:[#allocation2 + $0x90] sm:$0xff]  }
  0x21   :  { %603 = vmatpush3.bf16.msra.mxu0 %v684_v4  ;;  %v696_v17 = vld [vmem:[#allocation2 + $0x10] sm:$0xff]   ;;  %v698_v18 = vld [vmem:[#allocation2 + $0x48] sm:$0xff]   ;;  %v701_v21 = vld [vmem:[#allocation2 + $0x40] sm:$0xff]  }
  0x22   :  { %604 = vmatprep.subr.bf16.mxu0 %v686_v6  ;;  %v699_v19 = vld [vmem:[#allocation2 + $0x8] sm:$0xff]   ;;  %v703_v22 = vld [vmem:[#allocation2 + $0x80] sm:$0xff]   ;;  %v716_v32 = vld [vmem:[%s842_s0 + $0x50] ss:$12 sps:$4 sm:$0xff]  }
  0x23   :  { %655 = vmatpush3.bf16.msra.mxu1 %v685_v5  ;;  %v700_v20 = vld [vmem:[#allocation2 + $0x88] sm:$0xff]   ;;  %v706_v23 = vld [vmem:[%s842_s0 + $0x4] ss:$12 sps:$4 sm:$0xff]   ;;  %v712_v31 = vld [vmem:[%s842_s0 + $0x34] ss:$12 sps:$4 sm:$0xff]  }
  0x24   :  { %656 = vmatprep.subr.bf16.mxu1 %v688_v8  ;;  %v707_v24 = vld [vmem:[%s842_s0 + $0x8] ss:$12 sps:$4 sm:$0xff]   ;;  %v702_v25 = vld [vmem:[#allocation2] sm:$0xff]   ;;  %345 = vmatprep.mubr.bf16.mxu0 %v706_v23  ;;  %v714_v33 = vld [vmem:[%s842_s0 + $0x30] ss:$12 sps:$4 sm:$0xff]  }
  0x25   :  { %605 = vmatpush3.bf16.msra.mxu0 %v687_v7  ;;  %668 = vmatprep.mubr.bf16.mxu1 %v707_v24  ;;  %v704_v26 = vld [vmem:[%s842_s0] ss:$12 sps:$4 sm:$0xff]   ;;  %v709_v27 = vld [vmem:[%s842_s0 + $0x1c] ss:$12 sps:$4 sm:$0xff]   ;;  %v715_v29 = vld [vmem:[%s842_s0 + $0x38] ss:$12 sps:$4 sm:$0xff]  }
  0x26   :  { %606 = vmatprep.subr.bf16.mxu0 %v689_v9  ;;  %v708_v28 = vld [vmem:[%s842_s0 + $0x20] ss:$12 sps:$4 sm:$0xff]   ;;  %v711_v30 = vld [vmem:[%s842_s0 + $0x18] ss:$12 sps:$4 sm:$0xff]   ;;  %v719_v35 = vld [vmem:[%s842_s0 + $0x48] ss:$12 sps:$4 sm:$0xff]  }
  0x27   :  { %657 = vmatpush3.bf16.msra.mxu1 %v688_v8  ;;  %v717_v34 = vld [vmem:[%s842_s0 + $0x4c] ss:$12 sps:$4 sm:$0xff]   ;;  %v559_v42 = vld [vmem:[#allocation4] ss:$0 sm:$0xff]  ;;  %v560_v48 = vld [vmem:[#allocation4 + $0x1] ss:$0 sm:$0xff] }
  0x28   :  { %658 = vmatprep.subr.bf16.mxu1 %v691_v11 }
  0x29   :  { %607 = vmatpush3.bf16.msra.mxu0 %v690_v10 }
  0x2a   :  { %608 = vmatprep.subr.bf16.mxu0 %v692_v12 }
  0x2b   :  { %659 = vmatpush3.bf16.msra.mxu1 %v691_v11 }
  0x2c   :  { %660 = vmatprep.subr.bf16.mxu1 %v694_v13 }
  0x2d   :  { %609 = vmatpush3.bf16.msra.mxu0 %v693_v14 }
  0x2e   :  { %610 = vmatprep.subr.bf16.mxu0 %v695_v15 }
  0x2f   :  { %661 = vmatpush3.bf16.msra.mxu1 %v694_v13 }
  0x30   :  { %662 = vmatprep.subr.bf16.mxu1 %v697_v16 }
  0x31   :  { %611 = vmatpush3.bf16.msra.mxu0 %v696_v17 }
  0x32   :  { %612 = vmatprep.subr.bf16.mxu0 %v698_v18 }
  0x33   :  { %663 = vmatpush3.bf16.msra.mxu1 %v697_v16 }
  0x34   :  { %664 = vmatprep.subr.bf16.mxu1 %v700_v20 }
  0x35   :  { %613 = vmatpush3.bf16.msra.mxu0 %v699_v19 }
  0x36   :  { %614 = vmatprep.subr.bf16.mxu0 %v701_v21 }
  0x37   :  { %665 = vmatpush3.bf16.msra.mxu1 %v700_v20 }
  0x38   :  { %666 = vmatprep.subr.bf16.mxu1 %v703_v22 }
  0x39   :  { %615 = vmatpush3.bf16.msra.mxu0 %v702_v25 }
  0x3b   :  { %667 = vmatpush3.bf16.msra.mxu1 %v703_v22 }
  0x3c   :  { %346 = vmatmul.mubr.bf16.vlgmr.msra.gmra.mxu0 %v704_v26 }
  0x3d   :  { %353 = vmatprep.mubr.bf16.mxu0 %v709_v27 }
  0x3e   :  { %669 = vmatmul.mubr.bf16.vlgmr.msra.gmra.mxu1 %v708_v28 }
  0x3f   :  { %672 = vmatprep.mubr.bf16.mxu1 %v715_v29 }
  0x44   :  { %354 = vmatmul.mubr.bf16.gmra.mxu0 %v711_v30 }
  0x45   :  { %361 = vmatprep.mubr.bf16.mxu0 %v712_v31 }
  0x46   :  { %673 = vmatmul.mubr.bf16.gmra.mxu1 %v716_v32 }
  0x4c   :  { %362 = vmatmul.mubr.bf16.gmra.mxu0 %v714_v33 }
  0x4d   :  { %369 = vmatprep.mubr.bf16.mxu0 %v717_v34 }
  0x54   :  { %370 = vmatmul.mubr.bf16.gmra.mxu0 %v719_v35 }
  0xfc   :  { %v616_v36 = vpop.f32.mrf.mxu0 }
  0xfe   :  { %v617_v37 = vpop.f32.mrf.mxu0  ;;  %v670_v38 = vpop.f32.mrf.mxu1 }
  0xff   :  { %v618_v39 = vadd.f32 %v617_v37, %v616_v36 }
 0x100   :  { %v619_v40 = vpop.f32.mrf.mxu0  ;;  %v412_v41 = vpop.f32.mrf.mxu1 }
 0x101   :  { %v413_v43 = vadd.f32 %v618_v39, %v412_v41 }
 0x102   :  { %v620_v44 = vpop.f32.mrf.mxu0  ;;  %v671_v45 = vpop.f32.mrf.mxu1 }
 0x103   :  { %v448_v46 = vmul.f32 %v559_v42, %v413_v43  ;;  %v621_v47 = vadd.f32 %v620_v44, %v619_v40 }
 0x104   :  { %v622_v49 = vpop.f32.mrf.mxu0  ;;  %v415_v50 = vpop.f32.mrf.mxu1 }
 0x105   :  { %v416_v51 = vadd.f32 %v621_v47, %v415_v50  ;;  %v461_v54 = vadd.f32 %v560_v48, %v448_v46 }
 0x106   :  { %v623_v52 = vpop.f32.mrf.mxu0  ;;  %v674_v53 = vpop.f32.mrf.mxu1 }
 0x107   :  { %v449_v55 = vmul.f32 %v559_v42, %v416_v51  ;;  %v624_v56 = vadd.f32 %v623_v52, %v622_v49  ;;  %v469_v62 = vmax.f32 %v461_v54, 0.0 }
 0x108   :  { %v625_v57 = vpop.f32.mrf.mxu0  ;;  %v428_v61 = vpop.f32.mrf.mxu1 }
 0x109   :  { %v462_v58 = vadd.f32 %v560_v48, %v449_v55  ;;  %v421_v59 = vadd.f32 %v670_v38, %v624_v56 }
 0x10a   :  { %v626_v60 = vpop.f32.mrf.mxu0  ;;  %v675_v6 = vpop.f32.mrf.mxu1 }
 0x10b   :  { %v470_v63 = vmax.f32 %v462_v58, 0.0  ;;  %v450_v0 = vmul.f32 %v559_v42, %v421_v59  ;;  %v627_v1 = vadd.f32 %v626_v60, %v625_v57 }
 0x10c   :  { %v628_v2 = vpop.f32.mrf.mxu0  ;;  %v431_v14 = vpop.f32.mrf.mxu1 }
 0x10d   :  { %v580_v3 = vpack.c.bf16 %v470_v63, %v469_v62  ;;  %v424_v4 = vadd.f32 %v671_v45, %v627_v1  ;;  %v463_v7 = vadd.f32 %v560_v48, %v450_v0 }
 0x10e   :  { %v629_v5 = vpop.f32.mrf.mxu0 }
 0x10f   :  { %581 = vst [vmem:[%s845_s3] sm:$0xff] %v580_v3   ;;  %v451_v8 = vmul.f32 %v559_v42, %v424_v4  ;;  %v630_v9 = vadd.f32 %v629_v5, %v628_v2  ;;  %v471_v15 = vmax.f32 %v463_v7, 0.0 }
 0x110   :  { %v631_v10 = vpop.f32.mrf.mxu0 }
 0x111   :  { %v464_v11 = vadd.f32 %v560_v48, %v451_v8  ;;  %v429_v12 = vadd.f32 %v630_v9, %v428_v61 }
 0x112   :  { %v632_v13 = vpop.f32.mrf.mxu0 }
 0x113   :  { %v472_v16 = vmax.f32 %v464_v11, 0.0  ;;  %v452_v17 = vmul.f32 %v559_v42, %v429_v12  ;;  %v633_v18 = vadd.f32 %v632_v13, %v631_v10 }
 0x114   :  { %v634_v19 = vpop.f32.mrf.mxu0 }
 0x115   :  { %v585_v20 = vpack.c.bf16 %v472_v16, %v471_v15  ;;  %v432_v21 = vadd.f32 %v633_v18, %v431_v14  ;;  %v465_v23 = vadd.f32 %v560_v48, %v452_v17 }
 0x116   :  { %v635_v22 = vpop.f32.mrf.mxu0 }
 0x117   :  { %597 = vst [vmem:[%s845_s3 + $0x8] sm:$0xff] %v585_v20   ;;  %v453_v24 = vmul.f32 %v559_v42, %v432_v21  ;;  %v636_v25 = vadd.f32 %v635_v22, %v634_v19  ;;  %v473_v30 = vmax.f32 %v465_v23, 0.0 }
 0x118   :  { %v637_v26 = vpop.f32.mrf.mxu0 }
 0x119   :  { %v466_v27 = vadd.f32 %v560_v48, %v453_v24  ;;  %v437_v28 = vadd.f32 %v674_v53, %v636_v25 }
 0x11a   :  { %v638_v29 = vpop.f32.mrf.mxu0 }
 0x11b   :  { %v474_v31 = vmax.f32 %v466_v27, 0.0  ;;  %v454_v32 = vmul.f32 %v559_v42, %v437_v28  ;;  %v639_v33 = vadd.f32 %v638_v29, %v637_v26 }
 0x11d   :  { %v590_v34 = vpack.c.bf16 %v474_v31, %v473_v30  ;;  %v440_v35 = vadd.f32 %v675_v6, %v639_v33  ;;  %v467_v36 = vadd.f32 %v560_v48, %v454_v32 }
 0x11f   :  { %598 = vst [vmem:[%s845_s3 + $0x10] sm:$0xff] %v590_v34   ;;  %v455_v37 = vmul.f32 %v559_v42, %v440_v35  ;;  %v475_v39 = vmax.f32 %v467_v36, 0.0 }
 0x121   :  { %v468_v38 = vadd.f32 %v560_v48, %v455_v37 }
 0x123   :  { %v476_v40 = vmax.f32 %v468_v38, 0.0 }
 0x125   :  { %v595_v41 = vpack.c.bf16 %v476_v40, %v475_v39 }
 0x127   :  { %599 = vst [vmem:[%s845_s3 + $0x18] sm:$0xff] %v595_v41  }
 0x128   :  { %521 = vsyncpa [#allocation3], 1 }
 0x129   :  { %522 = vsyncpa [#allocation5], 1 }

// kernel: resnet1d_forward.15
= control target key start
LH: loop header
LB: loop body
LE: loop exit
PB: predicated region body
PF: predicated region fallthrough
CT: control target
= control target key end

     0   :  { %9 = vsyncpa [#allocation3], 0  ;;  %s925_s0 = inlined_call_operand.vmem [shape: bf16[64,384], index: 0, kind: input, shape index: {}]   ;;  %s926_s1 = inlined_call_operand.hbm [shape: bf16[384,128], index: 1, kind: input, shape index: {}]   ;;  %s927_s2 = inlined_call_operand.hbm [shape: f32[8,128], index: 2, kind: input, shape index: {}]   ;;  %s928_s3 = inlined_call_operand.vmem [shape: bf16[64,128], index: 3, kind: input, shape index: {}]   ;;  %s929_s4 = inlined_call_operand.vmem [shape: bf16[64,128], index: 4, kind: output, shape index: {}]  }
   0x1   :  { %10 = vsyncpa [#allocation5], 0  ;;  %s810_s15 = smov [#allocation2]  }
   0x2   :  { %s18_s16 = sshll.u32 %s810_s15, 4  ;;  %s19_s16 = int_to_ptr.vmem [resolvable:$true] %s18_s16 }
   0x3   :  { %s774_s17 = scalar_lea.vmem %s19_s16, 3072  ;;  %p779_p1 = scmp.lt.s32.totalorder %s19_s16, %s19_s16 }
   0x4   :  { %p775_p0 = scmp.ne.s32.totalorder %s19_s16, %s774_s17  ;;  %p780_p2 = scmp.lt.s32.totalorder %s774_s17, %s774_s17 }
   0x6   :  { %p781_p3 = por %p780_p2, %p779_p1 }
   0x8   :  { %p782_p4 = pnand %p781_p3, %p775_p0 }
   0xa   :  { %785 = shalt.err (!%p782_p4)
}
   0xb   :  { %s811_s18 = smov 64   ;;  %s812_s19 = smov 4  }
   0xc   :  { %24 = dma.hbm_to_vmem [thread:$0]  %s926_s1, 3072, %s19_s16, [#allocation3], %s811_s18, %s811_s18, %s812_s19  }
   0xd   :  { %s813_s22 = smov [#allocation4]  }
   0xe   :  { %s31_s23 = sshll.u32 %s813_s22, 4  ;;  %s32_s23 = int_to_ptr.vmem [resolvable:$true] %s31_s23 }
   0xf   :  { %s794_s24 = scalar_lea.vmem %s32_s23, 128  ;;  %p799_p6 = scmp.lt.s32.totalorder %s32_s23, %s32_s23 }
  0x10   :  { %p795_p5 = scmp.ne.s32.totalorder %s32_s23, %s794_s24  ;;  %p800_p7 = scmp.lt.s32.totalorder %s794_s24, %s794_s24 }
  0x12   :  { %p801_p8 = por %p800_p7, %p799_p6 }
  0x14   :  { %p802_p9 = pnand %p801_p8, %p795_p5 }
  0x16   :  { %805 = shalt.err (!%p802_p9)
}
  0x17   :  { %34 = dma.hbm_to_vmem [thread:$0]  %s927_s2, 128, %s32_s23, [#allocation5]  }
  0x18   :  { %806 = dma.done.wait [#allocation3], 3072  }
  0x19   :  { %807 = vsyncadd [#allocation3], 4294964224 }
  0x1a   :  { %808 = dma.done.wait [#allocation5], 128  }
  0x1b   :  { %809 = vsyncadd [#allocation5], 4294967168  ;;  %v726_v0 = vld [vmem:[#allocation2 + $0x78] sm:$0xff]   ;;  %v729_v3 = vld [vmem:[#allocation2 + $0x70] sm:$0xff]  }
  0x1c   :  { %v727_v1 = vld [vmem:[#allocation2 + $0x38] sm:$0xff]   ;;  %646 = vmatprep.subr.bf16.mxu0 %v726_v0  ;;  %v730_v4 = vld [vmem:[#allocation2 + $0x30] sm:$0xff]   ;;  %v732_v6 = vld [vmem:[#allocation2 + $0x68] sm:$0xff]  }
  0x1d   :  { %v728_v2 = vld [vmem:[#allocation2 + $0xb8] sm:$0xff]   ;;  %647 = vmatpush3.bf16.msra.mxu0 %v727_v1  ;;  %v731_v5 = vld [vmem:[#allocation2 + $0xb0] sm:$0xff]   ;;  %v733_v7 = vld [vmem:[#allocation2 + $0x28] sm:$0xff]  }
  0x1e   :  { %698 = vmatprep.subr.bf16.mxu1 %v728_v2  ;;  %648 = vmatprep.subr.bf16.mxu0 %v729_v3  ;;  %v734_v8 = vld [vmem:[#allocation2 + $0xa8] sm:$0xff]   ;;  %v735_v9 = vld [vmem:[#allocation2 + $0x60] sm:$0xff]   ;;  %v738_v12 = vld [vmem:[#allocation2 + $0x58] sm:$0xff]  }
  0x1f   :  { %699 = vmatpush3.bf16.msra.mxu1 %v728_v2  ;;  %v736_v10 = vld [vmem:[#allocation2 + $0x20] sm:$0xff]   ;;  %v740_v13 = vld [vmem:[#allocation2 + $0x98] sm:$0xff]   ;;  %v741_v15 = vld [vmem:[#allocation2 + $0x50] sm:$0xff]  }
  0x20   :  { %700 = vmatprep.subr.bf16.mxu1 %v731_v5  ;;  %v737_v11 = vld [vmem:[#allocation2 + $0xa0] sm:$0xff]   ;;  %v739_v14 = vld [vmem:[#allocation2 + $0x18] sm:$0xff]   ;;  %v743_v16 = vld [vmem:[#allocation2 + $0x90] sm:$0xff]  }
  0x21   :  { %649 = vmatpush3.bf16.msra.mxu0 %v730_v4  ;;  %v742_v17 = vld [vmem:[#allocation2 + $0x10] sm:$0xff]   ;;  %v744_v18 = vld [vmem:[#allocation2 + $0x48] sm:$0xff]   ;;  %v747_v21 = vld [vmem:[#allocation2 + $0x40] sm:$0xff]  }
  0x22   :  { %650 = vmatprep.subr.bf16.mxu0 %v732_v6  ;;  %v745_v19 = vld [vmem:[#allocation2 + $0x8] sm:$0xff]   ;;  %v749_v22 = vld [vmem:[#allocation2 + $0x80] sm:$0xff]   ;;  %v762_v32 = vld [vmem:[%s925_s0 + $0x50] ss:$12 sps:$4 sm:$0xff]  }
  0x23   :  { %701 = vmatpush3.bf16.msra.mxu1 %v731_v5  ;;  %v746_v20 = vld [vmem:[#allocation2 + $0x88] sm:$0xff]   ;;  %v752_v23 = vld [vmem:[%s925_s0 + $0x4] ss:$12 sps:$4 sm:$0xff]   ;;  %v758_v31 = vld [vmem:[%s925_s0 + $0x34] ss:$12 sps:$4 sm:$0xff]  }
  0x24   :  { %702 = vmatprep.subr.bf16.mxu1 %v734_v8  ;;  %v753_v24 = vld [vmem:[%s925_s0 + $0x8] ss:$12 sps:$4 sm:$0xff]   ;;  %v748_v25 = vld [vmem:[#allocation2] sm:$0xff]   ;;  %348 = vmatprep.mubr.bf16.mxu0 %v752_v23  ;;  %v760_v33 = vld [vmem:[%s925_s0 + $0x30] ss:$12 sps:$4 sm:$0xff]  }
  0x25   :  { %651 = vmatpush3.bf16.msra.mxu0 %v733_v7  ;;  %714 = vmatprep.mubr.bf16.mxu1 %v753_v24  ;;  %v750_v26 = vld [vmem:[%s925_s0] ss:$12 sps:$4 sm:$0xff]   ;;  %v755_v27 = vld [vmem:[%s925_s0 + $0x1c] ss:$12 sps:$4 sm:$0xff]   ;;  %v761_v29 = vld [vmem:[%s925_s0 + $0x38] ss:$12 sps:$4 sm:$0xff]  }
  0x26   :  { %652 = vmatprep.subr.bf16.mxu0 %v735_v9  ;;  %v754_v28 = vld [vmem:[%s925_s0 + $0x20] ss:$12 sps:$4 sm:$0xff]   ;;  %v757_v30 = vld [vmem:[%s925_s0 + $0x18] ss:$12 sps:$4 sm:$0xff]   ;;  %v765_v35 = vld [vmem:[%s925_s0 + $0x48] ss:$12 sps:$4 sm:$0xff]  }
  0x27   :  { %703 = vmatpush3.bf16.msra.mxu1 %v734_v8  ;;  %v763_v34 = vld [vmem:[%s925_s0 + $0x4c] ss:$12 sps:$4 sm:$0xff]   ;;  %v881_v42 = vld [vmem:[#allocation4] ss:$0 sm:$0xff]  ;;  %v883_v44 = vld [vmem:[#allocation4 + $0x1] ss:$0 sm:$0xff] }
  0x28   :  { %704 = vmatprep.subr.bf16.mxu1 %v737_v11  ;;  %v605_v45 = vld [vmem:[%s928_s3] sm:$0xff]   ;;  %v640_v0 = vld [vmem:[%s928_s3 + $0x8] sm:$0xff]  }
  0x29   :  { %653 = vmatpush3.bf16.msra.mxu0 %v736_v10  ;;  %v606_v53 = vunpack.c.l.bf16 %v605_v45  ;;  %v607_v58 = vunpack.c.h.bf16 %v605_v45  ;;  %v610_v6 = vunpack.c.l.bf16 %v640_v0  ;;  %v642_v45 = vld [vmem:[%s928_s3 + $0x18] sm:$0xff]  }
  0x2a   :  { %654 = vmatprep.subr.bf16.mxu0 %v738_v12 }
  0x2b   :  { %705 = vmatpush3.bf16.msra.mxu1 %v737_v11 }
  0x2c   :  { %706 = vmatprep.subr.bf16.mxu1 %v740_v13 }
  0x2d   :  { %655 = vmatpush3.bf16.msra.mxu0 %v739_v14 }
  0x2e   :  { %656 = vmatprep.subr.bf16.mxu0 %v741_v15 }
  0x2f   :  { %707 = vmatpush3.bf16.msra.mxu1 %v740_v13 }
  0x30   :  { %708 = vmatprep.subr.bf16.mxu1 %v743_v16 }
  0x31   :  { %657 = vmatpush3.bf16.msra.mxu0 %v742_v17 }
  0x32   :  { %658 = vmatprep.subr.bf16.mxu0 %v744_v18 }
  0x33   :  { %709 = vmatpush3.bf16.msra.mxu1 %v743_v16  ;;  %v611_v16 = vunpack.c.h.bf16 %v640_v0 }
  0x34   :  { %710 = vmatprep.subr.bf16.mxu1 %v746_v20 }
  0x35   :  { %659 = vmatpush3.bf16.msra.mxu0 %v745_v19 }
  0x36   :  { %660 = vmatprep.subr.bf16.mxu0 %v747_v21 }
  0x37   :  { %711 = vmatpush3.bf16.msra.mxu1 %v746_v20 }
  0x38   :  { %712 = vmatprep.subr.bf16.mxu1 %v749_v22 }
  0x39   :  { %661 = vmatpush3.bf16.msra.mxu0 %v748_v25 }
  0x3b   :  { %713 = vmatpush3.bf16.msra.mxu1 %v749_v22  ;;  %v641_v22 = vld [vmem:[%s928_s3 + $0x10] sm:$0xff]  }
  0x3c   :  { %349 = vmatmul.mubr.bf16.vlgmr.msra.gmra.mxu0 %v750_v26 }
  0x3d   :  { %356 = vmatprep.mubr.bf16.mxu0 %v755_v27 }
  0x3e   :  { %715 = vmatmul.mubr.bf16.vlgmr.msra.gmra.mxu1 %v754_v28  ;;  %v614_v28 = vunpack.c.l.bf16 %v641_v22 }
  0x3f   :  { %718 = vmatprep.mubr.bf16.mxu1 %v761_v29 }
  0x44   :  { %357 = vmatmul.mubr.bf16.gmra.mxu0 %v757_v30 }
  0x45   :  { %364 = vmatprep.mubr.bf16.mxu0 %v758_v31 }
  0x46   :  { %719 = vmatmul.mubr.bf16.gmra.mxu1 %v762_v32 }
  0x4c   :  { %365 = vmatmul.mubr.bf16.gmra.mxu0 %v760_v33 }
  0x4d   :  { %372 = vmatprep.mubr.bf16.mxu0 %v763_v34 }
  0x54   :  { %373 = vmatmul.mubr.bf16.gmra.mxu0 %v765_v35 }
  0xfc   :  { %v662_v36 = vpop.f32.mrf.mxu0 }
  0xfe   :  { %v663_v37 = vpop.f32.mrf.mxu0  ;;  %v716_v38 = vpop.f32.mrf.mxu1 }
  0xff   :  { %v664_v39 = vadd.f32 %v663_v37, %v662_v36  ;;  %v615_v37 = vunpack.c.h.bf16 %v641_v22 }
 0x100   :  { %v665_v40 = vpop.f32.mrf.mxu0  ;;  %v415_v41 = vpop.f32.mrf.mxu1 }
 0x101   :  { %v416_v43 = vadd.f32 %v664_v39, %v415_v41 }
 0x102   :  { %v666_v46 = vpop.f32.mrf.mxu0  ;;  %v717_v47 = vpop.f32.mrf.mxu1 }
 0x103   :  { %v451_v48 = vmul.f32 %v881_v42, %v416_v43  ;;  %v667_v49 = vadd.f32 %v666_v46, %v665_v40 }
 0x104   :  { %v668_v50 = vpop.f32.mrf.mxu0  ;;  %v418_v51 = vpop.f32.mrf.mxu1 }
 0x105   :  { %v464_v52 = vadd.f32 %v883_v44, %v451_v48  ;;  %v419_v54 = vadd.f32 %v667_v49, %v418_v51 }
 0x106   :  { %v669_v55 = vpop.f32.mrf.mxu0  ;;  %v720_v56 = vpop.f32.mrf.mxu1 }
 0x107   :  { %v452_v57 = vmul.f32 %v881_v42, %v419_v54  ;;  %v670_v59 = vadd.f32 %v669_v55, %v668_v50  ;;  %v488_v61 = vadd.f32 %v606_v53, %v464_v52  ;;  %v618_v50 = vunpack.c.l.bf16 %v642_v45 }
 0x108   :  { %v671_v60 = vpop.f32.mrf.mxu0  ;;  %v431_v2 = vpop.f32.mrf.mxu1 }
 0x109   :  { %v465_v62 = vadd.f32 %v883_v44, %v452_v57  ;;  %v424_v63 = vadd.f32 %v716_v38, %v670_v59  ;;  %v496_v8 = vmax.f32 %v488_v61, 0.0 }
 0x10a   :  { %v672_v1 = vpop.f32.mrf.mxu0  ;;  %v721_v13 = vpop.f32.mrf.mxu1 }
 0x10b   :  { %v489_v3 = vadd.f32 %v607_v58, %v465_v62  ;;  %v453_v4 = vmul.f32 %v881_v42, %v424_v63  ;;  %v673_v5 = vadd.f32 %v672_v1, %v671_v60  ;;  %v619_v58 = vunpack.c.h.bf16 %v642_v45 }
 0x10c   :  { %v674_v7 = vpop.f32.mrf.mxu0  ;;  %v434_v24 = vpop.f32.mrf.mxu1 }
 0x10d   :  { %v497_v9 = vmax.f32 %v489_v3, 0.0  ;;  %v466_v10 = vadd.f32 %v883_v44, %v453_v4  ;;  %v427_v11 = vadd.f32 %v717_v47, %v673_v5 }
 0x10e   :  { %v675_v12 = vpop.f32.mrf.mxu0 }
 0x10f   :  { %v623_v14 = vpack.c.bf16 %v497_v9, %v496_v8  ;;  %v454_v15 = vmul.f32 %v881_v42, %v427_v11  ;;  %v676_v17 = vadd.f32 %v675_v12, %v674_v7  ;;  %v490_v19 = vadd.f32 %v610_v6, %v466_v10 }
 0x110   :  { %v677_v18 = vpop.f32.mrf.mxu0 }
 0x111   :  { %624 = vst [vmem:[%s929_s4] sm:$0xff] %v623_v14   ;;  %v467_v20 = vadd.f32 %v883_v44, %v454_v15  ;;  %v432_v21 = vadd.f32 %v676_v17, %v431_v2  ;;  %v498_v30 = vmax.f32 %v490_v19, 0.0 }
 0x112   :  { %v678_v23 = vpop.f32.mrf.mxu0 }
 0x113   :  { %v491_v25 = vadd.f32 %v611_v16, %v467_v20  ;;  %v455_v26 = vmul.f32 %v881_v42, %v432_v21  ;;  %v679_v27 = vadd.f32 %v678_v23, %v677_v18 }
 0x114   :  { %v680_v29 = vpop.f32.mrf.mxu0 }
 0x115   :  { %v499_v31 = vmax.f32 %v491_v25, 0.0  ;;  %v468_v32 = vadd.f32 %v883_v44, %v455_v26  ;;  %v435_v33 = vadd.f32 %v679_v27, %v434_v24 }
 0x116   :  { %v681_v34 = vpop.f32.mrf.mxu0 }
 0x117   :  { %v628_v35 = vpack.c.bf16 %v499_v31, %v498_v30  ;;  %v456_v36 = vmul.f32 %v881_v42, %v435_v33  ;;  %v682_v38 = vadd.f32 %v681_v34, %v680_v29  ;;  %v492_v40 = vadd.f32 %v614_v28, %v468_v32 }
 0x118   :  { %v683_v39 = vpop.f32.mrf.mxu0 }
 0x119   :  { %643 = vst [vmem:[%s929_s4 + $0x8] sm:$0xff] %v628_v35   ;;  %v469_v41 = vadd.f32 %v883_v44, %v456_v36  ;;  %v440_v43 = vadd.f32 %v720_v56, %v682_v38  ;;  %v500_v51 = vmax.f32 %v492_v40, 0.0 }
 0x11a   :  { %v684_v46 = vpop.f32.mrf.mxu0 }
 0x11b   :  { %v493_v47 = vadd.f32 %v615_v37, %v469_v41  ;;  %v457_v48 = vmul.f32 %v881_v42, %v440_v43  ;;  %v685_v49 = vadd.f32 %v684_v46, %v683_v39 }
 0x11d   :  { %v501_v52 = vmax.f32 %v493_v47, 0.0  ;;  %v470_v53 = vadd.f32 %v883_v44, %v457_v48  ;;  %v443_v54 = vadd.f32 %v721_v13, %v685_v49 }
 0x11f   :  { %v633_v55 = vpack.c.bf16 %v501_v52, %v500_v51  ;;  %v458_v57 = vmul.f32 %v881_v42, %v443_v54  ;;  %v494_v56 = vadd.f32 %v618_v50, %v470_v53 }
 0x121   :  { %644 = vst [vmem:[%s929_s4 + $0x10] sm:$0xff] %v633_v55   ;;  %v471_v59 = vadd.f32 %v883_v44, %v458_v57  ;;  %v502_v61 = vmax.f32 %v494_v56, 0.0 }
 0x123   :  { %v495_v60 = vadd.f32 %v619_v58, %v471_v59 }
 0x125   :  { %v503_v62 = vmax.f32 %v495_v60, 0.0 }
 0x127   :  { %v638_v63 = vpack.c.bf16 %v503_v62, %v502_v61 }
 0x129   :  { %645 = vst [vmem:[%s929_s4 + $0x18] sm:$0xff] %v638_v63  }
 0x12a   :  { %548 = vsyncpa [#allocation3], 1 }
 0x12b   :  { %549 = vsyncpa [#allocation5], 1 }

// kernel: resnet1d_forward.16
= control target key start
LH: loop header
LB: loop body
LE: loop exit
PB: predicated region body
PF: predicated region fallthrough
CT: control target
= control target key end

     0   :  { %8 = vsyncpa [#allocation3], 0  ;;  %s662_s0 = inlined_call_operand.vmem [shape: bf16[32,384], index: 0, kind: input, shape index: {}]   ;;  %s663_s1 = inlined_call_operand.hbm [shape: bf16[384,128], index: 1, kind: input, shape index: {}]   ;;  %s664_s2 = inlined_call_operand.hbm [shape: f32[8,128], index: 2, kind: input, shape index: {}]   ;;  %s665_s3 = inlined_call_operand.vmem [shape: bf16[32,128], index: 3, kind: output, shape index: {}]  }
   0x1   :  { %9 = vsyncpa [#allocation5], 0  ;;  %s608_s12 = smov [#allocation2]  }
   0x2   :  { %s17_s13 = sshll.u32 %s608_s12, 4  ;;  %s18_s13 = int_to_ptr.vmem [resolvable:$true] %s17_s13 }
   0x3   :  { %s572_s14 = scalar_lea.vmem %s18_s13, 3072  ;;  %p577_p1 = scmp.lt.s32.totalorder %s18_s13, %s18_s13 }
   0x4   :  { %p573_p0 = scmp.ne.s32.totalorder %s18_s13, %s572_s14  ;;  %p578_p2 = scmp.lt.s32.totalorder %s572_s14, %s572_s14 }
   0x6   :  { %p579_p3 = por %p578_p2, %p577_p1 }
   0x8   :  { %p580_p4 = pnand %p579_p3, %p573_p0 }
   0xa   :  { %583 = shalt.err (!%p580_p4)
}
   0xb   :  { %s609_s15 = smov 64   ;;  %s610_s16 = smov 4  }
   0xc   :  { %23 = dma.hbm_to_vmem [thread:$0]  %s663_s1, 3072, %s18_s13, [#allocation3], %s609_s15, %s609_s15, %s610_s16  }
   0xd   :  { %s611_s19 = smov [#allocation4]  }
   0xe   :  { %s30_s20 = sshll.u32 %s611_s19, 4  ;;  %s31_s20 = int_to_ptr.vmem [resolvable:$true] %s30_s20 }
   0xf   :  { %s592_s21 = scalar_lea.vmem %s31_s20, 128  ;;  %p597_p6 = scmp.lt.s32.totalorder %s31_s20, %s31_s20 }
  0x10   :  { %p593_p5 = scmp.ne.s32.totalorder %s31_s20, %s592_s21  ;;  %p598_p7 = scmp.lt.s32.totalorder %s592_s21, %s592_s21 }
  0x12   :  { %p599_p8 = por %p598_p7, %p597_p6 }
  0x14   :  { %p600_p9 = pnand %p599_p8, %p593_p5 }
  0x16   :  { %603 = shalt.err (!%p600_p9)
}
  0x17   :  { %33 = dma.hbm_to_vmem [thread:$0]  %s664_s2, 128, %s31_s20, [#allocation5]  }
  0x18   :  { %604 = dma.done.wait [#allocation3], 3072  }
  0x19   :  { %605 = vsyncadd [#allocation3], 4294964224 }
  0x1a   :  { %606 = dma.done.wait [#allocation5], 128  }
  0x1b   :  { %607 = vsyncadd [#allocation5], 4294967168  ;;  %v532_v0 = vld [vmem:[#allocation2 + $0x78] sm:$0xff]   ;;  %v535_v3 = vld [vmem:[#allocation2 + $0x70] sm:$0xff]  }
  0x1c   :  { %v533_v1 = vld [vmem:[#allocation2 + $0x38] sm:$0xff]   ;;  %470 = vmatprep.subr.bf16.mxu0 %v532_v0  ;;  %v536_v4 = vld [vmem:[#allocation2 + $0x30] sm:$0xff]   ;;  %v538_v6 = vld [vmem:[#allocation2 + $0x68] sm:$0xff]  }
  0x1d   :  { %v534_v2 = vld [vmem:[#allocation2 + $0xb8] sm:$0xff]   ;;  %471 = vmatpush3.bf16.msra.mxu0 %v533_v1  ;;  %v537_v5 = vld [vmem:[#allocation2 + $0xb0] sm:$0xff]   ;;  %v539_v7 = vld [vmem:[#allocation2 + $0x28] sm:$0xff]  }
  0x1e   :  { %508 = vmatprep.subr.bf16.mxu1 %v534_v2  ;;  %472 = vmatprep.subr.bf16.mxu0 %v535_v3  ;;  %v540_v8 = vld [vmem:[#allocation2 + $0xa8] sm:$0xff]   ;;  %v541_v9 = vld [vmem:[#allocation2 + $0x60] sm:$0xff]   ;;  %v544_v12 = vld [vmem:[#allocation2 + $0x58] sm:$0xff]  }
  0x1f   :  { %509 = vmatpush3.bf16.msra.mxu1 %v534_v2  ;;  %v542_v10 = vld [vmem:[#allocation2 + $0x20] sm:$0xff]   ;;  %v546_v13 = vld [vmem:[#allocation2 + $0x98] sm:$0xff]   ;;  %v547_v15 = vld [vmem:[#allocation2 + $0x50] sm:$0xff]  }
  0x20   :  { %510 = vmatprep.subr.bf16.mxu1 %v537_v5  ;;  %v543_v11 = vld [vmem:[#allocation2 + $0xa0] sm:$0xff]   ;;  %v545_v14 = vld [vmem:[#allocation2 + $0x18] sm:$0xff]   ;;  %v549_v16 = vld [vmem:[#allocation2 + $0x90] sm:$0xff]  }
  0x21   :  { %473 = vmatpush3.bf16.msra.mxu0 %v536_v4  ;;  %v548_v17 = vld [vmem:[#allocation2 + $0x10] sm:$0xff]   ;;  %v550_v18 = vld [vmem:[#allocation2 + $0x48] sm:$0xff]   ;;  %v553_v21 = vld [vmem:[#allocation2 + $0x40] sm:$0xff]  }
  0x22   :  { %474 = vmatprep.subr.bf16.mxu0 %v538_v6  ;;  %v551_v19 = vld [vmem:[#allocation2 + $0x8] sm:$0xff]   ;;  %v555_v22 = vld [vmem:[#allocation2 + $0x80] sm:$0xff]  }
  0x23   :  { %511 = vmatpush3.bf16.msra.mxu1 %v537_v5  ;;  %v552_v20 = vld [vmem:[#allocation2 + $0x88] sm:$0xff]   ;;  %v558_v23 = vld [vmem:[%s662_s0 + $0x4] ss:$12 sps:$4 sm:$0xff]   ;;  %v449_v36 = vld [vmem:[#allocation4] ss:$0 sm:$0xff] }
  0x24   :  { %512 = vmatprep.subr.bf16.mxu1 %v540_v8  ;;  %v559_v24 = vld [vmem:[%s662_s0 + $0x8] ss:$12 sps:$4 sm:$0xff]   ;;  %v554_v25 = vld [vmem:[#allocation2] sm:$0xff]   ;;  %305 = vmatprep.mubr.bf16.mxu0 %v558_v23 }
  0x25   :  { %475 = vmatpush3.bf16.msra.mxu0 %v539_v7  ;;  %524 = vmatprep.mubr.bf16.mxu1 %v559_v24  ;;  %v556_v26 = vld [vmem:[%s662_s0] ss:$12 sps:$4 sm:$0xff]   ;;  %v561_v27 = vld [vmem:[%s662_s0 + $0x1c] ss:$12 sps:$4 sm:$0xff]   ;;  %v563_v29 = vld [vmem:[%s662_s0 + $0x18] ss:$12 sps:$4 sm:$0xff]  }
  0x26   :  { %476 = vmatprep.subr.bf16.mxu0 %v541_v9  ;;  %v560_v28 = vld [vmem:[%s662_s0 + $0x20] ss:$12 sps:$4 sm:$0xff]  }
  0x27   :  { %513 = vmatpush3.bf16.msra.mxu1 %v540_v8  ;;  %v450_v42 = vld [vmem:[#allocation4 + $0x1] ss:$0 sm:$0xff] }
  0x28   :  { %514 = vmatprep.subr.bf16.mxu1 %v543_v11 }
  0x29   :  { %477 = vmatpush3.bf16.msra.mxu0 %v542_v10 }
  0x2a   :  { %478 = vmatprep.subr.bf16.mxu0 %v544_v12 }
  0x2b   :  { %515 = vmatpush3.bf16.msra.mxu1 %v543_v11 }
  0x2c   :  { %516 = vmatprep.subr.bf16.mxu1 %v546_v13 }
  0x2d   :  { %479 = vmatpush3.bf16.msra.mxu0 %v545_v14 }
  0x2e   :  { %480 = vmatprep.subr.bf16.mxu0 %v547_v15 }
  0x2f   :  { %517 = vmatpush3.bf16.msra.mxu1 %v546_v13 }
  0x30   :  { %518 = vmatprep.subr.bf16.mxu1 %v549_v16 }
  0x31   :  { %481 = vmatpush3.bf16.msra.mxu0 %v548_v17 }
  0x32   :  { %482 = vmatprep.subr.bf16.mxu0 %v550_v18 }
  0x33   :  { %519 = vmatpush3.bf16.msra.mxu1 %v549_v16 }
  0x34   :  { %520 = vmatprep.subr.bf16.mxu1 %v552_v20 }
  0x35   :  { %483 = vmatpush3.bf16.msra.mxu0 %v551_v19 }
  0x36   :  { %484 = vmatprep.subr.bf16.mxu0 %v553_v21 }
  0x37   :  { %521 = vmatpush3.bf16.msra.mxu1 %v552_v20 }
  0x38   :  { %522 = vmatprep.subr.bf16.mxu1 %v555_v22 }
  0x39   :  { %485 = vmatpush3.bf16.msra.mxu0 %v554_v25 }
  0x3b   :  { %523 = vmatpush3.bf16.msra.mxu1 %v555_v22 }
  0x3c   :  { %306 = vmatmul.mubr.bf16.vlgmr.msra.gmra.mxu0 %v556_v26 }
  0x3d   :  { %313 = vmatprep.mubr.bf16.mxu0 %v561_v27 }
  0x3e   :  { %525 = vmatmul.mubr.bf16.vlgmr.msra.gmra.mxu1 %v560_v28 }
  0x44   :  { %314 = vmatmul.mubr.bf16.gmra.mxu0 %v563_v29 }
  0xfc   :  { %v486_v30 = vpop.f32.mrf.mxu0 }
  0xfe   :  { %v487_v31 = vpop.f32.mrf.mxu0  ;;  %v526_v32 = vpop.f32.mrf.mxu1 }
  0xff   :  { %v488_v33 = vadd.f32 %v487_v31, %v486_v30 }
 0x100   :  { %v489_v34 = vpop.f32.mrf.mxu0  ;;  %v356_v35 = vpop.f32.mrf.mxu1 }
 0x101   :  { %v357_v37 = vadd.f32 %v488_v33, %v356_v35 }
 0x102   :  { %v490_v38 = vpop.f32.mrf.mxu0  ;;  %v527_v39 = vpop.f32.mrf.mxu1 }
 0x103   :  { %v376_v40 = vmul.f32 %v449_v36, %v357_v37  ;;  %v491_v41 = vadd.f32 %v490_v38, %v489_v34 }
 0x104   :  { %v492_v43 = vpop.f32.mrf.mxu0  ;;  %v359_v44 = vpop.f32.mrf.mxu1 }
 0x105   :  { %v360_v45 = vadd.f32 %v491_v41, %v359_v44  ;;  %v385_v47 = vadd.f32 %v450_v42, %v376_v40 }
 0x106   :  { %v493_v46 = vpop.f32.mrf.mxu0 }
 0x107   :  { %v377_v48 = vmul.f32 %v449_v36, %v360_v45  ;;  %v494_v49 = vadd.f32 %v493_v46, %v492_v43  ;;  %v389_v54 = vmax.f32 %v385_v47, 0.0 }
 0x108   :  { %v495_v50 = vpop.f32.mrf.mxu0 }
 0x109   :  { %v386_v51 = vadd.f32 %v450_v42, %v377_v48  ;;  %v365_v52 = vadd.f32 %v526_v32, %v494_v49 }
 0x10a   :  { %v496_v53 = vpop.f32.mrf.mxu0 }
 0x10b   :  { %v390_v55 = vmax.f32 %v386_v51, 0.0  ;;  %v378_v56 = vmul.f32 %v449_v36, %v365_v52  ;;  %v497_v57 = vadd.f32 %v496_v53, %v495_v50 }
 0x10d   :  { %v462_v58 = vpack.c.bf16 %v390_v55, %v389_v54  ;;  %v368_v59 = vadd.f32 %v527_v39, %v497_v57  ;;  %v387_v60 = vadd.f32 %v450_v42, %v378_v56 }
 0x10f   :  { %463 = vst [vmem:[%s665_s3] sm:$0xff] %v462_v58   ;;  %v379_v61 = vmul.f32 %v449_v36, %v368_v59  ;;  %v391_v63 = vmax.f32 %v387_v60, 0.0 }
 0x111   :  { %v388_v62 = vadd.f32 %v450_v42, %v379_v61 }
 0x113   :  { %v392_v0 = vmax.f32 %v388_v62, 0.0 }
 0x115   :  { %v467_v1 = vpack.c.bf16 %v392_v0, %v391_v63 }
 0x117   :  { %469 = vst [vmem:[%s665_s3 + $0x8] sm:$0xff] %v467_v1  }
 0x118   :  { %417 = vsyncpa [#allocation3], 1 }
 0x119   :  { %418 = vsyncpa [#allocation5], 1 }

// kernel: resnet1d_forward.18
= control target key start
LH: loop header
LB: loop body
LE: loop exit
PB: predicated region body
PF: predicated region fallthrough
CT: control target
= control target key end

     0   :  { %9 = vsyncpa [#allocation3], 0  ;;  %s697_s0 = inlined_call_operand.vmem [shape: bf16[32,384], index: 0, kind: input, shape index: {}]   ;;  %s698_s1 = inlined_call_operand.hbm [shape: bf16[384,128], index: 1, kind: input, shape index: {}]   ;;  %s699_s2 = inlined_call_operand.hbm [shape: f32[8,128], index: 2, kind: input, shape index: {}]   ;;  %s700_s3 = inlined_call_operand.vmem [shape: bf16[32,128], index: 3, kind: input, shape index: {}]   ;;  %s701_s4 = inlined_call_operand.vmem [shape: bf16[32,128], index: 4, kind: output, shape index: {}]  }
   0x1   :  { %10 = vsyncpa [#allocation5], 0  ;;  %s632_s15 = smov [#allocation2]  }
   0x2   :  { %s18_s16 = sshll.u32 %s632_s15, 4  ;;  %s19_s16 = int_to_ptr.vmem [resolvable:$true] %s18_s16 }
   0x3   :  { %s596_s17 = scalar_lea.vmem %s19_s16, 3072  ;;  %p601_p1 = scmp.lt.s32.totalorder %s19_s16, %s19_s16 }
   0x4   :  { %p597_p0 = scmp.ne.s32.totalorder %s19_s16, %s596_s17  ;;  %p602_p2 = scmp.lt.s32.totalorder %s596_s17, %s596_s17 }
   0x6   :  { %p603_p3 = por %p602_p2, %p601_p1 }
   0x8   :  { %p604_p4 = pnand %p603_p3, %p597_p0 }
   0xa   :  { %607 = shalt.err (!%p604_p4)
}
   0xb   :  { %s633_s18 = smov 64   ;;  %s634_s19 = smov 4  }
   0xc   :  { %24 = dma.hbm_to_vmem [thread:$0]  %s698_s1, 3072, %s19_s16, [#allocation3], %s633_s18, %s633_s18, %s634_s19  }
   0xd   :  { %s635_s22 = smov [#allocation4]  }
   0xe   :  { %s31_s23 = sshll.u32 %s635_s22, 4  ;;  %s32_s23 = int_to_ptr.vmem [resolvable:$true] %s31_s23 }
   0xf   :  { %s616_s24 = scalar_lea.vmem %s32_s23, 128  ;;  %p621_p6 = scmp.lt.s32.totalorder %s32_s23, %s32_s23 }
  0x10   :  { %p617_p5 = scmp.ne.s32.totalorder %s32_s23, %s616_s24  ;;  %p622_p7 = scmp.lt.s32.totalorder %s616_s24, %s616_s24 }
  0x12   :  { %p623_p8 = por %p622_p7, %p621_p6 }
  0x14   :  { %p624_p9 = pnand %p623_p8, %p617_p5 }
  0x16   :  { %627 = shalt.err (!%p624_p9)
}
  0x17   :  { %34 = dma.hbm_to_vmem [thread:$0]  %s699_s2, 128, %s32_s23, [#allocation5]  }
  0x18   :  { %628 = dma.done.wait [#allocation3], 3072  }
  0x19   :  { %629 = vsyncadd [#allocation3], 4294964224 }
  0x1a   :  { %630 = dma.done.wait [#allocation5], 128  }
  0x1b   :  { %631 = vsyncadd [#allocation5], 4294967168  ;;  %v556_v0 = vld [vmem:[#allocation2 + $0x78] sm:$0xff]   ;;  %v559_v3 = vld [vmem:[#allocation2 + $0x70] sm:$0xff]  }
  0x1c   :  { %v557_v1 = vld [vmem:[#allocation2 + $0x38] sm:$0xff]   ;;  %494 = vmatprep.subr.bf16.mxu0 %v556_v0  ;;  %v560_v4 = vld [vmem:[#allocation2 + $0x30] sm:$0xff]   ;;  %v562_v6 = vld [vmem:[#allocation2 + $0x68] sm:$0xff]  }
  0x1d   :  { %v558_v2 = vld [vmem:[#allocation2 + $0xb8] sm:$0xff]   ;;  %495 = vmatpush3.bf16.msra.mxu0 %v557_v1  ;;  %v561_v5 = vld [vmem:[#allocation2 + $0xb0] sm:$0xff]   ;;  %v563_v7 = vld [vmem:[#allocation2 + $0x28] sm:$0xff]  }
  0x1e   :  { %532 = vmatprep.subr.bf16.mxu1 %v558_v2  ;;  %496 = vmatprep.subr.bf16.mxu0 %v559_v3  ;;  %v564_v8 = vld [vmem:[#allocation2 + $0xa8] sm:$0xff]   ;;  %v565_v9 = vld [vmem:[#allocation2 + $0x60] sm:$0xff]   ;;  %v568_v12 = vld [vmem:[#allocation2 + $0x58] sm:$0xff]  }
  0x1f   :  { %533 = vmatpush3.bf16.msra.mxu1 %v558_v2  ;;  %v566_v10 = vld [vmem:[#allocation2 + $0x20] sm:$0xff]   ;;  %v570_v13 = vld [vmem:[#allocation2 + $0x98] sm:$0xff]   ;;  %v571_v15 = vld [vmem:[#allocation2 + $0x50] sm:$0xff]  }
  0x20   :  { %534 = vmatprep.subr.bf16.mxu1 %v561_v5  ;;  %v567_v11 = vld [vmem:[#allocation2 + $0xa0] sm:$0xff]   ;;  %v569_v14 = vld [vmem:[#allocation2 + $0x18] sm:$0xff]   ;;  %v573_v16 = vld [vmem:[#allocation2 + $0x90] sm:$0xff]  }
  0x21   :  { %497 = vmatpush3.bf16.msra.mxu0 %v560_v4  ;;  %v572_v17 = vld [vmem:[#allocation2 + $0x10] sm:$0xff]   ;;  %v574_v18 = vld [vmem:[#allocation2 + $0x48] sm:$0xff]   ;;  %v577_v21 = vld [vmem:[#allocation2 + $0x40] sm:$0xff]  }
  0x22   :  { %498 = vmatprep.subr.bf16.mxu0 %v562_v6  ;;  %v575_v19 = vld [vmem:[#allocation2 + $0x8] sm:$0xff]   ;;  %v579_v22 = vld [vmem:[#allocation2 + $0x80] sm:$0xff]  }
  0x23   :  { %535 = vmatpush3.bf16.msra.mxu1 %v561_v5  ;;  %v576_v20 = vld [vmem:[#allocation2 + $0x88] sm:$0xff]   ;;  %v582_v23 = vld [vmem:[%s697_s0 + $0x4] ss:$12 sps:$4 sm:$0xff]   ;;  %v464_v36 = vld [vmem:[#allocation4] ss:$0 sm:$0xff] }
  0x24   :  { %536 = vmatprep.subr.bf16.mxu1 %v564_v8  ;;  %v583_v24 = vld [vmem:[%s697_s0 + $0x8] ss:$12 sps:$4 sm:$0xff]   ;;  %v578_v25 = vld [vmem:[#allocation2] sm:$0xff]   ;;  %308 = vmatprep.mubr.bf16.mxu0 %v582_v23 }
  0x25   :  { %499 = vmatpush3.bf16.msra.mxu0 %v563_v7  ;;  %548 = vmatprep.mubr.bf16.mxu1 %v583_v24  ;;  %v580_v26 = vld [vmem:[%s697_s0] ss:$12 sps:$4 sm:$0xff]   ;;  %v585_v27 = vld [vmem:[%s697_s0 + $0x1c] ss:$12 sps:$4 sm:$0xff]   ;;  %v587_v29 = vld [vmem:[%s697_s0 + $0x18] ss:$12 sps:$4 sm:$0xff]  }
  0x26   :  { %500 = vmatprep.subr.bf16.mxu0 %v565_v9  ;;  %v584_v28 = vld [vmem:[%s697_s0 + $0x20] ss:$12 sps:$4 sm:$0xff]  }
  0x27   :  { %537 = vmatpush3.bf16.msra.mxu1 %v564_v8  ;;  %v465_v38 = vld [vmem:[#allocation4 + $0x1] ss:$0 sm:$0xff]  ;;  %v492_v57 = vld [vmem:[%s700_s3 + $0x8] sm:$0xff]  }
  0x28   :  { %538 = vmatprep.subr.bf16.mxu1 %v567_v11  ;;  %v475_v39 = vld [vmem:[%s700_s3] sm:$0xff]   ;;  %v480_v62 = vunpack.c.l.bf16 %v492_v57  ;;  %v481_v5 = vunpack.c.h.bf16 %v492_v57 }
  0x29   :  { %501 = vmatpush3.bf16.msra.mxu0 %v566_v10  ;;  %v476_v47 = vunpack.c.l.bf16 %v475_v39  ;;  %v477_v51 = vunpack.c.h.bf16 %v475_v39 }
  0x2a   :  { %502 = vmatprep.subr.bf16.mxu0 %v568_v12 }
  0x2b   :  { %539 = vmatpush3.bf16.msra.mxu1 %v567_v11 }
  0x2c   :  { %540 = vmatprep.subr.bf16.mxu1 %v570_v13 }
  0x2d   :  { %503 = vmatpush3.bf16.msra.mxu0 %v569_v14 }
  0x2e   :  { %504 = vmatprep.subr.bf16.mxu0 %v571_v15 }
  0x2f   :  { %541 = vmatpush3.bf16.msra.mxu1 %v570_v13 }
  0x30   :  { %542 = vmatprep.subr.bf16.mxu1 %v573_v16 }
  0x31   :  { %505 = vmatpush3.bf16.msra.mxu0 %v572_v17 }
  0x32   :  { %506 = vmatprep.subr.bf16.mxu0 %v574_v18 }
  0x33   :  { %543 = vmatpush3.bf16.msra.mxu1 %v573_v16 }
  0x34   :  { %544 = vmatprep.subr.bf16.mxu1 %v576_v20 }
  0x35   :  { %507 = vmatpush3.bf16.msra.mxu0 %v575_v19 }
  0x36   :  { %508 = vmatprep.subr.bf16.mxu0 %v577_v21 }
  0x37   :  { %545 = vmatpush3.bf16.msra.mxu1 %v576_v20 }
  0x38   :  { %546 = vmatprep.subr.bf16.mxu1 %v579_v22 }
  0x39   :  { %509 = vmatpush3.bf16.msra.mxu0 %v578_v25 }
  0x3b   :  { %547 = vmatpush3.bf16.msra.mxu1 %v579_v22 }
  0x3c   :  { %309 = vmatmul.mubr.bf16.vlgmr.msra.gmra.mxu0 %v580_v26 }
  0x3d   :  { %316 = vmatprep.mubr.bf16.mxu0 %v585_v27 }
  0x3e   :  { %549 = vmatmul.mubr.bf16.vlgmr.msra.gmra.mxu1 %v584_v28 }
  0x44   :  { %317 = vmatmul.mubr.bf16.gmra.mxu0 %v587_v29 }
  0xfc   :  { %v510_v30 = vpop.f32.mrf.mxu0 }
  0xfe   :  { %v511_v31 = vpop.f32.mrf.mxu0  ;;  %v550_v32 = vpop.f32.mrf.mxu1 }
  0xff   :  { %v512_v33 = vadd.f32 %v511_v31, %v510_v30 }
 0x100   :  { %v513_v34 = vpop.f32.mrf.mxu0  ;;  %v359_v35 = vpop.f32.mrf.mxu1 }
 0x101   :  { %v360_v37 = vadd.f32 %v512_v33, %v359_v35 }
 0x102   :  { %v514_v40 = vpop.f32.mrf.mxu0  ;;  %v551_v41 = vpop.f32.mrf.mxu1 }
 0x103   :  { %v379_v42 = vmul.f32 %v464_v36, %v360_v37  ;;  %v515_v43 = vadd.f32 %v514_v40, %v513_v34 }
 0x104   :  { %v516_v44 = vpop.f32.mrf.mxu0  ;;  %v362_v45 = vpop.f32.mrf.mxu1 }
 0x105   :  { %v388_v46 = vadd.f32 %v465_v38, %v379_v42  ;;  %v363_v48 = vadd.f32 %v515_v43, %v362_v45 }
 0x106   :  { %v517_v49 = vpop.f32.mrf.mxu0 }
 0x107   :  { %v380_v50 = vmul.f32 %v464_v36, %v363_v48  ;;  %v518_v52 = vadd.f32 %v517_v49, %v516_v44  ;;  %v400_v54 = vadd.f32 %v476_v47, %v388_v46 }
 0x108   :  { %v519_v53 = vpop.f32.mrf.mxu0 }
 0x109   :  { %v389_v55 = vadd.f32 %v465_v38, %v380_v50  ;;  %v368_v56 = vadd.f32 %v550_v32, %v518_v52  ;;  %v404_v63 = vmax.f32 %v400_v54, 0.0 }
 0x10a   :  { %v520_v58 = vpop.f32.mrf.mxu0 }
 0x10b   :  { %v401_v59 = vadd.f32 %v477_v51, %v389_v55  ;;  %v381_v60 = vmul.f32 %v464_v36, %v368_v56  ;;  %v521_v61 = vadd.f32 %v520_v58, %v519_v53 }
 0x10d   :  { %v405_v0 = vmax.f32 %v401_v59, 0.0  ;;  %v390_v1 = vadd.f32 %v465_v38, %v381_v60  ;;  %v371_v2 = vadd.f32 %v551_v41, %v521_v61 }
 0x10f   :  { %v485_v3 = vpack.c.bf16 %v405_v0, %v404_v63  ;;  %v382_v4 = vmul.f32 %v464_v36, %v371_v2  ;;  %v402_v6 = vadd.f32 %v480_v62, %v390_v1 }
 0x111   :  { %486 = vst [vmem:[%s701_s4] sm:$0xff] %v485_v3   ;;  %v391_v7 = vadd.f32 %v465_v38, %v382_v4  ;;  %v406_v9 = vmax.f32 %v402_v6, 0.0 }
 0x113   :  { %v403_v8 = vadd.f32 %v481_v5, %v391_v7 }
 0x115   :  { %v407_v10 = vmax.f32 %v403_v8, 0.0 }
 0x117   :  { %v490_v11 = vpack.c.bf16 %v407_v10, %v406_v9 }
 0x119   :  { %493 = vst [vmem:[%s701_s4 + $0x8] sm:$0xff] %v490_v11  }
 0x11a   :  { %432 = vsyncpa [#allocation3], 1 }
 0x11b   :  { %433 = vsyncpa [#allocation5], 1 }

// kernel: resnet1d_forward.20
= control target key start
LH: loop header
LB: loop body
LE: loop exit
PB: predicated region body
PF: predicated region fallthrough
CT: control target
= control target key end

     0   :  { %v261_v1 = vmov 0   ;;  %v164_v18 = vlaneseq  ;;  %s345_s1 = inlined_call_operand.vmem [shape: bf16[128,256], index: 1, kind: input, shape index: {}]   ;;  %s346_s0 = inlined_call_operand.vmem [shape: bf16[16,128], index: 0, kind: input, shape index: {}]   ;;  %s347_s2 = inlined_call_operand.vmem [shape: f32[8,256], index: 2, kind: input, shape index: {}]   ;;  %s348_s3 = inlined_call_operand.vmem [shape: bf16[16,256], index: 3, kind: output, shape index: {}]  }
   0x1   :  { %v236_v0 = vld [vmem:[%s345_s1 + $0x74] ss:$8 sps:$4 sm:$0xff]   ;;  %151 = vmatprep.mubr.bf16.mxu0 %v261_v1  ;;  %v238_v2 = vld [vmem:[%s345_s1 + $0x70] ss:$8 sps:$4 sm:$0xff]   ;;  %v239_v3 = vld [vmem:[%s345_s1 + $0x64] ss:$8 sps:$4 sm:$0xff]  }
   0x2   :  { %119 = vmatprep.subr.bf16.mxu0 %v236_v0  ;;  %v241_v4 = vld [vmem:[%s345_s1 + $0x60] ss:$8 sps:$4 sm:$0xff]   ;;  %v242_v5 = vld [vmem:[%s345_s1 + $0x54] ss:$8 sps:$4 sm:$0xff]   ;;  %v244_v6 = vld [vmem:[%s345_s1 + $0x50] ss:$8 sps:$4 sm:$0xff]  }
   0x3   :  { %120 = vmatpush1.bf16.msra.mxu0 %v238_v2  ;;  %v245_v7 = vld [vmem:[%s345_s1 + $0x44] ss:$8 sps:$4 sm:$0xff]   ;;  %v247_v8 = vld [vmem:[%s345_s1 + $0x40] ss:$8 sps:$4 sm:$0xff]   ;;  %v248_v9 = vld [vmem:[%s345_s1 + $0x34] ss:$8 sps:$4 sm:$0xff]  }
   0x4   :  { %121 = vmatprep.subr.bf16.mxu0 %v239_v3  ;;  %v250_v10 = vld [vmem:[%s345_s1 + $0x30] ss:$8 sps:$4 sm:$0xff]   ;;  %v251_v11 = vld [vmem:[%s345_s1 + $0x24] ss:$8 sps:$4 sm:$0xff]   ;;  %v253_v12 = vld [vmem:[%s345_s1 + $0x20] ss:$8 sps:$4 sm:$0xff]  }
   0x5   :  { %v254_v13 = vld [vmem:[%s345_s1 + $0x14] ss:$8 sps:$4 sm:$0xff]   ;;  %v256_v14 = vld [vmem:[%s345_s1 + $0x10] ss:$8 sps:$4 sm:$0xff]   ;;  %v257_v15 = vld [vmem:[%s345_s1 + $0x4] ss:$8 sps:$4 sm:$0xff]  }
   0x6   :  { %v259_v16 = vld [vmem:[%s345_s1] ss:$8 sps:$4 sm:$0xff]   ;;  %v165_v19 = vshrl.u32 %v164_v18, 7 }
   0x7   :  { %122 = vmatpush1.bf16.msra.mxu0 %v241_v4  ;;  %v260_v17 = vld [vmem:[%s346_s0] sm:$0xff]  }
   0x8   :  { %123 = vmatprep.subr.bf16.mxu0 %v242_v5  ;;  %v166_v20 = vsub.s32 0, %v165_v19  ;;  %v162_v21 = vld [vmem:[%s347_s2] ss:$8 sm:$0x3]  ;;  %v170_v22 = vsub.s32 1, %v165_v19 }
   0x9   :  { %v230_v24 = vld [vmem:[%s347_s2 + $0x1] ss:$8 sm:$0x3] }
   0xa   :  { %v167_v23 = vrot.slane %v162_v21, %v166_v20  ;;  %v171_v25 = vrot.slane %v162_v21, %v170_v22  ;;  %v184_v28 = vrot.slane %v230_v24, %v166_v20  ;;  %v188_v29 = vrot.slane %v230_v24, %v170_v22 }
   0xb   :  { %124 = vmatpush1.bf16.msra.mxu0 %v244_v6 }
   0xc   :  { %125 = vmatprep.subr.bf16.mxu0 %v245_v7 }
   0xf   :  { %126 = vmatpush1.bf16.msra.mxu0 %v247_v8 }
  0x10   :  { %127 = vmatprep.subr.bf16.mxu0 %v248_v9 }
  0x13   :  { %128 = vmatpush1.bf16.msra.mxu0 %v250_v10 }
  0x14   :  { %129 = vmatprep.subr.bf16.mxu0 %v251_v11 }
  0x17   :  { %130 = vmatpush1.bf16.msra.mxu0 %v253_v12 }
  0x18   :  { %131 = vmatprep.subr.bf16.mxu0 %v254_v13 }
  0x1b   :  { %132 = vmatpush1.bf16.msra.mxu0 %v256_v14 }
  0x1c   :  { %133 = vmatprep.subr.bf16.mxu0 %v257_v15 }
  0x1f   :  { %134 = vmatpush1.bf16.msra.mxu0 %v259_v16 }
  0x22   :  { %152 = vmatmul.mubr.bf16.vlgmr.msra.gmra.mxu0 %v260_v17 }
  0xe2   :  { %v153_v26 = vpop.f32.mrf.mxu0 }
  0xe3   :  { %v174_v27 = vmul.f32 %v167_v23, %v153_v26 }
  0xe4   :  { %v155_v30 = vpop.f32.mrf.mxu0 }
  0xe5   :  { %v175_v31 = vmul.f32 %v171_v25, %v155_v30  ;;  %v191_v33 = vadd.f32 %v184_v28, %v174_v27 }
  0xe6   :  { %v157_v32 = vpop.f32.mrf.mxu0 }
  0xe7   :  { %v192_v34 = vadd.f32 %v188_v29, %v175_v31  ;;  %v176_v35 = vmul.f32 %v167_v23, %v157_v32 }
  0xe8   :  { %v159_v36 = vpop.f32.mrf.mxu0 }
  0xe9   :  { %v233_v37 = vpack.c.bf16 %v192_v34, %v191_v33  ;;  %v177_v38 = vmul.f32 %v171_v25, %v159_v36  ;;  %v193_v39 = vadd.f32 %v184_v28, %v176_v35 }
  0xeb   :  { %207 = vst [vmem:[%s348_s3] sm:$0xff] %v233_v37  ;;  %v194_v40 = vadd.f32 %v188_v29, %v177_v38 }
  0xed   :  { %v234_v41 = vpack.c.bf16 %v194_v40, %v193_v39 }
  0xef   :  { %208 = vst [vmem:[%s348_s3 + $0x8] sm:$0xff] %v234_v41 }

// kernel: resnet1d_forward.19
= control target key start
LH: loop header
LB: loop body
LE: loop exit
PB: predicated region body
PF: predicated region fallthrough
CT: control target
= control target key end

     0   :  { %8 = vsyncpa [#allocation3], 0  ;;  %s632_s12 = smov [#allocation2]   ;;  %s816_s0 = inlined_call_operand.vmem [shape: bf16[16,384], index: 0, kind: input, shape index: {}]   ;;  %s817_s1 = inlined_call_operand.vmem [shape: bf16[384,256], index: 1, kind: input, shape index: {}]   ;;  %s818_s2 = inlined_call_operand.hbm [shape: f32[8,256], index: 2, kind: input, shape index: {}]   ;;  %s819_s3 = inlined_call_operand.vmem [shape: bf16[16,256], index: 3, kind: output, shape index: {}]  }
   0x1   :  { %s19_s13 = sshll.u32 %s632_s12, 4  ;;  %s20_s13 = int_to_ptr.vmem [resolvable:$true] %s19_s13 }
   0x2   :  { %s618_s14 = scalar_lea.vmem %s20_s13, 256  ;;  %p623_p1 = scmp.lt.s32.totalorder %s20_s13, %s20_s13 }
   0x3   :  { %p619_p0 = scmp.ne.s32.totalorder %s20_s13, %s618_s14  ;;  %p624_p2 = scmp.lt.s32.totalorder %s618_s14, %s618_s14 }
   0x5   :  { %p625_p3 = por %p624_p2, %p623_p1 }
   0x7   :  { %p626_p4 = pnand %p625_p3, %p619_p0 }
   0x9   :  { %629 = shalt.err (!%p626_p4)
}
   0xa   :  { %22 = dma.hbm_to_vmem [thread:$0]  %s818_s2, 256, %s20_s13, [#allocation3]  }
   0xb   :  { %630 = dma.done.wait [#allocation3], 256  }
   0xc   :  { %631 = vsyncadd [#allocation3], 4294967040  ;;  %v633_v0 = vmov 0   ;;  %v534_v1 = vld [vmem:[%s817_s1 + $0x74] ss:$8 sps:$4 sm:$0xff]   ;;  %v423_v52 = vlaneseq }
   0xd   :  { %410 = vmatprep.mubr.bf16.mxu1 %v633_v0  ;;  %v536_v2 = vld [vmem:[%s817_s1 + $0x70] ss:$8 sps:$4 sm:$0xff]   ;;  %335 = vmatprep.subr.bf16.mxu0 %v534_v1  ;;  %v537_v3 = vld [vmem:[%s817_s1 + $0x64] ss:$8 sps:$4 sm:$0xff]   ;;  %v539_v4 = vld [vmem:[%s817_s1 + $0x60] ss:$8 sps:$4 sm:$0xff]  }
   0xe   :  { %336 = vmatpush1.bf16.msra.mxu0 %v536_v2  ;;  %v540_v5 = vld [vmem:[%s817_s1 + $0x54] ss:$8 sps:$4 sm:$0xff]   ;;  %v542_v6 = vld [vmem:[%s817_s1 + $0x50] ss:$8 sps:$4 sm:$0xff]   ;;  %v543_v7 = vld [vmem:[%s817_s1 + $0x44] ss:$8 sps:$4 sm:$0xff]  }
   0xf   :  { %337 = vmatprep.subr.bf16.mxu0 %v537_v3  ;;  %v555_v8 = vld [vmem:[%s817_s1 + $0x174] ss:$8 sps:$4 sm:$0xff]   ;;  %v557_v9 = vld [vmem:[%s817_s1 + $0x170] ss:$8 sps:$4 sm:$0xff]   ;;  %v545_v10 = vld [vmem:[%s817_s1 + $0x40] ss:$8 sps:$4 sm:$0xff]  }
  0x10   :  { %v546_v11 = vld [vmem:[%s817_s1 + $0x34] ss:$8 sps:$4 sm:$0xff]   ;;  %378 = vmatprep.subr.bf16.mxu1 %v555_v8  ;;  %v561_v12 = vld [vmem:[%s817_s1 + $0x164] ss:$8 sps:$4 sm:$0xff]   ;;  %v563_v13 = vld [vmem:[%s817_s1 + $0x160] ss:$8 sps:$4 sm:$0xff]  }
  0x11   :  { %379 = vmatpush1.bf16.msra.mxu1 %v557_v9  ;;  %v548_v14 = vld [vmem:[%s817_s1 + $0x30] ss:$8 sps:$4 sm:$0xff]   ;;  %v567_v15 = vld [vmem:[%s817_s1 + $0x154] ss:$8 sps:$4 sm:$0xff]   ;;  %v549_v16 = vld [vmem:[%s817_s1 + $0x24] ss:$8 sps:$4 sm:$0xff]  }
  0x12   :  { %338 = vmatpush1.bf16.msra.mxu0 %v539_v4  ;;  %380 = vmatprep.subr.bf16.mxu1 %v561_v12  ;;  %v569_v17 = vld [vmem:[%s817_s1 + $0x150] ss:$8 sps:$4 sm:$0xff]   ;;  %v573_v18 = vld [vmem:[%s817_s1 + $0x144] ss:$8 sps:$4 sm:$0xff]   ;;  %v551_v19 = vld [vmem:[%s817_s1 + $0x20] ss:$8 sps:$4 sm:$0xff]  }
  0x13   :  { %339 = vmatprep.subr.bf16.mxu0 %v540_v5  ;;  %v552_v20 = vld [vmem:[%s817_s1 + $0x14] ss:$8 sps:$4 sm:$0xff]   ;;  %v575_v21 = vld [vmem:[%s817_s1 + $0x140] ss:$8 sps:$4 sm:$0xff]   ;;  %v554_v23 = vld [vmem:[%s817_s1 + $0x10] ss:$8 sps:$4 sm:$0xff]  }
  0x14   :  { %v579_v22 = vld [vmem:[%s817_s1 + $0x134] ss:$8 sps:$4 sm:$0xff]   ;;  %v558_v24 = vld [vmem:[%s817_s1 + $0x4] ss:$8 sps:$4 sm:$0xff]   ;;  %v581_v25 = vld [vmem:[%s817_s1 + $0x130] ss:$8 sps:$4 sm:$0xff]  }
  0x15   :  { %381 = vmatpush1.bf16.msra.mxu1 %v563_v13  ;;  %v585_v26 = vld [vmem:[%s817_s1 + $0x124] ss:$8 sps:$4 sm:$0xff]   ;;  %v560_v27 = vld [vmem:[%s817_s1] ss:$8 sps:$4 sm:$0xff]   ;;  %v564_v28 = vld [vmem:[%s817_s1 + $0xf4] ss:$8 sps:$4 sm:$0xff]  }
  0x16   :  { %340 = vmatpush1.bf16.msra.mxu0 %v542_v6  ;;  %382 = vmatprep.subr.bf16.mxu1 %v567_v15  ;;  %v587_v29 = vld [vmem:[%s817_s1 + $0x120] ss:$8 sps:$4 sm:$0xff]   ;;  %v591_v30 = vld [vmem:[%s817_s1 + $0x114] ss:$8 sps:$4 sm:$0xff]   ;;  %v566_v31 = vld [vmem:[%s817_s1 + $0xf0] ss:$8 sps:$4 sm:$0xff]  }
  0x17   :  { %341 = vmatprep.subr.bf16.mxu0 %v543_v7  ;;  %v570_v32 = vld [vmem:[%s817_s1 + $0xe4] ss:$8 sps:$4 sm:$0xff]   ;;  %v593_v33 = vld [vmem:[%s817_s1 + $0x110] ss:$8 sps:$4 sm:$0xff]   ;;  %v572_v36 = vld [vmem:[%s817_s1 + $0xe0] ss:$8 sps:$4 sm:$0xff]  }
  0x18   :  { %v597_v34 = vld [vmem:[%s817_s1 + $0x104] ss:$8 sps:$4 sm:$0xff]   ;;  %v576_v37 = vld [vmem:[%s817_s1 + $0xd4] ss:$8 sps:$4 sm:$0xff]   ;;  %v599_v38 = vld [vmem:[%s817_s1 + $0x100] ss:$8 sps:$4 sm:$0xff]  }
  0x19   :  { %383 = vmatpush1.bf16.msra.mxu1 %v569_v17  ;;  %v609_v35 = vld [vmem:[%s816_s0 + $0x4] ss:$12 sps:$4 sm:$0xff]   ;;  %v603_v41 = vld [vmem:[%s816_s0 + $0x8] ss:$12 sps:$4 sm:$0xff]   ;;  %v607_v51 = vld [vmem:[%s816_s0] ss:$12 sps:$4 sm:$0xff]  }
  0x1a   :  { %342 = vmatpush1.bf16.msra.mxu0 %v545_v10  ;;  %384 = vmatprep.subr.bf16.mxu1 %v573_v18  ;;  %v578_v39 = vld [vmem:[%s817_s1 + $0xd0] ss:$8 sps:$4 sm:$0xff]   ;;  %v582_v40 = vld [vmem:[%s817_s1 + $0xc4] ss:$8 sps:$4 sm:$0xff]   ;;  %v584_v42 = vld [vmem:[%s817_s1 + $0xc0] ss:$8 sps:$4 sm:$0xff]  }
  0x1b   :  { %343 = vmatprep.subr.bf16.mxu0 %v546_v11  ;;  %367 = vmatprep.mubr.bf16.mxu0 %v609_v35  ;;  %v588_v43 = vld [vmem:[%s817_s1 + $0xb4] ss:$8 sps:$4 sm:$0xff]   ;;  %v590_v44 = vld [vmem:[%s817_s1 + $0xb0] ss:$8 sps:$4 sm:$0xff]   ;;  %v594_v45 = vld [vmem:[%s817_s1 + $0xa4] ss:$8 sps:$4 sm:$0xff]  }
  0x1c   :  { %v596_v46 = vld [vmem:[%s817_s1 + $0xa0] ss:$8 sps:$4 sm:$0xff]   ;;  %v600_v47 = vld [vmem:[%s817_s1 + $0x94] ss:$8 sps:$4 sm:$0xff]   ;;  %v602_v48 = vld [vmem:[%s817_s1 + $0x90] ss:$8 sps:$4 sm:$0xff]  }
  0x1d   :  { %385 = vmatpush1.bf16.msra.mxu1 %v575_v21  ;;  %v604_v49 = vld [vmem:[%s817_s1 + $0x84] ss:$8 sps:$4 sm:$0xff]   ;;  %v606_v50 = vld [vmem:[%s817_s1 + $0x80] ss:$8 sps:$4 sm:$0xff]   ;;  %v424_v53 = vshrl.u32 %v423_v52, 7 }
  0x1e   :  { %344 = vmatpush1.bf16.msra.mxu0 %v548_v14  ;;  %386 = vmatprep.subr.bf16.mxu1 %v579_v22  ;;  %v421_v56 = vld [vmem:[#allocation2] ss:$8 sm:$0x3]  ;;  %v438_v59 = vld [vmem:[#allocation2 + $0x1] ss:$8 sm:$0x3] }
  0x1f   :  { %345 = vmatprep.subr.bf16.mxu0 %v549_v16  ;;  %v425_v55 = vsub.s32 0, %v424_v53  ;;  %v429_v57 = vsub.s32 1, %v424_v53 }
  0x21   :  { %387 = vmatpush1.bf16.msra.mxu1 %v581_v25  ;;  %v426_v60 = vrot.slane %v421_v56, %v425_v55  ;;  %v443_v63 = vrot.slane %v438_v59, %v425_v55  ;;  %v430_v0 = vrot.slane %v421_v56, %v429_v57  ;;  %v447_v5 = vrot.slane %v438_v59, %v429_v57 }
  0x22   :  { %346 = vmatpush1.bf16.msra.mxu0 %v551_v19  ;;  %388 = vmatprep.subr.bf16.mxu1 %v585_v26 }
  0x23   :  { %347 = vmatprep.subr.bf16.mxu0 %v552_v20 }
  0x25   :  { %389 = vmatpush1.bf16.msra.mxu1 %v587_v29 }
  0x26   :  { %348 = vmatpush1.bf16.msra.mxu0 %v554_v23  ;;  %390 = vmatprep.subr.bf16.mxu1 %v591_v30 }
  0x27   :  { %349 = vmatprep.subr.bf16.mxu0 %v558_v24 }
  0x29   :  { %391 = vmatpush1.bf16.msra.mxu1 %v593_v33 }
  0x2a   :  { %350 = vmatpush1.bf16.msra.mxu0 %v560_v27  ;;  %392 = vmatprep.subr.bf16.mxu1 %v597_v34 }
  0x2b   :  { %351 = vmatprep.subr.bf16.mxu0 %v564_v28 }
  0x2d   :  { %393 = vmatpush1.bf16.msra.mxu1 %v599_v38 }
  0x2e   :  { %352 = vmatpush2.bf16.msra.mxu0 %v566_v31 }
  0x2f   :  { %353 = vmatprep.subr.bf16.mxu0 %v570_v32 }
  0x30   :  { %411 = vmatmul.mubr.bf16.vlgmr.msra.gmra.mxu1 %v603_v41 }
  0x32   :  { %354 = vmatpush2.bf16.msra.mxu0 %v572_v36 }
  0x33   :  { %355 = vmatprep.subr.bf16.mxu0 %v576_v37 }
  0x36   :  { %356 = vmatpush2.bf16.msra.mxu0 %v578_v39 }
  0x37   :  { %357 = vmatprep.subr.bf16.mxu0 %v582_v40 }
  0x3a   :  { %358 = vmatpush2.bf16.msra.mxu0 %v584_v42 }
  0x3b   :  { %359 = vmatprep.subr.bf16.mxu0 %v588_v43 }
  0x3e   :  { %360 = vmatpush2.bf16.msra.mxu0 %v590_v44 }
  0x3f   :  { %361 = vmatprep.subr.bf16.mxu0 %v594_v45 }
  0x42   :  { %362 = vmatpush2.bf16.msra.mxu0 %v596_v46 }
  0x43   :  { %363 = vmatprep.subr.bf16.mxu0 %v600_v47 }
  0x46   :  { %364 = vmatpush2.bf16.msra.mxu0 %v602_v48 }
  0x47   :  { %365 = vmatprep.subr.bf16.mxu0 %v604_v49 }
  0x4a   :  { %366 = vmatpush2.bf16.msra.mxu0 %v606_v50 }
  0x4d   :  { %368 = vmatmul.mubr.bf16.vlgmr.msra.gmra.mxu0 %v607_v51 }
  0xf0   :  { %v412_v54 = vpop.f32.mrf.mxu1 }
  0xf2   :  { %v414_v58 = vpop.f32.mrf.mxu1 }
  0xf4   :  { %v416_v1 = vpop.f32.mrf.mxu1 }
  0xf6   :  { %v418_v10 = vpop.f32.mrf.mxu1 }
 0x10d   :  { %v369_v61 = vpop.f32.mrf.mxu0 }
 0x10e   :  { %v413_v62 = vadd.f32 %v412_v54, %v369_v61 }
 0x10f   :  { %v371_v2 = vpop.f32.mrf.mxu0 }
 0x110   :  { %v433_v3 = vmul.f32 %v426_v60, %v413_v62  ;;  %v415_v4 = vadd.f32 %v414_v58, %v371_v2 }
 0x111   :  { %v373_v6 = vpop.f32.mrf.mxu0 }
 0x112   :  { %v450_v7 = vadd.f32 %v443_v63, %v433_v3  ;;  %v434_v8 = vmul.f32 %v430_v0, %v415_v4  ;;  %v417_v9 = vadd.f32 %v416_v1, %v373_v6 }
 0x113   :  { %v375_v11 = vpop.f32.mrf.mxu0 }
 0x114   :  { %v451_v12 = vadd.f32 %v447_v5, %v434_v8  ;;  %v435_v13 = vmul.f32 %v426_v60, %v417_v9  ;;  %v419_v14 = vadd.f32 %v418_v10, %v375_v11  ;;  %v454_v15 = vmax.f32 %v450_v7, 0.0 }
 0x116   :  { %v455_v16 = vmax.f32 %v451_v12, 0.0  ;;  %v452_v17 = vadd.f32 %v443_v63, %v435_v13  ;;  %v436_v18 = vmul.f32 %v430_v0, %v419_v14 }
 0x118   :  { %v530_v19 = vpack.c.bf16 %v455_v16, %v454_v15  ;;  %v453_v20 = vadd.f32 %v447_v5, %v436_v18  ;;  %v456_v21 = vmax.f32 %v452_v17, 0.0 }
 0x11a   :  { %470 = vst [vmem:[%s819_s3] sm:$0xff] %v530_v19  ;;  %v457_v22 = vmax.f32 %v453_v20, 0.0 }
 0x11c   :  { %v531_v23 = vpack.c.bf16 %v457_v22, %v456_v21 }
 0x11e   :  { %471 = vst [vmem:[%s819_s3 + $0x8] sm:$0xff] %v531_v23 }
 0x11f   :  { %476 = vsyncpa [#allocation3], 1 }

// kernel: resnet1d_forward.23
= control target key start
LH: loop header
LB: loop body
LE: loop exit
PB: predicated region body
PF: predicated region fallthrough
CT: control target
= control target key end

     0   :  { %s959_s1 = inlined_call_operand.vmem [shape: bf16[256,512], index: 1, kind: input, shape index: {}]   ;;  %s960_s0 = inlined_call_operand.vmem [shape: bf16[8,256], index: 0, kind: input, shape index: {}]   ;;  %s961_s2 = inlined_call_operand.vmem [shape: f32[8,512], index: 2, kind: input, shape index: {}]   ;;  %s962_s3 = inlined_call_operand.vmem [shape: bf16[8,512], index: 3, kind: output, shape index: {}]  }
   0x1   :  { %v634_v0 = vld [vmem:[%s959_s1 + $0xe4] ss:$16 sps:$4 sm:$0xff]   ;;  %v636_v1 = vld [vmem:[%s959_s1 + $0xec] ss:$16 sps:$4 sm:$0xff]   ;;  %v638_v2 = vld [vmem:[%s959_s1 + $0xe0] ss:$16 sps:$4 sm:$0xff]  }
   0x2   :  { %406 = vmatprep.subr.bf16.mxu0 %v634_v0  ;;  %v639_v3 = vld [vmem:[%s959_s1 + $0xe8] ss:$16 sps:$4 sm:$0xff]   ;;  %447 = vmatprep.subr.bf16.mxu1 %v636_v1  ;;  %v640_v4 = vld [vmem:[%s959_s1 + $0xc4] ss:$16 sps:$4 sm:$0xff]   ;;  %v642_v5 = vld [vmem:[%s959_s1 + $0xcc] ss:$16 sps:$4 sm:$0xff]  }
   0x3   :  { %407 = vmatpush1.bf16.msra.mxu0 %v638_v2  ;;  %448 = vmatpush1.bf16.msra.mxu1 %v639_v3  ;;  %v644_v6 = vld [vmem:[%s959_s1 + $0xc0] ss:$16 sps:$4 sm:$0xff]   ;;  %v645_v7 = vld [vmem:[%s959_s1 + $0xc8] ss:$16 sps:$4 sm:$0xff]   ;;  %v646_v8 = vld [vmem:[%s959_s1 + $0xa4] ss:$16 sps:$4 sm:$0xff]   ;;  %v490_v3 = vlaneseq }
   0x4   :  { %408 = vmatprep.subr.bf16.mxu0 %v640_v4  ;;  %449 = vmatprep.subr.bf16.mxu1 %v642_v5  ;;  %v648_v9 = vld [vmem:[%s959_s1 + $0xac] ss:$16 sps:$4 sm:$0xff]   ;;  %v650_v10 = vld [vmem:[%s959_s1 + $0xa0] ss:$16 sps:$4 sm:$0xff]   ;;  %v651_v11 = vld [vmem:[%s959_s1 + $0xa8] ss:$16 sps:$4 sm:$0xff]  }
   0x5   :  { %v652_v12 = vld [vmem:[%s959_s1 + $0x84] ss:$16 sps:$4 sm:$0xff]   ;;  %v654_v13 = vld [vmem:[%s959_s1 + $0x8c] ss:$16 sps:$4 sm:$0xff]   ;;  %v656_v14 = vld [vmem:[%s959_s1 + $0x80] ss:$16 sps:$4 sm:$0xff]  }
   0x6   :  { %v657_v15 = vld [vmem:[%s959_s1 + $0x88] ss:$16 sps:$4 sm:$0xff]   ;;  %v658_v16 = vld [vmem:[%s959_s1 + $0x64] ss:$16 sps:$4 sm:$0xff]   ;;  %v660_v17 = vld [vmem:[%s959_s1 + $0x6c] ss:$16 sps:$4 sm:$0xff]  }
   0x7   :  { %409 = vmatpush1.bf16.msra.mxu0 %v644_v6  ;;  %450 = vmatpush1.bf16.msra.mxu1 %v645_v7  ;;  %v662_v18 = vld [vmem:[%s959_s1 + $0x60] ss:$16 sps:$4 sm:$0xff]   ;;  %v663_v19 = vld [vmem:[%s959_s1 + $0x68] ss:$16 sps:$4 sm:$0xff]   ;;  %v664_v20 = vld [vmem:[%s959_s1 + $0x44] ss:$16 sps:$4 sm:$0xff]  }
   0x8   :  { %410 = vmatprep.subr.bf16.mxu0 %v646_v8  ;;  %451 = vmatprep.subr.bf16.mxu1 %v648_v9  ;;  %v666_v21 = vld [vmem:[%s959_s1 + $0x4c] ss:$16 sps:$4 sm:$0xff]   ;;  %v668_v22 = vld [vmem:[%s959_s1 + $0x40] ss:$16 sps:$4 sm:$0xff]   ;;  %v669_v23 = vld [vmem:[%s959_s1 + $0x48] ss:$16 sps:$4 sm:$0xff]  }
   0x9   :  { %v670_v24 = vld [vmem:[%s959_s1 + $0x24] ss:$16 sps:$4 sm:$0xff]   ;;  %v672_v25 = vld [vmem:[%s959_s1 + $0x2c] ss:$16 sps:$4 sm:$0xff]   ;;  %v674_v26 = vld [vmem:[%s959_s1 + $0x20] ss:$16 sps:$4 sm:$0xff]  }
   0xa   :  { %v675_v27 = vld [vmem:[%s959_s1 + $0x28] ss:$16 sps:$4 sm:$0xff]   ;;  %v676_v28 = vld [vmem:[%s959_s1 + $0x4] ss:$16 sps:$4 sm:$0xff]   ;;  %v678_v29 = vld [vmem:[%s959_s1 + $0xc] ss:$16 sps:$4 sm:$0xff]  }
   0xb   :  { %411 = vmatpush1.bf16.msra.mxu0 %v650_v10  ;;  %452 = vmatpush1.bf16.msra.mxu1 %v651_v11  ;;  %v680_v30 = vld [vmem:[%s959_s1] ss:$16 sps:$4 sm:$0xff]   ;;  %v681_v31 = vld [vmem:[%s959_s1 + $0x8] ss:$16 sps:$4 sm:$0xff]   ;;  %v682_v32 = vld [vmem:[%s959_s1 + $0x1e4] ss:$16 sps:$4 sm:$0xff]  }
   0xc   :  { %412 = vmatprep.subr.bf16.mxu0 %v652_v12  ;;  %453 = vmatprep.subr.bf16.mxu1 %v654_v13  ;;  %v684_v33 = vld [vmem:[%s959_s1 + $0x1ec] ss:$16 sps:$4 sm:$0xff]   ;;  %v686_v34 = vld [vmem:[%s959_s1 + $0x1e0] ss:$16 sps:$4 sm:$0xff]   ;;  %v687_v35 = vld [vmem:[%s959_s1 + $0x1e8] ss:$16 sps:$4 sm:$0xff]  }
   0xd   :  { %v688_v36 = vld [vmem:[%s959_s1 + $0x1c4] ss:$16 sps:$4 sm:$0xff]   ;;  %v690_v37 = vld [vmem:[%s959_s1 + $0x1cc] ss:$16 sps:$4 sm:$0xff]   ;;  %v692_v38 = vld [vmem:[%s959_s1 + $0x1c0] ss:$16 sps:$4 sm:$0xff]  }
   0xe   :  { %v693_v39 = vld [vmem:[%s959_s1 + $0x1c8] ss:$16 sps:$4 sm:$0xff]   ;;  %v694_v40 = vld [vmem:[%s959_s1 + $0x1a4] ss:$16 sps:$4 sm:$0xff]   ;;  %v696_v41 = vld [vmem:[%s959_s1 + $0x1ac] ss:$16 sps:$4 sm:$0xff]  }
   0xf   :  { %413 = vmatpush1.bf16.msra.mxu0 %v656_v14  ;;  %454 = vmatpush1.bf16.msra.mxu1 %v657_v15  ;;  %v698_v42 = vld [vmem:[%s959_s1 + $0x1a0] ss:$16 sps:$4 sm:$0xff]   ;;  %v699_v43 = vld [vmem:[%s959_s1 + $0x1a8] ss:$16 sps:$4 sm:$0xff]   ;;  %v700_v44 = vld [vmem:[%s959_s1 + $0x184] ss:$16 sps:$4 sm:$0xff]  }
  0x10   :  { %414 = vmatprep.subr.bf16.mxu0 %v658_v16  ;;  %455 = vmatprep.subr.bf16.mxu1 %v660_v17  ;;  %v702_v45 = vld [vmem:[%s959_s1 + $0x18c] ss:$16 sps:$4 sm:$0xff]   ;;  %v14_v46 = vld [vmem:[%s960_s0] sm:$0xff]  ;;  %v705_v49 = vld [vmem:[%s959_s1 + $0x188] ss:$16 sps:$4 sm:$0xff]   ;;  %v491_v4 = vshrl.u32 %v490_v3, 7 }
  0x11   :  { %v564_v47 = vcombine.high %v14_v46, %v14_v46  ;;  %v704_v48 = vld [vmem:[%s959_s1 + $0x180] ss:$16 sps:$4 sm:$0xff]   ;;  %v706_v50 = vld [vmem:[%s959_s1 + $0x164] ss:$16 sps:$4 sm:$0xff]   ;;  %v708_v51 = vld [vmem:[%s959_s1 + $0x16c] ss:$16 sps:$4 sm:$0xff]   ;;  %v563_v2 = vcombine.low %v14_v46, %v14_v46 }
  0x12   :  { %v710_v52 = vld [vmem:[%s959_s1 + $0x160] ss:$16 sps:$4 sm:$0xff]   ;;  %v711_v53 = vld [vmem:[%s959_s1 + $0x168] ss:$16 sps:$4 sm:$0xff]   ;;  %v712_v54 = vld [vmem:[%s959_s1 + $0x144] ss:$16 sps:$4 sm:$0xff]  }
  0x13   :  { %415 = vmatpush1.bf16.msra.mxu0 %v662_v18  ;;  %456 = vmatpush1.bf16.msra.mxu1 %v663_v19  ;;  %v714_v55 = vld [vmem:[%s959_s1 + $0x14c] ss:$16 sps:$4 sm:$0xff]   ;;  %v716_v56 = vld [vmem:[%s959_s1 + $0x140] ss:$16 sps:$4 sm:$0xff]   ;;  %v717_v57 = vld [vmem:[%s959_s1 + $0x148] ss:$16 sps:$4 sm:$0xff]  }
  0x14   :  { %416 = vmatprep.subr.bf16.mxu0 %v664_v20  ;;  %457 = vmatprep.subr.bf16.mxu1 %v666_v21  ;;  %v718_v58 = vld [vmem:[%s959_s1 + $0x124] ss:$16 sps:$4 sm:$0xff]   ;;  %v720_v59 = vld [vmem:[%s959_s1 + $0x12c] ss:$16 sps:$4 sm:$0xff]   ;;  %v722_v60 = vld [vmem:[%s959_s1 + $0x120] ss:$16 sps:$4 sm:$0xff]  }
  0x15   :  { %438 = vmatprep.mubr.bf16.mxu0 %v564_v47  ;;  %479 = vmatprep.mubr.bf16.mxu1 %v564_v47  ;;  %v723_v61 = vld [vmem:[%s959_s1 + $0x128] ss:$16 sps:$4 sm:$0xff]   ;;  %v724_v62 = vld [vmem:[%s959_s1 + $0x104] ss:$16 sps:$4 sm:$0xff]   ;;  %v726_v63 = vld [vmem:[%s959_s1 + $0x10c] ss:$16 sps:$4 sm:$0xff]  }
  0x16   :  { %v728_v0 = vld [vmem:[%s959_s1 + $0x100] ss:$16 sps:$4 sm:$0xff]   ;;  %v729_v1 = vld [vmem:[%s959_s1 + $0x108] ss:$16 sps:$4 sm:$0xff]   ;;  %v492_v5 = vsub.s32 0, %v491_v4  ;;  %v500_v6 = vsub.s32 2, %v491_v4 }
  0x17   :  { %417 = vmatpush1.bf16.msra.mxu0 %v668_v22  ;;  %458 = vmatpush1.bf16.msra.mxu1 %v669_v23  ;;  %v488_v7 = vld [vmem:[%s961_s2] ss:$8 sm:$0xf]  ;;  %v496_v8 = vsub.s32 1, %v491_v4  ;;  %v504_v9 = vsub.s32 3, %v491_v4 }
  0x18   :  { %418 = vmatprep.subr.bf16.mxu0 %v670_v24  ;;  %459 = vmatprep.subr.bf16.mxu1 %v672_v25  ;;  %v493_v10 = vrot.slane %v488_v7, %v492_v5  ;;  %v629_v11 = vld [vmem:[%s961_s2 + $0x1] ss:$8 sm:$0xf]  ;;  %v501_v12 = vrot.slane %v488_v7, %v500_v6 }
  0x19   :  { %v497_v13 = vrot.slane %v488_v7, %v496_v8  ;;  %v505_v14 = vrot.slane %v488_v7, %v504_v9  ;;  %v520_v16 = vrot.slane %v629_v11, %v492_v5  ;;  %v528_v18 = vrot.slane %v629_v11, %v500_v6 }
  0x1a   :  { %v524_v21 = vrot.slane %v629_v11, %v496_v8  ;;  %v532_v22 = vrot.slane %v629_v11, %v504_v9 }
  0x1b   :  { %419 = vmatpush1.bf16.msra.mxu0 %v674_v26  ;;  %460 = vmatpush1.bf16.msra.mxu1 %v675_v27 }
  0x1c   :  { %420 = vmatprep.subr.bf16.mxu0 %v676_v28  ;;  %461 = vmatprep.subr.bf16.mxu1 %v678_v29 }
  0x1f   :  { %421 = vmatpush1.bf16.msra.mxu0 %v680_v30  ;;  %462 = vmatpush1.bf16.msra.mxu1 %v681_v31 }
  0x20   :  { %422 = vmatprep.subr.bf16.mxu0 %v682_v32  ;;  %463 = vmatprep.subr.bf16.mxu1 %v684_v33 }
  0x23   :  { %423 = vmatpush2.bf16.msra.mxu0 %v686_v34  ;;  %464 = vmatpush2.bf16.msra.mxu1 %v687_v35 }
  0x24   :  { %424 = vmatprep.subr.bf16.mxu0 %v688_v36  ;;  %465 = vmatprep.subr.bf16.mxu1 %v690_v37 }
  0x27   :  { %425 = vmatpush2.bf16.msra.mxu0 %v692_v38  ;;  %466 = vmatpush2.bf16.msra.mxu1 %v693_v39 }
  0x28   :  { %426 = vmatprep.subr.bf16.mxu0 %v694_v40  ;;  %467 = vmatprep.subr.bf16.mxu1 %v696_v41 }
  0x2b   :  { %427 = vmatpush2.bf16.msra.mxu0 %v698_v42  ;;  %468 = vmatpush2.bf16.msra.mxu1 %v699_v43 }
  0x2c   :  { %428 = vmatprep.subr.bf16.mxu0 %v700_v44  ;;  %469 = vmatprep.subr.bf16.mxu1 %v702_v45 }
  0x2f   :  { %429 = vmatpush2.bf16.msra.mxu0 %v704_v48  ;;  %470 = vmatpush2.bf16.msra.mxu1 %v705_v49 }
  0x30   :  { %430 = vmatprep.subr.bf16.mxu0 %v706_v50  ;;  %471 = vmatprep.subr.bf16.mxu1 %v708_v51 }
  0x33   :  { %431 = vmatpush2.bf16.msra.mxu0 %v710_v52  ;;  %472 = vmatpush2.bf16.msra.mxu1 %v711_v53 }
  0x34   :  { %432 = vmatprep.subr.bf16.mxu0 %v712_v54  ;;  %473 = vmatprep.subr.bf16.mxu1 %v714_v55 }
  0x37   :  { %433 = vmatpush2.bf16.msra.mxu0 %v716_v56  ;;  %474 = vmatpush2.bf16.msra.mxu1 %v717_v57 }
  0x38   :  { %434 = vmatprep.subr.bf16.mxu0 %v718_v58  ;;  %475 = vmatprep.subr.bf16.mxu1 %v720_v59 }
  0x3b   :  { %435 = vmatpush2.bf16.msra.mxu0 %v722_v60  ;;  %476 = vmatpush2.bf16.msra.mxu1 %v723_v61 }
  0x3c   :  { %436 = vmatprep.subr.bf16.mxu0 %v724_v62  ;;  %477 = vmatprep.subr.bf16.mxu1 %v726_v63 }
  0x3f   :  { %437 = vmatpush2.bf16.msra.mxu0 %v728_v0  ;;  %478 = vmatpush2.bf16.msra.mxu1 %v729_v1 }
  0x42   :  { %439 = vmatmul.mubr.bf16.vlgmr.msra.gmra.mxu0 %v563_v2  ;;  %480 = vmatmul.mubr.bf16.vlgmr.msra.gmra.mxu1 %v563_v2 }
 0x102   :  { %v440_v15 = vpop.f32.mrf.mxu0  ;;  %v481_v17 = vpop.f32.mrf.mxu1 }
 0x103   :  { %v510_v19 = vmul.f32 %v493_v10, %v440_v15  ;;  %v512_v20 = vmul.f32 %v501_v12, %v481_v17 }
 0x104   :  { %v442_v23 = vpop.f32.mrf.mxu0  ;;  %v483_v24 = vpop.f32.mrf.mxu1 }
 0x105   :  { %v511_v25 = vmul.f32 %v497_v13, %v442_v23  ;;  %v513_v26 = vmul.f32 %v505_v14, %v483_v24  ;;  %v537_v29 = vadd.f32 %v520_v16, %v510_v19  ;;  %v539_v30 = vadd.f32 %v528_v18, %v512_v20 }
 0x106   :  { %v444_v27 = vpop.f32.mrf.mxu0  ;;  %v485_v28 = vpop.f32.mrf.mxu1 }
 0x107   :  { %v538_v31 = vadd.f32 %v524_v21, %v511_v25  ;;  %v540_v32 = vadd.f32 %v532_v22, %v513_v26 }
 0x108   :  { %v445_v33 = vpop.f32.mrf.mxu0  ;;  %v486_v34 = vpop.f32.mrf.mxu1 }
 0x109   :  { %v632_v35 = vpack.c.bf16 %v538_v31, %v537_v29  ;;  %v633_v36 = vpack.c.bf16 %v540_v32, %v539_v30 }
 0x10b   :  { %557 = vst [vmem:[%s962_s3] sm:$0xff] %v632_v35  ;;  %558 = vst [vmem:[%s962_s3 + $0x8] sm:$0xff] %v633_v36 }

// kernel: resnet1d_forward.21
= control target key start
LH: loop header
LB: loop body
LE: loop exit
PB: predicated region body
PF: predicated region fallthrough
CT: control target
= control target key end

     0   :  { %s1432_s1 = inlined_call_operand.vmem [shape: bf16[768,256], index: 1, kind: input, shape index: {}]   ;;  %s1433_s0 = inlined_call_operand.vmem [shape: bf16[16,768], index: 0, kind: input, shape index: {}]   ;;  %s1434_s2 = inlined_call_operand.vmem [shape: f32[8,256], index: 2, kind: input, shape index: {}]   ;;  %s1435_s3 = inlined_call_operand.vmem [shape: bf16[16,256], index: 3, kind: input, shape index: {}]   ;;  %s1436_s4 = inlined_call_operand.vmem [shape: bf16[16,256], index: 4, kind: output, shape index: {}]  }
   0x1   :  { %v930_v0 = vld [vmem:[%s1432_s1 + $0x74] ss:$8 sps:$4 sm:$0xff]   ;;  %v934_v2 = vld [vmem:[%s1432_s1 + $0x70] ss:$8 sps:$4 sm:$0xff]   ;;  %v936_v4 = vld [vmem:[%s1432_s1 + $0x64] ss:$8 sps:$4 sm:$0xff]  }
   0x2   :  { %v932_v1 = vld [vmem:[%s1432_s1 + $0x174] ss:$8 sps:$4 sm:$0xff]   ;;  %629 = vmatprep.subr.bf16.mxu0 %v930_v0  ;;  %v935_v3 = vld [vmem:[%s1432_s1 + $0x170] ss:$8 sps:$4 sm:$0xff]   ;;  %v938_v5 = vld [vmem:[%s1432_s1 + $0x164] ss:$8 sps:$4 sm:$0xff]  }
   0x3   :  { %672 = vmatprep.subr.bf16.mxu1 %v932_v1  ;;  %630 = vmatpush1.bf16.msra.mxu0 %v934_v2  ;;  %v940_v6 = vld [vmem:[%s1432_s1 + $0x60] ss:$8 sps:$4 sm:$0xff]   ;;  %v942_v8 = vld [vmem:[%s1432_s1 + $0x54] ss:$8 sps:$4 sm:$0xff]   ;;  %v946_v10 = vld [vmem:[%s1432_s1 + $0x50] ss:$8 sps:$4 sm:$0xff]  }
   0x4   :  { %673 = vmatpush1.bf16.msra.mxu1 %v935_v3  ;;  %631 = vmatprep.subr.bf16.mxu0 %v936_v4  ;;  %v941_v7 = vld [vmem:[%s1432_s1 + $0x160] ss:$8 sps:$4 sm:$0xff]   ;;  %v944_v9 = vld [vmem:[%s1432_s1 + $0x154] ss:$8 sps:$4 sm:$0xff]   ;;  %v947_v11 = vld [vmem:[%s1432_s1 + $0x150] ss:$8 sps:$4 sm:$0xff]  }
   0x5   :  { %674 = vmatprep.subr.bf16.mxu1 %v938_v5  ;;  %v948_v12 = vld [vmem:[%s1432_s1 + $0x44] ss:$8 sps:$4 sm:$0xff]   ;;  %v952_v14 = vld [vmem:[%s1432_s1 + $0x40] ss:$8 sps:$4 sm:$0xff]   ;;  %v954_v16 = vld [vmem:[%s1432_s1 + $0x34] ss:$8 sps:$4 sm:$0xff]  }
   0x6   :  { %v950_v13 = vld [vmem:[%s1432_s1 + $0x144] ss:$8 sps:$4 sm:$0xff]   ;;  %v953_v15 = vld [vmem:[%s1432_s1 + $0x140] ss:$8 sps:$4 sm:$0xff]   ;;  %v956_v17 = vld [vmem:[%s1432_s1 + $0x134] ss:$8 sps:$4 sm:$0xff]  }
   0x7   :  { %632 = vmatpush1.bf16.msra.mxu0 %v940_v6  ;;  %v958_v18 = vld [vmem:[%s1432_s1 + $0x30] ss:$8 sps:$4 sm:$0xff]   ;;  %v960_v20 = vld [vmem:[%s1432_s1 + $0x24] ss:$8 sps:$4 sm:$0xff]   ;;  %v964_v22 = vld [vmem:[%s1432_s1 + $0x20] ss:$8 sps:$4 sm:$0xff]  }
   0x8   :  { %675 = vmatpush1.bf16.msra.mxu1 %v941_v7  ;;  %633 = vmatprep.subr.bf16.mxu0 %v942_v8  ;;  %v959_v19 = vld [vmem:[%s1432_s1 + $0x130] ss:$8 sps:$4 sm:$0xff]   ;;  %v962_v21 = vld [vmem:[%s1432_s1 + $0x124] ss:$8 sps:$4 sm:$0xff]   ;;  %v965_v23 = vld [vmem:[%s1432_s1 + $0x120] ss:$8 sps:$4 sm:$0xff]  }
   0x9   :  { %676 = vmatprep.subr.bf16.mxu1 %v944_v9  ;;  %v966_v24 = vld [vmem:[%s1432_s1 + $0x14] ss:$8 sps:$4 sm:$0xff]   ;;  %v970_v26 = vld [vmem:[%s1432_s1 + $0x10] ss:$8 sps:$4 sm:$0xff]   ;;  %v972_v28 = vld [vmem:[%s1432_s1 + $0x4] ss:$8 sps:$4 sm:$0xff]  }
   0xa   :  { %v968_v25 = vld [vmem:[%s1432_s1 + $0x114] ss:$8 sps:$4 sm:$0xff]   ;;  %v971_v27 = vld [vmem:[%s1432_s1 + $0x110] ss:$8 sps:$4 sm:$0xff]   ;;  %v974_v29 = vld [vmem:[%s1432_s1 + $0x104] ss:$8 sps:$4 sm:$0xff]  }
   0xb   :  { %634 = vmatpush1.bf16.msra.mxu0 %v946_v10  ;;  %v976_v30 = vld [vmem:[%s1432_s1] ss:$8 sps:$4 sm:$0xff]   ;;  %v978_v32 = vld [vmem:[%s1432_s1 + $0xf4] ss:$8 sps:$4 sm:$0xff]   ;;  %v982_v34 = vld [vmem:[%s1432_s1 + $0xf0] ss:$8 sps:$4 sm:$0xff]  }
   0xc   :  { %677 = vmatpush1.bf16.msra.mxu1 %v947_v11  ;;  %635 = vmatprep.subr.bf16.mxu0 %v948_v12  ;;  %v977_v31 = vld [vmem:[%s1432_s1 + $0x100] ss:$8 sps:$4 sm:$0xff]   ;;  %v980_v33 = vld [vmem:[%s1432_s1 + $0x1f4] ss:$8 sps:$4 sm:$0xff]   ;;  %v983_v35 = vld [vmem:[%s1432_s1 + $0x1f0] ss:$8 sps:$4 sm:$0xff]  }
   0xd   :  { %678 = vmatprep.subr.bf16.mxu1 %v950_v13  ;;  %v984_v36 = vld [vmem:[%s1432_s1 + $0xe4] ss:$8 sps:$4 sm:$0xff]   ;;  %v988_v38 = vld [vmem:[%s1432_s1 + $0xe0] ss:$8 sps:$4 sm:$0xff]   ;;  %v990_v40 = vld [vmem:[%s1432_s1 + $0xd4] ss:$8 sps:$4 sm:$0xff]  }
   0xe   :  { %v986_v37 = vld [vmem:[%s1432_s1 + $0x1e4] ss:$8 sps:$4 sm:$0xff]   ;;  %v989_v39 = vld [vmem:[%s1432_s1 + $0x1e0] ss:$8 sps:$4 sm:$0xff]   ;;  %v992_v41 = vld [vmem:[%s1432_s1 + $0x1d4] ss:$8 sps:$4 sm:$0xff]  }
   0xf   :  { %636 = vmatpush1.bf16.msra.mxu0 %v952_v14  ;;  %v994_v42 = vld [vmem:[%s1432_s1 + $0xd0] ss:$8 sps:$4 sm:$0xff]   ;;  %v996_v44 = vld [vmem:[%s1432_s1 + $0xc4] ss:$8 sps:$4 sm:$0xff]   ;;  %v1000_v46 = vld [vmem:[%s1432_s1 + $0xc0] ss:$8 sps:$4 sm:$0xff]  }
  0x10   :  { %679 = vmatpush1.bf16.msra.mxu1 %v953_v15  ;;  %637 = vmatprep.subr.bf16.mxu0 %v954_v16  ;;  %v995_v43 = vld [vmem:[%s1432_s1 + $0x1d0] ss:$8 sps:$4 sm:$0xff]   ;;  %v998_v45 = vld [vmem:[%s1432_s1 + $0x1c4] ss:$8 sps:$4 sm:$0xff]   ;;  %v1001_v47 = vld [vmem:[%s1432_s1 + $0x1c0] ss:$8 sps:$4 sm:$0xff]  }
  0x11   :  { %680 = vmatprep.subr.bf16.mxu1 %v956_v17  ;;  %v1002_v48 = vld [vmem:[%s1432_s1 + $0xb4] ss:$8 sps:$4 sm:$0xff]   ;;  %v1031_v51 = vld [vmem:[%s1433_s0 + $0xc] ss:$24 sps:$4 sm:$0xff]   ;;  %v1006_v52 = vld [vmem:[%s1432_s1 + $0xb0] ss:$8 sps:$4 sm:$0xff]  }
  0x12   :  { %v1028_v49 = vld [vmem:[%s1433_s0 + $0x4] ss:$24 sps:$4 sm:$0xff]   ;;  %v1007_v53 = vld [vmem:[%s1432_s1 + $0x1b0] ss:$8 sps:$4 sm:$0xff]   ;;  %704 = vmatprep.mubr.bf16.mxu1 %v1031_v51  ;;  %v1012_v56 = vld [vmem:[%s1432_s1 + $0xa0] ss:$8 sps:$4 sm:$0xff]  }
  0x13   :  { %638 = vmatpush1.bf16.msra.mxu0 %v958_v18  ;;  %v1004_v50 = vld [vmem:[%s1432_s1 + $0x1b4] ss:$8 sps:$4 sm:$0xff]   ;;  %661 = vmatprep.mubr.bf16.mxu0 %v1028_v49  ;;  %v1008_v54 = vld [vmem:[%s1432_s1 + $0xa4] ss:$8 sps:$4 sm:$0xff]   ;;  %v1013_v57 = vld [vmem:[%s1432_s1 + $0x1a0] ss:$8 sps:$4 sm:$0xff]  }
  0x14   :  { %681 = vmatpush1.bf16.msra.mxu1 %v959_v19  ;;  %639 = vmatprep.subr.bf16.mxu0 %v960_v20  ;;  %v1010_v55 = vld [vmem:[%s1432_s1 + $0x1a4] ss:$8 sps:$4 sm:$0xff]   ;;  %v1014_v58 = vld [vmem:[%s1432_s1 + $0x94] ss:$8 sps:$4 sm:$0xff]   ;;  %v1018_v60 = vld [vmem:[%s1432_s1 + $0x90] ss:$8 sps:$4 sm:$0xff]  }
  0x15   :  { %682 = vmatprep.subr.bf16.mxu1 %v962_v21  ;;  %v1016_v59 = vld [vmem:[%s1432_s1 + $0x194] ss:$8 sps:$4 sm:$0xff]   ;;  %v1019_v61 = vld [vmem:[%s1432_s1 + $0x190] ss:$8 sps:$4 sm:$0xff]   ;;  %v1020_v62 = vld [vmem:[%s1432_s1 + $0x84] ss:$8 sps:$4 sm:$0xff]  }
  0x16   :  { %v1022_v63 = vld [vmem:[%s1432_s1 + $0x184] ss:$8 sps:$4 sm:$0xff]   ;;  %v1024_v0 = vld [vmem:[%s1432_s1 + $0x80] ss:$8 sps:$4 sm:$0xff]   ;;  %v1034_v2 = vld [vmem:[%s1432_s1 + $0x274] ss:$8 sps:$4 sm:$0xff]  }
  0x17   :  { %640 = vmatpush1.bf16.msra.mxu0 %v964_v22  ;;  %v1025_v1 = vld [vmem:[%s1432_s1 + $0x180] ss:$8 sps:$4 sm:$0xff]   ;;  %v1032_v5 = vld [vmem:[%s1432_s1 + $0x270] ss:$8 sps:$4 sm:$0xff]   ;;  %v1037_v6 = vld [vmem:[%s1432_s1 + $0x264] ss:$8 sps:$4 sm:$0xff]  }
  0x18   :  { %683 = vmatpush1.bf16.msra.mxu1 %v965_v23  ;;  %641 = vmatprep.subr.bf16.mxu0 %v966_v24  ;;  %v1026_v3 = vld [vmem:[%s1433_s0] ss:$24 sps:$4 sm:$0xff]   ;;  %v1082_v7 = vld [vmem:[%s1433_s0 + $0x14] ss:$24 sps:$4 sm:$0xff]  }
  0x19   :  { %684 = vmatprep.subr.bf16.mxu1 %v968_v25  ;;  %v1029_v4 = vld [vmem:[%s1433_s0 + $0x8] ss:$24 sps:$4 sm:$0xff]   ;;  %v1040_v9 = vld [vmem:[%s1432_s1 + $0x254] ss:$8 sps:$4 sm:$0xff]   ;;  %v1038_v10 = vld [vmem:[%s1432_s1 + $0x250] ss:$8 sps:$4 sm:$0xff]  }
  0x1a   :  { %v1035_v8 = vld [vmem:[%s1432_s1 + $0x260] ss:$8 sps:$4 sm:$0xff]   ;;  %v1043_v11 = vld [vmem:[%s1432_s1 + $0x244] ss:$8 sps:$4 sm:$0xff]   ;;  %v1046_v13 = vld [vmem:[%s1432_s1 + $0x234] ss:$8 sps:$4 sm:$0xff]  }
  0x1b   :  { %642 = vmatpush1.bf16.msra.mxu0 %v970_v26  ;;  %v1041_v12 = vld [vmem:[%s1432_s1 + $0x240] ss:$8 sps:$4 sm:$0xff]   ;;  %v1044_v14 = vld [vmem:[%s1432_s1 + $0x230] ss:$8 sps:$4 sm:$0xff]   ;;  %v1049_v15 = vld [vmem:[%s1432_s1 + $0x224] ss:$8 sps:$4 sm:$0xff]  }
  0x1c   :  { %685 = vmatpush1.bf16.msra.mxu1 %v971_v27  ;;  %643 = vmatprep.subr.bf16.mxu0 %v972_v28  ;;  %v1047_v16 = vld [vmem:[%s1432_s1 + $0x220] ss:$8 sps:$4 sm:$0xff]   ;;  %v1052_v17 = vld [vmem:[%s1432_s1 + $0x214] ss:$8 sps:$4 sm:$0xff]   ;;  %v1050_v18 = vld [vmem:[%s1432_s1 + $0x210] ss:$8 sps:$4 sm:$0xff]  }
  0x1d   :  { %686 = vmatprep.subr.bf16.mxu1 %v974_v29  ;;  %v1055_v19 = vld [vmem:[%s1432_s1 + $0x204] ss:$8 sps:$4 sm:$0xff]   ;;  %v1053_v20 = vld [vmem:[%s1432_s1 + $0x200] ss:$8 sps:$4 sm:$0xff]   ;;  %v1058_v21 = vld [vmem:[%s1432_s1 + $0x2f4] ss:$8 sps:$4 sm:$0xff]  }
  0x1e   :  { %v1056_v22 = vld [vmem:[%s1432_s1 + $0x2f0] ss:$8 sps:$4 sm:$0xff]   ;;  %v1061_v23 = vld [vmem:[%s1432_s1 + $0x2e4] ss:$8 sps:$4 sm:$0xff]   ;;  %v1059_v24 = vld [vmem:[%s1432_s1 + $0x2e0] ss:$8 sps:$4 sm:$0xff]  }
  0x1f   :  { %644 = vmatpush1.bf16.msra.mxu0 %v976_v30  ;;  %v1064_v25 = vld [vmem:[%s1432_s1 + $0x2d4] ss:$8 sps:$4 sm:$0xff]   ;;  %v1062_v26 = vld [vmem:[%s1432_s1 + $0x2d0] ss:$8 sps:$4 sm:$0xff]   ;;  %v1067_v27 = vld [vmem:[%s1432_s1 + $0x2c4] ss:$8 sps:$4 sm:$0xff]  }
  0x20   :  { %687 = vmatpush1.bf16.msra.mxu1 %v977_v31  ;;  %645 = vmatprep.subr.bf16.mxu0 %v978_v32  ;;  %v1065_v28 = vld [vmem:[%s1432_s1 + $0x2c0] ss:$8 sps:$4 sm:$0xff]   ;;  %v1070_v29 = vld [vmem:[%s1432_s1 + $0x2b4] ss:$8 sps:$4 sm:$0xff]   ;;  %v1068_v30 = vld [vmem:[%s1432_s1 + $0x2b0] ss:$8 sps:$4 sm:$0xff]  }
  0x21   :  { %688 = vmatprep.subr.bf16.mxu1 %v980_v33  ;;  %v1073_v31 = vld [vmem:[%s1432_s1 + $0x2a4] ss:$8 sps:$4 sm:$0xff]   ;;  %v1071_v32 = vld [vmem:[%s1432_s1 + $0x2a0] ss:$8 sps:$4 sm:$0xff]   ;;  %v1076_v33 = vld [vmem:[%s1432_s1 + $0x294] ss:$8 sps:$4 sm:$0xff]  }
  0x23   :  { %646 = vmatpush2.bf16.msra.mxu0 %v982_v34  ;;  %v1074_v34 = vld [vmem:[%s1432_s1 + $0x290] ss:$8 sps:$4 sm:$0xff]  }
  0x24   :  { %689 = vmatpush2.bf16.msra.mxu1 %v983_v35  ;;  %647 = vmatprep.subr.bf16.mxu0 %v984_v36  ;;  %v1079_v35 = vld [vmem:[%s1432_s1 + $0x284] ss:$8 sps:$4 sm:$0xff]   ;;  %v1077_v36 = vld [vmem:[%s1432_s1 + $0x280] ss:$8 sps:$4 sm:$0xff]  }
  0x25   :  { %690 = vmatprep.subr.bf16.mxu1 %v986_v37  ;;  %v1080_v37 = vld [vmem:[%s1433_s0 + $0x10] ss:$24 sps:$4 sm:$0xff]  }
  0x27   :  { %648 = vmatpush2.bf16.msra.mxu0 %v988_v38 }
  0x28   :  { %691 = vmatpush2.bf16.msra.mxu1 %v989_v39  ;;  %649 = vmatprep.subr.bf16.mxu0 %v990_v40  ;;  %v760_v39 = vlaneseq }
  0x29   :  { %692 = vmatprep.subr.bf16.mxu1 %v992_v41 }
  0x2b   :  { %650 = vmatpush2.bf16.msra.mxu0 %v994_v42  ;;  %v761_v42 = vshrl.u32 %v760_v39, 7 }
  0x2c   :  { %693 = vmatpush2.bf16.msra.mxu1 %v995_v43  ;;  %651 = vmatprep.subr.bf16.mxu0 %v996_v44 }
  0x2d   :  { %694 = vmatprep.subr.bf16.mxu1 %v998_v45  ;;  %v762_v45 = vsub.s32 0, %v761_v42 }
  0x2f   :  { %652 = vmatpush2.bf16.msra.mxu0 %v1000_v46  ;;  %v758_v46 = vld [vmem:[%s1434_s2] ss:$8 sm:$0x3] }
  0x30   :  { %695 = vmatpush2.bf16.msra.mxu1 %v1001_v47  ;;  %653 = vmatprep.subr.bf16.mxu0 %v1002_v48  ;;  %v766_v47 = vsub.s32 1, %v761_v42 }
  0x31   :  { %696 = vmatprep.subr.bf16.mxu1 %v1004_v50  ;;  %v925_v50 = vld [vmem:[%s1434_s2 + $0x1] ss:$8 sm:$0x3] }
  0x33   :  { %654 = vmatpush2.bf16.msra.mxu0 %v1006_v52  ;;  %v763_v52 = vrot.slane %v758_v46, %v762_v45 }
  0x34   :  { %697 = vmatpush2.bf16.msra.mxu1 %v1007_v53  ;;  %655 = vmatprep.subr.bf16.mxu0 %v1008_v54  ;;  %v791_v53 = vld [vmem:[%s1435_s3] sm:$0xff] }
  0x35   :  { %698 = vmatprep.subr.bf16.mxu1 %v1010_v55 }
  0x37   :  { %656 = vmatpush2.bf16.msra.mxu0 %v1012_v56 }
  0x38   :  { %699 = vmatpush2.bf16.msra.mxu1 %v1013_v57  ;;  %657 = vmatprep.subr.bf16.mxu0 %v1014_v58  ;;  %v780_v57 = vrot.slane %v925_v50, %v762_v45  ;;  %v767_v58 = vrot.slane %v758_v46, %v766_v47 }
  0x39   :  { %700 = vmatprep.subr.bf16.mxu1 %v1016_v59 }
  0x3b   :  { %658 = vmatpush2.bf16.msra.mxu0 %v1018_v60  ;;  %v793_v60 = vunpack.c.l.bf16 %v791_v53 }
  0x3c   :  { %701 = vmatpush2.bf16.msra.mxu1 %v1019_v61  ;;  %659 = vmatprep.subr.bf16.mxu0 %v1020_v62 }
  0x3d   :  { %702 = vmatprep.subr.bf16.mxu1 %v1022_v63 }
  0x3f   :  { %660 = vmatpush2.bf16.msra.mxu0 %v1024_v0 }
  0x40   :  { %703 = vmatpush2.bf16.msra.mxu1 %v1025_v1  ;;  %715 = vmatprep.subr.bf16.mxu0 %v1034_v2  ;;  %v784_v1 = vrot.slane %v925_v50, %v766_v47  ;;  %v792_v2 = vld [vmem:[%s1435_s3 + $0x8] sm:$0xff] }
  0x42   :  { %662 = vmatmul.mubr.bf16.vlgmr.msra.gmra.mxu0 %v1026_v3  ;;  %v794_v3 = vunpack.c.h.bf16 %v791_v53 }
  0x43   :  { %705 = vmatmul.mubr.bf16.vlgmr.msra.gmra.mxu1 %v1029_v4  ;;  %716 = vmatpush1.bf16.msra.mxu0 %v1032_v5 }
  0x44   :  { %717 = vmatprep.subr.bf16.mxu0 %v1037_v6  ;;  %747 = vmatprep.mubr.bf16.mxu0 %v1082_v7 }
  0x47   :  { %718 = vmatpush1.bf16.msra.mxu0 %v1035_v8 }
  0x48   :  { %719 = vmatprep.subr.bf16.mxu0 %v1040_v9  ;;  %v795_v9 = vunpack.c.l.bf16 %v792_v2 }
  0x4b   :  { %720 = vmatpush1.bf16.msra.mxu0 %v1038_v10 }
  0x4c   :  { %721 = vmatprep.subr.bf16.mxu0 %v1043_v11 }
  0x4f   :  { %722 = vmatpush1.bf16.msra.mxu0 %v1041_v12 }
  0x50   :  { %723 = vmatprep.subr.bf16.mxu0 %v1046_v13 }
  0x53   :  { %724 = vmatpush1.bf16.msra.mxu0 %v1044_v14 }
  0x54   :  { %725 = vmatprep.subr.bf16.mxu0 %v1049_v15 }
  0x57   :  { %726 = vmatpush1.bf16.msra.mxu0 %v1047_v16 }
  0x58   :  { %727 = vmatprep.subr.bf16.mxu0 %v1052_v17 }
  0x5b   :  { %728 = vmatpush1.bf16.msra.mxu0 %v1050_v18  ;;  %v796_v18 = vunpack.c.h.bf16 %v792_v2 }
  0x5c   :  { %729 = vmatprep.subr.bf16.mxu0 %v1055_v19 }
  0x5f   :  { %730 = vmatpush1.bf16.msra.mxu0 %v1053_v20 }
  0x60   :  { %731 = vmatprep.subr.bf16.mxu0 %v1058_v21 }
  0x63   :  { %732 = vmatpush2.bf16.msra.mxu0 %v1056_v22 }
  0x64   :  { %733 = vmatprep.subr.bf16.mxu0 %v1061_v23 }
  0x67   :  { %734 = vmatpush2.bf16.msra.mxu0 %v1059_v24 }
  0x68   :  { %735 = vmatprep.subr.bf16.mxu0 %v1064_v25 }
  0x6b   :  { %736 = vmatpush2.bf16.msra.mxu0 %v1062_v26 }
  0x6c   :  { %737 = vmatprep.subr.bf16.mxu0 %v1067_v27 }
  0x6f   :  { %738 = vmatpush2.bf16.msra.mxu0 %v1065_v28 }
  0x70   :  { %739 = vmatprep.subr.bf16.mxu0 %v1070_v29 }
  0x73   :  { %740 = vmatpush2.bf16.msra.mxu0 %v1068_v30 }
  0x74   :  { %741 = vmatprep.subr.bf16.mxu0 %v1073_v31 }
  0x77   :  { %742 = vmatpush2.bf16.msra.mxu0 %v1071_v32 }
  0x78   :  { %743 = vmatprep.subr.bf16.mxu0 %v1076_v33 }
  0x7b   :  { %744 = vmatpush2.bf16.msra.mxu0 %v1074_v34 }
  0x7c   :  { %745 = vmatprep.subr.bf16.mxu0 %v1079_v35 }
  0x7f   :  { %746 = vmatpush2.bf16.msra.mxu0 %v1077_v36 }
  0x82   :  { %748 = vmatmul.mubr.bf16.vlgmr.msra.gmra.mxu0 %v1080_v37 }
 0x102   :  { %v663_v38 = vpop.f32.mrf.mxu0 }
 0x103   :  { %v706_v40 = vpop.f32.mrf.mxu1 }
 0x104   :  { %v665_v41 = vpop.f32.mrf.mxu0  ;;  %v707_v51 = vadd.f32 %v706_v40, %v663_v38 }
 0x105   :  { %v708_v43 = vpop.f32.mrf.mxu1 }
 0x106   :  { %v667_v44 = vpop.f32.mrf.mxu0  ;;  %v709_v55 = vadd.f32 %v708_v43, %v665_v41 }
 0x107   :  { %v710_v48 = vpop.f32.mrf.mxu1 }
 0x108   :  { %v669_v49 = vpop.f32.mrf.mxu0  ;;  %v711_v62 = vadd.f32 %v710_v48, %v667_v44 }
 0x109   :  { %v712_v59 = vpop.f32.mrf.mxu1 }
 0x10a   :  { %v713_v5 = vadd.f32 %v712_v59, %v669_v49 }
 0x142   :  { %v749_v54 = vpop.f32.mrf.mxu0 }
 0x143   :  { %v750_v56 = vadd.f32 %v749_v54, %v707_v51 }
 0x144   :  { %v751_v61 = vpop.f32.mrf.mxu0 }
 0x145   :  { %v770_v63 = vmul.f32 %v763_v52, %v750_v56  ;;  %v752_v0 = vadd.f32 %v751_v61, %v709_v55 }
 0x146   :  { %v753_v4 = vpop.f32.mrf.mxu0 }
 0x147   :  { %v787_v6 = vadd.f32 %v780_v57, %v770_v63  ;;  %v771_v7 = vmul.f32 %v767_v58, %v752_v0  ;;  %v754_v8 = vadd.f32 %v753_v4, %v711_v62 }
 0x148   :  { %v755_v10 = vpop.f32.mrf.mxu0 }
 0x149   :  { %v797_v11 = vadd.f32 %v793_v60, %v787_v6  ;;  %v788_v12 = vadd.f32 %v784_v1, %v771_v7  ;;  %v772_v13 = vmul.f32 %v763_v52, %v754_v8  ;;  %v756_v14 = vadd.f32 %v755_v10, %v713_v5 }
 0x14b   :  { %v798_v15 = vadd.f32 %v794_v3, %v788_v12  ;;  %v789_v16 = vadd.f32 %v780_v57, %v772_v13  ;;  %v773_v17 = vmul.f32 %v767_v58, %v756_v14  ;;  %v801_v19 = vmax.f32 %v797_v11, 0.0 }
 0x14d   :  { %v802_v20 = vmax.f32 %v798_v15, 0.0  ;;  %v799_v21 = vadd.f32 %v795_v9, %v789_v16  ;;  %v790_v22 = vadd.f32 %v784_v1, %v773_v17 }
 0x14f   :  { %v928_v23 = vpack.c.bf16 %v802_v20, %v801_v19  ;;  %v800_v24 = vadd.f32 %v796_v18, %v790_v22  ;;  %v803_v25 = vmax.f32 %v799_v21, 0.0 }
 0x151   :  { %817 = vst [vmem:[%s1436_s4] sm:$0xff] %v928_v23  ;;  %v804_v26 = vmax.f32 %v800_v24, 0.0 }
 0x153   :  { %v929_v27 = vpack.c.bf16 %v804_v26, %v803_v25 }
 0x155   :  { %818 = vst [vmem:[%s1436_s4 + $0x8] sm:$0xff] %v929_v27 }

// kernel: resnet1d_forward.22
= control target key start
LH: loop header
LB: loop body
LE: loop exit
PB: predicated region body
PF: predicated region fallthrough
CT: control target
= control target key end

     0   :  { %s2659_s1 = inlined_call_operand.vmem [shape: bf16[768,512], index: 1, kind: input, shape index: {}]   ;;  %s2660_s0 = inlined_call_operand.vmem [shape: bf16[8,768], index: 0, kind: input, shape index: {}]   ;;  %s2661_s2 = inlined_call_operand.vmem [shape: f32[8,512], index: 2, kind: input, shape index: {}]   ;;  %s2662_s3 = inlined_call_operand.vmem [shape: bf16[8,512], index: 3, kind: output, shape index: {}]  }
   0x1   :  { %v1718_v0 = vld [vmem:[%s2659_s1 + $0xe4] ss:$16 sps:$4 sm:$0xff]   ;;  %v1722_v2 = vld [vmem:[%s2659_s1 + $0xe0] ss:$16 sps:$4 sm:$0xff]   ;;  %v15_v48 = vld [vmem:[%s2660_s0 + $0x8] sm:$0xff] }
   0x2   :  { %v1720_v1 = vld [vmem:[%s2659_s1 + $0x2e4] ss:$16 sps:$4 sm:$0xff]   ;;  %1190 = vmatprep.subr.bf16.mxu0 %v1718_v0  ;;  %v1723_v3 = vld [vmem:[%s2659_s1 + $0x2e0] ss:$16 sps:$4 sm:$0xff]   ;;  %v2184_v51 = vcombine.high %v15_v48, %v15_v48 }
   0x3   :  { %1231 = vmatprep.subr.bf16.mxu1 %v1720_v1  ;;  %v1724_v4 = vld [vmem:[%s2659_s1 + $0xc4] ss:$16 sps:$4 sm:$0xff]   ;;  %1191 = vmatpush1.bf16.msra.mxu0 %v1722_v2  ;;  %v1728_v6 = vld [vmem:[%s2659_s1 + $0xc0] ss:$16 sps:$4 sm:$0xff]  }
   0x4   :  { %1232 = vmatpush1.bf16.msra.mxu1 %v1723_v3  ;;  %v1726_v5 = vld [vmem:[%s2659_s1 + $0x2c4] ss:$16 sps:$4 sm:$0xff]   ;;  %1192 = vmatprep.subr.bf16.mxu0 %v1724_v4  ;;  %v1729_v7 = vld [vmem:[%s2659_s1 + $0x2c0] ss:$16 sps:$4 sm:$0xff]  }
   0x5   :  { %1233 = vmatprep.subr.bf16.mxu1 %v1726_v5  ;;  %v1730_v8 = vld [vmem:[%s2659_s1 + $0xa4] ss:$16 sps:$4 sm:$0xff]   ;;  %v1734_v10 = vld [vmem:[%s2659_s1 + $0xa0] ss:$16 sps:$4 sm:$0xff]   ;;  %1263 = vmatprep.mubr.bf16.mxu1 %v2184_v51  ;;  %v1823_v5 = vld [vmem:[%s2659_s1 + $0xec] ss:$16 sps:$4 sm:$0xff]  }
   0x6   :  { %v1732_v9 = vld [vmem:[%s2659_s1 + $0x2a4] ss:$16 sps:$4 sm:$0xff]   ;;  %v1735_v11 = vld [vmem:[%s2659_s1 + $0x2a0] ss:$16 sps:$4 sm:$0xff]  }
   0x7   :  { %1193 = vmatpush1.bf16.msra.mxu0 %v1728_v6  ;;  %v1736_v12 = vld [vmem:[%s2659_s1 + $0x84] ss:$16 sps:$4 sm:$0xff]   ;;  %v1740_v14 = vld [vmem:[%s2659_s1 + $0x80] ss:$16 sps:$4 sm:$0xff]  }
   0x8   :  { %1234 = vmatpush1.bf16.msra.mxu1 %v1729_v7  ;;  %1194 = vmatprep.subr.bf16.mxu0 %v1730_v8  ;;  %v1738_v13 = vld [vmem:[%s2659_s1 + $0x284] ss:$16 sps:$4 sm:$0xff]   ;;  %v1741_v15 = vld [vmem:[%s2659_s1 + $0x280] ss:$16 sps:$4 sm:$0xff]   ;;  %v2244_v7 = vcombine.low %v15_v48, %v15_v48 }
   0x9   :  { %1235 = vmatprep.subr.bf16.mxu1 %v1732_v9  ;;  %v1742_v16 = vld [vmem:[%s2659_s1 + $0x64] ss:$16 sps:$4 sm:$0xff]   ;;  %v1746_v18 = vld [vmem:[%s2659_s1 + $0x60] ss:$16 sps:$4 sm:$0xff]   ;;  %v1821_v9 = vld [vmem:[%s2659_s1 + $0xe8] ss:$16 sps:$4 sm:$0xff]  }
   0xa   :  { %v1744_v17 = vld [vmem:[%s2659_s1 + $0x264] ss:$16 sps:$4 sm:$0xff]   ;;  %v1747_v19 = vld [vmem:[%s2659_s1 + $0x260] ss:$16 sps:$4 sm:$0xff]  }
   0xb   :  { %1195 = vmatpush1.bf16.msra.mxu0 %v1734_v10  ;;  %v1748_v20 = vld [vmem:[%s2659_s1 + $0x44] ss:$16 sps:$4 sm:$0xff]   ;;  %v1752_v22 = vld [vmem:[%s2659_s1 + $0x40] ss:$16 sps:$4 sm:$0xff]  }
   0xc   :  { %1236 = vmatpush1.bf16.msra.mxu1 %v1735_v11  ;;  %1196 = vmatprep.subr.bf16.mxu0 %v1736_v12  ;;  %v1750_v21 = vld [vmem:[%s2659_s1 + $0x244] ss:$16 sps:$4 sm:$0xff]   ;;  %v1753_v23 = vld [vmem:[%s2659_s1 + $0x240] ss:$16 sps:$4 sm:$0xff]   ;;  %v1829_v11 = vld [vmem:[%s2659_s1 + $0xcc] ss:$16 sps:$4 sm:$0xff]  }
   0xd   :  { %1237 = vmatprep.subr.bf16.mxu1 %v1738_v13  ;;  %v1754_v24 = vld [vmem:[%s2659_s1 + $0x24] ss:$16 sps:$4 sm:$0xff]   ;;  %v1758_v26 = vld [vmem:[%s2659_s1 + $0x20] ss:$16 sps:$4 sm:$0xff]   ;;  %v1827_v13 = vld [vmem:[%s2659_s1 + $0xc8] ss:$16 sps:$4 sm:$0xff]  }
   0xe   :  { %v1756_v25 = vld [vmem:[%s2659_s1 + $0x224] ss:$16 sps:$4 sm:$0xff]   ;;  %v1759_v27 = vld [vmem:[%s2659_s1 + $0x220] ss:$16 sps:$4 sm:$0xff]  }
   0xf   :  { %1197 = vmatpush1.bf16.msra.mxu0 %v1740_v14  ;;  %v1760_v28 = vld [vmem:[%s2659_s1 + $0x4] ss:$16 sps:$4 sm:$0xff]   ;;  %v1764_v30 = vld [vmem:[%s2659_s1] ss:$16 sps:$4 sm:$0xff]  }
  0x10   :  { %1238 = vmatpush1.bf16.msra.mxu1 %v1741_v15  ;;  %1198 = vmatprep.subr.bf16.mxu0 %v1742_v16  ;;  %v1762_v29 = vld [vmem:[%s2659_s1 + $0x204] ss:$16 sps:$4 sm:$0xff]   ;;  %v1765_v31 = vld [vmem:[%s2659_s1 + $0x200] ss:$16 sps:$4 sm:$0xff]   ;;  %v1835_v15 = vld [vmem:[%s2659_s1 + $0xac] ss:$16 sps:$4 sm:$0xff]  }
  0x11   :  { %1239 = vmatprep.subr.bf16.mxu1 %v1744_v17  ;;  %v1766_v32 = vld [vmem:[%s2659_s1 + $0x1e4] ss:$16 sps:$4 sm:$0xff]   ;;  %v1770_v34 = vld [vmem:[%s2659_s1 + $0x1e0] ss:$16 sps:$4 sm:$0xff]   ;;  %v1833_v17 = vld [vmem:[%s2659_s1 + $0xa8] ss:$16 sps:$4 sm:$0xff]  }
  0x12   :  { %v1768_v33 = vld [vmem:[%s2659_s1 + $0x3e4] ss:$16 sps:$4 sm:$0xff]   ;;  %v1771_v35 = vld [vmem:[%s2659_s1 + $0x3e0] ss:$16 sps:$4 sm:$0xff]  }
  0x13   :  { %1199 = vmatpush1.bf16.msra.mxu0 %v1746_v18  ;;  %v1772_v36 = vld [vmem:[%s2659_s1 + $0x1c4] ss:$16 sps:$4 sm:$0xff]   ;;  %v1776_v38 = vld [vmem:[%s2659_s1 + $0x1c0] ss:$16 sps:$4 sm:$0xff]  }
  0x14   :  { %1240 = vmatpush1.bf16.msra.mxu1 %v1747_v19  ;;  %1200 = vmatprep.subr.bf16.mxu0 %v1748_v20  ;;  %v1774_v37 = vld [vmem:[%s2659_s1 + $0x3c4] ss:$16 sps:$4 sm:$0xff]   ;;  %v1777_v39 = vld [vmem:[%s2659_s1 + $0x3c0] ss:$16 sps:$4 sm:$0xff]   ;;  %v1841_v19 = vld [vmem:[%s2659_s1 + $0x8c] ss:$16 sps:$4 sm:$0xff]  }
  0x15   :  { %1241 = vmatprep.subr.bf16.mxu1 %v1750_v21  ;;  %v1778_v40 = vld [vmem:[%s2659_s1 + $0x1a4] ss:$16 sps:$4 sm:$0xff]   ;;  %v1782_v42 = vld [vmem:[%s2659_s1 + $0x1a0] ss:$16 sps:$4 sm:$0xff]   ;;  %v1839_v21 = vld [vmem:[%s2659_s1 + $0x88] ss:$16 sps:$4 sm:$0xff]  }
  0x16   :  { %v1780_v41 = vld [vmem:[%s2659_s1 + $0x3a4] ss:$16 sps:$4 sm:$0xff]   ;;  %v1783_v43 = vld [vmem:[%s2659_s1 + $0x3a0] ss:$16 sps:$4 sm:$0xff]  }
  0x17   :  { %1201 = vmatpush1.bf16.msra.mxu0 %v1752_v22  ;;  %v1784_v44 = vld [vmem:[%s2659_s1 + $0x184] ss:$16 sps:$4 sm:$0xff]   ;;  %v1788_v49 = vld [vmem:[%s2659_s1 + $0x180] ss:$16 sps:$4 sm:$0xff]  }
  0x18   :  { %1242 = vmatpush1.bf16.msra.mxu1 %v1753_v23  ;;  %1202 = vmatprep.subr.bf16.mxu0 %v1754_v24  ;;  %v1786_v45 = vld [vmem:[%s2659_s1 + $0x384] ss:$16 sps:$4 sm:$0xff]   ;;  %v1789_v50 = vld [vmem:[%s2659_s1 + $0x380] ss:$16 sps:$4 sm:$0xff]   ;;  %v1847_v23 = vld [vmem:[%s2659_s1 + $0x6c] ss:$16 sps:$4 sm:$0xff]  }
  0x19   :  { %1243 = vmatprep.subr.bf16.mxu1 %v1756_v25  ;;  %v14_v46 = vld [vmem:[%s2660_s0] sm:$0xff]  ;;  %v1845_v25 = vld [vmem:[%s2659_s1 + $0x68] ss:$16 sps:$4 sm:$0xff]  }
  0x1a   :  { %v2173_v47 = vcombine.high %v14_v46, %v14_v46  ;;  %v1790_v52 = vld [vmem:[%s2659_s1 + $0x164] ss:$16 sps:$4 sm:$0xff]   ;;  %v1794_v54 = vld [vmem:[%s2659_s1 + $0x160] ss:$16 sps:$4 sm:$0xff]   ;;  %v2242_v6 = vcombine.low %v14_v46, %v14_v46 }
  0x1b   :  { %1203 = vmatpush1.bf16.msra.mxu0 %v1758_v26  ;;  %v1792_v53 = vld [vmem:[%s2659_s1 + $0x364] ss:$16 sps:$4 sm:$0xff]   ;;  %v1795_v55 = vld [vmem:[%s2659_s1 + $0x360] ss:$16 sps:$4 sm:$0xff]  }
  0x1c   :  { %1244 = vmatpush1.bf16.msra.mxu1 %v1759_v27  ;;  %1204 = vmatprep.subr.bf16.mxu0 %v1760_v28  ;;  %v1796_v56 = vld [vmem:[%s2659_s1 + $0x144] ss:$16 sps:$4 sm:$0xff]   ;;  %v1800_v58 = vld [vmem:[%s2659_s1 + $0x140] ss:$16 sps:$4 sm:$0xff]   ;;  %v1853_v27 = vld [vmem:[%s2659_s1 + $0x4c] ss:$16 sps:$4 sm:$0xff]  }
  0x1d   :  { %1245 = vmatprep.subr.bf16.mxu1 %v1762_v29  ;;  %1222 = vmatprep.mubr.bf16.mxu0 %v2173_v47  ;;  %v1798_v57 = vld [vmem:[%s2659_s1 + $0x344] ss:$16 sps:$4 sm:$0xff]   ;;  %v1801_v59 = vld [vmem:[%s2659_s1 + $0x340] ss:$16 sps:$4 sm:$0xff]   ;;  %v1851_v29 = vld [vmem:[%s2659_s1 + $0x48] ss:$16 sps:$4 sm:$0xff]  }
  0x1e   :  { %v1802_v60 = vld [vmem:[%s2659_s1 + $0x124] ss:$16 sps:$4 sm:$0xff]   ;;  %v1806_v62 = vld [vmem:[%s2659_s1 + $0x120] ss:$16 sps:$4 sm:$0xff]  }
  0x1f   :  { %1205 = vmatpush1.bf16.msra.mxu0 %v1764_v30  ;;  %v1804_v61 = vld [vmem:[%s2659_s1 + $0x324] ss:$16 sps:$4 sm:$0xff]   ;;  %v1807_v63 = vld [vmem:[%s2659_s1 + $0x320] ss:$16 sps:$4 sm:$0xff]  }
  0x20   :  { %1246 = vmatpush1.bf16.msra.mxu1 %v1765_v31  ;;  %1206 = vmatprep.subr.bf16.mxu0 %v1766_v32  ;;  %v1808_v0 = vld [vmem:[%s2659_s1 + $0x104] ss:$16 sps:$4 sm:$0xff]   ;;  %v1812_v2 = vld [vmem:[%s2659_s1 + $0x100] ss:$16 sps:$4 sm:$0xff]   ;;  %v1859_v31 = vld [vmem:[%s2659_s1 + $0x2c] ss:$16 sps:$4 sm:$0xff]  }
  0x21   :  { %1247 = vmatprep.subr.bf16.mxu1 %v1768_v33  ;;  %v1810_v1 = vld [vmem:[%s2659_s1 + $0x304] ss:$16 sps:$4 sm:$0xff]   ;;  %v1813_v3 = vld [vmem:[%s2659_s1 + $0x300] ss:$16 sps:$4 sm:$0xff]  }
  0x22   :  { %v1820_v4 = vld [vmem:[%s2659_s1 + $0x4e4] ss:$16 sps:$4 sm:$0xff]   ;;  %v1818_v8 = vld [vmem:[%s2659_s1 + $0x4e0] ss:$16 sps:$4 sm:$0xff]  }
  0x23   :  { %1207 = vmatpush2.bf16.msra.mxu0 %v1770_v34  ;;  %v1826_v10 = vld [vmem:[%s2659_s1 + $0x4c4] ss:$16 sps:$4 sm:$0xff]   ;;  %v1824_v12 = vld [vmem:[%s2659_s1 + $0x4c0] ss:$16 sps:$4 sm:$0xff]  }
  0x24   :  { %1248 = vmatpush2.bf16.msra.mxu1 %v1771_v35  ;;  %1208 = vmatprep.subr.bf16.mxu0 %v1772_v36  ;;  %v1832_v14 = vld [vmem:[%s2659_s1 + $0x4a4] ss:$16 sps:$4 sm:$0xff]   ;;  %v1830_v16 = vld [vmem:[%s2659_s1 + $0x4a0] ss:$16 sps:$4 sm:$0xff]   ;;  %v1857_v35 = vld [vmem:[%s2659_s1 + $0x28] ss:$16 sps:$4 sm:$0xff]  }
  0x25   :  { %1249 = vmatprep.subr.bf16.mxu1 %v1774_v37  ;;  %v1838_v18 = vld [vmem:[%s2659_s1 + $0x484] ss:$16 sps:$4 sm:$0xff]   ;;  %v1836_v20 = vld [vmem:[%s2659_s1 + $0x480] ss:$16 sps:$4 sm:$0xff]   ;;  %v1865_v37 = vld [vmem:[%s2659_s1 + $0xc] ss:$16 sps:$4 sm:$0xff]  }
  0x26   :  { %v1844_v22 = vld [vmem:[%s2659_s1 + $0x464] ss:$16 sps:$4 sm:$0xff]   ;;  %v1842_v24 = vld [vmem:[%s2659_s1 + $0x460] ss:$16 sps:$4 sm:$0xff]  }
  0x27   :  { %1209 = vmatpush2.bf16.msra.mxu0 %v1776_v38  ;;  %v1850_v26 = vld [vmem:[%s2659_s1 + $0x444] ss:$16 sps:$4 sm:$0xff]   ;;  %v1848_v28 = vld [vmem:[%s2659_s1 + $0x440] ss:$16 sps:$4 sm:$0xff]  }
  0x28   :  { %1250 = vmatpush2.bf16.msra.mxu1 %v1777_v39  ;;  %1210 = vmatprep.subr.bf16.mxu0 %v1778_v40  ;;  %v1856_v30 = vld [vmem:[%s2659_s1 + $0x424] ss:$16 sps:$4 sm:$0xff]   ;;  %v1854_v33 = vld [vmem:[%s2659_s1 + $0x420] ss:$16 sps:$4 sm:$0xff]   ;;  %v1863_v39 = vld [vmem:[%s2659_s1 + $0x8] ss:$16 sps:$4 sm:$0xff]  }
  0x29   :  { %1251 = vmatprep.subr.bf16.mxu1 %v1780_v41  ;;  %v2324_v32 = vld [vmem:[%s2660_s0 + $0x10] sm:$0xff]  ;;  %v1871_v41 = vld [vmem:[%s2659_s1 + $0x1ec] ss:$16 sps:$4 sm:$0xff]  }
  0x2a   :  { %v2331_v34 = vcombine.high %v2324_v32, %v2324_v32  ;;  %v1862_v36 = vld [vmem:[%s2659_s1 + $0x404] ss:$16 sps:$4 sm:$0xff]   ;;  %v1860_v38 = vld [vmem:[%s2659_s1 + $0x400] ss:$16 sps:$4 sm:$0xff]  }
  0x2b   :  { %1211 = vmatpush2.bf16.msra.mxu0 %v1782_v42  ;;  %v1868_v40 = vld [vmem:[%s2659_s1 + $0x5e4] ss:$16 sps:$4 sm:$0xff]   ;;  %v1866_v42 = vld [vmem:[%s2659_s1 + $0x5e0] ss:$16 sps:$4 sm:$0xff]  }
  0x2c   :  { %1252 = vmatpush2.bf16.msra.mxu1 %v1783_v43  ;;  %1212 = vmatprep.subr.bf16.mxu0 %v1784_v44  ;;  %v1869_v43 = vld [vmem:[%s2659_s1 + $0x1e8] ss:$16 sps:$4 sm:$0xff]   ;;  %v1874_v44 = vld [vmem:[%s2659_s1 + $0x5c4] ss:$16 sps:$4 sm:$0xff]   ;;  %v1872_v46 = vld [vmem:[%s2659_s1 + $0x5c0] ss:$16 sps:$4 sm:$0xff]  }
  0x2d   :  { %1253 = vmatprep.subr.bf16.mxu1 %v1786_v45  ;;  %v1877_v45 = vld [vmem:[%s2659_s1 + $0x1cc] ss:$16 sps:$4 sm:$0xff]   ;;  %v1880_v48 = vld [vmem:[%s2659_s1 + $0x5a4] ss:$16 sps:$4 sm:$0xff]  }
  0x2f   :  { %1213 = vmatpush2.bf16.msra.mxu0 %v1788_v49  ;;  %v1883_v49 = vld [vmem:[%s2659_s1 + $0x1ac] ss:$16 sps:$4 sm:$0xff]  }
  0x30   :  { %1254 = vmatpush2.bf16.msra.mxu1 %v1789_v50  ;;  %1214 = vmatprep.subr.bf16.mxu0 %v1790_v52  ;;  %v1878_v50 = vld [vmem:[%s2659_s1 + $0x5a0] ss:$16 sps:$4 sm:$0xff]   ;;  %v1881_v52 = vld [vmem:[%s2659_s1 + $0x1a8] ss:$16 sps:$4 sm:$0xff]  }
  0x31   :  { %1255 = vmatprep.subr.bf16.mxu1 %v1792_v53  ;;  %v1886_v53 = vld [vmem:[%s2659_s1 + $0x584] ss:$16 sps:$4 sm:$0xff]  }
  0x33   :  { %1215 = vmatpush2.bf16.msra.mxu0 %v1794_v54  ;;  %v1889_v54 = vld [vmem:[%s2659_s1 + $0x18c] ss:$16 sps:$4 sm:$0xff]  }
  0x34   :  { %1256 = vmatpush2.bf16.msra.mxu1 %v1795_v55  ;;  %1216 = vmatprep.subr.bf16.mxu0 %v1796_v56  ;;  %v1884_v55 = vld [vmem:[%s2659_s1 + $0x580] ss:$16 sps:$4 sm:$0xff]   ;;  %v1887_v56 = vld [vmem:[%s2659_s1 + $0x188] ss:$16 sps:$4 sm:$0xff]  }
  0x35   :  { %1257 = vmatprep.subr.bf16.mxu1 %v1798_v57  ;;  %v1892_v57 = vld [vmem:[%s2659_s1 + $0x564] ss:$16 sps:$4 sm:$0xff]  }
  0x37   :  { %1217 = vmatpush2.bf16.msra.mxu0 %v1800_v58  ;;  %v1895_v58 = vld [vmem:[%s2659_s1 + $0x16c] ss:$16 sps:$4 sm:$0xff]  }
  0x38   :  { %1258 = vmatpush2.bf16.msra.mxu1 %v1801_v59  ;;  %1218 = vmatprep.subr.bf16.mxu0 %v1802_v60  ;;  %v1890_v59 = vld [vmem:[%s2659_s1 + $0x560] ss:$16 sps:$4 sm:$0xff]   ;;  %v1893_v60 = vld [vmem:[%s2659_s1 + $0x168] ss:$16 sps:$4 sm:$0xff]  }
  0x39   :  { %1259 = vmatprep.subr.bf16.mxu1 %v1804_v61  ;;  %v1898_v61 = vld [vmem:[%s2659_s1 + $0x544] ss:$16 sps:$4 sm:$0xff]  }
  0x3b   :  { %1219 = vmatpush2.bf16.msra.mxu0 %v1806_v62  ;;  %v1901_v62 = vld [vmem:[%s2659_s1 + $0x14c] ss:$16 sps:$4 sm:$0xff]  }
  0x3c   :  { %1260 = vmatpush2.bf16.msra.mxu1 %v1807_v63  ;;  %1220 = vmatprep.subr.bf16.mxu0 %v1808_v0  ;;  %v1896_v63 = vld [vmem:[%s2659_s1 + $0x540] ss:$16 sps:$4 sm:$0xff]   ;;  %v1899_v0 = vld [vmem:[%s2659_s1 + $0x148] ss:$16 sps:$4 sm:$0xff]  }
  0x3d   :  { %1261 = vmatprep.subr.bf16.mxu1 %v1810_v1  ;;  %v1904_v1 = vld [vmem:[%s2659_s1 + $0x524] ss:$16 sps:$4 sm:$0xff]  }
  0x3f   :  { %1221 = vmatpush2.bf16.msra.mxu0 %v1812_v2  ;;  %v1907_v2 = vld [vmem:[%s2659_s1 + $0x12c] ss:$16 sps:$4 sm:$0xff]  }
  0x40   :  { %1262 = vmatpush2.bf16.msra.mxu1 %v1813_v3  ;;  %1272 = vmatprep.subr.bf16.mxu0 %v1820_v4  ;;  %v1902_v3 = vld [vmem:[%s2659_s1 + $0x520] ss:$16 sps:$4 sm:$0xff]   ;;  %v1905_v4 = vld [vmem:[%s2659_s1 + $0x128] ss:$16 sps:$4 sm:$0xff]  }
  0x41   :  { %1313 = vmatprep.subr.bf16.mxu1 %v1823_v5  ;;  %v1910_v5 = vld [vmem:[%s2659_s1 + $0x504] ss:$16 sps:$4 sm:$0xff]  }
  0x42   :  { %1223 = vmatmul.mubr.bf16.vlgmr.msra.gmra.mxu0 %v2242_v6 }
  0x43   :  { %1264 = vmatmul.mubr.bf16.vlgmr.msra.gmra.mxu1 %v2244_v7  ;;  %1273 = vmatpush1.bf16.msra.mxu0 %v1818_v8  ;;  %v1913_v8 = vld [vmem:[%s2659_s1 + $0x10c] ss:$16 sps:$4 sm:$0xff]  }
  0x44   :  { %1314 = vmatpush1.bf16.msra.mxu1 %v1821_v9  ;;  %1274 = vmatprep.subr.bf16.mxu0 %v1826_v10  ;;  %v1908_v9 = vld [vmem:[%s2659_s1 + $0x500] ss:$16 sps:$4 sm:$0xff]   ;;  %v1911_v10 = vld [vmem:[%s2659_s1 + $0x108] ss:$16 sps:$4 sm:$0xff]  }
  0x45   :  { %1315 = vmatprep.subr.bf16.mxu1 %v1829_v11  ;;  %1345 = vmatprep.mubr.bf16.mxu1 %v2173_v47  ;;  %v1875_v47 = vld [vmem:[%s2659_s1 + $0x1c8] ss:$16 sps:$4 sm:$0xff]   ;;  %v1918_v11 = vld [vmem:[%s2659_s1 + $0x2ec] ss:$16 sps:$4 sm:$0xff]  }
  0x46   :  { %1304 = vmatprep.mubr.bf16.mxu0 %v2331_v34 }
  0x47   :  { %1275 = vmatpush1.bf16.msra.mxu0 %v1824_v12  ;;  %v1921_v12 = vld [vmem:[%s2659_s1 + $0x4ec] ss:$16 sps:$4 sm:$0xff]  }
  0x48   :  { %1316 = vmatpush1.bf16.msra.mxu1 %v1827_v13  ;;  %1276 = vmatprep.subr.bf16.mxu0 %v1832_v14  ;;  %v2453_v13 = vcombine.low %v2324_v32, %v2324_v32  ;;  %v1916_v14 = vld [vmem:[%s2659_s1 + $0x2e8] ss:$16 sps:$4 sm:$0xff]  }
  0x49   :  { %1317 = vmatprep.subr.bf16.mxu1 %v1835_v15  ;;  %v1919_v15 = vld [vmem:[%s2659_s1 + $0x4e8] ss:$16 sps:$4 sm:$0xff]  }
  0x4a   :  { %v1946_v32 = vld [vmem:[%s2659_s1 + $0x248] ss:$16 sps:$4 sm:$0xff]  }
  0x4b   :  { %1277 = vmatpush1.bf16.msra.mxu0 %v1830_v16  ;;  %v1924_v16 = vld [vmem:[%s2659_s1 + $0x2cc] ss:$16 sps:$4 sm:$0xff]  }
  0x4c   :  { %1318 = vmatpush1.bf16.msra.mxu1 %v1833_v17  ;;  %1278 = vmatprep.subr.bf16.mxu0 %v1838_v18  ;;  %v1927_v17 = vld [vmem:[%s2659_s1 + $0x4cc] ss:$16 sps:$4 sm:$0xff]   ;;  %v1922_v18 = vld [vmem:[%s2659_s1 + $0x2c8] ss:$16 sps:$4 sm:$0xff]  }
  0x4d   :  { %1319 = vmatprep.subr.bf16.mxu1 %v1841_v19  ;;  %v1925_v19 = vld [vmem:[%s2659_s1 + $0x4c8] ss:$16 sps:$4 sm:$0xff]  }
  0x4f   :  { %1279 = vmatpush1.bf16.msra.mxu0 %v1836_v20  ;;  %v1930_v20 = vld [vmem:[%s2659_s1 + $0x2ac] ss:$16 sps:$4 sm:$0xff]  }
  0x50   :  { %1320 = vmatpush1.bf16.msra.mxu1 %v1839_v21  ;;  %1280 = vmatprep.subr.bf16.mxu0 %v1844_v22  ;;  %v1928_v21 = vld [vmem:[%s2659_s1 + $0x2a8] ss:$16 sps:$4 sm:$0xff]  }
  0x51   :  { %1321 = vmatprep.subr.bf16.mxu1 %v1847_v23  ;;  %v1931_v22 = vld [vmem:[%s2659_s1 + $0x4a8] ss:$16 sps:$4 sm:$0xff]   ;;  %v1936_v23 = vld [vmem:[%s2659_s1 + $0x28c] ss:$16 sps:$4 sm:$0xff]  }
  0x53   :  { %1281 = vmatpush1.bf16.msra.mxu0 %v1842_v24  ;;  %v1934_v24 = vld [vmem:[%s2659_s1 + $0x288] ss:$16 sps:$4 sm:$0xff]  }
  0x54   :  { %1322 = vmatpush1.bf16.msra.mxu1 %v1845_v25  ;;  %1282 = vmatprep.subr.bf16.mxu0 %v1850_v26  ;;  %v1937_v25 = vld [vmem:[%s2659_s1 + $0x488] ss:$16 sps:$4 sm:$0xff]   ;;  %v1942_v26 = vld [vmem:[%s2659_s1 + $0x26c] ss:$16 sps:$4 sm:$0xff]  }
  0x55   :  { %1323 = vmatprep.subr.bf16.mxu1 %v1853_v27  ;;  %v1945_v27 = vld [vmem:[%s2659_s1 + $0x46c] ss:$16 sps:$4 sm:$0xff]  }
  0x57   :  { %1283 = vmatpush1.bf16.msra.mxu0 %v1848_v28  ;;  %v1940_v28 = vld [vmem:[%s2659_s1 + $0x268] ss:$16 sps:$4 sm:$0xff]  }
  0x58   :  { %1324 = vmatpush1.bf16.msra.mxu1 %v1851_v29  ;;  %1284 = vmatprep.subr.bf16.mxu0 %v1856_v30  ;;  %v1943_v29 = vld [vmem:[%s2659_s1 + $0x468] ss:$16 sps:$4 sm:$0xff]   ;;  %v1948_v30 = vld [vmem:[%s2659_s1 + $0x24c] ss:$16 sps:$4 sm:$0xff]  }
  0x59   :  { %1325 = vmatprep.subr.bf16.mxu1 %v1859_v31  ;;  %v1951_v31 = vld [vmem:[%s2659_s1 + $0x44c] ss:$16 sps:$4 sm:$0xff]  }
  0x5b   :  { %1285 = vmatpush1.bf16.msra.mxu0 %v1854_v33  ;;  %v1949_v33 = vld [vmem:[%s2659_s1 + $0x448] ss:$16 sps:$4 sm:$0xff]  }
  0x5c   :  { %1326 = vmatpush1.bf16.msra.mxu1 %v1857_v35  ;;  %1286 = vmatprep.subr.bf16.mxu0 %v1862_v36  ;;  %v1957_v35 = vld [vmem:[%s2659_s1 + $0x42c] ss:$16 sps:$4 sm:$0xff]   ;;  %v1952_v36 = vld [vmem:[%s2659_s1 + $0x228] ss:$16 sps:$4 sm:$0xff]  }
  0x5d   :  { %1327 = vmatprep.subr.bf16.mxu1 %v1865_v37  ;;  %v1955_v37 = vld [vmem:[%s2659_s1 + $0x428] ss:$16 sps:$4 sm:$0xff]  }
  0x5f   :  { %1287 = vmatpush1.bf16.msra.mxu0 %v1860_v38  ;;  %v1960_v38 = vld [vmem:[%s2659_s1 + $0x20c] ss:$16 sps:$4 sm:$0xff]  }
  0x60   :  { %1328 = vmatpush1.bf16.msra.mxu1 %v1863_v39  ;;  %1288 = vmatprep.subr.bf16.mxu0 %v1868_v40  ;;  %v1963_v39 = vld [vmem:[%s2659_s1 + $0x40c] ss:$16 sps:$4 sm:$0xff]   ;;  %v1958_v40 = vld [vmem:[%s2659_s1 + $0x208] ss:$16 sps:$4 sm:$0xff]  }
  0x61   :  { %1329 = vmatprep.subr.bf16.mxu1 %v1871_v41  ;;  %v1961_v41 = vld [vmem:[%s2659_s1 + $0x408] ss:$16 sps:$4 sm:$0xff]  }
  0x63   :  { %1289 = vmatpush2.bf16.msra.mxu0 %v1866_v42  ;;  %v1966_v42 = vld [vmem:[%s2659_s1 + $0x3ec] ss:$16 sps:$4 sm:$0xff]  }
  0x64   :  { %1330 = vmatpush2.bf16.msra.mxu1 %v1869_v43  ;;  %1290 = vmatprep.subr.bf16.mxu0 %v1874_v44  ;;  %v1969_v43 = vld [vmem:[%s2659_s1 + $0x5ec] ss:$16 sps:$4 sm:$0xff]   ;;  %v1964_v44 = vld [vmem:[%s2659_s1 + $0x3e8] ss:$16 sps:$4 sm:$0xff]  }
  0x65   :  { %1331 = vmatprep.subr.bf16.mxu1 %v1877_v45  ;;  %v1967_v45 = vld [vmem:[%s2659_s1 + $0x5e8] ss:$16 sps:$4 sm:$0xff]  }
  0x67   :  { %1291 = vmatpush2.bf16.msra.mxu0 %v1872_v46  ;;  %v1972_v46 = vld [vmem:[%s2659_s1 + $0x3cc] ss:$16 sps:$4 sm:$0xff]  }
  0x68   :  { %1332 = vmatpush2.bf16.msra.mxu1 %v1875_v47  ;;  %1292 = vmatprep.subr.bf16.mxu0 %v1880_v48  ;;  %v1975_v47 = vld [vmem:[%s2659_s1 + $0x5cc] ss:$16 sps:$4 sm:$0xff]   ;;  %v1970_v48 = vld [vmem:[%s2659_s1 + $0x3c8] ss:$16 sps:$4 sm:$0xff]  }
  0x69   :  { %1333 = vmatprep.subr.bf16.mxu1 %v1883_v49  ;;  %v1973_v49 = vld [vmem:[%s2659_s1 + $0x5c8] ss:$16 sps:$4 sm:$0xff]  }
  0x6b   :  { %1293 = vmatpush2.bf16.msra.mxu0 %v1878_v50  ;;  %v1978_v50 = vld [vmem:[%s2659_s1 + $0x3ac] ss:$16 sps:$4 sm:$0xff]  }
  0x6c   :  { %1334 = vmatpush2.bf16.msra.mxu1 %v1881_v52  ;;  %1294 = vmatprep.subr.bf16.mxu0 %v1886_v53  ;;  %v1981_v52 = vld [vmem:[%s2659_s1 + $0x5ac] ss:$16 sps:$4 sm:$0xff]   ;;  %v1976_v53 = vld [vmem:[%s2659_s1 + $0x3a8] ss:$16 sps:$4 sm:$0xff]  }
  0x6d   :  { %1335 = vmatprep.subr.bf16.mxu1 %v1889_v54  ;;  %v1979_v54 = vld [vmem:[%s2659_s1 + $0x5a8] ss:$16 sps:$4 sm:$0xff]  }
  0x6f   :  { %1295 = vmatpush2.bf16.msra.mxu0 %v1884_v55  ;;  %v1984_v55 = vld [vmem:[%s2659_s1 + $0x38c] ss:$16 sps:$4 sm:$0xff]  }
  0x70   :  { %1336 = vmatpush2.bf16.msra.mxu1 %v1887_v56  ;;  %1296 = vmatprep.subr.bf16.mxu0 %v1892_v57  ;;  %v1987_v56 = vld [vmem:[%s2659_s1 + $0x58c] ss:$16 sps:$4 sm:$0xff]   ;;  %v1982_v57 = vld [vmem:[%s2659_s1 + $0x388] ss:$16 sps:$4 sm:$0xff]  }
  0x71   :  { %1337 = vmatprep.subr.bf16.mxu1 %v1895_v58  ;;  %v1985_v58 = vld [vmem:[%s2659_s1 + $0x588] ss:$16 sps:$4 sm:$0xff]  }
  0x73   :  { %1297 = vmatpush2.bf16.msra.mxu0 %v1890_v59  ;;  %v1990_v59 = vld [vmem:[%s2659_s1 + $0x36c] ss:$16 sps:$4 sm:$0xff]  }
  0x74   :  { %1338 = vmatpush2.bf16.msra.mxu1 %v1893_v60  ;;  %1298 = vmatprep.subr.bf16.mxu0 %v1898_v61  ;;  %v1993_v60 = vld [vmem:[%s2659_s1 + $0x56c] ss:$16 sps:$4 sm:$0xff]   ;;  %v1988_v61 = vld [vmem:[%s2659_s1 + $0x368] ss:$16 sps:$4 sm:$0xff]  }
  0x75   :  { %1339 = vmatprep.subr.bf16.mxu1 %v1901_v62  ;;  %v1991_v62 = vld [vmem:[%s2659_s1 + $0x568] ss:$16 sps:$4 sm:$0xff]  }
  0x77   :  { %1299 = vmatpush2.bf16.msra.mxu0 %v1896_v63  ;;  %v1996_v63 = vld [vmem:[%s2659_s1 + $0x34c] ss:$16 sps:$4 sm:$0xff]  }
  0x78   :  { %1340 = vmatpush2.bf16.msra.mxu1 %v1899_v0  ;;  %1300 = vmatprep.subr.bf16.mxu0 %v1904_v1  ;;  %v1999_v0 = vld [vmem:[%s2659_s1 + $0x54c] ss:$16 sps:$4 sm:$0xff]   ;;  %v1994_v1 = vld [vmem:[%s2659_s1 + $0x348] ss:$16 sps:$4 sm:$0xff]  }
  0x79   :  { %1341 = vmatprep.subr.bf16.mxu1 %v1907_v2  ;;  %v1997_v2 = vld [vmem:[%s2659_s1 + $0x548] ss:$16 sps:$4 sm:$0xff]  }
  0x7b   :  { %1301 = vmatpush2.bf16.msra.mxu0 %v1902_v3  ;;  %v2002_v3 = vld [vmem:[%s2659_s1 + $0x32c] ss:$16 sps:$4 sm:$0xff]  }
  0x7c   :  { %1342 = vmatpush2.bf16.msra.mxu1 %v1905_v4  ;;  %1302 = vmatprep.subr.bf16.mxu0 %v1910_v5  ;;  %v2005_v4 = vld [vmem:[%s2659_s1 + $0x52c] ss:$16 sps:$4 sm:$0xff]   ;;  %v2000_v5 = vld [vmem:[%s2659_s1 + $0x328] ss:$16 sps:$4 sm:$0xff]  }
  0x7d   :  { %1343 = vmatprep.subr.bf16.mxu1 %v1913_v8  ;;  %v2003_v8 = vld [vmem:[%s2659_s1 + $0x528] ss:$16 sps:$4 sm:$0xff]  }
  0x7f   :  { %1303 = vmatpush2.bf16.msra.mxu0 %v1908_v9  ;;  %v2008_v9 = vld [vmem:[%s2659_s1 + $0x30c] ss:$16 sps:$4 sm:$0xff]  }
  0x80   :  { %1344 = vmatpush2.bf16.msra.mxu1 %v1911_v10  ;;  %1354 = vmatprep.subr.bf16.mxu0 %v1918_v11  ;;  %v2011_v10 = vld [vmem:[%s2659_s1 + $0x50c] ss:$16 sps:$4 sm:$0xff]   ;;  %v2006_v11 = vld [vmem:[%s2659_s1 + $0x308] ss:$16 sps:$4 sm:$0xff]  }
  0x81   :  { %1395 = vmatprep.subr.bf16.mxu1 %v1921_v12  ;;  %v2009_v12 = vld [vmem:[%s2659_s1 + $0x508] ss:$16 sps:$4 sm:$0xff]  }
  0x82   :  { %1305 = vmatmul.mubr.bf16.vlgmr.msra.gmra.mxu0 %v2453_v13 }
  0x83   :  { %1346 = vmatmul.mubr.bf16.vlgmr.msra.gmra.mxu1 %v2242_v6  ;;  %1355 = vmatpush1.bf16.msra.mxu0 %v1916_v14  ;;  %v1933_v6 = vld [vmem:[%s2659_s1 + $0x4ac] ss:$16 sps:$4 sm:$0xff]  }
  0x84   :  { %1396 = vmatpush1.bf16.msra.mxu1 %v1919_v15  ;;  %1356 = vmatprep.subr.bf16.mxu0 %v1924_v16 }
  0x85   :  { %1397 = vmatprep.subr.bf16.mxu1 %v1927_v17  ;;  %1386 = vmatprep.mubr.bf16.mxu0 %v2184_v51  ;;  %v1939_v51 = vld [vmem:[%s2659_s1 + $0x48c] ss:$16 sps:$4 sm:$0xff]  }
  0x86   :  { %1427 = vmatprep.mubr.bf16.mxu1 %v2331_v34  ;;  %v1954_v34 = vld [vmem:[%s2659_s1 + $0x22c] ss:$16 sps:$4 sm:$0xff]  }
  0x87   :  { %1357 = vmatpush1.bf16.msra.mxu0 %v1922_v18 }
  0x88   :  { %1398 = vmatpush1.bf16.msra.mxu1 %v1925_v19  ;;  %1358 = vmatprep.subr.bf16.mxu0 %v1930_v20 }
  0x89   :  { %1399 = vmatprep.subr.bf16.mxu1 %v1933_v6 }
  0x8b   :  { %1359 = vmatpush1.bf16.msra.mxu0 %v1928_v21 }
  0x8c   :  { %1400 = vmatpush1.bf16.msra.mxu1 %v1931_v22  ;;  %1360 = vmatprep.subr.bf16.mxu0 %v1936_v23  ;;  %v1438_v22 = vlaneseq }
  0x8d   :  { %1401 = vmatprep.subr.bf16.mxu1 %v1939_v51 }
  0x8e   :  { %v1439_v23 = vshrl.u32 %v1438_v22, 7 }
  0x8f   :  { %1361 = vmatpush1.bf16.msra.mxu0 %v1934_v24  ;;  %v1436_v24 = vld [vmem:[%s2661_s2] ss:$8 sm:$0xf] }
  0x90   :  { %1402 = vmatpush1.bf16.msra.mxu1 %v1937_v25  ;;  %1362 = vmatprep.subr.bf16.mxu0 %v1942_v26  ;;  %v1440_v51 = vsub.s32 0, %v1439_v23  ;;  %v1444_v25 = vsub.s32 1, %v1439_v23 }
  0x91   :  { %1403 = vmatprep.subr.bf16.mxu1 %v1945_v27 }
  0x93   :  { %1363 = vmatpush1.bf16.msra.mxu0 %v1940_v28 }
  0x94   :  { %1404 = vmatpush1.bf16.msra.mxu1 %v1943_v29  ;;  %1364 = vmatprep.subr.bf16.mxu0 %v1948_v30 }
  0x95   :  { %1405 = vmatprep.subr.bf16.mxu1 %v1951_v31  ;;  %v1445_v31 = vrot.slane %v1436_v24, %v1444_v25 }
  0x97   :  { %1365 = vmatpush1.bf16.msra.mxu0 %v1946_v32 }
  0x98   :  { %1406 = vmatpush1.bf16.msra.mxu1 %v1949_v33  ;;  %1366 = vmatprep.subr.bf16.mxu0 %v1954_v34 }
  0x99   :  { %1407 = vmatprep.subr.bf16.mxu1 %v1957_v35 }
  0x9b   :  { %1367 = vmatpush1.bf16.msra.mxu0 %v1952_v36 }
  0x9c   :  { %1408 = vmatpush1.bf16.msra.mxu1 %v1955_v37  ;;  %1368 = vmatprep.subr.bf16.mxu0 %v1960_v38 }
  0x9d   :  { %1409 = vmatprep.subr.bf16.mxu1 %v1963_v39 }
  0x9f   :  { %1369 = vmatpush1.bf16.msra.mxu0 %v1958_v40 }
  0xa0   :  { %1410 = vmatpush1.bf16.msra.mxu1 %v1961_v41  ;;  %1370 = vmatprep.subr.bf16.mxu0 %v1966_v42 }
  0xa1   :  { %1411 = vmatprep.subr.bf16.mxu1 %v1969_v43 }
  0xa3   :  { %1371 = vmatpush2.bf16.msra.mxu0 %v1964_v44 }
  0xa4   :  { %1412 = vmatpush2.bf16.msra.mxu1 %v1967_v45  ;;  %1372 = vmatprep.subr.bf16.mxu0 %v1972_v46 }
  0xa5   :  { %1413 = vmatprep.subr.bf16.mxu1 %v1975_v47  ;;  %v1448_v47 = vsub.s32 2, %v1439_v23 }
  0xa7   :  { %1373 = vmatpush2.bf16.msra.mxu0 %v1970_v48  ;;  %v1452_v48 = vsub.s32 3, %v1439_v23 }
  0xa8   :  { %1414 = vmatpush2.bf16.msra.mxu1 %v1973_v49  ;;  %1374 = vmatprep.subr.bf16.mxu0 %v1978_v50 }
  0xa9   :  { %1415 = vmatprep.subr.bf16.mxu1 %v1981_v52 }
  0xab   :  { %1375 = vmatpush2.bf16.msra.mxu0 %v1976_v53  ;;  %v1449_v53 = vrot.slane %v1436_v24, %v1448_v47 }
  0xac   :  { %1416 = vmatpush2.bf16.msra.mxu1 %v1979_v54  ;;  %1376 = vmatprep.subr.bf16.mxu0 %v1984_v55 }
  0xad   :  { %1417 = vmatprep.subr.bf16.mxu1 %v1987_v56 }
  0xaf   :  { %1377 = vmatpush2.bf16.msra.mxu0 %v1982_v57 }
  0xb0   :  { %1418 = vmatpush2.bf16.msra.mxu1 %v1985_v58  ;;  %1378 = vmatprep.subr.bf16.mxu0 %v1990_v59  ;;  %v1453_v59 = vrot.slane %v1436_v24, %v1452_v48 }
  0xb1   :  { %1419 = vmatprep.subr.bf16.mxu1 %v1993_v60 }
  0xb3   :  { %1379 = vmatpush2.bf16.msra.mxu0 %v1988_v61 }
  0xb4   :  { %1420 = vmatpush2.bf16.msra.mxu1 %v1991_v62  ;;  %1380 = vmatprep.subr.bf16.mxu0 %v1996_v63 }
  0xb5   :  { %1421 = vmatprep.subr.bf16.mxu1 %v1999_v0 }
  0xb7   :  { %1381 = vmatpush2.bf16.msra.mxu0 %v1994_v1 }
  0xb8   :  { %1422 = vmatpush2.bf16.msra.mxu1 %v1997_v2  ;;  %1382 = vmatprep.subr.bf16.mxu0 %v2002_v3 }
  0xb9   :  { %1423 = vmatprep.subr.bf16.mxu1 %v2005_v4 }
  0xbb   :  { %1383 = vmatpush2.bf16.msra.mxu0 %v2000_v5 }
  0xbc   :  { %1424 = vmatpush2.bf16.msra.mxu1 %v2003_v8  ;;  %1384 = vmatprep.subr.bf16.mxu0 %v2008_v9 }
  0xbd   :  { %1425 = vmatprep.subr.bf16.mxu1 %v2011_v10 }
  0xbf   :  { %1385 = vmatpush2.bf16.msra.mxu0 %v2006_v11 }
  0xc0   :  { %1426 = vmatpush2.bf16.msra.mxu1 %v2009_v12 }
  0xc2   :  { %1387 = vmatmul.mubr.bf16.vlgmr.msra.gmra.mxu0 %v2244_v7  ;;  %v1713_v7 = vld [vmem:[%s2661_s2 + $0x1] ss:$8 sm:$0xf] }
  0xc3   :  { %1428 = vmatmul.mubr.bf16.vlgmr.msra.gmra.mxu1 %v2453_v13  ;;  %v1441_v13 = vrot.slane %v1436_v24, %v1440_v51  ;;  %v1468_v30 = vrot.slane %v1713_v7, %v1440_v51  ;;  %v1472_v36 = vrot.slane %v1713_v7, %v1444_v25  ;;  %v1476_v57 = vrot.slane %v1713_v7, %v1448_v47 }
  0xc4   :  { %v1480_v0 = vrot.slane %v1713_v7, %v1452_v48 }
 0x102   :  { %v1224_v14 = vpop.f32.mrf.mxu0 }
 0x103   :  { %v1265_v15 = vpop.f32.mrf.mxu1 }
 0x104   :  { %v1266_v16 = vadd.f32 %v1265_v15, %v1224_v14  ;;  %v1226_v17 = vpop.f32.mrf.mxu0 }
 0x105   :  { %v1267_v18 = vpop.f32.mrf.mxu1 }
 0x106   :  { %v1228_v19 = vpop.f32.mrf.mxu0  ;;  %v1268_v28 = vadd.f32 %v1267_v18, %v1226_v17 }
 0x107   :  { %v1269_v20 = vpop.f32.mrf.mxu1 }
 0x108   :  { %v1229_v6 = vpop.f32.mrf.mxu0 }
 0x109   :  { %v1270_v21 = vpop.f32.mrf.mxu1 }
 0x142   :  { %v1306_v26 = vpop.f32.mrf.mxu0 }
 0x143   :  { %v1347_v27 = vpop.f32.mrf.mxu1  ;;  %v1307_v29 = vadd.f32 %v1306_v26, %v1266_v16 }
 0x144   :  { %v1308_v32 = vpop.f32.mrf.mxu0 }
 0x145   :  { %v1349_v33 = vpop.f32.mrf.mxu1  ;;  %v1458_v34 = vmul.f32 %v1441_v13, %v1307_v29  ;;  %v1309_v35 = vadd.f32 %v1308_v32, %v1268_v28 }
 0x146   :  { %v1310_v37 = vpop.f32.mrf.mxu0 }
 0x147   :  { %v1351_v38 = vpop.f32.mrf.mxu1  ;;  %v1485_v39 = vadd.f32 %v1468_v30, %v1458_v34  ;;  %v1459_v40 = vmul.f32 %v1445_v31, %v1309_v35 }
 0x148   :  { %v1311_v41 = vpop.f32.mrf.mxu0 }
 0x149   :  { %v1352_v42 = vpop.f32.mrf.mxu1  ;;  %v1486_v43 = vadd.f32 %v1472_v36, %v1459_v40  ;;  %v1489_v44 = vmax.f32 %v1485_v39, 0.0 }
 0x14b   :  { %v1490_v45 = vmax.f32 %v1486_v43, 0.0 }
 0x14d   :  { %v1716_v46 = vpack.c.bf16 %v1490_v45, %v1489_v44 }
 0x14f   :  { %1509 = vst [vmem:[%s2662_s3] sm:$0xff] %v1716_v46 }
 0x182   :  { %v1388_v49 = vpop.f32.mrf.mxu0 }
 0x183   :  { %v1429_v50 = vpop.f32.mrf.mxu1  ;;  %v1389_v52 = vadd.f32 %v1388_v49, %v1347_v27 }
 0x184   :  { %v1390_v54 = vpop.f32.mrf.mxu0 }
 0x185   :  { %v1431_v55 = vpop.f32.mrf.mxu1  ;;  %v1430_v56 = vadd.f32 %v1429_v50, %v1389_v52  ;;  %v1391_v58 = vadd.f32 %v1390_v54, %v1349_v33 }
 0x186   :  { %v1392_v60 = vpop.f32.mrf.mxu0 }
 0x187   :  { %v1433_v61 = vpop.f32.mrf.mxu1  ;;  %v1460_v62 = vmul.f32 %v1449_v53, %v1430_v56  ;;  %v1432_v63 = vadd.f32 %v1431_v55, %v1391_v58 }
 0x188   :  { %v1393_v1 = vpop.f32.mrf.mxu0 }
 0x189   :  { %v1434_v2 = vpop.f32.mrf.mxu1  ;;  %v1487_v3 = vadd.f32 %v1476_v57, %v1460_v62  ;;  %v1461_v4 = vmul.f32 %v1453_v59, %v1432_v63 }
 0x18b   :  { %v1488_v5 = vadd.f32 %v1480_v0, %v1461_v4  ;;  %v1491_v8 = vmax.f32 %v1487_v3, 0.0 }
 0x18d   :  { %v1492_v9 = vmax.f32 %v1488_v5, 0.0 }
 0x18f   :  { %v1717_v10 = vpack.c.bf16 %v1492_v9, %v1491_v8 }
 0x191   :  { %1510 = vst [vmem:[%s2662_s3 + $0x8] sm:$0xff] %v1717_v10 }

// kernel: resnet1d_forward.25
= control target key start
LH: loop header
LB: loop body
LE: loop exit
PB: predicated region body
PF: predicated region fallthrough
CT: control target
= control target key end

     0   :  { %v110_v30 = vlaneseq  ;;  %vm40_vm0 = vcmask 1043456   ;;  %s819_s0 = inlined_call_operand.vmem [shape: bf16[2,4,512], index: 0, kind: input, shape index: {}]   ;;  %s820_s1 = inlined_call_operand.vmem [shape: bf16[512,128], index: 1, kind: input, shape index: {}]   ;;  %s821_s2 = inlined_call_operand.vmem [shape: f32[8,128], index: 2, kind: input, shape index: {}]   ;;  %s822_s3 = inlined_call_operand.hbm [shape: f32[2,128], index: 3, kind: output, shape index: {}]  }
   0x1   :  { %v621_v0 = vld [vmem:[%s820_s1 + $0x78] sm:$0xff]   ;;  %v625_v4 = vld [vmem:[%s820_s1 + $0x70] sm:$0xff]   ;;  %v629_v8 = vld [vmem:[%s820_s1 + $0x68] sm:$0xff]  }
   0x2   :  { %v622_v1 = vld [vmem:[%s820_s1 + $0x38] sm:$0xff]   ;;  %575 = vmatprep.subr.bf16.mxu0 %v621_v0  ;;  %v626_v5 = vld [vmem:[%s820_s1 + $0x30] sm:$0xff]   ;;  %v630_v9 = vld [vmem:[%s820_s1 + $0x28] sm:$0xff]  }
   0x3   :  { %v623_v2 = vld [vmem:[%s820_s1 + $0xf8] sm:$0xff]   ;;  %576 = vmatpush3.bf16.msra.mxu0 %v622_v1  ;;  %v627_v6 = vld [vmem:[%s820_s1 + $0xf0] sm:$0xff]   ;;  %v631_v10 = vld [vmem:[%s820_s1 + $0xe8] sm:$0xff]  }
   0x4   :  { %v624_v3 = vld [vmem:[%s820_s1 + $0xb8] sm:$0xff]   ;;  %597 = vmatprep.subr.bf16.mxu1 %v623_v2  ;;  %577 = vmatprep.subr.bf16.mxu0 %v625_v4  ;;  %v628_v7 = vld [vmem:[%s820_s1 + $0xb0] sm:$0xff]   ;;  %v632_v11 = vld [vmem:[%s820_s1 + $0xa8] sm:$0xff]  }
   0x5   :  { %598 = vmatpush3.bf16.msra.mxu1 %v624_v3  ;;  %v633_v12 = vld [vmem:[%s820_s1 + $0x60] sm:$0xff]   ;;  %v637_v16 = vld [vmem:[%s820_s1 + $0x58] sm:$0xff]   ;;  %v641_v20 = vld [vmem:[%s820_s1 + $0x50] sm:$0xff]  }
   0x6   :  { %599 = vmatprep.subr.bf16.mxu1 %v627_v6  ;;  %v634_v13 = vld [vmem:[%s820_s1 + $0x20] sm:$0xff]   ;;  %v638_v17 = vld [vmem:[%s820_s1 + $0x18] sm:$0xff]   ;;  %v642_v21 = vld [vmem:[%s820_s1 + $0x10] sm:$0xff]  }
   0x7   :  { %578 = vmatpush3.bf16.msra.mxu0 %v626_v5  ;;  %v635_v14 = vld [vmem:[%s820_s1 + $0xe0] sm:$0xff]   ;;  %v639_v18 = vld [vmem:[%s820_s1 + $0xd8] sm:$0xff]   ;;  %v643_v22 = vld [vmem:[%s820_s1 + $0xd0] sm:$0xff]  }
   0x8   :  { %579 = vmatprep.subr.bf16.mxu0 %v629_v8  ;;  %v636_v15 = vld [vmem:[%s820_s1 + $0xa0] sm:$0xff]   ;;  %v640_v19 = vld [vmem:[%s820_s1 + $0x98] sm:$0xff]   ;;  %v644_v23 = vld [vmem:[%s820_s1 + $0x90] sm:$0xff]  }
   0x9   :  { %600 = vmatpush3.bf16.msra.mxu1 %v628_v7  ;;  %v645_v24 = vld [vmem:[%s820_s1 + $0x48] sm:$0xff]   ;;  %v649_v28 = vld [vmem:[%s820_s1 + $0x40] sm:$0xff]  }
   0xa   :  { %601 = vmatprep.subr.bf16.mxu1 %v631_v10  ;;  %v646_v25 = vld [vmem:[%s820_s1 + $0x8] sm:$0xff]   ;;  %v650_v29 = vld [vmem:[%s820_s1] sm:$0xff]  }
   0xb   :  { %580 = vmatpush3.bf16.msra.mxu0 %v630_v9  ;;  %v647_v26 = vld [vmem:[%s820_s1 + $0xc8] sm:$0xff]   ;;  %v651_v31 = vld [vmem:[%s820_s1 + $0xc0] sm:$0xff]  }
   0xc   :  { %581 = vmatprep.subr.bf16.mxu0 %v633_v12  ;;  %v648_v27 = vld [vmem:[%s820_s1 + $0x88] sm:$0xff]   ;;  %v22_v32 = vld [vmem:[%s819_s0] sm:$0xff] }
   0xd   :  { %602 = vmatpush3.bf16.msra.mxu1 %v632_v11  ;;  %v23_v33 = vld [vmem:[%s819_s0 + $0x8] sm:$0xff]  ;;  %v24_v34 = vunpack.c.l.bf16 %v22_v32  ;;  %v25_v35 = vunpack.c.h.bf16 %v22_v32  ;;  %v652_v38 = vld [vmem:[%s820_s1 + $0x80] sm:$0xff]  }
   0xe   :  { %603 = vmatprep.subr.bf16.mxu1 %v635_v14  ;;  %v26_v36 = vunpack.c.l.bf16 %v23_v33  ;;  %v27_v37 = vunpack.c.h.bf16 %v23_v33 }
   0xf   :  { %582 = vmatpush3.bf16.msra.mxu0 %v634_v13 }
  0x10   :  { %583 = vmatprep.subr.bf16.mxu0 %v637_v16 }
  0x11   :  { %604 = vmatpush3.bf16.msra.mxu1 %v636_v15 }
  0x12   :  { %605 = vmatprep.subr.bf16.mxu1 %v639_v18 }
  0x13   :  { %584 = vmatpush3.bf16.msra.mxu0 %v638_v17 }
  0x14   :  { %585 = vmatprep.subr.bf16.mxu0 %v641_v20 }
  0x15   :  { %606 = vmatpush3.bf16.msra.mxu1 %v640_v19 }
  0x16   :  { %607 = vmatprep.subr.bf16.mxu1 %v643_v22 }
  0x17   :  { %586 = vmatpush3.bf16.msra.mxu0 %v642_v21 }
  0x18   :  { %587 = vmatprep.subr.bf16.mxu0 %v645_v24 }
  0x19   :  { %608 = vmatpush3.bf16.msra.mxu1 %v644_v23 }
  0x1a   :  { %609 = vmatprep.subr.bf16.mxu1 %v647_v26 }
  0x1b   :  { %588 = vmatpush3.bf16.msra.mxu0 %v646_v25 }
  0x1c   :  { %589 = vmatprep.subr.bf16.mxu0 %v649_v28 }
  0x1d   :  { %610 = vmatpush3.bf16.msra.mxu1 %v648_v27 }
  0x1e   :  { %611 = vmatprep.subr.bf16.mxu1 %v651_v31 }
  0x1f   :  { %590 = vmatpush3.bf16.msra.mxu0 %v650_v29 }
  0x20   :  { %8 = vsyncpa [#allocation4], 0  ;;  %v675_v39 = vmov 1983009808   ;;  %v801_v41 = vshrl.u32 %v110_v30, 7  ;;  %v32_v42 = vcombine.high %v24_v34, %v24_v34  ;;  %v33_v43 = vcombine.high %v25_v35, %v25_v35  ;;  %s676_s26 = smov [#allocation3]  }
  0x21   :  { %v799_v40 = vunpack.c.l.s4 %v675_v39  ;;  %v34_v44 = vcombine.high %v26_v36, %v26_v36  ;;  %v35_v45 = vcombine.high %v27_v37, %v27_v37  ;;  %612 = vmatpush3.bf16.msra.mxu1 %v652_v38  ;;  %v41_v46 = vsel %vm40_vm0, %v24_v34, 0.0  ;;  %s534_s27 = sshll.u32 %s676_s26, 4  ;;  %s535_s27 = int_to_ptr.vmem [resolvable:$true] %s534_s27 }
  0x22   :  { %v55_v47 = vsel %vm40_vm0, %v25_v35, 0.0  ;;  %v69_v48 = vsel %vm40_vm0, %v26_v36, 0.0  ;;  %v83_v49 = vsel %vm40_vm0, %v27_v37, 0.0  ;;  %v42_v50 = vrot.slane %v41_v46, 4  ;;  %s653_s28 = scalar_lea.vmem %s535_s27, 32  ;;  %p658_p1 = scmp.lt.s32.totalorder %s535_s27, %s535_s27 }
  0x23   :  { %v48_v51 = vsel %vm40_vm0, %v32_v42, 0.0  ;;  %v56_v52 = vrot.slane %v55_v47, 4  ;;  %v62_v53 = vsel %vm40_vm0, %v33_v43, 0.0  ;;  %v70_v56 = vrot.slane %v69_v48, 4  ;;  %p654_p0 = scmp.ne.s32.totalorder %s535_s27, %s653_s28  ;;  %p659_p2 = scmp.lt.s32.totalorder %s653_s28, %s653_s28 }
  0x24   :  { %v49_v54 = vrot.slane %v48_v51, 4  ;;  %v63_v55 = vrot.slane %v62_v53, 4  ;;  %v76_v57 = vsel %vm40_vm0, %v34_v44, 0.0  ;;  %v43_v58 = vadd.f32 %v42_v50, %v41_v46 }
  0x25   :  { %v57_v59 = vadd.f32 %v56_v52, %v55_v47  ;;  %v77_v60 = vrot.slane %v76_v57, 4  ;;  %v84_v61 = vrot.slane %v83_v49, 4  ;;  %v71_v0 = vadd.f32 %v70_v56, %v69_v48  ;;  %p660_p3 = por %p659_p2, %p658_p1 }
  0x26   :  { %v50_v62 = vadd.f32 %v49_v54, %v48_v51  ;;  %v64_v63 = vadd.f32 %v63_v55, %v62_v53  ;;  %v90_v1 = vsel %vm40_vm0, %v35_v45, 0.0  ;;  %v44_v2 = vrot.slane %v43_v58, 2 }
  0x27   :  { %v58_v3 = vrot.slane %v57_v59, 2  ;;  %v78_v4 = vadd.f32 %v77_v60, %v76_v57  ;;  %v85_v5 = vadd.f32 %v84_v61, %v83_v49  ;;  %v72_v8 = vrot.slane %v71_v0, 2  ;;  %p661_p4 = pnand %p660_p3, %p654_p0 }
  0x28   :  { %v51_v6 = vrot.slane %v50_v62, 2  ;;  %v65_v7 = vrot.slane %v64_v63, 2  ;;  %v91_v9 = vrot.slane %v90_v1, 4  ;;  %v45_v10 = vadd.f32 %v44_v2, %v43_v58  ;;  %v542_v2 = vld [vmem:[%s821_s2] ss:$0 sm:$0xff] }
  0x29   :  { %v59_v11 = vadd.f32 %v58_v3, %v57_v59  ;;  %v79_v12 = vrot.slane %v78_v4, 2  ;;  %v86_v13 = vrot.slane %v85_v5, 2  ;;  %v73_v16 = vadd.f32 %v72_v8, %v71_v0 }
  0x2a   :  { %v52_v14 = vadd.f32 %v51_v6, %v50_v62  ;;  %v66_v15 = vadd.f32 %v65_v7, %v64_v63  ;;  %v92_v17 = vadd.f32 %v91_v9, %v90_v1  ;;  %v46_v18 = vrot.slane %v45_v10, 1 }
  0x2b   :  { %v60_v19 = vrot.slane %v59_v11, 1  ;;  %v80_v20 = vadd.f32 %v79_v12, %v78_v4  ;;  %v87_v21 = vadd.f32 %v86_v13, %v85_v5  ;;  %v74_v24 = vrot.slane %v73_v16, 1 }
  0x2c   :  { %v53_v22 = vrot.slane %v52_v14, 1  ;;  %v67_v23 = vrot.slane %v66_v15, 1  ;;  %v93_v25 = vrot.slane %v92_v17, 2  ;;  %v47_v26 = vadd.f32 %v46_v18, %v45_v10 }
  0x2d   :  { %v61_v27 = vadd.f32 %v60_v19, %v59_v11  ;;  %v81_v28 = vrot.slane %v80_v20, 1  ;;  %v88_v29 = vrot.slane %v87_v21, 1  ;;  %v75_v32 = vadd.f32 %v74_v24, %v73_v16 }
  0x2e   :  { %v54_v30 = vadd.f32 %v53_v22, %v52_v14  ;;  %v68_v31 = vadd.f32 %v67_v23, %v66_v15  ;;  %v94_v33 = vadd.f32 %v93_v25, %v92_v17  ;;  %v109_v35 = vunpack.c.0.s8 %v799_v40 }
  0x2f   :  { %v82_v34 = vadd.f32 %v81_v28, %v80_v20  ;;  %v89_v36 = vadd.f32 %v88_v29, %v87_v21  ;;  %vm144_vm1 = vcmask 1041409   ;;  %vm146_vm2 = vcmask 1043459  }
  0x30   :  { %v95_v37 = vrot.slane %v94_v33, 1  ;;  %v105_v38 = vcombine.low %v47_v26, %v54_v30  ;;  %v106_v39 = vcombine.low %v61_v27, %v68_v31  ;;  %v112_v42 = vsub.s32 %v109_v35, %v801_v41 }
  0x31   :  { %v122_v43 = vcombine.low %v75_v32, %v82_v34  ;;  %vm148_vm3 = vcmask 1045509   ;;  %vm150_vm4 = vcmask 1047559  }
  0x32   :  { %v96_v44 = vadd.f32 %v95_v37, %v94_v33  ;;  %v113_v45 = vrot.slane %v105_v38, %v112_v42  ;;  %v120_v46 = vrot.slane %v106_v39, %v112_v42 }
  0x33   :  { %v130_v48 = vrot.slane %v122_v43, %v112_v42 }
  0x34   :  { %v123_v47 = vcombine.low %v89_v36, %v96_v44  ;;  %v121_v50 = vcombine.low %v113_v45, %v120_v46 }
  0x36   :  { %v137_v49 = vrot.slane %v123_v47, %v112_v42 }
  0x38   :  { %v138_v51 = vcombine.low %v130_v48, %v137_v49 }
  0x3a   :  { %v143_v52 = vrot.slane %v138_v51, 7 }
  0x3c   :  { %v145_v40 = vsel %vm144_vm1, %v143_v52, %v121_v50 }
  0x3d   :  { %v147_v53 = vsel %vm146_vm2, %v143_v52, %v145_v40 }
  0x3e   :  { %v149_v54 = vsel %vm148_vm3, %v143_v52, %v147_v53 }
  0x3f   :  { %v151_v55 = vsel %vm150_vm4, %v143_v52, %v149_v54 }
  0x40   :  { %v159_v56 = vmul.f32 0.25, %v151_v55 }
  0x42   :  { %v168_v41 = vrot.slane %v159_v56, %v112_v42  ;;  %v161_v57 = vcombine.high %v159_v56, %v159_v56 }
  0x44   :  { %v176_v58 = vcombine.high %v168_v41, %v168_v41  ;;  %v175_v59 = vrot.slane %v161_v57, %v112_v42  ;;  %v182_v60 = vpack.c.bf16 %v168_v41, %v168_v41 }
  0x46   :  { %v183_v61 = vpack.c.bf16 %v176_v58, %v176_v58  ;;  %v177_v62 = vcombine.high %v175_v59, %v175_v59  ;;  %v184_v63 = vpack.c.bf16 %v175_v59, %v175_v59 }
  0x48   :  { %479 = vmatprep.mubr.bf16.mxu0 %v183_v61  ;;  %v185_v0 = vpack.c.bf16 %v177_v62, %v177_v62 }
  0x49   :  { %480 = vmatmul.mubr.bf16.vlgmr.msra.gmra.mxu0 %v182_v60 }
  0x4a   :  { %519 = vmatprep.mubr.bf16.mxu1 %v185_v0 }
  0x4b   :  { %520 = vmatmul.mubr.bf16.vlgmr.msra.gmra.mxu1 %v184_v63 }
 0x109   :  { %v591_v1 = vpop.f32.mrf.mxu0 }
 0x10b   :  { %v592_v3 = vpop.f32.mrf.mxu0  ;;  %v613_v4 = vpop.f32.mrf.mxu1 }
 0x10c   :  { %v593_v5 = vadd.f32 %v592_v3, %v591_v1 }
 0x10d   :  { %v594_v6 = vpop.f32.mrf.mxu0  ;;  %v614_v7 = vpop.f32.mrf.mxu1 }
 0x10e   :  { %v482_v8 = vadd.f32 %v593_v5, %v542_v2  ;;  %v615_v9 = vadd.f32 %v614_v7, %v613_v4 }
 0x10f   :  { %v595_v10 = vpop.f32.mrf.mxu0  ;;  %v616_v11 = vpop.f32.mrf.mxu1 }
 0x110   :  { %v522_v12 = vadd.f32 %v615_v9, %v482_v8 }
 0x111   :  { %v617_v13 = vpop.f32.mrf.mxu1 }
 0x112   :  { %527 = vst [vmem:[#allocation3] sm:$0x3] %v522_v12 }
 0x113   :  { %664 = shalt.err (!%p661_p4)
}
 0x114   :  { %537 = dma.vmem_to_hbm [thread:$0]  %s535_s27, 32, %s822_s3, [#allocation4]  }
 0x115   :  { %673 = dma.done.wait [#allocation4], 32  }
 0x116   :  { %674 = vsyncadd [#allocation4], 4294967264 }
 0x117   :  { %541 = vsyncpa [#allocation4], 1 }

// kernel: resnet1d_forward.24
= control target key start
LH: loop header
LB: loop body
LE: loop exit
PB: predicated region body
PF: predicated region fallthrough
CT: control target
= control target key end

     0   :  { %s5257_s1 = inlined_call_operand.vmem [shape: bf16[1536,512], index: 1, kind: input, shape index: {}]   ;;  %s5258_s0 = inlined_call_operand.vmem [shape: bf16[8,1536], index: 0, kind: input, shape index: {}]   ;;  %s5259_s2 = inlined_call_operand.vmem [shape: f32[8,512], index: 2, kind: input, shape index: {}]   ;;  %s5260_s3 = inlined_call_operand.vmem [shape: bf16[8,512], index: 3, kind: input, shape index: {}]   ;;  %s5261_s4 = inlined_call_operand.vmem [shape: bf16[8,512], index: 4, kind: output, shape index: {}]  }
   0x1   :  { %v3351_v0 = vld [vmem:[%s5257_s1 + $0xe4] ss:$16 sps:$4 sm:$0xff]   ;;  %v3355_v2 = vld [vmem:[%s5257_s1 + $0xe0] ss:$16 sps:$4 sm:$0xff]   ;;  %v18_v48 = vld [vmem:[%s5258_s0 + $0x8] sm:$0xff] }
   0x2   :  { %v3353_v1 = vld [vmem:[%s5257_s1 + $0x2e4] ss:$16 sps:$4 sm:$0xff]   ;;  %2369 = vmatprep.subr.bf16.mxu0 %v3351_v0  ;;  %v3356_v3 = vld [vmem:[%s5257_s1 + $0x2e0] ss:$16 sps:$4 sm:$0xff]   ;;  %v4116_v51 = vcombine.high %v18_v48, %v18_v48 }
   0x3   :  { %2410 = vmatprep.subr.bf16.mxu1 %v3353_v1  ;;  %v3357_v4 = vld [vmem:[%s5257_s1 + $0xc4] ss:$16 sps:$4 sm:$0xff]   ;;  %2370 = vmatpush1.bf16.msra.mxu0 %v3355_v2  ;;  %v3361_v6 = vld [vmem:[%s5257_s1 + $0xc0] ss:$16 sps:$4 sm:$0xff]  }
   0x4   :  { %2411 = vmatpush1.bf16.msra.mxu1 %v3356_v3  ;;  %v3359_v5 = vld [vmem:[%s5257_s1 + $0x2c4] ss:$16 sps:$4 sm:$0xff]   ;;  %2371 = vmatprep.subr.bf16.mxu0 %v3357_v4  ;;  %v3362_v7 = vld [vmem:[%s5257_s1 + $0x2c0] ss:$16 sps:$4 sm:$0xff]  }
   0x5   :  { %2412 = vmatprep.subr.bf16.mxu1 %v3359_v5  ;;  %v3363_v8 = vld [vmem:[%s5257_s1 + $0xa4] ss:$16 sps:$4 sm:$0xff]   ;;  %v3367_v10 = vld [vmem:[%s5257_s1 + $0xa0] ss:$16 sps:$4 sm:$0xff]   ;;  %2442 = vmatprep.mubr.bf16.mxu1 %v4116_v51 }
   0x6   :  { %v3365_v9 = vld [vmem:[%s5257_s1 + $0x2a4] ss:$16 sps:$4 sm:$0xff]   ;;  %v3368_v11 = vld [vmem:[%s5257_s1 + $0x2a0] ss:$16 sps:$4 sm:$0xff]  }
   0x7   :  { %2372 = vmatpush1.bf16.msra.mxu0 %v3361_v6  ;;  %v3369_v12 = vld [vmem:[%s5257_s1 + $0x84] ss:$16 sps:$4 sm:$0xff]   ;;  %v3373_v14 = vld [vmem:[%s5257_s1 + $0x80] ss:$16 sps:$4 sm:$0xff]  }
   0x8   :  { %2413 = vmatpush1.bf16.msra.mxu1 %v3362_v7  ;;  %2373 = vmatprep.subr.bf16.mxu0 %v3363_v8  ;;  %v3371_v13 = vld [vmem:[%s5257_s1 + $0x284] ss:$16 sps:$4 sm:$0xff]   ;;  %v3374_v15 = vld [vmem:[%s5257_s1 + $0x280] ss:$16 sps:$4 sm:$0xff]   ;;  %v4176_v7 = vcombine.low %v18_v48, %v18_v48 }
   0x9   :  { %2414 = vmatprep.subr.bf16.mxu1 %v3365_v9  ;;  %v3375_v16 = vld [vmem:[%s5257_s1 + $0x64] ss:$16 sps:$4 sm:$0xff]   ;;  %v3379_v18 = vld [vmem:[%s5257_s1 + $0x60] ss:$16 sps:$4 sm:$0xff]  }
   0xa   :  { %v3377_v17 = vld [vmem:[%s5257_s1 + $0x264] ss:$16 sps:$4 sm:$0xff]   ;;  %v3380_v19 = vld [vmem:[%s5257_s1 + $0x260] ss:$16 sps:$4 sm:$0xff]  }
   0xb   :  { %2374 = vmatpush1.bf16.msra.mxu0 %v3367_v10  ;;  %v3381_v20 = vld [vmem:[%s5257_s1 + $0x44] ss:$16 sps:$4 sm:$0xff]   ;;  %v3385_v22 = vld [vmem:[%s5257_s1 + $0x40] ss:$16 sps:$4 sm:$0xff]  }
   0xc   :  { %2415 = vmatpush1.bf16.msra.mxu1 %v3368_v11  ;;  %2375 = vmatprep.subr.bf16.mxu0 %v3369_v12  ;;  %v3383_v21 = vld [vmem:[%s5257_s1 + $0x244] ss:$16 sps:$4 sm:$0xff]   ;;  %v3386_v23 = vld [vmem:[%s5257_s1 + $0x240] ss:$16 sps:$4 sm:$0xff]  }
   0xd   :  { %2416 = vmatprep.subr.bf16.mxu1 %v3371_v13  ;;  %v3387_v24 = vld [vmem:[%s5257_s1 + $0x24] ss:$16 sps:$4 sm:$0xff]   ;;  %v3391_v26 = vld [vmem:[%s5257_s1 + $0x20] ss:$16 sps:$4 sm:$0xff]  }
   0xe   :  { %v3389_v25 = vld [vmem:[%s5257_s1 + $0x224] ss:$16 sps:$4 sm:$0xff]   ;;  %v3392_v27 = vld [vmem:[%s5257_s1 + $0x220] ss:$16 sps:$4 sm:$0xff]  }
   0xf   :  { %2376 = vmatpush1.bf16.msra.mxu0 %v3373_v14  ;;  %v3393_v28 = vld [vmem:[%s5257_s1 + $0x4] ss:$16 sps:$4 sm:$0xff]   ;;  %v3397_v30 = vld [vmem:[%s5257_s1] ss:$16 sps:$4 sm:$0xff]  }
  0x10   :  { %2417 = vmatpush1.bf16.msra.mxu1 %v3374_v15  ;;  %2377 = vmatprep.subr.bf16.mxu0 %v3375_v16  ;;  %v3395_v29 = vld [vmem:[%s5257_s1 + $0x204] ss:$16 sps:$4 sm:$0xff]   ;;  %v3398_v31 = vld [vmem:[%s5257_s1 + $0x200] ss:$16 sps:$4 sm:$0xff]  }
  0x11   :  { %2418 = vmatprep.subr.bf16.mxu1 %v3377_v17  ;;  %v3399_v32 = vld [vmem:[%s5257_s1 + $0x1e4] ss:$16 sps:$4 sm:$0xff]   ;;  %v3403_v34 = vld [vmem:[%s5257_s1 + $0x1e0] ss:$16 sps:$4 sm:$0xff]  }
  0x12   :  { %v3401_v33 = vld [vmem:[%s5257_s1 + $0x3e4] ss:$16 sps:$4 sm:$0xff]   ;;  %v3404_v35 = vld [vmem:[%s5257_s1 + $0x3e0] ss:$16 sps:$4 sm:$0xff]  }
  0x13   :  { %2378 = vmatpush1.bf16.msra.mxu0 %v3379_v18  ;;  %v3405_v36 = vld [vmem:[%s5257_s1 + $0x1c4] ss:$16 sps:$4 sm:$0xff]   ;;  %v3409_v38 = vld [vmem:[%s5257_s1 + $0x1c0] ss:$16 sps:$4 sm:$0xff]  }
  0x14   :  { %2419 = vmatpush1.bf16.msra.mxu1 %v3380_v19  ;;  %2379 = vmatprep.subr.bf16.mxu0 %v3381_v20  ;;  %v3407_v37 = vld [vmem:[%s5257_s1 + $0x3c4] ss:$16 sps:$4 sm:$0xff]   ;;  %v3410_v39 = vld [vmem:[%s5257_s1 + $0x3c0] ss:$16 sps:$4 sm:$0xff]  }
  0x15   :  { %2420 = vmatprep.subr.bf16.mxu1 %v3383_v21  ;;  %v3411_v40 = vld [vmem:[%s5257_s1 + $0x1a4] ss:$16 sps:$4 sm:$0xff]   ;;  %v3415_v42 = vld [vmem:[%s5257_s1 + $0x1a0] ss:$16 sps:$4 sm:$0xff]  }
  0x16   :  { %v3413_v41 = vld [vmem:[%s5257_s1 + $0x3a4] ss:$16 sps:$4 sm:$0xff]   ;;  %v3416_v43 = vld [vmem:[%s5257_s1 + $0x3a0] ss:$16 sps:$4 sm:$0xff]  }
  0x17   :  { %2380 = vmatpush1.bf16.msra.mxu0 %v3385_v22  ;;  %v3417_v44 = vld [vmem:[%s5257_s1 + $0x184] ss:$16 sps:$4 sm:$0xff]   ;;  %v3421_v49 = vld [vmem:[%s5257_s1 + $0x180] ss:$16 sps:$4 sm:$0xff]  }
  0x18   :  { %2421 = vmatpush1.bf16.msra.mxu1 %v3386_v23  ;;  %2381 = vmatprep.subr.bf16.mxu0 %v3387_v24  ;;  %v3419_v45 = vld [vmem:[%s5257_s1 + $0x384] ss:$16 sps:$4 sm:$0xff]   ;;  %v3422_v50 = vld [vmem:[%s5257_s1 + $0x380] ss:$16 sps:$4 sm:$0xff]  }
  0x19   :  { %2422 = vmatprep.subr.bf16.mxu1 %v3389_v25  ;;  %v17_v46 = vld [vmem:[%s5258_s0] sm:$0xff] }
  0x1a   :  { %v4105_v47 = vcombine.high %v17_v46, %v17_v46  ;;  %v3423_v52 = vld [vmem:[%s5257_s1 + $0x164] ss:$16 sps:$4 sm:$0xff]   ;;  %v3427_v54 = vld [vmem:[%s5257_s1 + $0x160] ss:$16 sps:$4 sm:$0xff]   ;;  %v4174_v6 = vcombine.low %v17_v46, %v17_v46 }
  0x1b   :  { %2382 = vmatpush1.bf16.msra.mxu0 %v3391_v26  ;;  %v3425_v53 = vld [vmem:[%s5257_s1 + $0x364] ss:$16 sps:$4 sm:$0xff]   ;;  %v3428_v55 = vld [vmem:[%s5257_s1 + $0x360] ss:$16 sps:$4 sm:$0xff]  }
  0x1c   :  { %2423 = vmatpush1.bf16.msra.mxu1 %v3392_v27  ;;  %2383 = vmatprep.subr.bf16.mxu0 %v3393_v28  ;;  %v3429_v56 = vld [vmem:[%s5257_s1 + $0x144] ss:$16 sps:$4 sm:$0xff]   ;;  %v3433_v58 = vld [vmem:[%s5257_s1 + $0x140] ss:$16 sps:$4 sm:$0xff]  }
  0x1d   :  { %2424 = vmatprep.subr.bf16.mxu1 %v3395_v29  ;;  %2401 = vmatprep.mubr.bf16.mxu0 %v4105_v47  ;;  %v3431_v57 = vld [vmem:[%s5257_s1 + $0x344] ss:$16 sps:$4 sm:$0xff]   ;;  %v3434_v59 = vld [vmem:[%s5257_s1 + $0x340] ss:$16 sps:$4 sm:$0xff]  }
  0x1e   :  { %v3435_v60 = vld [vmem:[%s5257_s1 + $0x124] ss:$16 sps:$4 sm:$0xff]   ;;  %v3439_v62 = vld [vmem:[%s5257_s1 + $0x120] ss:$16 sps:$4 sm:$0xff]  }
  0x1f   :  { %2384 = vmatpush1.bf16.msra.mxu0 %v3397_v30  ;;  %v3437_v61 = vld [vmem:[%s5257_s1 + $0x324] ss:$16 sps:$4 sm:$0xff]   ;;  %v3440_v63 = vld [vmem:[%s5257_s1 + $0x320] ss:$16 sps:$4 sm:$0xff]  }
  0x20   :  { %2425 = vmatpush1.bf16.msra.mxu1 %v3398_v31  ;;  %2385 = vmatprep.subr.bf16.mxu0 %v3399_v32  ;;  %v3441_v0 = vld [vmem:[%s5257_s1 + $0x104] ss:$16 sps:$4 sm:$0xff]   ;;  %v3445_v2 = vld [vmem:[%s5257_s1 + $0x100] ss:$16 sps:$4 sm:$0xff]  }
  0x21   :  { %2426 = vmatprep.subr.bf16.mxu1 %v3401_v33  ;;  %v3443_v1 = vld [vmem:[%s5257_s1 + $0x304] ss:$16 sps:$4 sm:$0xff]   ;;  %v3446_v3 = vld [vmem:[%s5257_s1 + $0x300] ss:$16 sps:$4 sm:$0xff]   ;;  %v4260_v33 = vld [vmem:[%s5258_s0 + $0x18] sm:$0xff] }
  0x22   :  { %v3453_v4 = vld [vmem:[%s5257_s1 + $0x4e4] ss:$16 sps:$4 sm:$0xff]   ;;  %v3451_v8 = vld [vmem:[%s5257_s1 + $0x4e0] ss:$16 sps:$4 sm:$0xff]  }
  0x23   :  { %2386 = vmatpush2.bf16.msra.mxu0 %v3403_v34  ;;  %v3456_v5 = vld [vmem:[%s5257_s1 + $0x6e4] ss:$16 sps:$4 sm:$0xff]   ;;  %v3454_v9 = vld [vmem:[%s5257_s1 + $0x6e0] ss:$16 sps:$4 sm:$0xff]  }
  0x24   :  { %2427 = vmatpush2.bf16.msra.mxu1 %v3404_v35  ;;  %2387 = vmatprep.subr.bf16.mxu0 %v3405_v36  ;;  %v3459_v10 = vld [vmem:[%s5257_s1 + $0x4c4] ss:$16 sps:$4 sm:$0xff]   ;;  %v3457_v12 = vld [vmem:[%s5257_s1 + $0x4c0] ss:$16 sps:$4 sm:$0xff]  }
  0x25   :  { %2428 = vmatprep.subr.bf16.mxu1 %v3407_v37  ;;  %v3462_v11 = vld [vmem:[%s5257_s1 + $0x6c4] ss:$16 sps:$4 sm:$0xff]   ;;  %v3460_v13 = vld [vmem:[%s5257_s1 + $0x6c0] ss:$16 sps:$4 sm:$0xff]   ;;  %v4274_v37 = vcombine.high %v4260_v33, %v4260_v33 }
  0x26   :  { %v3465_v14 = vld [vmem:[%s5257_s1 + $0x4a4] ss:$16 sps:$4 sm:$0xff]   ;;  %v3463_v16 = vld [vmem:[%s5257_s1 + $0x4a0] ss:$16 sps:$4 sm:$0xff]  }
  0x27   :  { %2388 = vmatpush2.bf16.msra.mxu0 %v3409_v38  ;;  %v3468_v15 = vld [vmem:[%s5257_s1 + $0x6a4] ss:$16 sps:$4 sm:$0xff]   ;;  %v3466_v17 = vld [vmem:[%s5257_s1 + $0x6a0] ss:$16 sps:$4 sm:$0xff]  }
  0x28   :  { %2429 = vmatpush2.bf16.msra.mxu1 %v3410_v39  ;;  %2389 = vmatprep.subr.bf16.mxu0 %v3411_v40  ;;  %v3471_v18 = vld [vmem:[%s5257_s1 + $0x484] ss:$16 sps:$4 sm:$0xff]   ;;  %v3469_v20 = vld [vmem:[%s5257_s1 + $0x480] ss:$16 sps:$4 sm:$0xff]  }
  0x29   :  { %2430 = vmatprep.subr.bf16.mxu1 %v3413_v41  ;;  %v3474_v19 = vld [vmem:[%s5257_s1 + $0x684] ss:$16 sps:$4 sm:$0xff]   ;;  %v3472_v21 = vld [vmem:[%s5257_s1 + $0x680] ss:$16 sps:$4 sm:$0xff]  }
  0x2a   :  { %v3477_v22 = vld [vmem:[%s5257_s1 + $0x464] ss:$16 sps:$4 sm:$0xff]   ;;  %v3475_v24 = vld [vmem:[%s5257_s1 + $0x460] ss:$16 sps:$4 sm:$0xff]  }
  0x2b   :  { %2390 = vmatpush2.bf16.msra.mxu0 %v3415_v42  ;;  %v3480_v23 = vld [vmem:[%s5257_s1 + $0x664] ss:$16 sps:$4 sm:$0xff]   ;;  %v3478_v25 = vld [vmem:[%s5257_s1 + $0x660] ss:$16 sps:$4 sm:$0xff]  }
  0x2c   :  { %2431 = vmatpush2.bf16.msra.mxu1 %v3416_v43  ;;  %2391 = vmatprep.subr.bf16.mxu0 %v3417_v44  ;;  %v3483_v26 = vld [vmem:[%s5257_s1 + $0x444] ss:$16 sps:$4 sm:$0xff]   ;;  %v3481_v28 = vld [vmem:[%s5257_s1 + $0x440] ss:$16 sps:$4 sm:$0xff]  }
  0x2d   :  { %2432 = vmatprep.subr.bf16.mxu1 %v3419_v45  ;;  %v3486_v27 = vld [vmem:[%s5257_s1 + $0x644] ss:$16 sps:$4 sm:$0xff]   ;;  %v3484_v29 = vld [vmem:[%s5257_s1 + $0x640] ss:$16 sps:$4 sm:$0xff]  }
  0x2e   :  { %v3489_v30 = vld [vmem:[%s5257_s1 + $0x424] ss:$16 sps:$4 sm:$0xff]   ;;  %v3487_v34 = vld [vmem:[%s5257_s1 + $0x420] ss:$16 sps:$4 sm:$0xff]  }
  0x2f   :  { %2392 = vmatpush2.bf16.msra.mxu0 %v3421_v49  ;;  %v3492_v31 = vld [vmem:[%s5257_s1 + $0x624] ss:$16 sps:$4 sm:$0xff]   ;;  %v3490_v35 = vld [vmem:[%s5257_s1 + $0x620] ss:$16 sps:$4 sm:$0xff]  }
  0x30   :  { %2433 = vmatpush2.bf16.msra.mxu1 %v3422_v50  ;;  %2393 = vmatprep.subr.bf16.mxu0 %v3423_v52  ;;  %v4255_v32 = vld [vmem:[%s5258_s0 + $0x10] sm:$0xff] }
  0x31   :  { %2434 = vmatprep.subr.bf16.mxu1 %v3425_v53  ;;  %v4270_v36 = vcombine.high %v4255_v32, %v4255_v32  ;;  %v3495_v38 = vld [vmem:[%s5257_s1 + $0x404] ss:$16 sps:$4 sm:$0xff]   ;;  %v3493_v40 = vld [vmem:[%s5257_s1 + $0x400] ss:$16 sps:$4 sm:$0xff]  }
  0x32   :  { %v3498_v39 = vld [vmem:[%s5257_s1 + $0x604] ss:$16 sps:$4 sm:$0xff]   ;;  %v3496_v41 = vld [vmem:[%s5257_s1 + $0x600] ss:$16 sps:$4 sm:$0xff]  }
  0x33   :  { %2394 = vmatpush2.bf16.msra.mxu0 %v3427_v54  ;;  %v3501_v42 = vld [vmem:[%s5257_s1 + $0x5e4] ss:$16 sps:$4 sm:$0xff]   ;;  %v3499_v44 = vld [vmem:[%s5257_s1 + $0x5e0] ss:$16 sps:$4 sm:$0xff]  }
  0x34   :  { %2435 = vmatpush2.bf16.msra.mxu1 %v3428_v55  ;;  %2395 = vmatprep.subr.bf16.mxu0 %v3429_v56  ;;  %v3504_v43 = vld [vmem:[%s5257_s1 + $0x7e4] ss:$16 sps:$4 sm:$0xff]   ;;  %v3502_v45 = vld [vmem:[%s5257_s1 + $0x7e0] ss:$16 sps:$4 sm:$0xff]  }
  0x35   :  { %2436 = vmatprep.subr.bf16.mxu1 %v3431_v57  ;;  %v3507_v46 = vld [vmem:[%s5257_s1 + $0x5c4] ss:$16 sps:$4 sm:$0xff]   ;;  %v3505_v49 = vld [vmem:[%s5257_s1 + $0x5c0] ss:$16 sps:$4 sm:$0xff]  }
  0x36   :  { %v3510_v48 = vld [vmem:[%s5257_s1 + $0x7c4] ss:$16 sps:$4 sm:$0xff]   ;;  %v3508_v50 = vld [vmem:[%s5257_s1 + $0x7c0] ss:$16 sps:$4 sm:$0xff]  }
  0x37   :  { %2396 = vmatpush2.bf16.msra.mxu0 %v3433_v58  ;;  %v3513_v52 = vld [vmem:[%s5257_s1 + $0x5a4] ss:$16 sps:$4 sm:$0xff]   ;;  %v3511_v54 = vld [vmem:[%s5257_s1 + $0x5a0] ss:$16 sps:$4 sm:$0xff]  }
  0x38   :  { %2437 = vmatpush2.bf16.msra.mxu1 %v3434_v59  ;;  %2397 = vmatprep.subr.bf16.mxu0 %v3435_v60  ;;  %v3516_v53 = vld [vmem:[%s5257_s1 + $0x7a4] ss:$16 sps:$4 sm:$0xff]   ;;  %v3514_v55 = vld [vmem:[%s5257_s1 + $0x7a0] ss:$16 sps:$4 sm:$0xff]  }
  0x39   :  { %2438 = vmatprep.subr.bf16.mxu1 %v3437_v61  ;;  %v3519_v56 = vld [vmem:[%s5257_s1 + $0x584] ss:$16 sps:$4 sm:$0xff]   ;;  %v3517_v58 = vld [vmem:[%s5257_s1 + $0x580] ss:$16 sps:$4 sm:$0xff]  }
  0x3a   :  { %v3522_v57 = vld [vmem:[%s5257_s1 + $0x784] ss:$16 sps:$4 sm:$0xff]   ;;  %v3520_v59 = vld [vmem:[%s5257_s1 + $0x780] ss:$16 sps:$4 sm:$0xff]  }
  0x3b   :  { %2398 = vmatpush2.bf16.msra.mxu0 %v3439_v62  ;;  %v3525_v60 = vld [vmem:[%s5257_s1 + $0x564] ss:$16 sps:$4 sm:$0xff]   ;;  %v3523_v62 = vld [vmem:[%s5257_s1 + $0x560] ss:$16 sps:$4 sm:$0xff]  }
  0x3c   :  { %2439 = vmatpush2.bf16.msra.mxu1 %v3440_v63  ;;  %2399 = vmatprep.subr.bf16.mxu0 %v3441_v0  ;;  %v3528_v61 = vld [vmem:[%s5257_s1 + $0x764] ss:$16 sps:$4 sm:$0xff]   ;;  %v3526_v63 = vld [vmem:[%s5257_s1 + $0x760] ss:$16 sps:$4 sm:$0xff]  }
  0x3d   :  { %2440 = vmatprep.subr.bf16.mxu1 %v3443_v1  ;;  %v3531_v0 = vld [vmem:[%s5257_s1 + $0x544] ss:$16 sps:$4 sm:$0xff]  }
  0x3e   :  { %v3534_v1 = vld [vmem:[%s5257_s1 + $0x744] ss:$16 sps:$4 sm:$0xff]  }
  0x3f   :  { %2400 = vmatpush2.bf16.msra.mxu0 %v3445_v2  ;;  %v3529_v2 = vld [vmem:[%s5257_s1 + $0x540] ss:$16 sps:$4 sm:$0xff]  }
  0x40   :  { %2441 = vmatpush2.bf16.msra.mxu1 %v3446_v3  ;;  %2451 = vmatprep.subr.bf16.mxu0 %v3453_v4  ;;  %v3532_v3 = vld [vmem:[%s5257_s1 + $0x740] ss:$16 sps:$4 sm:$0xff]   ;;  %v3537_v4 = vld [vmem:[%s5257_s1 + $0x524] ss:$16 sps:$4 sm:$0xff]  }
  0x41   :  { %2492 = vmatprep.subr.bf16.mxu1 %v3456_v5  ;;  %v3540_v5 = vld [vmem:[%s5257_s1 + $0x724] ss:$16 sps:$4 sm:$0xff]  }
  0x42   :  { %2402 = vmatmul.mubr.bf16.vlgmr.msra.gmra.mxu0 %v4174_v6 }
  0x43   :  { %2443 = vmatmul.mubr.bf16.vlgmr.msra.gmra.mxu1 %v4176_v7  ;;  %2452 = vmatpush1.bf16.msra.mxu0 %v3451_v8  ;;  %v3535_v8 = vld [vmem:[%s5257_s1 + $0x520] ss:$16 sps:$4 sm:$0xff]  }
  0x44   :  { %2493 = vmatpush1.bf16.msra.mxu1 %v3454_v9  ;;  %2453 = vmatprep.subr.bf16.mxu0 %v3459_v10  ;;  %v3538_v9 = vld [vmem:[%s5257_s1 + $0x720] ss:$16 sps:$4 sm:$0xff]   ;;  %v3543_v10 = vld [vmem:[%s5257_s1 + $0x504] ss:$16 sps:$4 sm:$0xff]  }
  0x45   :  { %2494 = vmatprep.subr.bf16.mxu1 %v3462_v11  ;;  %2483 = vmatprep.mubr.bf16.mxu0 %v4270_v36  ;;  %v3546_v11 = vld [vmem:[%s5257_s1 + $0x704] ss:$16 sps:$4 sm:$0xff]  }
  0x46   :  { %2524 = vmatprep.mubr.bf16.mxu1 %v4274_v37 }
  0x47   :  { %2454 = vmatpush1.bf16.msra.mxu0 %v3457_v12  ;;  %v3541_v12 = vld [vmem:[%s5257_s1 + $0x500] ss:$16 sps:$4 sm:$0xff]  }
  0x48   :  { %2495 = vmatpush1.bf16.msra.mxu1 %v3460_v13  ;;  %2455 = vmatprep.subr.bf16.mxu0 %v3465_v14  ;;  %v3544_v13 = vld [vmem:[%s5257_s1 + $0x700] ss:$16 sps:$4 sm:$0xff]   ;;  %v3553_v14 = vld [vmem:[%s5257_s1 + $0x8e4] ss:$16 sps:$4 sm:$0xff]  }
  0x49   :  { %2496 = vmatprep.subr.bf16.mxu1 %v3468_v15  ;;  %v3556_v15 = vld [vmem:[%s5257_s1 + $0xae4] ss:$16 sps:$4 sm:$0xff]  }
  0x4b   :  { %2456 = vmatpush1.bf16.msra.mxu0 %v3463_v16  ;;  %v4394_v16 = vcombine.low %v4255_v32, %v4255_v32  ;;  %v3571_v32 = vld [vmem:[%s5257_s1 + $0x884] ss:$16 sps:$4 sm:$0xff]  }
  0x4c   :  { %2497 = vmatpush1.bf16.msra.mxu1 %v3466_v17  ;;  %2457 = vmatprep.subr.bf16.mxu0 %v3471_v18  ;;  %v4398_v17 = vcombine.low %v4260_v33, %v4260_v33  ;;  %v3551_v18 = vld [vmem:[%s5257_s1 + $0x8e0] ss:$16 sps:$4 sm:$0xff]   ;;  %v3574_v33 = vld [vmem:[%s5257_s1 + $0xa84] ss:$16 sps:$4 sm:$0xff]  }
  0x4d   :  { %2498 = vmatprep.subr.bf16.mxu1 %v3474_v19  ;;  %v3554_v19 = vld [vmem:[%s5257_s1 + $0xae0] ss:$16 sps:$4 sm:$0xff]  }
  0x4f   :  { %2458 = vmatpush1.bf16.msra.mxu0 %v3469_v20  ;;  %v3559_v20 = vld [vmem:[%s5257_s1 + $0x8c4] ss:$16 sps:$4 sm:$0xff]  }
  0x50   :  { %2499 = vmatpush1.bf16.msra.mxu1 %v3472_v21  ;;  %2459 = vmatprep.subr.bf16.mxu0 %v3477_v22  ;;  %v3562_v21 = vld [vmem:[%s5257_s1 + $0xac4] ss:$16 sps:$4 sm:$0xff]  }
  0x51   :  { %2500 = vmatprep.subr.bf16.mxu1 %v3480_v23  ;;  %v4415_v22 = vld [vmem:[%s5258_s0 + $0x20] sm:$0xff]  ;;  %v4420_v23 = vld [vmem:[%s5258_s0 + $0x28] sm:$0xff] }
  0x53   :  { %2460 = vmatpush1.bf16.msra.mxu0 %v3475_v24  ;;  %v4424_v24 = vcombine.high %v4415_v22, %v4415_v22 }
  0x54   :  { %2501 = vmatpush1.bf16.msra.mxu1 %v3478_v25  ;;  %2461 = vmatprep.subr.bf16.mxu0 %v3483_v26  ;;  %v4428_v25 = vcombine.high %v4420_v23, %v4420_v23  ;;  %v3557_v26 = vld [vmem:[%s5257_s1 + $0x8c0] ss:$16 sps:$4 sm:$0xff]  }
  0x55   :  { %2502 = vmatprep.subr.bf16.mxu1 %v3486_v27  ;;  %v3560_v27 = vld [vmem:[%s5257_s1 + $0xac0] ss:$16 sps:$4 sm:$0xff]  }
  0x57   :  { %2462 = vmatpush1.bf16.msra.mxu0 %v3481_v28  ;;  %v3565_v28 = vld [vmem:[%s5257_s1 + $0x8a4] ss:$16 sps:$4 sm:$0xff]  }
  0x58   :  { %2503 = vmatpush1.bf16.msra.mxu1 %v3484_v29  ;;  %2463 = vmatprep.subr.bf16.mxu0 %v3489_v30  ;;  %v3568_v29 = vld [vmem:[%s5257_s1 + $0xaa4] ss:$16 sps:$4 sm:$0xff]   ;;  %v3563_v30 = vld [vmem:[%s5257_s1 + $0x8a0] ss:$16 sps:$4 sm:$0xff]  }
  0x59   :  { %2504 = vmatprep.subr.bf16.mxu1 %v3492_v31  ;;  %v3566_v31 = vld [vmem:[%s5257_s1 + $0xaa0] ss:$16 sps:$4 sm:$0xff]  }
  0x5b   :  { %2464 = vmatpush1.bf16.msra.mxu0 %v3487_v34  ;;  %v3569_v34 = vld [vmem:[%s5257_s1 + $0x880] ss:$16 sps:$4 sm:$0xff]  }
  0x5c   :  { %2505 = vmatpush1.bf16.msra.mxu1 %v3490_v35  ;;  %2465 = vmatprep.subr.bf16.mxu0 %v3495_v38  ;;  %v3572_v35 = vld [vmem:[%s5257_s1 + $0xa80] ss:$16 sps:$4 sm:$0xff]   ;;  %v3577_v38 = vld [vmem:[%s5257_s1 + $0x864] ss:$16 sps:$4 sm:$0xff]  }
  0x5d   :  { %2506 = vmatprep.subr.bf16.mxu1 %v3498_v39  ;;  %v3580_v39 = vld [vmem:[%s5257_s1 + $0xa64] ss:$16 sps:$4 sm:$0xff]  }
  0x5f   :  { %2466 = vmatpush1.bf16.msra.mxu0 %v3493_v40  ;;  %v3575_v40 = vld [vmem:[%s5257_s1 + $0x860] ss:$16 sps:$4 sm:$0xff]  }
  0x60   :  { %2507 = vmatpush1.bf16.msra.mxu1 %v3496_v41  ;;  %2467 = vmatprep.subr.bf16.mxu0 %v3501_v42  ;;  %v3578_v41 = vld [vmem:[%s5257_s1 + $0xa60] ss:$16 sps:$4 sm:$0xff]   ;;  %v3583_v42 = vld [vmem:[%s5257_s1 + $0x844] ss:$16 sps:$4 sm:$0xff]  }
  0x61   :  { %2508 = vmatprep.subr.bf16.mxu1 %v3504_v43  ;;  %v3586_v43 = vld [vmem:[%s5257_s1 + $0xa44] ss:$16 sps:$4 sm:$0xff]  }
  0x63   :  { %2468 = vmatpush2.bf16.msra.mxu0 %v3499_v44  ;;  %v3581_v44 = vld [vmem:[%s5257_s1 + $0x840] ss:$16 sps:$4 sm:$0xff]  }
  0x64   :  { %2509 = vmatpush2.bf16.msra.mxu1 %v3502_v45  ;;  %2469 = vmatprep.subr.bf16.mxu0 %v3507_v46  ;;  %v3584_v45 = vld [vmem:[%s5257_s1 + $0xa40] ss:$16 sps:$4 sm:$0xff]   ;;  %v3589_v46 = vld [vmem:[%s5257_s1 + $0x824] ss:$16 sps:$4 sm:$0xff]  }
  0x65   :  { %2510 = vmatprep.subr.bf16.mxu1 %v3510_v48  ;;  %v3592_v48 = vld [vmem:[%s5257_s1 + $0xa24] ss:$16 sps:$4 sm:$0xff]  }
  0x67   :  { %2470 = vmatpush2.bf16.msra.mxu0 %v3505_v49  ;;  %v3587_v49 = vld [vmem:[%s5257_s1 + $0x820] ss:$16 sps:$4 sm:$0xff]  }
  0x68   :  { %2511 = vmatpush2.bf16.msra.mxu1 %v3508_v50  ;;  %2471 = vmatprep.subr.bf16.mxu0 %v3513_v52  ;;  %v3590_v50 = vld [vmem:[%s5257_s1 + $0xa20] ss:$16 sps:$4 sm:$0xff]   ;;  %v3595_v52 = vld [vmem:[%s5257_s1 + $0x804] ss:$16 sps:$4 sm:$0xff]  }
  0x69   :  { %2512 = vmatprep.subr.bf16.mxu1 %v3516_v53  ;;  %v3598_v53 = vld [vmem:[%s5257_s1 + $0xa04] ss:$16 sps:$4 sm:$0xff]  }
  0x6b   :  { %2472 = vmatpush2.bf16.msra.mxu0 %v3511_v54  ;;  %v3593_v54 = vld [vmem:[%s5257_s1 + $0x800] ss:$16 sps:$4 sm:$0xff]  }
  0x6c   :  { %2513 = vmatpush2.bf16.msra.mxu1 %v3514_v55  ;;  %2473 = vmatprep.subr.bf16.mxu0 %v3519_v56  ;;  %v3596_v55 = vld [vmem:[%s5257_s1 + $0xa00] ss:$16 sps:$4 sm:$0xff]   ;;  %v3601_v56 = vld [vmem:[%s5257_s1 + $0x9e4] ss:$16 sps:$4 sm:$0xff]  }
  0x6d   :  { %2514 = vmatprep.subr.bf16.mxu1 %v3522_v57  ;;  %v3604_v57 = vld [vmem:[%s5257_s1 + $0xbe4] ss:$16 sps:$4 sm:$0xff]  }
  0x6f   :  { %2474 = vmatpush2.bf16.msra.mxu0 %v3517_v58  ;;  %v3599_v58 = vld [vmem:[%s5257_s1 + $0x9e0] ss:$16 sps:$4 sm:$0xff]  }
  0x70   :  { %2515 = vmatpush2.bf16.msra.mxu1 %v3520_v59  ;;  %2475 = vmatprep.subr.bf16.mxu0 %v3525_v60  ;;  %v3602_v59 = vld [vmem:[%s5257_s1 + $0xbe0] ss:$16 sps:$4 sm:$0xff]   ;;  %v3607_v60 = vld [vmem:[%s5257_s1 + $0x9c4] ss:$16 sps:$4 sm:$0xff]  }
  0x71   :  { %2516 = vmatprep.subr.bf16.mxu1 %v3528_v61  ;;  %v3610_v61 = vld [vmem:[%s5257_s1 + $0xbc4] ss:$16 sps:$4 sm:$0xff]  }
  0x73   :  { %2476 = vmatpush2.bf16.msra.mxu0 %v3523_v62  ;;  %v3605_v62 = vld [vmem:[%s5257_s1 + $0x9c0] ss:$16 sps:$4 sm:$0xff]  }
  0x74   :  { %2517 = vmatpush2.bf16.msra.mxu1 %v3526_v63  ;;  %2477 = vmatprep.subr.bf16.mxu0 %v3531_v0  ;;  %v3608_v63 = vld [vmem:[%s5257_s1 + $0xbc0] ss:$16 sps:$4 sm:$0xff]   ;;  %v3613_v0 = vld [vmem:[%s5257_s1 + $0x9a4] ss:$16 sps:$4 sm:$0xff]  }
  0x75   :  { %2518 = vmatprep.subr.bf16.mxu1 %v3534_v1  ;;  %v3616_v1 = vld [vmem:[%s5257_s1 + $0xba4] ss:$16 sps:$4 sm:$0xff]  }
  0x77   :  { %2478 = vmatpush2.bf16.msra.mxu0 %v3529_v2  ;;  %v3611_v2 = vld [vmem:[%s5257_s1 + $0x9a0] ss:$16 sps:$4 sm:$0xff]  }
  0x78   :  { %2519 = vmatpush2.bf16.msra.mxu1 %v3532_v3  ;;  %2479 = vmatprep.subr.bf16.mxu0 %v3537_v4  ;;  %v3614_v3 = vld [vmem:[%s5257_s1 + $0xba0] ss:$16 sps:$4 sm:$0xff]   ;;  %v3619_v4 = vld [vmem:[%s5257_s1 + $0x984] ss:$16 sps:$4 sm:$0xff]  }
  0x79   :  { %2520 = vmatprep.subr.bf16.mxu1 %v3540_v5  ;;  %v3622_v5 = vld [vmem:[%s5257_s1 + $0xb84] ss:$16 sps:$4 sm:$0xff]  }
  0x7b   :  { %2480 = vmatpush2.bf16.msra.mxu0 %v3535_v8  ;;  %v3617_v8 = vld [vmem:[%s5257_s1 + $0x980] ss:$16 sps:$4 sm:$0xff]  }
  0x7c   :  { %2521 = vmatpush2.bf16.msra.mxu1 %v3538_v9  ;;  %2481 = vmatprep.subr.bf16.mxu0 %v3543_v10  ;;  %v3620_v9 = vld [vmem:[%s5257_s1 + $0xb80] ss:$16 sps:$4 sm:$0xff]   ;;  %v3625_v10 = vld [vmem:[%s5257_s1 + $0x964] ss:$16 sps:$4 sm:$0xff]  }
  0x7d   :  { %2522 = vmatprep.subr.bf16.mxu1 %v3546_v11  ;;  %v3628_v11 = vld [vmem:[%s5257_s1 + $0xb64] ss:$16 sps:$4 sm:$0xff]  }
  0x7f   :  { %2482 = vmatpush2.bf16.msra.mxu0 %v3541_v12  ;;  %v3623_v12 = vld [vmem:[%s5257_s1 + $0x960] ss:$16 sps:$4 sm:$0xff]  }
  0x80   :  { %2523 = vmatpush2.bf16.msra.mxu1 %v3544_v13  ;;  %2533 = vmatprep.subr.bf16.mxu0 %v3553_v14  ;;  %v3626_v13 = vld [vmem:[%s5257_s1 + $0xb60] ss:$16 sps:$4 sm:$0xff]   ;;  %v3631_v14 = vld [vmem:[%s5257_s1 + $0x944] ss:$16 sps:$4 sm:$0xff]  }
  0x81   :  { %2574 = vmatprep.subr.bf16.mxu1 %v3556_v15  ;;  %v3634_v15 = vld [vmem:[%s5257_s1 + $0xb44] ss:$16 sps:$4 sm:$0xff]  }
  0x82   :  { %2484 = vmatmul.mubr.bf16.vlgmr.msra.gmra.mxu0 %v4394_v16 }
  0x83   :  { %2525 = vmatmul.mubr.bf16.vlgmr.msra.gmra.mxu1 %v4398_v17  ;;  %2534 = vmatpush1.bf16.msra.mxu0 %v3551_v18  ;;  %v3629_v18 = vld [vmem:[%s5257_s1 + $0x940] ss:$16 sps:$4 sm:$0xff]  }
  0x84   :  { %2575 = vmatpush1.bf16.msra.mxu1 %v3554_v19  ;;  %2535 = vmatprep.subr.bf16.mxu0 %v3559_v20  ;;  %v3632_v19 = vld [vmem:[%s5257_s1 + $0xb40] ss:$16 sps:$4 sm:$0xff]   ;;  %v3637_v20 = vld [vmem:[%s5257_s1 + $0x924] ss:$16 sps:$4 sm:$0xff]  }
  0x85   :  { %2576 = vmatprep.subr.bf16.mxu1 %v3562_v21  ;;  %2565 = vmatprep.mubr.bf16.mxu0 %v4424_v24  ;;  %v3640_v21 = vld [vmem:[%s5257_s1 + $0xb24] ss:$16 sps:$4 sm:$0xff]  }
  0x86   :  { %2606 = vmatprep.mubr.bf16.mxu1 %v4428_v25 }
  0x87   :  { %2536 = vmatpush1.bf16.msra.mxu0 %v3557_v26  ;;  %v3635_v26 = vld [vmem:[%s5257_s1 + $0x920] ss:$16 sps:$4 sm:$0xff]  }
  0x88   :  { %2577 = vmatpush1.bf16.msra.mxu1 %v3560_v27  ;;  %2537 = vmatprep.subr.bf16.mxu0 %v3565_v28  ;;  %v3638_v27 = vld [vmem:[%s5257_s1 + $0xb20] ss:$16 sps:$4 sm:$0xff]   ;;  %v3643_v28 = vld [vmem:[%s5257_s1 + $0x904] ss:$16 sps:$4 sm:$0xff]  }
  0x89   :  { %2578 = vmatprep.subr.bf16.mxu1 %v3568_v29  ;;  %v3646_v29 = vld [vmem:[%s5257_s1 + $0xb04] ss:$16 sps:$4 sm:$0xff]  }
  0x8b   :  { %2538 = vmatpush1.bf16.msra.mxu0 %v3563_v30  ;;  %v3641_v30 = vld [vmem:[%s5257_s1 + $0x900] ss:$16 sps:$4 sm:$0xff]  }
  0x8c   :  { %2579 = vmatpush1.bf16.msra.mxu1 %v3566_v31  ;;  %2539 = vmatprep.subr.bf16.mxu0 %v3571_v32  ;;  %v3644_v31 = vld [vmem:[%s5257_s1 + $0xb00] ss:$16 sps:$4 sm:$0xff]   ;;  %v3653_v32 = vld [vmem:[%s5257_s1 + $0xec] ss:$16 sps:$4 sm:$0xff]  }
  0x8d   :  { %2580 = vmatprep.subr.bf16.mxu1 %v3574_v33  ;;  %v3656_v33 = vld [vmem:[%s5257_s1 + $0x2ec] ss:$16 sps:$4 sm:$0xff]  }
  0x8f   :  { %2540 = vmatpush1.bf16.msra.mxu0 %v3569_v34  ;;  %v4616_v34 = vcombine.low %v4415_v22, %v4415_v22  ;;  %v3659_v22 = vld [vmem:[%s5257_s1 + $0xcc] ss:$16 sps:$4 sm:$0xff]  }
  0x90   :  { %2581 = vmatpush1.bf16.msra.mxu1 %v3572_v35  ;;  %2541 = vmatprep.subr.bf16.mxu0 %v3577_v38  ;;  %v4620_v35 = vcombine.low %v4420_v23, %v4420_v23  ;;  %v3651_v38 = vld [vmem:[%s5257_s1 + $0xe8] ss:$16 sps:$4 sm:$0xff]   ;;  %v3662_v23 = vld [vmem:[%s5257_s1 + $0x2cc] ss:$16 sps:$4 sm:$0xff]  }
  0x91   :  { %2582 = vmatprep.subr.bf16.mxu1 %v3580_v39  ;;  %v3654_v39 = vld [vmem:[%s5257_s1 + $0x2e8] ss:$16 sps:$4 sm:$0xff]  }
  0x93   :  { %2542 = vmatpush1.bf16.msra.mxu0 %v3575_v40  ;;  %v3657_v40 = vld [vmem:[%s5257_s1 + $0xc8] ss:$16 sps:$4 sm:$0xff]  }
  0x94   :  { %2583 = vmatpush1.bf16.msra.mxu1 %v3578_v41  ;;  %2543 = vmatprep.subr.bf16.mxu0 %v3583_v42  ;;  %v3660_v41 = vld [vmem:[%s5257_s1 + $0x2c8] ss:$16 sps:$4 sm:$0xff]   ;;  %v3665_v42 = vld [vmem:[%s5257_s1 + $0xac] ss:$16 sps:$4 sm:$0xff]  }
  0x95   :  { %2584 = vmatprep.subr.bf16.mxu1 %v3586_v43  ;;  %v3668_v43 = vld [vmem:[%s5257_s1 + $0x2ac] ss:$16 sps:$4 sm:$0xff]  }
  0x97   :  { %2544 = vmatpush1.bf16.msra.mxu0 %v3581_v44  ;;  %v3663_v44 = vld [vmem:[%s5257_s1 + $0xa8] ss:$16 sps:$4 sm:$0xff]  }
  0x98   :  { %2585 = vmatpush1.bf16.msra.mxu1 %v3584_v45  ;;  %2545 = vmatprep.subr.bf16.mxu0 %v3589_v46  ;;  %v3666_v45 = vld [vmem:[%s5257_s1 + $0x2a8] ss:$16 sps:$4 sm:$0xff]   ;;  %v3671_v46 = vld [vmem:[%s5257_s1 + $0x8c] ss:$16 sps:$4 sm:$0xff]  }
  0x99   :  { %2586 = vmatprep.subr.bf16.mxu1 %v3592_v48  ;;  %v3672_v48 = vld [vmem:[%s5257_s1 + $0x288] ss:$16 sps:$4 sm:$0xff]  }
  0x9b   :  { %2546 = vmatpush1.bf16.msra.mxu0 %v3587_v49  ;;  %v3677_v49 = vld [vmem:[%s5257_s1 + $0x6c] ss:$16 sps:$4 sm:$0xff]  }
  0x9c   :  { %2587 = vmatpush1.bf16.msra.mxu1 %v3590_v50  ;;  %2547 = vmatprep.subr.bf16.mxu0 %v3595_v52  ;;  %v3680_v50 = vld [vmem:[%s5257_s1 + $0x26c] ss:$16 sps:$4 sm:$0xff]   ;;  %v3675_v52 = vld [vmem:[%s5257_s1 + $0x68] ss:$16 sps:$4 sm:$0xff]  }
  0x9d   :  { %2588 = vmatprep.subr.bf16.mxu1 %v3598_v53  ;;  %v3678_v53 = vld [vmem:[%s5257_s1 + $0x268] ss:$16 sps:$4 sm:$0xff]  }
  0x9f   :  { %2548 = vmatpush1.bf16.msra.mxu0 %v3593_v54  ;;  %v3683_v54 = vld [vmem:[%s5257_s1 + $0x4c] ss:$16 sps:$4 sm:$0xff]  }
  0xa0   :  { %2589 = vmatpush1.bf16.msra.mxu1 %v3596_v55  ;;  %2549 = vmatprep.subr.bf16.mxu0 %v3601_v56  ;;  %v3686_v55 = vld [vmem:[%s5257_s1 + $0x24c] ss:$16 sps:$4 sm:$0xff]   ;;  %v3681_v56 = vld [vmem:[%s5257_s1 + $0x48] ss:$16 sps:$4 sm:$0xff]  }
  0xa1   :  { %2590 = vmatprep.subr.bf16.mxu1 %v3604_v57  ;;  %v3684_v57 = vld [vmem:[%s5257_s1 + $0x248] ss:$16 sps:$4 sm:$0xff]  }
  0xa3   :  { %2550 = vmatpush2.bf16.msra.mxu0 %v3599_v58  ;;  %v3689_v58 = vld [vmem:[%s5257_s1 + $0x2c] ss:$16 sps:$4 sm:$0xff]  }
  0xa4   :  { %2591 = vmatpush2.bf16.msra.mxu1 %v3602_v59  ;;  %2551 = vmatprep.subr.bf16.mxu0 %v3607_v60  ;;  %v3692_v59 = vld [vmem:[%s5257_s1 + $0x22c] ss:$16 sps:$4 sm:$0xff]   ;;  %v3687_v60 = vld [vmem:[%s5257_s1 + $0x28] ss:$16 sps:$4 sm:$0xff]  }
  0xa5   :  { %2592 = vmatprep.subr.bf16.mxu1 %v3610_v61  ;;  %v3690_v61 = vld [vmem:[%s5257_s1 + $0x228] ss:$16 sps:$4 sm:$0xff]  }
  0xa7   :  { %2552 = vmatpush2.bf16.msra.mxu0 %v3605_v62  ;;  %v3695_v62 = vld [vmem:[%s5257_s1 + $0xc] ss:$16 sps:$4 sm:$0xff]  }
  0xa8   :  { %2593 = vmatpush2.bf16.msra.mxu1 %v3608_v63  ;;  %2553 = vmatprep.subr.bf16.mxu0 %v3613_v0  ;;  %v3698_v63 = vld [vmem:[%s5257_s1 + $0x20c] ss:$16 sps:$4 sm:$0xff]   ;;  %v3693_v0 = vld [vmem:[%s5257_s1 + $0x8] ss:$16 sps:$4 sm:$0xff]  }
  0xa9   :  { %2594 = vmatprep.subr.bf16.mxu1 %v3616_v1  ;;  %v3696_v1 = vld [vmem:[%s5257_s1 + $0x208] ss:$16 sps:$4 sm:$0xff]  }
  0xab   :  { %2554 = vmatpush2.bf16.msra.mxu0 %v3611_v2  ;;  %v3701_v2 = vld [vmem:[%s5257_s1 + $0x1ec] ss:$16 sps:$4 sm:$0xff]  }
  0xac   :  { %2595 = vmatpush2.bf16.msra.mxu1 %v3614_v3  ;;  %2555 = vmatprep.subr.bf16.mxu0 %v3619_v4  ;;  %v3704_v3 = vld [vmem:[%s5257_s1 + $0x3ec] ss:$16 sps:$4 sm:$0xff]   ;;  %v3699_v4 = vld [vmem:[%s5257_s1 + $0x1e8] ss:$16 sps:$4 sm:$0xff]  }
  0xad   :  { %2596 = vmatprep.subr.bf16.mxu1 %v3622_v5  ;;  %v3702_v5 = vld [vmem:[%s5257_s1 + $0x3e8] ss:$16 sps:$4 sm:$0xff]  }
  0xaf   :  { %2556 = vmatpush2.bf16.msra.mxu0 %v3617_v8  ;;  %v3707_v8 = vld [vmem:[%s5257_s1 + $0x1cc] ss:$16 sps:$4 sm:$0xff]  }
  0xb0   :  { %2597 = vmatpush2.bf16.msra.mxu1 %v3620_v9  ;;  %2557 = vmatprep.subr.bf16.mxu0 %v3625_v10  ;;  %v3710_v9 = vld [vmem:[%s5257_s1 + $0x3cc] ss:$16 sps:$4 sm:$0xff]   ;;  %v3705_v10 = vld [vmem:[%s5257_s1 + $0x1c8] ss:$16 sps:$4 sm:$0xff]  }
  0xb1   :  { %2598 = vmatprep.subr.bf16.mxu1 %v3628_v11  ;;  %v3708_v11 = vld [vmem:[%s5257_s1 + $0x3c8] ss:$16 sps:$4 sm:$0xff]  }
  0xb3   :  { %2558 = vmatpush2.bf16.msra.mxu0 %v3623_v12  ;;  %v3713_v12 = vld [vmem:[%s5257_s1 + $0x1ac] ss:$16 sps:$4 sm:$0xff]  }
  0xb4   :  { %2599 = vmatpush2.bf16.msra.mxu1 %v3626_v13  ;;  %2559 = vmatprep.subr.bf16.mxu0 %v3631_v14  ;;  %v3716_v13 = vld [vmem:[%s5257_s1 + $0x3ac] ss:$16 sps:$4 sm:$0xff]   ;;  %v3711_v14 = vld [vmem:[%s5257_s1 + $0x1a8] ss:$16 sps:$4 sm:$0xff]  }
  0xb5   :  { %2600 = vmatprep.subr.bf16.mxu1 %v3634_v15  ;;  %v3714_v15 = vld [vmem:[%s5257_s1 + $0x3a8] ss:$16 sps:$4 sm:$0xff]  }
  0xb7   :  { %2560 = vmatpush2.bf16.msra.mxu0 %v3629_v18  ;;  %v3719_v18 = vld [vmem:[%s5257_s1 + $0x18c] ss:$16 sps:$4 sm:$0xff]  }
  0xb8   :  { %2601 = vmatpush2.bf16.msra.mxu1 %v3632_v19  ;;  %2561 = vmatprep.subr.bf16.mxu0 %v3637_v20  ;;  %v3722_v19 = vld [vmem:[%s5257_s1 + $0x38c] ss:$16 sps:$4 sm:$0xff]   ;;  %v3717_v20 = vld [vmem:[%s5257_s1 + $0x188] ss:$16 sps:$4 sm:$0xff]  }
  0xb9   :  { %2602 = vmatprep.subr.bf16.mxu1 %v3640_v21  ;;  %v3720_v21 = vld [vmem:[%s5257_s1 + $0x388] ss:$16 sps:$4 sm:$0xff]  }
  0xbb   :  { %2562 = vmatpush2.bf16.msra.mxu0 %v3635_v26  ;;  %v3725_v26 = vld [vmem:[%s5257_s1 + $0x16c] ss:$16 sps:$4 sm:$0xff]  }
  0xbc   :  { %2603 = vmatpush2.bf16.msra.mxu1 %v3638_v27  ;;  %2563 = vmatprep.subr.bf16.mxu0 %v3643_v28  ;;  %v3728_v27 = vld [vmem:[%s5257_s1 + $0x36c] ss:$16 sps:$4 sm:$0xff]   ;;  %v3723_v28 = vld [vmem:[%s5257_s1 + $0x168] ss:$16 sps:$4 sm:$0xff]  }
  0xbd   :  { %2604 = vmatprep.subr.bf16.mxu1 %v3646_v29  ;;  %v3726_v29 = vld [vmem:[%s5257_s1 + $0x368] ss:$16 sps:$4 sm:$0xff]  }
  0xbf   :  { %2564 = vmatpush2.bf16.msra.mxu0 %v3641_v30  ;;  %v3731_v30 = vld [vmem:[%s5257_s1 + $0x14c] ss:$16 sps:$4 sm:$0xff]  }
  0xc0   :  { %2605 = vmatpush2.bf16.msra.mxu1 %v3644_v31  ;;  %2615 = vmatprep.subr.bf16.mxu0 %v3653_v32  ;;  %v3734_v31 = vld [vmem:[%s5257_s1 + $0x34c] ss:$16 sps:$4 sm:$0xff]   ;;  %v3729_v32 = vld [vmem:[%s5257_s1 + $0x148] ss:$16 sps:$4 sm:$0xff]  }
  0xc1   :  { %2656 = vmatprep.subr.bf16.mxu1 %v3656_v33  ;;  %v3732_v33 = vld [vmem:[%s5257_s1 + $0x348] ss:$16 sps:$4 sm:$0xff]  }
  0xc2   :  { %2566 = vmatmul.mubr.bf16.vlgmr.msra.gmra.mxu0 %v4616_v34 }
  0xc3   :  { %2607 = vmatmul.mubr.bf16.vlgmr.msra.gmra.mxu1 %v4620_v35  ;;  %2616 = vmatpush1.bf16.msra.mxu0 %v3651_v38  ;;  %v3737_v38 = vld [vmem:[%s5257_s1 + $0x12c] ss:$16 sps:$4 sm:$0xff]  }
  0xc4   :  { %2657 = vmatpush1.bf16.msra.mxu1 %v3654_v39  ;;  %2617 = vmatprep.subr.bf16.mxu0 %v3659_v22  ;;  %v3740_v39 = vld [vmem:[%s5257_s1 + $0x32c] ss:$16 sps:$4 sm:$0xff]   ;;  %v3735_v22 = vld [vmem:[%s5257_s1 + $0x128] ss:$16 sps:$4 sm:$0xff]  }
  0xc5   :  { %2658 = vmatprep.subr.bf16.mxu1 %v3662_v23  ;;  %2647 = vmatprep.mubr.bf16.mxu0 %v4105_v47  ;;  %v3674_v47 = vld [vmem:[%s5257_s1 + $0x28c] ss:$16 sps:$4 sm:$0xff]   ;;  %v3738_v23 = vld [vmem:[%s5257_s1 + $0x328] ss:$16 sps:$4 sm:$0xff]  }
  0xc6   :  { %2688 = vmatprep.mubr.bf16.mxu1 %v4116_v51  ;;  %v3669_v51 = vld [vmem:[%s5257_s1 + $0x88] ss:$16 sps:$4 sm:$0xff]  }
  0xc7   :  { %2618 = vmatpush1.bf16.msra.mxu0 %v3657_v40  ;;  %v3743_v40 = vld [vmem:[%s5257_s1 + $0x10c] ss:$16 sps:$4 sm:$0xff]  }
  0xc8   :  { %2659 = vmatpush1.bf16.msra.mxu1 %v3660_v41  ;;  %2619 = vmatprep.subr.bf16.mxu0 %v3665_v42  ;;  %v3746_v41 = vld [vmem:[%s5257_s1 + $0x30c] ss:$16 sps:$4 sm:$0xff]   ;;  %v3741_v42 = vld [vmem:[%s5257_s1 + $0x108] ss:$16 sps:$4 sm:$0xff]  }
  0xc9   :  { %2660 = vmatprep.subr.bf16.mxu1 %v3668_v43  ;;  %v3744_v43 = vld [vmem:[%s5257_s1 + $0x308] ss:$16 sps:$4 sm:$0xff]  }
  0xcb   :  { %2620 = vmatpush1.bf16.msra.mxu0 %v3663_v44  ;;  %v3749_v44 = vld [vmem:[%s5257_s1 + $0x4ec] ss:$16 sps:$4 sm:$0xff]  }
  0xcc   :  { %2661 = vmatpush1.bf16.msra.mxu1 %v3666_v45  ;;  %2621 = vmatprep.subr.bf16.mxu0 %v3671_v46  ;;  %v3752_v45 = vld [vmem:[%s5257_s1 + $0x6ec] ss:$16 sps:$4 sm:$0xff]   ;;  %v3747_v46 = vld [vmem:[%s5257_s1 + $0x4e8] ss:$16 sps:$4 sm:$0xff]  }
  0xcd   :  { %2662 = vmatprep.subr.bf16.mxu1 %v3674_v47  ;;  %v3750_v47 = vld [vmem:[%s5257_s1 + $0x6e8] ss:$16 sps:$4 sm:$0xff]  }
  0xcf   :  { %2622 = vmatpush1.bf16.msra.mxu0 %v3669_v51  ;;  %v3755_v51 = vld [vmem:[%s5257_s1 + $0x4cc] ss:$16 sps:$4 sm:$0xff]  }
  0xd0   :  { %2663 = vmatpush1.bf16.msra.mxu1 %v3672_v48  ;;  %2623 = vmatprep.subr.bf16.mxu0 %v3677_v49  ;;  %v3758_v48 = vld [vmem:[%s5257_s1 + $0x6cc] ss:$16 sps:$4 sm:$0xff]  }
  0xd1   :  { %2664 = vmatprep.subr.bf16.mxu1 %v3680_v50 }
  0xd3   :  { %2624 = vmatpush1.bf16.msra.mxu0 %v3675_v52 }
  0xd4   :  { %2665 = vmatpush1.bf16.msra.mxu1 %v3678_v53  ;;  %2625 = vmatprep.subr.bf16.mxu0 %v3683_v54  ;;  %v3753_v53 = vld [vmem:[%s5257_s1 + $0x4c8] ss:$16 sps:$4 sm:$0xff]  }
  0xd5   :  { %2666 = vmatprep.subr.bf16.mxu1 %v3686_v55  ;;  %v3756_v54 = vld [vmem:[%s5257_s1 + $0x6c8] ss:$16 sps:$4 sm:$0xff]  }
  0xd7   :  { %2626 = vmatpush1.bf16.msra.mxu0 %v3681_v56 }
  0xd8   :  { %2667 = vmatpush1.bf16.msra.mxu1 %v3684_v57  ;;  %2627 = vmatprep.subr.bf16.mxu0 %v3689_v58 }
  0xd9   :  { %2668 = vmatprep.subr.bf16.mxu1 %v3692_v59 }
  0xdb   :  { %2628 = vmatpush1.bf16.msra.mxu0 %v3687_v60  ;;  %v3759_v60 = vld [vmem:[%s5257_s1 + $0x4a8] ss:$16 sps:$4 sm:$0xff]  }
  0xdc   :  { %2669 = vmatpush1.bf16.msra.mxu1 %v3690_v61  ;;  %2629 = vmatprep.subr.bf16.mxu0 %v3695_v62  ;;  %v3762_v61 = vld [vmem:[%s5257_s1 + $0x6a8] ss:$16 sps:$4 sm:$0xff]  }
  0xdd   :  { %2670 = vmatprep.subr.bf16.mxu1 %v3698_v63 }
  0xdf   :  { %2630 = vmatpush1.bf16.msra.mxu0 %v3693_v0  ;;  %v3765_v0 = vld [vmem:[%s5257_s1 + $0x488] ss:$16 sps:$4 sm:$0xff]  }
  0xe0   :  { %2671 = vmatpush1.bf16.msra.mxu1 %v3696_v1  ;;  %2631 = vmatprep.subr.bf16.mxu0 %v3701_v2  ;;  %v3768_v1 = vld [vmem:[%s5257_s1 + $0x688] ss:$16 sps:$4 sm:$0xff]   ;;  %v3773_v2 = vld [vmem:[%s5257_s1 + $0x46c] ss:$16 sps:$4 sm:$0xff]  }
  0xe1   :  { %2672 = vmatprep.subr.bf16.mxu1 %v3704_v3  ;;  %v3776_v3 = vld [vmem:[%s5257_s1 + $0x66c] ss:$16 sps:$4 sm:$0xff]  }
  0xe3   :  { %2632 = vmatpush2.bf16.msra.mxu0 %v3699_v4  ;;  %v3771_v4 = vld [vmem:[%s5257_s1 + $0x468] ss:$16 sps:$4 sm:$0xff]  }
  0xe4   :  { %2673 = vmatpush2.bf16.msra.mxu1 %v3702_v5  ;;  %2633 = vmatprep.subr.bf16.mxu0 %v3707_v8  ;;  %v3774_v5 = vld [vmem:[%s5257_s1 + $0x668] ss:$16 sps:$4 sm:$0xff]   ;;  %v3779_v8 = vld [vmem:[%s5257_s1 + $0x44c] ss:$16 sps:$4 sm:$0xff]  }
  0xe5   :  { %2674 = vmatprep.subr.bf16.mxu1 %v3710_v9  ;;  %v3782_v9 = vld [vmem:[%s5257_s1 + $0x64c] ss:$16 sps:$4 sm:$0xff]  }
  0xe7   :  { %2634 = vmatpush2.bf16.msra.mxu0 %v3705_v10  ;;  %v3777_v10 = vld [vmem:[%s5257_s1 + $0x448] ss:$16 sps:$4 sm:$0xff]  }
  0xe8   :  { %2675 = vmatpush2.bf16.msra.mxu1 %v3708_v11  ;;  %2635 = vmatprep.subr.bf16.mxu0 %v3713_v12  ;;  %v3780_v11 = vld [vmem:[%s5257_s1 + $0x648] ss:$16 sps:$4 sm:$0xff]   ;;  %v3785_v12 = vld [vmem:[%s5257_s1 + $0x42c] ss:$16 sps:$4 sm:$0xff]  }
  0xe9   :  { %2676 = vmatprep.subr.bf16.mxu1 %v3716_v13  ;;  %v3788_v13 = vld [vmem:[%s5257_s1 + $0x62c] ss:$16 sps:$4 sm:$0xff]  }
  0xeb   :  { %2636 = vmatpush2.bf16.msra.mxu0 %v3711_v14  ;;  %v3783_v14 = vld [vmem:[%s5257_s1 + $0x428] ss:$16 sps:$4 sm:$0xff]  }
  0xec   :  { %2677 = vmatpush2.bf16.msra.mxu1 %v3714_v15  ;;  %2637 = vmatprep.subr.bf16.mxu0 %v3719_v18  ;;  %v3786_v15 = vld [vmem:[%s5257_s1 + $0x628] ss:$16 sps:$4 sm:$0xff]   ;;  %v3791_v18 = vld [vmem:[%s5257_s1 + $0x40c] ss:$16 sps:$4 sm:$0xff]  }
  0xed   :  { %2678 = vmatprep.subr.bf16.mxu1 %v3722_v19  ;;  %v3794_v19 = vld [vmem:[%s5257_s1 + $0x60c] ss:$16 sps:$4 sm:$0xff]  }
  0xef   :  { %2638 = vmatpush2.bf16.msra.mxu0 %v3717_v20  ;;  %v3789_v20 = vld [vmem:[%s5257_s1 + $0x408] ss:$16 sps:$4 sm:$0xff]  }
  0xf0   :  { %2679 = vmatpush2.bf16.msra.mxu1 %v3720_v21  ;;  %2639 = vmatprep.subr.bf16.mxu0 %v3725_v26  ;;  %v3792_v21 = vld [vmem:[%s5257_s1 + $0x608] ss:$16 sps:$4 sm:$0xff]   ;;  %v3797_v26 = vld [vmem:[%s5257_s1 + $0x5ec] ss:$16 sps:$4 sm:$0xff]  }
  0xf1   :  { %2680 = vmatprep.subr.bf16.mxu1 %v3728_v27  ;;  %v3800_v27 = vld [vmem:[%s5257_s1 + $0x7ec] ss:$16 sps:$4 sm:$0xff]  }
  0xf3   :  { %2640 = vmatpush2.bf16.msra.mxu0 %v3723_v28  ;;  %v3795_v28 = vld [vmem:[%s5257_s1 + $0x5e8] ss:$16 sps:$4 sm:$0xff]  }
  0xf4   :  { %2681 = vmatpush2.bf16.msra.mxu1 %v3726_v29  ;;  %2641 = vmatprep.subr.bf16.mxu0 %v3731_v30  ;;  %v3798_v29 = vld [vmem:[%s5257_s1 + $0x7e8] ss:$16 sps:$4 sm:$0xff]   ;;  %v3803_v30 = vld [vmem:[%s5257_s1 + $0x5cc] ss:$16 sps:$4 sm:$0xff]  }
  0xf5   :  { %2682 = vmatprep.subr.bf16.mxu1 %v3734_v31  ;;  %v3806_v31 = vld [vmem:[%s5257_s1 + $0x7cc] ss:$16 sps:$4 sm:$0xff]  }
  0xf7   :  { %2642 = vmatpush2.bf16.msra.mxu0 %v3729_v32  ;;  %v3801_v32 = vld [vmem:[%s5257_s1 + $0x5c8] ss:$16 sps:$4 sm:$0xff]  }
  0xf8   :  { %2683 = vmatpush2.bf16.msra.mxu1 %v3732_v33  ;;  %2643 = vmatprep.subr.bf16.mxu0 %v3737_v38  ;;  %v3804_v33 = vld [vmem:[%s5257_s1 + $0x7c8] ss:$16 sps:$4 sm:$0xff]   ;;  %v3809_v38 = vld [vmem:[%s5257_s1 + $0x5ac] ss:$16 sps:$4 sm:$0xff]  }
  0xf9   :  { %2684 = vmatprep.subr.bf16.mxu1 %v3740_v39  ;;  %v3812_v39 = vld [vmem:[%s5257_s1 + $0x7ac] ss:$16 sps:$4 sm:$0xff]  }
  0xfb   :  { %2644 = vmatpush2.bf16.msra.mxu0 %v3735_v22  ;;  %v3807_v22 = vld [vmem:[%s5257_s1 + $0x5a8] ss:$16 sps:$4 sm:$0xff]  }
  0xfc   :  { %2685 = vmatpush2.bf16.msra.mxu1 %v3738_v23  ;;  %2645 = vmatprep.subr.bf16.mxu0 %v3743_v40  ;;  %v3810_v23 = vld [vmem:[%s5257_s1 + $0x7a8] ss:$16 sps:$4 sm:$0xff]   ;;  %v3815_v40 = vld [vmem:[%s5257_s1 + $0x58c] ss:$16 sps:$4 sm:$0xff]  }
  0xfd   :  { %2686 = vmatprep.subr.bf16.mxu1 %v3746_v41  ;;  %v3818_v41 = vld [vmem:[%s5257_s1 + $0x78c] ss:$16 sps:$4 sm:$0xff]  }
  0xff   :  { %2646 = vmatpush2.bf16.msra.mxu0 %v3741_v42  ;;  %v3813_v42 = vld [vmem:[%s5257_s1 + $0x588] ss:$16 sps:$4 sm:$0xff]  }
 0x100   :  { %2687 = vmatpush2.bf16.msra.mxu1 %v3744_v43  ;;  %2697 = vmatprep.subr.bf16.mxu0 %v3749_v44  ;;  %v3816_v43 = vld [vmem:[%s5257_s1 + $0x788] ss:$16 sps:$4 sm:$0xff]   ;;  %v3821_v44 = vld [vmem:[%s5257_s1 + $0x56c] ss:$16 sps:$4 sm:$0xff]  }
 0x101   :  { %2738 = vmatprep.subr.bf16.mxu1 %v3752_v45  ;;  %v3824_v45 = vld [vmem:[%s5257_s1 + $0x76c] ss:$16 sps:$4 sm:$0xff]  }
 0x102   :  { %v2403_v49 = vpop.f32.mrf.mxu0  ;;  %2648 = vmatmul.mubr.bf16.vlgmr.msra.gmra.mxu0 %v4174_v6  ;;  %v3761_v6 = vld [vmem:[%s5257_s1 + $0x4ac] ss:$16 sps:$4 sm:$0xff]  }
 0x103   :  { %v2444_v50 = vpop.f32.mrf.mxu1  ;;  %2689 = vmatmul.mubr.bf16.vlgmr.msra.gmra.mxu1 %v4176_v7  ;;  %2698 = vmatpush1.bf16.msra.mxu0 %v3747_v46  ;;  %v3764_v7 = vld [vmem:[%s5257_s1 + $0x6ac] ss:$16 sps:$4 sm:$0xff]   ;;  %v3819_v46 = vld [vmem:[%s5257_s1 + $0x568] ss:$16 sps:$4 sm:$0xff]  }
 0x104   :  { %v4832_v52 = vadd.f32 %v2444_v50, %v2403_v49  ;;  %2739 = vmatpush1.bf16.msra.mxu1 %v3750_v47  ;;  %v2405_v55 = vpop.f32.mrf.mxu0  ;;  %2699 = vmatprep.subr.bf16.mxu0 %v3755_v51  ;;  %v3822_v47 = vld [vmem:[%s5257_s1 + $0x768] ss:$16 sps:$4 sm:$0xff]   ;;  %v3827_v51 = vld [vmem:[%s5257_s1 + $0x54c] ss:$16 sps:$4 sm:$0xff]  }
 0x105   :  { %v2446_v56 = vpop.f32.mrf.mxu1  ;;  %2740 = vmatprep.subr.bf16.mxu1 %v3758_v48  ;;  %2729 = vmatprep.mubr.bf16.mxu0 %v4270_v36  ;;  %v3767_v36 = vld [vmem:[%s5257_s1 + $0x48c] ss:$16 sps:$4 sm:$0xff]   ;;  %v3825_v49 = vld [vmem:[%s5257_s1 + $0x548] ss:$16 sps:$4 sm:$0xff]  }
 0x106   :  { %v4846_v57 = vadd.f32 %v2446_v56, %v2405_v55  ;;  %2770 = vmatprep.mubr.bf16.mxu1 %v4274_v37  ;;  %v2407_v58 = vpop.f32.mrf.mxu0  ;;  %v3770_v37 = vld [vmem:[%s5257_s1 + $0x68c] ss:$16 sps:$4 sm:$0xff]   ;;  %v3828_v50 = vld [vmem:[%s5257_s1 + $0x748] ss:$16 sps:$4 sm:$0xff]  }
 0x107   :  { %v2448_v59 = vpop.f32.mrf.mxu1  ;;  %2700 = vmatpush1.bf16.msra.mxu0 %v3753_v53  ;;  %v3830_v48 = vld [vmem:[%s5257_s1 + $0x74c] ss:$16 sps:$4 sm:$0xff]   ;;  %v3831_v55 = vld [vmem:[%s5257_s1 + $0x528] ss:$16 sps:$4 sm:$0xff]  }
 0x108   :  { %2741 = vmatpush1.bf16.msra.mxu1 %v3756_v54  ;;  %v2408_v62 = vpop.f32.mrf.mxu0  ;;  %2701 = vmatprep.subr.bf16.mxu0 %v3761_v6  ;;  %v3833_v53 = vld [vmem:[%s5257_s1 + $0x52c] ss:$16 sps:$4 sm:$0xff]   ;;  %v3834_v56 = vld [vmem:[%s5257_s1 + $0x728] ss:$16 sps:$4 sm:$0xff]  }
 0x109   :  { %v2449_v63 = vpop.f32.mrf.mxu1  ;;  %2742 = vmatprep.subr.bf16.mxu1 %v3764_v7  ;;  %v3836_v54 = vld [vmem:[%s5257_s1 + $0x72c] ss:$16 sps:$4 sm:$0xff]   ;;  %v3837_v58 = vld [vmem:[%s5257_s1 + $0x508] ss:$16 sps:$4 sm:$0xff]  }
 0x10a   :  { %v3839_v6 = vld [vmem:[%s5257_s1 + $0x50c] ss:$16 sps:$4 sm:$0xff]   ;;  %v3840_v59 = vld [vmem:[%s5257_s1 + $0x708] ss:$16 sps:$4 sm:$0xff]  }
 0x10b   :  { %2702 = vmatpush1.bf16.msra.mxu0 %v3759_v60  ;;  %v3842_v7 = vld [vmem:[%s5257_s1 + $0x70c] ss:$16 sps:$4 sm:$0xff]   ;;  %v3843_v62 = vld [vmem:[%s5257_s1 + $0x8e8] ss:$16 sps:$4 sm:$0xff]  }
 0x10c   :  { %2743 = vmatpush1.bf16.msra.mxu1 %v3762_v61  ;;  %2703 = vmatprep.subr.bf16.mxu0 %v3767_v36  ;;  %v3845_v60 = vld [vmem:[%s5257_s1 + $0x8ec] ss:$16 sps:$4 sm:$0xff]   ;;  %v3846_v63 = vld [vmem:[%s5257_s1 + $0xae8] ss:$16 sps:$4 sm:$0xff]  }
 0x10d   :  { %2744 = vmatprep.subr.bf16.mxu1 %v3770_v37  ;;  %v3848_v61 = vld [vmem:[%s5257_s1 + $0xaec] ss:$16 sps:$4 sm:$0xff]  }
 0x10e   :  { %v3851_v36 = vld [vmem:[%s5257_s1 + $0x8cc] ss:$16 sps:$4 sm:$0xff]  }
 0x10f   :  { %2704 = vmatpush1.bf16.msra.mxu0 %v3765_v0  ;;  %v3854_v37 = vld [vmem:[%s5257_s1 + $0xacc] ss:$16 sps:$4 sm:$0xff]  }
 0x110   :  { %2745 = vmatpush1.bf16.msra.mxu1 %v3768_v1  ;;  %2705 = vmatprep.subr.bf16.mxu0 %v3773_v2 }
 0x111   :  { %2746 = vmatprep.subr.bf16.mxu1 %v3776_v3  ;;  %v3849_v3 = vld [vmem:[%s5257_s1 + $0x8c8] ss:$16 sps:$4 sm:$0xff]  }
 0x113   :  { %2706 = vmatpush1.bf16.msra.mxu0 %v3771_v4  ;;  %v3852_v4 = vld [vmem:[%s5257_s1 + $0xac8] ss:$16 sps:$4 sm:$0xff]  }
 0x114   :  { %2747 = vmatpush1.bf16.msra.mxu1 %v3774_v5  ;;  %2707 = vmatprep.subr.bf16.mxu0 %v3779_v8 }
 0x115   :  { %2748 = vmatprep.subr.bf16.mxu1 %v3782_v9 }
 0x117   :  { %2708 = vmatpush1.bf16.msra.mxu0 %v3777_v10 }
 0x118   :  { %2749 = vmatpush1.bf16.msra.mxu1 %v3780_v11  ;;  %2709 = vmatprep.subr.bf16.mxu0 %v3785_v12  ;;  %v3855_v11 = vld [vmem:[%s5257_s1 + $0x8a8] ss:$16 sps:$4 sm:$0xff]  }
 0x119   :  { %2750 = vmatprep.subr.bf16.mxu1 %v3788_v13  ;;  %v3858_v12 = vld [vmem:[%s5257_s1 + $0xaa8] ss:$16 sps:$4 sm:$0xff]  }
 0x11b   :  { %2710 = vmatpush1.bf16.msra.mxu0 %v3783_v14 }
 0x11c   :  { %2751 = vmatpush1.bf16.msra.mxu1 %v3786_v15  ;;  %2711 = vmatprep.subr.bf16.mxu0 %v3791_v18  ;;  %v3861_v15 = vld [vmem:[%s5257_s1 + $0x888] ss:$16 sps:$4 sm:$0xff]  }
 0x11d   :  { %2752 = vmatprep.subr.bf16.mxu1 %v3794_v19  ;;  %v3864_v18 = vld [vmem:[%s5257_s1 + $0xa88] ss:$16 sps:$4 sm:$0xff]   ;;  %v3869_v19 = vld [vmem:[%s5257_s1 + $0x86c] ss:$16 sps:$4 sm:$0xff]  }
 0x11f   :  { %2712 = vmatpush1.bf16.msra.mxu0 %v3789_v20  ;;  %v3872_v20 = vld [vmem:[%s5257_s1 + $0xa6c] ss:$16 sps:$4 sm:$0xff]  }
 0x120   :  { %2753 = vmatpush1.bf16.msra.mxu1 %v3792_v21  ;;  %2713 = vmatprep.subr.bf16.mxu0 %v3797_v26  ;;  %v3867_v21 = vld [vmem:[%s5257_s1 + $0x868] ss:$16 sps:$4 sm:$0xff]  }
 0x121   :  { %2754 = vmatprep.subr.bf16.mxu1 %v3800_v27  ;;  %v3870_v26 = vld [vmem:[%s5257_s1 + $0xa68] ss:$16 sps:$4 sm:$0xff]   ;;  %v3875_v27 = vld [vmem:[%s5257_s1 + $0x84c] ss:$16 sps:$4 sm:$0xff]  }
 0x123   :  { %2714 = vmatpush2.bf16.msra.mxu0 %v3795_v28  ;;  %v3878_v28 = vld [vmem:[%s5257_s1 + $0xa4c] ss:$16 sps:$4 sm:$0xff]  }
 0x124   :  { %2755 = vmatpush2.bf16.msra.mxu1 %v3798_v29  ;;  %2715 = vmatprep.subr.bf16.mxu0 %v3803_v30  ;;  %v3873_v29 = vld [vmem:[%s5257_s1 + $0x848] ss:$16 sps:$4 sm:$0xff]  }
 0x125   :  { %2756 = vmatprep.subr.bf16.mxu1 %v3806_v31  ;;  %v3876_v30 = vld [vmem:[%s5257_s1 + $0xa48] ss:$16 sps:$4 sm:$0xff]   ;;  %v3881_v31 = vld [vmem:[%s5257_s1 + $0x82c] ss:$16 sps:$4 sm:$0xff]  }
 0x127   :  { %2716 = vmatpush2.bf16.msra.mxu0 %v3801_v32  ;;  %v3884_v32 = vld [vmem:[%s5257_s1 + $0xa2c] ss:$16 sps:$4 sm:$0xff]  }
 0x128   :  { %2757 = vmatpush2.bf16.msra.mxu1 %v3804_v33  ;;  %2717 = vmatprep.subr.bf16.mxu0 %v3809_v38  ;;  %v3879_v33 = vld [vmem:[%s5257_s1 + $0x828] ss:$16 sps:$4 sm:$0xff]  }
 0x129   :  { %2758 = vmatprep.subr.bf16.mxu1 %v3812_v39  ;;  %v3882_v38 = vld [vmem:[%s5257_s1 + $0xa28] ss:$16 sps:$4 sm:$0xff]   ;;  %v3887_v39 = vld [vmem:[%s5257_s1 + $0x80c] ss:$16 sps:$4 sm:$0xff]  }
 0x12b   :  { %2718 = vmatpush2.bf16.msra.mxu0 %v3807_v22  ;;  %v3890_v22 = vld [vmem:[%s5257_s1 + $0xa0c] ss:$16 sps:$4 sm:$0xff]  }
 0x12c   :  { %2759 = vmatpush2.bf16.msra.mxu1 %v3810_v23  ;;  %2719 = vmatprep.subr.bf16.mxu0 %v3815_v40  ;;  %v3885_v23 = vld [vmem:[%s5257_s1 + $0x808] ss:$16 sps:$4 sm:$0xff]  }
 0x12d   :  { %2760 = vmatprep.subr.bf16.mxu1 %v3818_v41  ;;  %v3888_v40 = vld [vmem:[%s5257_s1 + $0xa08] ss:$16 sps:$4 sm:$0xff]   ;;  %v3893_v41 = vld [vmem:[%s5257_s1 + $0x9ec] ss:$16 sps:$4 sm:$0xff]  }
 0x12f   :  { %2720 = vmatpush2.bf16.msra.mxu0 %v3813_v42  ;;  %v3896_v42 = vld [vmem:[%s5257_s1 + $0xbec] ss:$16 sps:$4 sm:$0xff]  }
 0x130   :  { %2761 = vmatpush2.bf16.msra.mxu1 %v3816_v43  ;;  %2721 = vmatprep.subr.bf16.mxu0 %v3821_v44  ;;  %v3891_v43 = vld [vmem:[%s5257_s1 + $0x9e8] ss:$16 sps:$4 sm:$0xff]  }
 0x131   :  { %2762 = vmatprep.subr.bf16.mxu1 %v3824_v45  ;;  %v3894_v44 = vld [vmem:[%s5257_s1 + $0xbe8] ss:$16 sps:$4 sm:$0xff]   ;;  %v3899_v45 = vld [vmem:[%s5257_s1 + $0x9cc] ss:$16 sps:$4 sm:$0xff]  }
 0x133   :  { %2722 = vmatpush2.bf16.msra.mxu0 %v3819_v46  ;;  %v3902_v46 = vld [vmem:[%s5257_s1 + $0xbcc] ss:$16 sps:$4 sm:$0xff]  }
 0x134   :  { %2763 = vmatpush2.bf16.msra.mxu1 %v3822_v47  ;;  %2723 = vmatprep.subr.bf16.mxu0 %v3827_v51  ;;  %v3897_v47 = vld [vmem:[%s5257_s1 + $0x9c8] ss:$16 sps:$4 sm:$0xff]  }
 0x135   :  { %2764 = vmatprep.subr.bf16.mxu1 %v3830_v48  ;;  %v3900_v51 = vld [vmem:[%s5257_s1 + $0xbc8] ss:$16 sps:$4 sm:$0xff]   ;;  %v3905_v48 = vld [vmem:[%s5257_s1 + $0x9ac] ss:$16 sps:$4 sm:$0xff]  }
 0x137   :  { %2724 = vmatpush2.bf16.msra.mxu0 %v3825_v49  ;;  %v3908_v49 = vld [vmem:[%s5257_s1 + $0xbac] ss:$16 sps:$4 sm:$0xff]  }
 0x138   :  { %2765 = vmatpush2.bf16.msra.mxu1 %v3828_v50  ;;  %2725 = vmatprep.subr.bf16.mxu0 %v3833_v53  ;;  %v3903_v50 = vld [vmem:[%s5257_s1 + $0x9a8] ss:$16 sps:$4 sm:$0xff]  }
 0x139   :  { %2766 = vmatprep.subr.bf16.mxu1 %v3836_v54  ;;  %v3906_v53 = vld [vmem:[%s5257_s1 + $0xba8] ss:$16 sps:$4 sm:$0xff]   ;;  %v3911_v54 = vld [vmem:[%s5257_s1 + $0x98c] ss:$16 sps:$4 sm:$0xff]  }
 0x13b   :  { %2726 = vmatpush2.bf16.msra.mxu0 %v3831_v55  ;;  %v3914_v55 = vld [vmem:[%s5257_s1 + $0xb8c] ss:$16 sps:$4 sm:$0xff]  }
 0x13c   :  { %2767 = vmatpush2.bf16.msra.mxu1 %v3834_v56  ;;  %2727 = vmatprep.subr.bf16.mxu0 %v3839_v6  ;;  %v3909_v56 = vld [vmem:[%s5257_s1 + $0x988] ss:$16 sps:$4 sm:$0xff]  }
 0x13d   :  { %2768 = vmatprep.subr.bf16.mxu1 %v3842_v7  ;;  %v3912_v6 = vld [vmem:[%s5257_s1 + $0xb88] ss:$16 sps:$4 sm:$0xff]   ;;  %v3917_v7 = vld [vmem:[%s5257_s1 + $0x96c] ss:$16 sps:$4 sm:$0xff]  }
 0x13f   :  { %2728 = vmatpush2.bf16.msra.mxu0 %v3837_v58  ;;  %v3920_v58 = vld [vmem:[%s5257_s1 + $0xb6c] ss:$16 sps:$4 sm:$0xff]  }
 0x140   :  { %2769 = vmatpush2.bf16.msra.mxu1 %v3840_v59  ;;  %2779 = vmatprep.subr.bf16.mxu0 %v3845_v60  ;;  %v3915_v59 = vld [vmem:[%s5257_s1 + $0x968] ss:$16 sps:$4 sm:$0xff]  }
 0x141   :  { %2820 = vmatprep.subr.bf16.mxu1 %v3848_v61  ;;  %v3918_v60 = vld [vmem:[%s5257_s1 + $0xb68] ss:$16 sps:$4 sm:$0xff]   ;;  %v3923_v61 = vld [vmem:[%s5257_s1 + $0x94c] ss:$16 sps:$4 sm:$0xff]  }
 0x142   :  { %v2485_v0 = vpop.f32.mrf.mxu0  ;;  %2730 = vmatmul.mubr.bf16.vlgmr.msra.gmra.mxu0 %v4394_v16  ;;  %v3857_v16 = vld [vmem:[%s5257_s1 + $0x8ac] ss:$16 sps:$4 sm:$0xff]  }
 0x143   :  { %v2526_v1 = vpop.f32.mrf.mxu1  ;;  %2771 = vmatmul.mubr.bf16.vlgmr.msra.gmra.mxu1 %v4398_v17  ;;  %v2486_v2 = vadd.f32 %v2485_v0, %v4832_v52  ;;  %2780 = vmatpush1.bf16.msra.mxu0 %v3843_v62  ;;  %v3860_v17 = vld [vmem:[%s5257_s1 + $0xaac] ss:$16 sps:$4 sm:$0xff]  }
 0x144   :  { %2821 = vmatpush1.bf16.msra.mxu1 %v3846_v63  ;;  %v5039_v5 = vpop.f32.mrf.mxu0  ;;  %2781 = vmatprep.subr.bf16.mxu0 %v3851_v36  ;;  %v3926_v62 = vld [vmem:[%s5257_s1 + $0xb4c] ss:$16 sps:$4 sm:$0xff]   ;;  %v3921_v63 = vld [vmem:[%s5257_s1 + $0x948] ss:$16 sps:$4 sm:$0xff]  }
 0x145   :  { %v5041_v8 = vpop.f32.mrf.mxu1  ;;  %2822 = vmatprep.subr.bf16.mxu1 %v3854_v37  ;;  %v5049_v52 = vadd.f32 %v2526_v1, %v2486_v2  ;;  %2811 = vmatprep.mubr.bf16.mxu0 %v4424_v24  ;;  %v3863_v24 = vld [vmem:[%s5257_s1 + $0x88c] ss:$16 sps:$4 sm:$0xff]   ;;  %v3924_v36 = vld [vmem:[%s5257_s1 + $0xb48] ss:$16 sps:$4 sm:$0xff]  }
 0x146   :  { %2852 = vmatprep.mubr.bf16.mxu1 %v4428_v25  ;;  %v2489_v9 = vpop.f32.mrf.mxu0  ;;  %v3866_v25 = vld [vmem:[%s5257_s1 + $0xa8c] ss:$16 sps:$4 sm:$0xff]   ;;  %v3927_v1 = vld [vmem:[%s5257_s1 + $0x928] ss:$16 sps:$4 sm:$0xff]  }
 0x147   :  { %v2530_v10 = vpop.f32.mrf.mxu1  ;;  %2782 = vmatpush1.bf16.msra.mxu0 %v3849_v3  ;;  %v3929_v37 = vld [vmem:[%s5257_s1 + $0x92c] ss:$16 sps:$4 sm:$0xff]   ;;  %v3930_v2 = vld [vmem:[%s5257_s1 + $0xb28] ss:$16 sps:$4 sm:$0xff]   ;;  %v2863_v3 = vlaneseq }
 0x148   :  { %2823 = vmatpush1.bf16.msra.mxu1 %v3852_v4  ;;  %v2490_v13 = vpop.f32.mrf.mxu0  ;;  %2783 = vmatprep.subr.bf16.mxu0 %v3857_v16  ;;  %v3932_v0 = vld [vmem:[%s5257_s1 + $0xb2c] ss:$16 sps:$4 sm:$0xff]   ;;  %v3936_v9 = vld [vmem:[%s5257_s1 + $0xb08] ss:$16 sps:$4 sm:$0xff]  }
 0x149   :  { %v2531_v14 = vpop.f32.mrf.mxu1  ;;  %2824 = vmatprep.subr.bf16.mxu1 %v3860_v17  ;;  %v3935_v4 = vld [vmem:[%s5257_s1 + $0x90c] ss:$16 sps:$4 sm:$0xff]   ;;  %v3933_v17 = vld [vmem:[%s5257_s1 + $0x908] ss:$16 sps:$4 sm:$0xff]   ;;  %v5215_v10 = vshrl.u32 %v2863_v3, 7 }
 0x14a   :  { %v3938_v16 = vld [vmem:[%s5257_s1 + $0xb0c] ss:$16 sps:$4 sm:$0xff]   ;;  %v5223_v13 = vld [vmem:[%s5259_s2] ss:$8 sm:$0xf] }
 0x14b   :  { %2784 = vmatpush1.bf16.msra.mxu0 %v3855_v11  ;;  %v2488_v11 = vadd.f32 %v5039_v5, %v4846_v57  ;;  %v2869_v14 = vsub.s32 1, %v5215_v10 }
 0x14c   :  { %2825 = vmatpush1.bf16.msra.mxu1 %v3858_v12  ;;  %2785 = vmatprep.subr.bf16.mxu0 %v3863_v24  ;;  %v2865_v12 = vsub.s32 0, %v5215_v10 }
 0x14d   :  { %2826 = vmatprep.subr.bf16.mxu1 %v3866_v25  ;;  %v2529_v57 = vadd.f32 %v5041_v8, %v2488_v11 }
 0x14f   :  { %2786 = vmatpush1.bf16.msra.mxu0 %v3861_v15  ;;  %v5229_v15 = vld [vmem:[%s5259_s2 + $0x1] ss:$8 sm:$0xf] }
 0x150   :  { %2827 = vmatpush1.bf16.msra.mxu1 %v3864_v18  ;;  %2787 = vmatprep.subr.bf16.mxu0 %v3869_v19  ;;  %v2866_v18 = vrot.slane %v5223_v13, %v2865_v12  ;;  %v2914_v19 = vld [vmem:[%s5260_s3] sm:$0xff] }
 0x151   :  { %2828 = vmatprep.subr.bf16.mxu1 %v3872_v20  ;;  %v2916_v8 = vunpack.c.l.bf16 %v2914_v19 }
 0x153   :  { %2788 = vmatpush1.bf16.msra.mxu0 %v3867_v21 }
 0x154   :  { %2829 = vmatpush1.bf16.msra.mxu1 %v3870_v26  ;;  %2789 = vmatprep.subr.bf16.mxu0 %v3875_v27  ;;  %v2893_v27 = vrot.slane %v5229_v15, %v2865_v12 }
 0x155   :  { %2830 = vmatprep.subr.bf16.mxu1 %v3878_v28 }
 0x157   :  { %2790 = vmatpush1.bf16.msra.mxu0 %v3873_v29 }
 0x158   :  { %2831 = vmatpush1.bf16.msra.mxu1 %v3876_v30  ;;  %2791 = vmatprep.subr.bf16.mxu0 %v3881_v31 }
 0x159   :  { %2832 = vmatprep.subr.bf16.mxu1 %v3884_v32 }
 0x15b   :  { %2792 = vmatpush1.bf16.msra.mxu0 %v3879_v33 }
 0x15c   :  { %2833 = vmatpush1.bf16.msra.mxu1 %v3882_v38  ;;  %2793 = vmatprep.subr.bf16.mxu0 %v3887_v39 }
 0x15d   :  { %2834 = vmatprep.subr.bf16.mxu1 %v3890_v22  ;;  %v2917_v22 = vunpack.c.h.bf16 %v2914_v19 }
 0x15f   :  { %2794 = vmatpush1.bf16.msra.mxu0 %v3885_v23 }
 0x160   :  { %2835 = vmatpush1.bf16.msra.mxu1 %v3888_v40  ;;  %2795 = vmatprep.subr.bf16.mxu0 %v3893_v41 }
 0x161   :  { %2836 = vmatprep.subr.bf16.mxu1 %v3896_v42 }
 0x163   :  { %2796 = vmatpush2.bf16.msra.mxu0 %v3891_v43 }
 0x164   :  { %2837 = vmatpush2.bf16.msra.mxu1 %v3894_v44  ;;  %2797 = vmatprep.subr.bf16.mxu0 %v3899_v45 }
 0x165   :  { %2838 = vmatprep.subr.bf16.mxu1 %v3902_v46 }
 0x167   :  { %2798 = vmatpush2.bf16.msra.mxu0 %v3897_v47 }
 0x168   :  { %2839 = vmatpush2.bf16.msra.mxu1 %v3900_v51  ;;  %2799 = vmatprep.subr.bf16.mxu0 %v3905_v48 }
 0x169   :  { %2840 = vmatprep.subr.bf16.mxu1 %v3908_v49 }
 0x16b   :  { %2800 = vmatpush2.bf16.msra.mxu0 %v3903_v50 }
 0x16c   :  { %2841 = vmatpush2.bf16.msra.mxu1 %v3906_v53  ;;  %2801 = vmatprep.subr.bf16.mxu0 %v3911_v54 }
 0x16d   :  { %2842 = vmatprep.subr.bf16.mxu1 %v3914_v55 }
 0x16f   :  { %2802 = vmatpush2.bf16.msra.mxu0 %v3909_v56 }
 0x170   :  { %2843 = vmatpush2.bf16.msra.mxu1 %v3912_v6  ;;  %2803 = vmatprep.subr.bf16.mxu0 %v3917_v7 }
 0x171   :  { %2844 = vmatprep.subr.bf16.mxu1 %v3920_v58 }
 0x173   :  { %2804 = vmatpush2.bf16.msra.mxu0 %v3915_v59 }
 0x174   :  { %2845 = vmatpush2.bf16.msra.mxu1 %v3918_v60  ;;  %2805 = vmatprep.subr.bf16.mxu0 %v3923_v61 }
 0x175   :  { %2846 = vmatprep.subr.bf16.mxu1 %v3926_v62 }
 0x177   :  { %2806 = vmatpush2.bf16.msra.mxu0 %v3921_v63 }
 0x178   :  { %2847 = vmatpush2.bf16.msra.mxu1 %v3924_v36  ;;  %2807 = vmatprep.subr.bf16.mxu0 %v3929_v37 }
 0x179   :  { %2848 = vmatprep.subr.bf16.mxu1 %v3932_v0  ;;  %v2873_v0 = vsub.s32 2, %v5215_v10 }
 0x17b   :  { %2808 = vmatpush2.bf16.msra.mxu0 %v3927_v1  ;;  %v2877_v1 = vsub.s32 3, %v5215_v10 }
 0x17c   :  { %2849 = vmatpush2.bf16.msra.mxu1 %v3930_v2  ;;  %2809 = vmatprep.subr.bf16.mxu0 %v3935_v4 }
 0x17d   :  { %2850 = vmatprep.subr.bf16.mxu1 %v3938_v16 }
 0x17f   :  { %2810 = vmatpush2.bf16.msra.mxu0 %v3933_v17  ;;  %v2874_v17 = vrot.slane %v5223_v13, %v2873_v0 }
 0x180   :  { %2851 = vmatpush2.bf16.msra.mxu1 %v3936_v9  ;;  %v2915_v9 = vld [vmem:[%s5260_s3 + $0x8] sm:$0xff] }
 0x181   :  { %v2918_v19 = vunpack.c.l.bf16 %v2915_v9 }
 0x182   :  { %v2567_v24 = vpop.f32.mrf.mxu0  ;;  %2812 = vmatmul.mubr.bf16.vlgmr.msra.gmra.mxu0 %v4616_v34  ;;  %v2870_v34 = vrot.slane %v5223_v13, %v2869_v14 }
 0x183   :  { %v2608_v25 = vpop.f32.mrf.mxu1  ;;  %2853 = vmatmul.mubr.bf16.vlgmr.msra.gmra.mxu1 %v4620_v35  ;;  %v2568_v5 = vadd.f32 %v2567_v24, %v5049_v52  ;;  %v2897_v52 = vrot.slane %v5229_v15, %v2869_v14  ;;  %v2901_v24 = vrot.slane %v5229_v15, %v2873_v0 }
 0x184   :  { %v2569_v20 = vpop.f32.mrf.mxu0 }
 0x185   :  { %v2610_v21 = vpop.f32.mrf.mxu1  ;;  %v2609_v26 = vadd.f32 %v2608_v25, %v2568_v5  ;;  %v2570_v28 = vadd.f32 %v2569_v20, %v2529_v57  ;;  %v2878_v57 = vrot.slane %v5223_v13, %v2877_v1 }
 0x186   :  { %v2571_v29 = vpop.f32.mrf.mxu0 }
 0x187   :  { %v2612_v35 = vpop.f32.mrf.mxu1  ;;  %v2883_v30 = vmul.f32 %v2866_v18, %v2609_v26  ;;  %v2611_v31 = vadd.f32 %v2610_v21, %v2570_v28  ;;  %v2905_v21 = vrot.slane %v5229_v15, %v2877_v1  ;;  %v2919_v29 = vunpack.c.h.bf16 %v2915_v9 }
 0x188   :  { %v2572_v32 = vpop.f32.mrf.mxu0 }
 0x189   :  { %v2613_v33 = vpop.f32.mrf.mxu1  ;;  %v2910_v38 = vadd.f32 %v2893_v27, %v2883_v30  ;;  %v2884_v39 = vmul.f32 %v2870_v34, %v2611_v31 }
 0x18b   :  { %v2920_v23 = vadd.f32 %v2916_v8, %v2910_v38  ;;  %v2911_v40 = vadd.f32 %v2897_v52, %v2884_v39 }
 0x18d   :  { %v2921_v41 = vadd.f32 %v2917_v22, %v2911_v40  ;;  %v2924_v42 = vmax.f32 %v2920_v23, 0.0 }
 0x18f   :  { %v2925_v43 = vmax.f32 %v2921_v41, 0.0 }
 0x191   :  { %v3349_v44 = vpack.c.bf16 %v2925_v43, %v2924_v42 }
 0x193   :  { %2944 = vst [vmem:[%s5261_s4] sm:$0xff] %v3349_v44 }
 0x1c2   :  { %v2649_v45 = vpop.f32.mrf.mxu0 }
 0x1c3   :  { %v2690_v46 = vpop.f32.mrf.mxu1 }
 0x1c4   :  { %v2691_v47 = vadd.f32 %v2690_v46, %v2649_v45  ;;  %v2651_v51 = vpop.f32.mrf.mxu0 }
 0x1c5   :  { %v2692_v48 = vpop.f32.mrf.mxu1 }
 0x1c6   :  { %v2693_v49 = vadd.f32 %v2692_v48, %v2651_v51  ;;  %v2653_v50 = vpop.f32.mrf.mxu0 }
 0x1c7   :  { %v2694_v53 = vpop.f32.mrf.mxu1 }
 0x1c8   :  { %v2654_v54 = vpop.f32.mrf.mxu0 }
 0x1c9   :  { %v2695_v55 = vpop.f32.mrf.mxu1 }
 0x202   :  { %v2731_v56 = vpop.f32.mrf.mxu0 }
 0x203   :  { %v2772_v6 = vpop.f32.mrf.mxu1  ;;  %v2732_v7 = vadd.f32 %v2731_v56, %v2691_v47 }
 0x204   :  { %v2733_v58 = vpop.f32.mrf.mxu0 }
 0x205   :  { %v2774_v59 = vpop.f32.mrf.mxu1  ;;  %v2773_v60 = vadd.f32 %v2772_v6, %v2732_v7  ;;  %v2734_v37 = vadd.f32 %v2733_v58, %v2693_v49 }
 0x206   :  { %v2735_v61 = vpop.f32.mrf.mxu0 }
 0x207   :  { %v2776_v62 = vpop.f32.mrf.mxu1  ;;  %v2775_v4 = vadd.f32 %v2774_v59, %v2734_v37 }
 0x208   :  { %v2736_v63 = vpop.f32.mrf.mxu0 }
 0x209   :  { %v2777_v36 = vpop.f32.mrf.mxu1 }
 0x242   :  { %v2813_v2 = vpop.f32.mrf.mxu0 }
 0x243   :  { %v2854_v3 = vpop.f32.mrf.mxu1  ;;  %v2814_v16 = vadd.f32 %v2813_v2, %v2773_v60 }
 0x244   :  { %v2815_v11 = vpop.f32.mrf.mxu0 }
 0x245   :  { %v2856_v12 = vpop.f32.mrf.mxu1  ;;  %v2855_v14 = vadd.f32 %v2854_v3, %v2814_v16  ;;  %v2816_v25 = vadd.f32 %v2815_v11, %v2775_v4 }
 0x246   :  { %v2817_v5 = vpop.f32.mrf.mxu0 }
 0x247   :  { %v2858_v10 = vpop.f32.mrf.mxu1  ;;  %v2885_v18 = vmul.f32 %v2874_v17, %v2855_v14  ;;  %v2857_v20 = vadd.f32 %v2856_v12, %v2816_v25 }
 0x248   :  { %v2818_v26 = vpop.f32.mrf.mxu0 }
 0x249   :  { %v2859_v27 = vpop.f32.mrf.mxu1  ;;  %v2912_v28 = vadd.f32 %v2901_v24, %v2885_v18  ;;  %v2886_v34 = vmul.f32 %v2878_v57, %v2857_v20 }
 0x24b   :  { %v2922_v35 = vadd.f32 %v2918_v19, %v2912_v28  ;;  %v2913_v30 = vadd.f32 %v2905_v21, %v2886_v34 }
 0x24d   :  { %v2923_v8 = vadd.f32 %v2919_v29, %v2913_v30  ;;  %v2926_v31 = vmax.f32 %v2922_v35, 0.0 }
 0x24f   :  { %v2927_v52 = vmax.f32 %v2923_v8, 0.0 }
 0x251   :  { %v3350_v32 = vpack.c.bf16 %v2927_v52, %v2926_v31 }
 0x253   :  { %2945 = vst [vmem:[%s5261_s4 + $0x8] sm:$0xff] %v3350_v32 }

</bundles_post_ra>
